<compile_context>
chip_gen: v6e
topology: v6e:2x2x1
jax: 0.10.0
libtpu: 0.0.40
codegen_flags: <defaults>
</compile_context>

<pallas_src>
import math
from functools import partial

import jax
import jax.numpy as jnp
from jax.experimental import pallas as pl
from jax.experimental.pallas import tpu as pltpu


def _round_up(x, m):
    return ((x + m - 1) // m) * m


def _row2d_kernel(x_ref, w1_ref, b1_ref, s1_ref, t1_ref,
                  w2_ref, b2_ref, s2_ref, t2_ref, out_ref, *, wa1, wa2):
    """Single invocation; everything resident in VMEM.

    x_ref  : [BR, WP, C0]       channel-last input, width NaN-padded to WP = wa1 + 2
    wK_ref : [3*Cin_K, Cout_K]  im2col conv weights
    bK/sK/tK : [1, Cout_K]      conv bias / folded BN scale / folded BN shift
    out_ref: [BR*wa2, C2]       channel-last output (aligned working width, cropped later)
    """
    x = x_ref[...]
    br = x.shape[0]

    nan_in = jnp.isnan(x)
    x0 = jnp.where(nan_in, 0.0, x)                       # masked_fill(mask, 0), per channel
    m0 = nan_in[:, :, 0:1].astype(jnp.float32)           # channel-0 NaN mask [BR, WP, 1]

    def stage(vals, mask, wa, w_ref, b_ref, s_ref, t_ref):
        cin = vals.shape[-1]
        # The three taps of the (1,3) 'valid' conv, sliced exactly once each and
        # concatenated on the lane axis -> one im2col operand.
        taps = jnp.concatenate(
            [vals[:, 0:wa, :], vals[:, 1:wa + 1, :], vals[:, 2:wa + 2, :]],
            axis=-1)                                     # [BR, wa, 3*cin]
        a2 = taps.reshape(br * wa, 3 * cin)              # aligned collapse (wa % 8 == 0)
        # Conv2d(cin, cout, (1,3)) == a single MXU matmul.
        conv = jnp.dot(a2, w_ref[...],
                       preferred_element_type=jnp.float32) + b_ref[...]
        # NaN mask of the conv output = channel-0 input mask shifted by 2 columns.
        mask_o = mask[:, 2:wa + 2, :]                    # [BR, wa, 1]
        mcol = mask_o.reshape(br * wa, 1)                # aligned collapse
        is_nan = mcol > 0.5
        # process_nan_2d: per-channel nanmean over (batch, rows, cols).
        # Padded / junk columns carry mask == 1 and drop out of the statistics.
        valid = 1.0 - mcol
        cnt = jnp.sum(valid)
        ch_mean = jnp.sum(conv * valid, axis=0, keepdims=True) / cnt  # NaN iff cnt == 0 (as torch)
        fea = jnp.where(is_nan, ch_mean, conv)
        # BatchNorm2d (eval mode, pre-folded) + LeakyReLU(0.2), batched over channels.
        fea = fea * s_ref[...] + t_ref[...]
        fea = jnp.where(fea >= 0.0, fea, 0.2 * fea)
        return fea, is_nan, mask_o

    # ---- stage 1 ----
    fea1, isn1, mask1 = stage(x0, m0, wa1, w1_ref, b1_ref, s1_ref, t1_ref)
    # masked_fill(mask, nan) followed by the next stage's masked_fill(isnan, 0) == zero-fill;
    # carry the (channel-uniform) mask separately instead of materializing NaNs.
    vals1 = jnp.where(isn1, 0.0, fea1).reshape(br, wa1, fea1.shape[-1])  # aligned split

    # ---- stage 2 ----
    fea2, isn2, _ = stage(vals1, mask1, wa2, w2_ref, b2_ref, s2_ref, t2_ref)

    # Restore NaNs and store the whole slab once.
    out_ref[...] = jnp.where(isn2, jnp.nan, fea2)


def row2d_forward(x, params):
    """x: [bs, C0, R, W] (NCHW).  params: 2 tuples of (w[3,Cout,Cin], b, gamma, beta, rm, rv).

    Returns [bs, C2, R, W - 4], matching Row2D.forward (eval mode)."""
    (w1, b1, g1, be1, rm1, rv1), (w2, b2, g2, be2, rm2, rv2) = params
    bs, c0, r, w0 = x.shape
    c1 = w1.shape[1]
    c2 = w2.shape[1]
    assert w0 >= 5, "need at least 5 columns for two valid (1,3) convolutions"

    wout = w0 - 4                      # true output width after the two convs
    wa2 = _round_up(wout, 8)           # stage-2 working width (sublane aligned)
    wa1 = _round_up(wa2 + 2, 8)        # stage-1 working width (sublane aligned)
    wpad = wa1 + 2                     # NaN-padded input width

    f32 = jnp.float32
    x = x.astype(f32)
    # NaN-pad the point axis: padded columns are excluded from every statistic
    # automatically (they look like NaN padding) and are cropped from the output.
    xp = jnp.pad(x, ((0, 0), (0, 0), (0, 0), (0, wpad - w0)),
                 constant_values=jnp.nan)
    # channel-last, rows folded into the batch axis (wrapper-side layout plumbing).
    x_cl = jnp.transpose(xp, (0, 2, 3, 1)).reshape(bs * r, wpad, c0)

    def fold(wk, bk, gk, bek, rmk, rvk, cin, cout):
        # im2col weight [3*cin, cout]: row (k*cin + i) pairs with tap k, input channel i.
        wmat = jnp.transpose(wk.astype(f32), (0, 2, 1)).reshape(3 * cin, cout)
        scale = gk.astype(f32) * jax.lax.rsqrt(rvk.astype(f32) + 1e-5)
        shift = bek.astype(f32) - rmk.astype(f32) * scale
        return (wmat, bk.astype(f32).reshape(1, cout),
                scale.reshape(1, cout), shift.reshape(1, cout))

    w1m, b1v, s1v, t1v = fold(w1, b1, g1, be1, rm1, rv1, c0, c1)
    w2m, b2v, s2v, t2v = fold(w2, b2, g2, be2, rm2, rv2, c1, c2)

    vmem = pl.BlockSpec(memory_space=pltpu.MemorySpace.VMEM)
    out2d = pl.pallas_call(
        partial(_row2d_kernel, wa1=wa1, wa2=wa2),
        out_shape=jax.ShapeDtypeStruct((bs * r * wa2, c2), f32),
        in_specs=[vmem] * 9,
        out_specs=vmem,
    )(x_cl, w1m, b1v, s1v, t1v, w2m, b2v, s2v, t2v)

    # Back to NCHW and crop the aligned working width to the true output width.
    out = out2d.reshape(bs, r, wa2, c2)
    out = jnp.transpose(out, (0, 3, 1, 2))[..., :wout]
    return out


def reference(x, params):
    """Pure-JAX mirror of the PyTorch forward (eval mode), for verification."""
    fea = x.astype(jnp.float32)
    for (w, b, g, be, rm, rv) in params:
        mask = jnp.isnan(fea)
        z = jnp.where(mask, 0.0, fea)
        wout = z.shape[-1] - 2
        conv = b[None, :, None, None]
        for k in range(3):
            conv = conv + jnp.einsum('oi,birw->borw', w[k], z[..., k:k + wout],
                                     precision=jax.lax.Precision.HIGHEST)
        conv = jnp.where(mask[:, 0:1, :, 2:], jnp.nan, conv)
        m2 = jnp.isnan(conv)
        cnt = jnp.sum((~m2).astype(jnp.float32), axis=(0, 2, 3), keepdims=True)
        ssum = jnp.sum(jnp.where(m2, 0.0, conv), axis=(0, 2, 3), keepdims=True)
        fea = jnp.where(m2, ssum / cnt, conv)
        fea = ((fea - rm[None, :, None, None])
               * jax.lax.rsqrt(rv[None, :, None, None] + 1e-5)
               * g[None, :, None, None] + be[None, :, None, None])
        fea = jnp.where(fea >= 0, fea, 0.2 * fea)
        fea = jnp.where(m2, jnp.nan, fea)
    return fea


if __name__ == "__main__":
    bs, dim_in, dim_out = 2, 4, 16
    n_row, n_col = 8, 16
    mid = int((dim_in * dim_out) ** 0.5)      # as in Row2D.__init__ -> 8
    channels = [dim_in, mid, dim_out]

    key = jax.random.PRNGKey(0)
    keys = jax.random.split(key, 13)

    params = []
    ki = 0
    for i in range(2):
        cin, cout = channels[i], channels[i + 1]
        fan_in = cin * 1 * 3
        bound = 1.0 / math.sqrt(fan_in)
        w = jax.random.uniform(keys[ki], (3, cout, cin), minval=-bound, maxval=bound,
                               dtype=jnp.float32); ki += 1
        b = jax.random.uniform(keys[ki], (cout,), minval=-bound, maxval=bound,
                               dtype=jnp.float32); ki += 1
        g = 1.0 + 0.1 * jax.random.normal(keys[ki], (cout,), dtype=jnp.float32); ki += 1
        be = 0.1 * jax.random.normal(keys[ki], (cout,), dtype=jnp.float32); ki += 1
        rm = 0.1 * jax.random.normal(keys[ki], (cout,), dtype=jnp.float32); ki += 1
        rv = 1.0 + 0.1 * jnp.abs(jax.random.normal(keys[ki], (cout,),
                                                   dtype=jnp.float32)); ki += 1
        params.append((w, b, g, be, rm, rv))
    params = tuple(params)

    x = jax.random.normal(keys[ki], (bs, dim_in, n_row, n_col), dtype=jnp.float32)
    # NaN padding on trailing points of some rows (channel-consistent, as the module
    # assumes via its channel-0 mask); no channel ends up entirely NaN.
    x = x.at[:, :, 1, 10:].set(jnp.nan)
    x = x.at[:, :, 3, 5:].set(jnp.nan)
    x = x.at[0, :, 5, 12:].set(jnp.nan)

    out = row2d_forward(x, params)
    out = jax.block_until_ready(out)

    ref = reference(x, params)

    assert out.shape == (bs, dim_out, n_row, n_col - 4), out.shape
    nan_ok = bool(jnp.array_equal(jnp.isnan(out), jnp.isnan(ref)))
    # Tolerance allows for the MXU's reduced-precision f32 passes on some generations.
    val_ok = bool(jnp.allclose(jnp.nan_to_num(out), jnp.nan_to_num(ref),
                               atol=1e-2, rtol=1e-2))
    assert nan_ok and val_ok

    print("KERNEL_OK")
</pallas_src>

<mosaic_0001>
module attributes {stable_mosaic.version = 11 : i64} {
  func.func @_row2d_kernel(%arg0: memref<16x26x4xf32, #tpu.memory_space<vmem>>, %arg1: memref<12x8xf32, #tpu.memory_space<vmem>>, %arg2: memref<1x8xf32, #tpu.memory_space<vmem>>, %arg3: memref<1x8xf32, #tpu.memory_space<vmem>>, %arg4: memref<1x8xf32, #tpu.memory_space<vmem>>, %arg5: memref<24x16xf32, #tpu.memory_space<vmem>>, %arg6: memref<1x16xf32, #tpu.memory_space<vmem>>, %arg7: memref<1x16xf32, #tpu.memory_space<vmem>>, %arg8: memref<1x16xf32, #tpu.memory_space<vmem>>, %arg9: memref<256x16xf32, #tpu.memory_space<vmem>>) attributes {dimension_semantics = [], scalar_prefetch = 0 : i64, scratch_operands = 0 : i64, tpu.core_type = #tpu.core_type<tc>} {
    %c0 = arith.constant 0 : index
    %c0_0 = arith.constant 0 : index
    %c0_1 = arith.constant 0 : index
    %0 = vector.load %arg0[%c0, %c0_0, %c0_1] : memref<16x26x4xf32, #tpu.memory_space<vmem>>, vector<16x26x4xf32>
    %1 = arith.cmpf one, %0, %0 : vector<16x26x4xf32>
    %cst = arith.constant 0.000000e+00 : f32
    %2 = vector.broadcast %cst : f32 to vector<16x26x4xf32>
    %3 = arith.select %1, %2, %0 : vector<16x26x4xi1>, vector<16x26x4xf32>
    %4 = vector.extract_strided_slice %1 {offsets = [0, 0, 0], sizes = [16, 26, 1], strides = [1, 1, 1]} : vector<16x26x4xi1> to vector<16x26x1xi1>
    %5 = arith.extui %4 : vector<16x26x1xi1> to vector<16x26x1xi32>
    %6 = arith.sitofp %5 : vector<16x26x1xi32> to vector<16x26x1xf32>
    %7 = vector.extract_strided_slice %3 {offsets = [0, 0, 0], sizes = [16, 24, 4], strides = [1, 1, 1]} : vector<16x26x4xf32> to vector<16x24x4xf32>
    %8 = vector.extract_strided_slice %3 {offsets = [0, 1, 0], sizes = [16, 24, 4], strides = [1, 1, 1]} : vector<16x26x4xf32> to vector<16x24x4xf32>
    %9 = vector.extract_strided_slice %3 {offsets = [0, 2, 0], sizes = [16, 24, 4], strides = [1, 1, 1]} : vector<16x26x4xf32> to vector<16x24x4xf32>
    %10 = tpu.concatenate %7, %8, %9 in 2 : vector<16x24x4xf32>, vector<16x24x4xf32>, vector<16x24x4xf32> -> vector<16x24x12xf32>
    %11 = vector.shape_cast %10 : vector<16x24x12xf32> to vector<384x12xf32>
    %c0_2 = arith.constant 0 : index
    %c0_3 = arith.constant 0 : index
    %12 = vector.load %arg1[%c0_2, %c0_3] : memref<12x8xf32, #tpu.memory_space<vmem>>, vector<12x8xf32>
    %cst_4 = arith.constant dense<0.000000e+00> : vector<384x8xf32>
    %13 = tpu.matmul %11, %12, %cst_4 {dimension_numbers = #tpu.dot_dimension_numbers<[1], [0], [0], [1], [0, 0, 1, 1], [], []>} : vector<384x12xf32>, vector<12x8xf32>, vector<384x8xf32> -> vector<384x8xf32>
    %c0_5 = arith.constant 0 : index
    %c0_6 = arith.constant 0 : index
    %14 = vector.load %arg2[%c0_5, %c0_6] : memref<1x8xf32, #tpu.memory_space<vmem>>, vector<1x8xf32>
    %15 = vector.broadcast %14 : vector<1x8xf32> to vector<384x8xf32>
    %16 = arith.addf %13, %15 : vector<384x8xf32>
    %17 = vector.extract_strided_slice %6 {offsets = [0, 2, 0], sizes = [16, 24, 1], strides = [1, 1, 1]} : vector<16x26x1xf32> to vector<16x24x1xf32>
    %18 = vector.shape_cast %17 : vector<16x24x1xf32> to vector<384x1xf32>
    %cst_7 = arith.constant 5.000000e-01 : f32
    %19 = vector.broadcast %cst_7 : f32 to vector<384x1xf32>
    %20 = arith.cmpf ogt, %18, %19 : vector<384x1xf32>
    %cst_8 = arith.constant 1.000000e+00 : f32
    %21 = vector.broadcast %cst_8 : f32 to vector<384x1xf32>
    %22 = arith.subf %21, %18 : vector<384x1xf32>
    %23 = vector.shape_cast %22 : vector<384x1xf32> to vector<1x384x1xf32>
    %cst_9 = arith.constant dense<0.000000e+00> : vector<1xf32>
    %24 = vector.multi_reduction <add>, %23, %cst_9 [1, 2] : vector<1x384x1xf32> to vector<1xf32>
    %25 = vector.shape_cast %24 : vector<1xf32> to vector<1x1x1xf32>
    %26 = vector.extract %25[0, 0, 0] : f32 from vector<1x1x1xf32>
    %27 = vector.broadcast %22 : vector<384x1xf32> to vector<384x8xf32>
    %28 = arith.mulf %16, %27 : vector<384x8xf32>
    %cst_10 = arith.constant dense<0.000000e+00> : vector<8xf32>
    %29 = vector.multi_reduction <add>, %28, %cst_10 [0] : vector<384x8xf32> to vector<8xf32>
    %30 = vector.shape_cast %29 : vector<8xf32> to vector<1x8xf32>
    %31 = vector.broadcast %26 : f32 to vector<1x8xf32>
    %32 = arith.divf %30, %31 : vector<1x8xf32>
    %33 = vector.shape_cast %20 : vector<384x1xi1> to vector<384x1xi1>
    %34 = vector.broadcast %33 : vector<384x1xi1> to vector<384x8xi1>
    %35 = vector.shape_cast %32 : vector<1x8xf32> to vector<1x8xf32>
    %36 = vector.broadcast %35 : vector<1x8xf32> to vector<384x8xf32>
    %37 = arith.select %34, %36, %16 : vector<384x8xi1>, vector<384x8xf32>
    %c0_11 = arith.constant 0 : index
    %c0_12 = arith.constant 0 : index
    %38 = vector.load %arg3[%c0_11, %c0_12] : memref<1x8xf32, #tpu.memory_space<vmem>>, vector<1x8xf32>
    %39 = vector.broadcast %38 : vector<1x8xf32> to vector<384x8xf32>
    %40 = arith.mulf %37, %39 : vector<384x8xf32>
    %c0_13 = arith.constant 0 : index
    %c0_14 = arith.constant 0 : index
    %41 = vector.load %arg4[%c0_13, %c0_14] : memref<1x8xf32, #tpu.memory_space<vmem>>, vector<1x8xf32>
    %42 = vector.broadcast %41 : vector<1x8xf32> to vector<384x8xf32>
    %43 = arith.addf %40, %42 : vector<384x8xf32>
    %cst_15 = arith.constant 0.000000e+00 : f32
    %44 = vector.broadcast %cst_15 : f32 to vector<384x8xf32>
    %45 = arith.cmpf oge, %43, %44 : vector<384x8xf32>
    %cst_16 = arith.constant 2.000000e-01 : f32
    %46 = vector.broadcast %cst_16 : f32 to vector<384x8xf32>
    %47 = arith.mulf %46, %43 : vector<384x8xf32>
    %48 = arith.select %45, %43, %47 : vector<384x8xi1>, vector<384x8xf32>
    %cst_17 = arith.constant 0.000000e+00 : f32
    %49 = vector.shape_cast %20 : vector<384x1xi1> to vector<384x1xi1>
    %50 = vector.broadcast %49 : vector<384x1xi1> to vector<384x8xi1>
    %51 = vector.broadcast %cst_17 : f32 to vector<384x8xf32>
    %52 = arith.select %50, %51, %48 : vector<384x8xi1>, vector<384x8xf32>
    %53 = vector.shape_cast %52 : vector<384x8xf32> to vector<16x24x8xf32>
    %54 = vector.extract_strided_slice %53 {offsets = [0, 0, 0], sizes = [16, 16, 8], strides = [1, 1, 1]} : vector<16x24x8xf32> to vector<16x16x8xf32>
    %55 = vector.extract_strided_slice %53 {offsets = [0, 1, 0], sizes = [16, 16, 8], strides = [1, 1, 1]} : vector<16x24x8xf32> to vector<16x16x8xf32>
    %56 = vector.extract_strided_slice %53 {offsets = [0, 2, 0], sizes = [16, 16, 8], strides = [1, 1, 1]} : vector<16x24x8xf32> to vector<16x16x8xf32>
    %57 = tpu.concatenate %54, %55, %56 in 2 : vector<16x16x8xf32>, vector<16x16x8xf32>, vector<16x16x8xf32> -> vector<16x16x24xf32>
    %58 = vector.shape_cast %57 : vector<16x16x24xf32> to vector<256x24xf32>
    %c0_18 = arith.constant 0 : index
    %c0_19 = arith.constant 0 : index
    %59 = vector.load %arg5[%c0_18, %c0_19] : memref<24x16xf32, #tpu.memory_space<vmem>>, vector<24x16xf32>
    %cst_20 = arith.constant dense<0.000000e+00> : vector<256x16xf32>
    %60 = tpu.matmul %58, %59, %cst_20 {dimension_numbers = #tpu.dot_dimension_numbers<[1], [0], [0], [1], [0, 0, 1, 1], [], []>} : vector<256x24xf32>, vector<24x16xf32>, vector<256x16xf32> -> vector<256x16xf32>
    %c0_21 = arith.constant 0 : index
    %c0_22 = arith.constant 0 : index
    %61 = vector.load %arg6[%c0_21, %c0_22] : memref<1x16xf32, #tpu.memory_space<vmem>>, vector<1x16xf32>
    %62 = vector.broadcast %61 : vector<1x16xf32> to vector<256x16xf32>
    %63 = arith.addf %60, %62 : vector<256x16xf32>
    %64 = vector.extract_strided_slice %17 {offsets = [0, 2, 0], sizes = [16, 16, 1], strides = [1, 1, 1]} : vector<16x24x1xf32> to vector<16x16x1xf32>
    %65 = vector.shape_cast %64 : vector<16x16x1xf32> to vector<256x1xf32>
    %cst_23 = arith.constant 5.000000e-01 : f32
    %66 = vector.broadcast %cst_23 : f32 to vector<256x1xf32>
    %67 = arith.cmpf ogt, %65, %66 : vector<256x1xf32>
    %cst_24 = arith.constant 1.000000e+00 : f32
    %68 = vector.broadcast %cst_24 : f32 to vector<256x1xf32>
    %69 = arith.subf %68, %65 : vector<256x1xf32>
    %70 = vector.shape_cast %69 : vector<256x1xf32> to vector<1x256x1xf32>
    %cst_25 = arith.constant dense<0.000000e+00> : vector<1xf32>
    %71 = vector.multi_reduction <add>, %70, %cst_25 [1, 2] : vector<1x256x1xf32> to vector<1xf32>
    %72 = vector.shape_cast %71 : vector<1xf32> to vector<1x1x1xf32>
    %73 = vector.extract %72[0, 0, 0] : f32 from vector<1x1x1xf32>
    %74 = vector.broadcast %69 : vector<256x1xf32> to vector<256x16xf32>
    %75 = arith.mulf %63, %74 : vector<256x16xf32>
    %cst_26 = arith.constant dense<0.000000e+00> : vector<16xf32>
    %76 = vector.multi_reduction <add>, %75, %cst_26 [0] : vector<256x16xf32> to vector<16xf32>
    %77 = vector.shape_cast %76 : vector<16xf32> to vector<1x16xf32>
    %78 = vector.broadcast %73 : f32 to vector<1x16xf32>
    %79 = arith.divf %77, %78 : vector<1x16xf32>
    %80 = vector.shape_cast %67 : vector<256x1xi1> to vector<256x1xi1>
    %81 = vector.broadcast %80 : vector<256x1xi1> to vector<256x16xi1>
    %82 = vector.shape_cast %79 : vector<1x16xf32> to vector<1x16xf32>
    %83 = vector.broadcast %82 : vector<1x16xf32> to vector<256x16xf32>
    %84 = arith.select %81, %83, %63 : vector<256x16xi1>, vector<256x16xf32>
    %c0_27 = arith.constant 0 : index
    %c0_28 = arith.constant 0 : index
    %85 = vector.load %arg7[%c0_27, %c0_28] : memref<1x16xf32, #tpu.memory_space<vmem>>, vector<1x16xf32>
    %86 = vector.broadcast %85 : vector<1x16xf32> to vector<256x16xf32>
    %87 = arith.mulf %84, %86 : vector<256x16xf32>
    %c0_29 = arith.constant 0 : index
    %c0_30 = arith.constant 0 : index
    %88 = vector.load %arg8[%c0_29, %c0_30] : memref<1x16xf32, #tpu.memory_space<vmem>>, vector<1x16xf32>
    %89 = vector.broadcast %88 : vector<1x16xf32> to vector<256x16xf32>
    %90 = arith.addf %87, %89 : vector<256x16xf32>
    %cst_31 = arith.constant 0.000000e+00 : f32
    %91 = vector.broadcast %cst_31 : f32 to vector<256x16xf32>
    %92 = arith.cmpf oge, %90, %91 : vector<256x16xf32>
    %cst_32 = arith.constant 2.000000e-01 : f32
    %93 = vector.broadcast %cst_32 : f32 to vector<256x16xf32>
    %94 = arith.mulf %93, %90 : vector<256x16xf32>
    %95 = arith.select %92, %90, %94 : vector<256x16xi1>, vector<256x16xf32>
    %cst_33 = arith.constant 0x7FC00000 : f32
    %96 = vector.shape_cast %67 : vector<256x1xi1> to vector<256x1xi1>
    %97 = vector.broadcast %96 : vector<256x1xi1> to vector<256x16xi1>
    %98 = vector.broadcast %cst_33 : f32 to vector<256x16xf32>
    %99 = arith.select %97, %98, %95 : vector<256x16xi1>, vector<256x16xf32>
    %c0_34 = arith.constant 0 : index
    %c0_35 = arith.constant 0 : index
    %100 = vector.load %arg9[%c0_34, %c0_35] : memref<256x16xf32, #tpu.memory_space<vmem>>, vector<256x16xf32>
    tpu.vector_store %arg9[%c0_34, %c0_35], %99 {strides = array<i32>} : memref<256x16xf32, #tpu.memory_space<vmem>>, vector<256x16xf32>,
    return
  }
}

</mosaic_0001>

<bundles_post_ra>
// kernel: tpu_custom_call.1
= control target key start
LH: loop header
LB: loop body
LE: loop exit
PB: predicated region body
PF: predicated region fallthrough
CT: control target
= control target key end

     0   :  { %vm10299_vm3 = vcmask 1046528   ;;  %s5026_s23 = smov 4   ;;  %v10049_v36 = vmov 0.0   ;;  %vm10297_vm12 = vcmask 1045504   ;;  %s10033_s0 = inlined_call_operand.vmem [shape: f32[16,26,4], index: 0, kind: input, shape index: {}]   ;;  %s10034_s1 = inlined_call_operand.vmem [shape: f32[12,8], index: 1, kind: input, shape index: {}]   ;;  %s10035_s2 = inlined_call_operand.vmem [shape: f32[1,8], index: 2, kind: input, shape index: {}]   ;;  %s10036_s3 = inlined_call_operand.vmem [shape: f32[1,8], index: 3, kind: input, shape index: {}]   ;;  %s10037_s4 = inlined_call_operand.vmem [shape: f32[1,8], index: 4, kind: input, shape index: {}]   ;;  %s10038_s5 = inlined_call_operand.vmem [shape: f32[24,16], index: 5, kind: input, shape index: {}]   ;;  %s10039_s6 = inlined_call_operand.vmem [shape: f32[1,16], index: 6, kind: input, shape index: {}]   ;;  %s10040_s7 = inlined_call_operand.vmem [shape: f32[1,16], index: 7, kind: input, shape index: {}]   ;;  %s10041_s8 = inlined_call_operand.vmem [shape: f32[1,16], index: 8, kind: input, shape index: {}]   ;;  %s10042_s9 = inlined_call_operand.vmem [shape: f32[256,16], index: 9, kind: output, shape index: {}]  }
   0x1   :  { %v5084_v0 = vld [vmem:[%s10033_s0 + $0x10] sm:$0xff]  ;;  %v5089_v1 = vld [vmem:[%s10033_s0 + $0x18] sm:$0x3]  ;;  %v5094_v2 = vld [vmem:[%s10033_s0] sm:$0xff] }
   0x2   :  { %vm98_vm0 = vcmp.ne.f32.partialorder %v5084_v0, %v5084_v0  ;;  %vm99_vm1 = vcmp.ne.f32.partialorder %v5089_v1, %v5089_v1  ;;  %v5103_v3 = vld [vmem:[%s10033_s0 + $0x8] sm:$0xff]  ;;  %vm96_vm2 = vcmp.ne.f32.partialorder %v5094_v2, %v5094_v2  ;;  %v5124_v8 = vld [vmem:[%s10033_s0 + $0x20] sm:$0xff]  ;;  %v5142_v11 = vld [vmem:[%s10033_s0 + $0x30] sm:$0xff] }
   0x3   :  { %v5111_v4 = vsel %vm98_vm0, 0.0, %v5084_v0  ;;  %v5117_v5 = vsel %vm99_vm1, 0.0, %v5089_v1  ;;  %vm97_vm4 = vcmp.ne.f32.partialorder %v5103_v3, %v5103_v3  ;;  %v5132_v9 = vsel %vm96_vm2, 0.0, %v5094_v2  ;;  %v5137_v10 = vld [vmem:[%s10033_s0 + $0x28] sm:$0xff]  ;;  %v5167_v17 = vld [vmem:[%s10033_s0 + $0x38] sm:$0x3] }
   0x4   :  { %v420_v6 = vrot.slane %v5111_v4, 1  ;;  %v422_v7 = vrot.slane %v5117_v5, 1  ;;  %v5149_v13 = vsel %vm97_vm4, 0.0, %v5103_v3  ;;  %v417_v14 = vrot.slane %v5132_v9, 1  ;;  %v41_v24 = vld [vmem:[%s10033_s0 + $0x48] sm:$0xff]  ;;  %v42_v25 = vld [vmem:[%s10033_s0 + $0x50] sm:$0xff] }
   0x5   :  { %10504 = vst [vmem:[#allocation2_spill] sm:$0xff] %v5149_v13  ;;  %v418_v15 = vrot.slane %v5149_v13, 1  ;;  %vm100_vm5 = vcmp.ne.f32.partialorder %v5124_v8, %v5124_v8  ;;  %vm101_vm6 = vcmp.ne.f32.partialorder %v5137_v10, %v5137_v10  ;;  %vm102_vm7 = vcmp.ne.f32.partialorder %v5142_v11, %v5142_v11  ;;  %v5199_v26 = vld [vmem:[%s10033_s0 + $0x40] sm:$0xff]  ;;  %v45_v43 = vld [vmem:[%s10033_s0 + $0x68] sm:$0xff]  ;;  %v43_v44 = vld [vmem:[%s10033_s0 + $0x58] sm:$0x3] }
   0x6   :  { %v423_v12 = vsel %vm10299_vm3, %v420_v6, %v422_v7  ;;  %v5162_v16 = vsel %vm100_vm5, 0.0, %v5124_v8  ;;  %v5176_v19 = vsel %vm101_vm6, 0.0, %v5137_v10  ;;  %vm103_vm8 = vcmp.ne.f32.partialorder %v5167_v17, %v5167_v17  ;;  %v44_v35 = vld [vmem:[%s10033_s0 + $0x60] sm:$0xff]  ;;  %v46_v51 = vld [vmem:[%s10033_s0 + $0x70] sm:$0xff]  ;;  %v47_v59 = vld [vmem:[%s10033_s0 + $0x78] sm:$0x3] }
   0x7   :  { %533 = vrot.lane.b32.xlu1 %v423_v12, %s5026_s23  ;;  %v419_v18 = vsel %vm10299_vm3, %v417_v14, %v418_v15  ;;  %v424_v20 = vrot.slane %v5162_v16, 1  ;;  %v425_v21 = vrot.slane %v5176_v19, 1  ;;  %v421_v22 = vsel %vm10299_vm3, %v418_v15, %v420_v6  ;;  %v49_v15 = vld [vmem:[%s10033_s0 + $0x88] sm:$0xff] }
   0x8   :  { %529 = vrot.lane.b32.xlu0 %v419_v18, %s5026_s23  ;;  %v5188_v23 = vsel %vm102_vm7, 0.0, %v5142_v11  ;;  %v5206_v28 = vsel %vm103_vm8, 0.0, %v5167_v17  ;;  %vm105_vm9 = vcmp.ne.f32.partialorder %v41_v24, %v41_v24  ;;  %vm106_vm10 = vcmp.ne.f32.partialorder %v42_v25, %v42_v25  ;;  %v50_v18 = vld [vmem:[%s10033_s0 + $0x90] sm:$0xff] }
   0x9   :  { %v426_v27 = vsel %vm10299_vm3, %v424_v20, %v425_v21  ;;  %v427_v29 = vrot.slane %v5188_v23, 1  ;;  %v429_v30 = vrot.slane %v5206_v28, 1  ;;  %vm10139_vm11 = vcmp.ne.f32.partialorder %v5199_v26, %v5199_v26 }
   0xa   :  { %v5216_v33 = vsel %vm105_vm9, 0.0, %v41_v24  ;;  %v5218_v34 = vsel %vm106_vm10, 0.0, %v42_v25  ;;  %v5224_v37 = vsel %vm105_vm9, 1.0, %v10049_v36  ;;  %v5227_v38 = vsel %vm106_vm10, 1.0, %v10049_v36 }
   0xb   :  { %535 = vrot.lane.b32.xlu1 %v426_v27, %s5026_s23  ;;  %v430_v31 = vsel %vm10299_vm3, %v427_v29, %v429_v30  ;;  %v428_v32 = vsel %vm10299_vm3, %v425_v21, %v427_v29  ;;  %10505 = vst [vmem:[#allocation3_spill] sm:$0xff] %v5224_v37  ;;  %10506 = vst [vmem:[#allocation4_spill] sm:$0xff] %v5227_v38  ;;  %v432_v39 = vrot.slane %v5216_v33, 1  ;;  %v434_v40 = vrot.slane %v5218_v34, 1 }
   0xc   :  { %531 = vrot.lane.b32.xlu0 %v421_v22, %s5026_s23  ;;  %v10044_v41 = vrot.slane %v5224_v37, 2  ;;  %v1572_v42 = vrot.slane %v5227_v38, 2  ;;  %v5246_v46 = vsel %vm10139_vm11, 0.0, %v5199_v26  ;;  %vm108_vm13 = vcmp.ne.f32.partialorder %v44_v35, %v44_v35 }
   0xd   :  { %v435_v45 = vsel %vm10299_vm3, %v432_v39, %v434_v40  ;;  %v431_v48 = vrot.slane %v5246_v46, 1  ;;  %vm109_vm14 = vcmp.ne.f32.partialorder %v45_v43, %v45_v43  ;;  %v5254_v49 = vsel %vm108_vm13, 0.0, %v44_v35 }
   0xe   :  { %v5251_v47 = vsel %vm10297_vm12, %v10044_v41, %v1572_v42  ;;  %v5257_v50 = vsel %vm108_vm13, 1.0, %v10049_v36  ;;  %vm107_vm15 = vcmp.ne.f32.partialorder %v43_v44, %v43_v44  ;;  %v5264_v53 = vsel %vm109_vm14, 0.0, %v45_v43 }
   0xf   :  { %539 = vrot.lane.b32.xlu1 %v430_v31, %s5026_s23  ;;  %10507 = vst [vmem:[#allocation5_spill] sm:$0xff] %v5251_v47  ;;  %10508 = vst [vmem:[#allocation6_spill] sm:$0xff] %v5257_v50  ;;  %v433_v52 = vsel %vm10299_vm3, %v431_v48, %v432_v39  ;;  %v5267_v54 = vsel %vm109_vm14, 1.0, %v10049_v36  ;;  %v438_v55 = vrot.slane %v5254_v49, 1  ;;  %v439_v56 = vrot.slane %v5264_v53, 1  ;;  %v48_v48 = vld [vmem:[%s10033_s0 + $0x80] sm:$0xff] }
  0x10   :  { %537 = vrot.lane.b32.xlu0 %v428_v32, %s5026_s23  ;;  %10509 = vst [vmem:[#allocation7_spill] sm:$0xff] %v5264_v53  ;;  %10510 = vst [vmem:[#allocation8_spill] sm:$0xff] %v5267_v54  ;;  %v1576_v57 = vrot.slane %v5257_v50, 2  ;;  %v1577_v58 = vrot.slane %v5267_v54, 2  ;;  %v5277_v60 = vsel %vm107_vm15, 0.0, %v43_v44  ;;  %v4652_v61 = vsel %vm107_vm15, 1.0, %v10049_v36 }
  0x11   :  { %vm110_vm9 = vcmp.ne.f32.partialorder %v46_v51, %v46_v51  ;;  %v440_v62 = vsel %vm10299_vm3, %v438_v55, %v439_v56  ;;  %v436_v6 = vrot.slane %v5277_v60, 1  ;;  %v1574_v7 = vrot.slane %v4652_v61, 2 }
  0x12   :  { %v5282_v63 = vsel %vm10297_vm12, %v1576_v57, %v1577_v58  ;;  %vm111_vm10 = vcmp.ne.f32.partialorder %v47_v59, %v47_v59  ;;  %v5286_v12 = vsel %vm110_vm9, 0.0, %v46_v51  ;;  %v4655_v14 = vsel %vm110_vm9, 1.0, %v10049_v36 }
  0x13   :  { %543 = vrot.lane.b32.xlu1 %v435_v45, %s5026_s23  ;;  %10511 = vst [vmem:[#allocation9_spill] sm:$0xff] %v5282_v63  ;;  %vm10160_vm13 = vcmask 1043456   ;;  %v437_v20 = vsel %vm10299_vm3, %v434_v40, %v436_v6  ;;  %v5297_v21 = vsel %vm10297_vm12, %v1572_v42, %v1574_v7  ;;  %v5299_v22 = vsel %vm111_vm10, 0.0, %v47_v59  ;;  %v53_v6 = vld [vmem:[%s10033_s0 + $0xa8] sm:$0xff] }
  0x14   :  { %541 = vrot.lane.b32.xlu0 %v433_v52, %s5026_s23  ;;  %10512 = vst [vmem:[#allocation10_spill] sm:$0xff] %v5297_v21  ;;  %v4656_v24 = vsel %vm111_vm10, 1.0, %v10049_v36  ;;  %v10043_v25 = vrot.slane %v5267_v54, 4  ;;  %v441_v27 = vrot.slane %v5286_v12, 1  ;;  %v443_v29 = vrot.slane %v5299_v22, 1 }
  0x15   :  { %v1579_v30 = vrot.slane %v4655_v14, 2  ;;  %v1581_v31 = vrot.slane %v4656_v24, 2  ;;  %v3713_v32 = vrot.slane %v4655_v14, 4  ;;  %vm113_vm14 = vcmp.ne.f32.partialorder %v49_v15, %v49_v15 }
  0x16   :  { %vm114_vm15 = vcmp.ne.f32.partialorder %v50_v18, %v50_v18  ;;  %v444_v35 = vsel %vm10299_vm3, %v441_v27, %v443_v29  ;;  %v442_v40 = vsel %vm10299_vm3, %v439_v56, %v441_v27  ;;  %v5311_v42 = vsel %vm113_vm14, 0.0, %v49_v15 }
  0x17   :  { %547 = vrot.lane.b32.xlu1 %v440_v62, %s5026_s23  ;;  %v5308_v39 = vsel %vm10297_vm12, %v1577_v58, %v1579_v30  ;;  %v5314_v43 = vsel %vm10297_vm12, %v1579_v30, %v1581_v31  ;;  %v5319_v44 = vsel %vm10160_vm13, %v10043_v25, %v3713_v32  ;;  %v5322_v45 = vsel %vm114_vm15, 0.0, %v50_v18  ;;  %v52_v62 = vld [vmem:[%s10033_s0 + $0xa0] sm:$0xff] }
  0x18   :  { %545 = vrot.lane.b32.xlu0 %v437_v20, %s5026_s23  ;;  %10513 = vst [vmem:[#allocation11_spill] sm:$0xff] %v5308_v39  ;;  %10514 = vst [vmem:[#allocation12_spill] sm:$0xff] %v5314_v43  ;;  %v4658_v51 = vsel %vm113_vm14, 1.0, %v10049_v36  ;;  %v4659_v52 = vsel %vm114_vm15, 1.0, %v10049_v36  ;;  %v446_v55 = vrot.slane %v5311_v42, 1  ;;  %v448_v56 = vrot.slane %v5322_v45, 1 }
  0x19   :  { %10515 = vst [vmem:[#allocation13_spill] sm:$0xff] %v5319_v44  ;;  %10516 = vst [vmem:[#allocation14_spill] sm:$0xff] %v5322_v45  ;;  %v1584_v57 = vrot.slane %v4658_v51, 2  ;;  %v1586_v58 = vrot.slane %v4659_v52, 2  ;;  %v3716_v59 = vrot.slane %v4658_v51, 4  ;;  %v3718_v61 = vrot.slane %v4659_v52, 4 }
  0x1a   :  { %vm112_vm9 = vcmp.ne.f32.partialorder %v48_v48, %v48_v48  ;;  %v449_v7 = vsel %vm10299_vm3, %v446_v55, %v448_v56  ;;  %vm116_vm10 = vcmp.ne.f32.partialorder %v52_v62, %v52_v62  ;;  %vm117_vm14 = vcmp.ne.f32.partialorder %v53_v6, %v53_v6  ;;  %v51_v51 = vld [vmem:[%s10033_s0 + $0x98] sm:$0x3]  ;;  %v54_v52 = vld [vmem:[%s10033_s0 + $0xb0] sm:$0xff] }
  0x1b   :  { %551 = vrot.lane.b32.xlu1 %v444_v35, %s5026_s23  ;;  %v5340_v14 = vsel %vm10297_vm12, %v1584_v57, %v1586_v58  ;;  %v5342_v15 = vsel %vm112_vm9, 0.0, %v48_v48  ;;  %v4657_v18 = vsel %vm112_vm9, 1.0, %v10049_v36  ;;  %v5346_v20 = vsel %vm10160_vm13, %v3716_v59, %v3718_v61  ;;  %v55_v61 = vld [vmem:[%s10033_s0 + $0xb8] sm:$0x3] }
  0x1c   :  { %549 = vrot.lane.b32.xlu0 %v442_v40, %s5026_s23  ;;  %10517 = vst [vmem:[#allocation15_spill] sm:$0xff] %v5340_v14  ;;  %10518 = vst [vmem:[#allocation16_spill] sm:$0xff] %v5346_v20  ;;  %v445_v24 = vrot.slane %v5342_v15, 1  ;;  %v1583_v27 = vrot.slane %v4657_v18, 2  ;;  %v3715_v29 = vrot.slane %v4657_v18, 4  ;;  %v5354_v32 = vsel %vm116_vm10, 0.0, %v52_v62 }
  0x1d   :  { %10520 = vst [vmem:[#allocation18_spill] sm:$0xff] %v5354_v32  ;;  %v5360_v40 = vsel %vm117_vm14, 0.0, %v53_v6  ;;  %v4661_v48 = vsel %vm116_vm10, 1.0, %v10049_v36  ;;  %vm115_vm15 = vcmp.ne.f32.partialorder %v51_v51, %v51_v51  ;;  %vm118_vm9 = vcmp.ne.f32.partialorder %v54_v52, %v54_v52 }
  0x1e   :  { %v447_v30 = vsel %vm10299_vm3, %v445_v24, %v446_v55  ;;  %v5352_v31 = vsel %vm10297_vm12, %v1583_v27, %v1584_v57  ;;  %v5357_v35 = vsel %vm10160_vm13, %v3715_v29, %v3716_v59  ;;  %10522 = vst [vmem:[#allocation20_spill] sm:$0xff] %v5360_v40  ;;  %v4662_v55 = vsel %vm117_vm14, 1.0, %v10049_v36 }
  0x1f   :  { %555 = vrot.lane.b32.xlu1 %v449_v7, %s5026_s23  ;;  %10519 = vst [vmem:[#allocation17_spill] sm:$0xff] %v5352_v31  ;;  %10521 = vst [vmem:[#allocation19_spill] sm:$0xff] %v5357_v35  ;;  %v452_v57 = vrot.slane %v5354_v32, 1  ;;  %v453_v59 = vrot.slane %v5360_v40, 1  ;;  %v1590_v62 = vrot.slane %v4661_v48, 2  ;;  %v1591_v6 = vrot.slane %v4662_v55, 2 }
  0x20   :  { %553 = vrot.lane.b32.xlu0 %v447_v30, %s5026_s23  ;;  %v3720_v7 = vrot.slane %v4661_v48, 4  ;;  %v3721_v24 = vrot.slane %v4662_v55, 4  ;;  %v5380_v29 = vsel %vm115_vm15, 0.0, %v51_v51  ;;  %v4660_v30 = vsel %vm115_vm15, 1.0, %v10049_v36  ;;  %v57_v51 = vld [vmem:[%s10033_s0 + $0xc8] sm:$0xff] }
  0x21   :  { %v454_v18 = vsel %vm10299_vm3, %v452_v57, %v453_v59  ;;  %v5377_v27 = vsel %vm10297_vm12, %v1590_v62, %v1591_v6  ;;  %vm119_vm10 = vcmp.ne.f32.partialorder %v55_v61, %v55_v61  ;;  %v450_v48 = vrot.slane %v5380_v29, 1 }
  0x22   :  { %10523 = vst [vmem:[#allocation21_spill] sm:$0xff] %v5377_v27  ;;  %v5384_v25 = vsel %vm10160_vm13, %v3720_v7, %v3721_v24  ;;  %v1588_v41 = vrot.slane %v4660_v30, 2  ;;  %v5387_v57 = vsel %vm118_vm9, 0.0, %v54_v52  ;;  %v5389_v55 = vsel %vm119_vm10, 0.0, %v55_v61  ;;  %v58_v52 = vld [vmem:[%s10033_s0 + $0xd0] sm:$0xff] }
  0x23   :  { %559 = vrot.lane.b32.xlu1 %v454_v18, %s5026_s23  ;;  %10524 = vst [vmem:[#allocation22_spill] sm:$0xff] %v5384_v25  ;;  %10525 = vst [vmem:[#allocation23_spill] sm:$0xff] %v5387_v57  ;;  %v4663_v62 = vsel %vm118_vm9, 1.0, %v10049_v36  ;;  %v451_v18 = vsel %vm10299_vm3, %v448_v56, %v450_v48  ;;  %v4664_v7 = vsel %vm119_vm10, 1.0, %v10049_v36  ;;  %v455_v61 = vrot.slane %v5387_v57, 1 }
  0x24   :  { %v5397_v20 = vsel %vm10297_vm12, %v1586_v58, %v1588_v41  ;;  %557 = vrot.lane.b32.xlu0 %v451_v18, %s5026_s23  ;;  %v457_v30 = vrot.slane %v5389_v55, 1  ;;  %v1593_v25 = vrot.slane %v4663_v62, 2  ;;  %v1595_v35 = vrot.slane %v4664_v7, 2 }
  0x25   :  { %10526 = vst [vmem:[#allocation24_spill] sm:$0xff] %v5397_v20  ;;  %v3723_v44 = vrot.slane %v4663_v62, 4  ;;  %vm121_vm14 = vcmp.ne.f32.partialorder %v57_v51, %v57_v51  ;;  %v456_v41 = vsel %vm10299_vm3, %v453_v59, %v455_v61  ;;  %vm122_vm15 = vcmp.ne.f32.partialorder %v58_v52, %v58_v52  ;;  %v56_v59 = vld [vmem:[%s10033_s0 + $0xc0] sm:$0xff] }
  0x26   :  { %v458_v56 = vsel %vm10299_vm3, %v455_v61, %v457_v30  ;;  %v5409_v58 = vsel %vm10297_vm12, %v1591_v6, %v1593_v25  ;;  %v5412_v48 = vsel %vm10297_vm12, %v1593_v25, %v1595_v35  ;;  %v5418_v36 = vsel %vm121_vm14, 0.0, %v57_v51  ;;  %v61_v51 = vld [vmem:[%s10033_s0 + $0xe8] sm:$0xff] }
  0x27   :  { %10527 = vst [vmem:[#allocation25_spill] sm:$0xff] %v5409_v58  ;;  %10528 = vst [vmem:[#allocation26_spill] sm:$0xff] %v5412_v48  ;;  %v5415_v18 = vsel %vm10160_vm13, %v3721_v24, %v3723_v44  ;;  %563 = vrot.lane.b32.xlu1 %v458_v56, %s5026_s23  ;;  %v5421_v62 = vsel %vm122_vm15, 0.0, %v58_v52  ;;  %v10532_v6 = vmov 0.0   ;;  %v460_v35 = vrot.slane %v5418_v36, 1  ;;  %v60_v24 = vld [vmem:[%s10033_s0 + $0xe0] sm:$0xff] }
  0x28   :  { %10529 = vst [vmem:[#allocation27_spill] sm:$0xff] %v5415_v18  ;;  %10530 = vst [vmem:[#allocation28_spill] sm:$0xff] %v5418_v36  ;;  %561 = vrot.lane.b32.xlu0 %v456_v41, %s5026_s23  ;;  %v4666_v7 = vsel %vm121_vm14, 1.0, %v10532_v6  ;;  %v4667_v25 = vsel %vm122_vm15, 1.0, %v10532_v6  ;;  %v462_v44 = vrot.slane %v5421_v62, 1  ;;  %vm120_vm9 = vcmp.ne.f32.partialorder %v56_v59, %v56_v59 }
  0x29   :  { %10531 = vst [vmem:[#allocation29_spill] sm:$0xff] %v5421_v62  ;;  %v1598_v52 = vrot.slane %v4666_v7, 2  ;;  %v1600_v30 = vrot.slane %v4667_v25, 2  ;;  %v3726_v56 = vrot.slane %v4666_v7, 4  ;;  %v3728_v41 = vrot.slane %v4667_v25, 4 }
  0x2a   :  { %v463_v61 = vsel %vm10299_vm3, %v460_v35, %v462_v44  ;;  %vm124_vm10 = vcmp.ne.f32.partialorder %v60_v24, %v60_v24  ;;  %vm125_vm14 = vcmp.ne.f32.partialorder %v61_v51, %v61_v51  ;;  %v5444_v50 = vsel %vm120_vm9, 0.0, %v56_v59  ;;  %v59_v7 = vld [vmem:[%s10033_s0 + $0xd8] sm:$0x3] }
  0x2b   :  { %567 = vrot.lane.b32.xlu1 %v463_v61, %s5026_s23  ;;  %v5439_v18 = vsel %vm10297_vm12, %v1598_v52, %v1600_v30  ;;  %v5442_v54 = vsel %vm10160_vm13, %v3726_v56, %v3728_v41  ;;  %10535 = vst [vmem:[#allocation32_spill] sm:$0xff] %v5444_v50  ;;  %v4665_v38 = vsel %vm120_vm9, 1.0, %v10532_v6  ;;  %v459_v25 = vrot.slane %v5444_v50, 1 }
  0x2c   :  { %10533 = vst [vmem:[#allocation30_spill] sm:$0xff] %v5439_v18  ;;  %10534 = vst [vmem:[#allocation31_spill] sm:$0xff] %v5442_v54  ;;  %v1597_v61 = vrot.slane %v4665_v38, 2  ;;  %v3725_v48 = vrot.slane %v4665_v38, 4  ;;  %v5451_v58 = vsel %vm124_vm10, 0.0, %v60_v24  ;;  %v5454_v27 = vsel %vm125_vm14, 0.0, %v61_v51 }
  0x2d   :  { %10536 = vst [vmem:[#allocation33_spill] sm:$0xff] %v5451_v58  ;;  %10537 = vst [vmem:[#allocation34_spill] sm:$0xff] %v5454_v27  ;;  %v4669_v41 = vsel %vm124_vm10, 1.0, %v10532_v6  ;;  %v461_v59 = vsel %vm10299_vm3, %v459_v25, %v460_v35  ;;  %vm123_vm15 = vcmp.ne.f32.partialorder %v59_v7, %v59_v7  ;;  %v4670_v38 = vsel %vm125_vm14, 1.0, %v10532_v6 }
  0x2e   :  { %v5459_v54 = vsel %vm10297_vm12, %v1597_v61, %v1598_v52  ;;  %v5462_v18 = vsel %vm10160_vm13, %v3725_v48, %v3726_v56  ;;  %565 = vrot.lane.b32.xlu0 %v461_v59, %s5026_s23  ;;  %v466_v24 = vrot.slane %v5451_v58, 1  ;;  %v467_v20 = vrot.slane %v5454_v27, 1  ;;  %v62_v48 = vld [vmem:[%s10033_s0 + $0xf0] sm:$0xff]  ;;  %v63_v52 = vld [vmem:[%s10033_s0 + $0xf8] sm:$0x3] }
  0x2f   :  { %10538 = vst [vmem:[#allocation35_spill] sm:$0xff] %v5459_v54  ;;  %10539 = vst [vmem:[#allocation36_spill] sm:$0xff] %v5462_v18  ;;  %v1604_v14 = vrot.slane %v4669_v41, 2  ;;  %v1605_v31 = vrot.slane %v4670_v38, 2  ;;  %v3730_v43 = vrot.slane %v4669_v41, 4  ;;  %v3731_v35 = vrot.slane %v4670_v38, 4 }
  0x30   :  { %v5469_v25 = vsel %vm123_vm15, 0.0, %v59_v7  ;;  %v468_v51 = vsel %vm10299_vm3, %v466_v24, %v467_v20  ;;  %v4668_v61 = vsel %vm123_vm15, 1.0, %v10532_v6  ;;  %v65_v38 = vld [vmem:[%s10033_s0 + $0x108] sm:$0xff]  ;;  %vm126_vm9 = vcmp.ne.f32.partialorder %v62_v48, %v62_v48 }
  0x31   :  { %v5479_v56 = vsel %vm10297_vm12, %v1604_v14, %v1605_v31  ;;  %v5483_v41 = vsel %vm10160_vm13, %v3730_v43, %v3731_v35  ;;  %571 = vrot.lane.b32.xlu1 %v468_v51, %s5026_s23  ;;  %v464_v7 = vrot.slane %v5469_v25, 1  ;;  %v1602_v59 = vrot.slane %v4668_v61, 2  ;;  %v66_v43 = vld [vmem:[%s10033_s0 + $0x110] sm:$0xff] }
  0x32   :  { %10540 = vst [vmem:[#allocation37_spill] sm:$0xff] %v5479_v56  ;;  %10541 = vst [vmem:[#allocation38_spill] sm:$0xff] %v5483_v41  ;;  %vm127_vm10 = vcmp.ne.f32.partialorder %v63_v52, %v63_v52  ;;  %v5494_v18 = vsel %vm126_vm9, 0.0, %v62_v48  ;;  %v4671_v61 = vsel %vm126_vm9, 1.0, %v10532_v6  ;;  %vm129_vm14 = vcmp.ne.f32.partialorder %v65_v38, %v65_v38 }
  0x33   :  { %v465_v24 = vsel %vm10299_vm3, %v462_v44, %v464_v7  ;;  %v5492_v14 = vsel %vm10297_vm12, %v1600_v30, %v1602_v59  ;;  %10543 = vst [vmem:[#allocation40_spill] sm:$0xff] %v5494_v18  ;;  %v5500_v51 = vsel %vm127_vm10, 0.0, %v63_v52  ;;  %v4672_v41 = vsel %vm127_vm10, 1.0, %v10532_v6 }
  0x34   :  { %10542 = vst [vmem:[#allocation39_spill] sm:$0xff] %v5492_v14  ;;  %569 = vrot.lane.b32.xlu0 %v465_v24, %s5026_s23  ;;  %10544 = vst [vmem:[#allocation41_spill] sm:$0xff] %v5500_v51  ;;  %v469_v44 = vrot.slane %v5494_v18, 1  ;;  %v471_v30 = vrot.slane %v5500_v51, 1  ;;  %v1607_v7 = vrot.slane %v4671_v61, 2  ;;  %v1609_v48 = vrot.slane %v4672_v41, 2 }
  0x35   :  { %v3733_v59 = vrot.slane %v4671_v61, 4  ;;  %vm130_vm15 = vcmp.ne.f32.partialorder %v66_v43, %v66_v43  ;;  %v5512_v24 = vsel %vm129_vm14, 0.0, %v65_v38  ;;  %v64_v61 = vld [vmem:[%s10033_s0 + $0x100] sm:$0xff]  ;;  %v703_v1 = vrot.slane %v5311_v42, 2 }
  0x36   :  { %v472_v56 = vsel %vm10299_vm3, %v469_v44, %v471_v30  ;;  %v5508_v14 = vsel %vm10297_vm12, %v1605_v31, %v1607_v7  ;;  %v470_v52 = vsel %vm10299_vm3, %v467_v20, %v469_v44  ;;  %10546 = vst [vmem:[#allocation43_spill] sm:$0xff] %v5512_v24  ;;  %v5515_v54 = vsel %vm10297_vm12, %v1607_v7, %v1609_v48 }
  0x37   :  { %10545 = vst [vmem:[#allocation42_spill] sm:$0xff] %v5508_v14  ;;  %10547 = vst [vmem:[#allocation44_spill] sm:$0xff] %v5515_v54  ;;  %v5518_v39 = vsel %vm10160_vm13, %v3731_v35, %v3733_v59  ;;  %575 = vrot.lane.b32.xlu1 %v472_v56, %s5026_s23  ;;  %v5522_v41 = vsel %vm130_vm15, 0.0, %v66_v43  ;;  %v4674_v31 = vsel %vm129_vm14, 1.0, %v10532_v6  ;;  %v4675_v20 = vsel %vm130_vm15, 1.0, %v10532_v6  ;;  %v68_v35 = vld [vmem:[%s10033_s0 + $0x120] sm:$0xff] }
  0x38   :  { %10548 = vst [vmem:[#allocation45_spill] sm:$0xff] %v5518_v39  ;;  %573 = vrot.lane.b32.xlu0 %v470_v52, %s5026_s23  ;;  %10549 = vst [vmem:[#allocation46_spill] sm:$0xff] %v5522_v41  ;;  %v474_v44 = vrot.slane %v5512_v24, 1  ;;  %v476_v56 = vrot.slane %v5522_v41, 1  ;;  %v69_v43 = vld [vmem:[%s10033_s0 + $0x128] sm:$0xff]  ;;  %v1612_v38 = vrot.slane %v4674_v31, 2  ;;  %vm128_vm9 = vcmp.ne.f32.partialorder %v64_v61, %v64_v61 }
  0x39   :  { %v1614_v30 = vrot.slane %v4675_v20, 2  ;;  %v3736_v7 = vrot.slane %v4674_v31, 4  ;;  %v3738_v59 = vrot.slane %v4675_v20, 4  ;;  %vm132_vm10 = vcmp.ne.f32.partialorder %v68_v35, %v68_v35 }
  0x3a   :  { %v477_v48 = vsel %vm10299_vm3, %v474_v44, %v476_v56  ;;  %v5543_v39 = vsel %vm128_vm9, 0.0, %v64_v61  ;;  %v4673_v54 = vsel %vm128_vm9, 1.0, %v10532_v6  ;;  %vm133_vm14 = vcmp.ne.f32.partialorder %v69_v43, %v69_v43 }
  0x3b   :  { %v5540_v52 = vsel %vm10297_vm12, %v1612_v38, %v1614_v30  ;;  %579 = vrot.lane.b32.xlu1 %v477_v48, %s5026_s23  ;;  %10551 = vst [vmem:[#allocation48_spill] sm:$0xff] %v5543_v39  ;;  %v5547_v14 = vsel %vm10160_vm13, %v3736_v7, %v3738_v59  ;;  %v473_v31 = vrot.slane %v5543_v39, 1  ;;  %v1611_v63 = vrot.slane %v4673_v54, 2 }
  0x3c   :  { %10550 = vst [vmem:[#allocation47_spill] sm:$0xff] %v5540_v52  ;;  %10552 = vst [vmem:[#allocation49_spill] sm:$0xff] %v5547_v14  ;;  %v3735_v41 = vrot.slane %v4673_v54, 4  ;;  %v5550_v20 = vsel %vm132_vm10, 0.0, %v68_v35  ;;  %v5552_v24 = vsel %vm133_vm14, 0.0, %v69_v43  ;;  %v4677_v61 = vsel %vm132_vm10, 1.0, %v10532_v6 }
  0x3d   :  { %10553 = vst [vmem:[#allocation50_spill] sm:$0xff] %v5550_v20  ;;  %10554 = vst [vmem:[#allocation51_spill] sm:$0xff] %v5552_v24  ;;  %v475_v52 = vsel %vm10299_vm3, %v473_v31, %v474_v44  ;;  %v5556_v48 = vsel %vm10297_vm12, %v1611_v63, %v1612_v38  ;;  %v4678_v59 = vsel %vm133_vm14, 1.0, %v10532_v6  ;;  %v67_v54 = vld [vmem:[%s10033_s0 + $0x118] sm:$0x3]  ;;  %v70_v35 = vld [vmem:[%s10033_s0 + $0x130] sm:$0xff] }
  0x3e   :  { %10555 = vst [vmem:[#allocation52_spill] sm:$0xff] %v5556_v48  ;;  %v5560_v47 = vsel %vm10160_vm13, %v3735_v41, %v3736_v7  ;;  %577 = vrot.lane.b32.xlu0 %v475_v52, %s5026_s23  ;;  %v480_v63 = vrot.slane %v5550_v20, 1  ;;  %v481_v44 = vrot.slane %v5552_v24, 1  ;;  %v1618_v43 = vrot.slane %v4677_v61, 2  ;;  %v71_v31 = vld [vmem:[%s10033_s0 + $0x138] sm:$0x3] }
  0x3f   :  { %10556 = vst [vmem:[#allocation53_spill] sm:$0xff] %v5560_v47  ;;  %v1619_v38 = vrot.slane %v4678_v59, 2  ;;  %v3740_v41 = vrot.slane %v4677_v61, 4  ;;  %v3741_v7 = vrot.slane %v4678_v59, 4  ;;  %vm131_vm15 = vcmp.ne.f32.partialorder %v67_v54, %v67_v54  ;;  %v73_v59 = vld [vmem:[%s10033_s0 + $0x148] sm:$0xff] }
  0x40   :  { %v482_v52 = vsel %vm10299_vm3, %v480_v63, %v481_v44  ;;  %vm134_vm9 = vcmp.ne.f32.partialorder %v70_v35, %v70_v35  ;;  %v5583_v48 = vsel %vm131_vm15, 0.0, %v67_v54  ;;  %v4676_v61 = vsel %vm131_vm15, 1.0, %v10532_v6  ;;  %v74_v54 = vld [vmem:[%s10033_s0 + $0x150] sm:$0xff] }
  0x41   :  { %v5577_v14 = vsel %vm10297_vm12, %v1618_v43, %v1619_v38  ;;  %v5580_v47 = vsel %vm10160_vm13, %v3740_v41, %v3741_v7  ;;  %583 = vrot.lane.b32.xlu1 %v482_v52, %s5026_s23  ;;  %10559 = vst [vmem:[#allocation56_spill] sm:$0xff] %v5583_v48  ;;  %v478_v63 = vrot.slane %v5583_v48, 1  ;;  %v1616_v24 = vrot.slane %v4676_v61, 2 }
  0x42   :  { %10557 = vst [vmem:[#allocation54_spill] sm:$0xff] %v5577_v14  ;;  %10558 = vst [vmem:[#allocation55_spill] sm:$0xff] %v5580_v47  ;;  %vm135_vm10 = vcmp.ne.f32.partialorder %v71_v31, %v71_v31  ;;  %v5590_v20 = vsel %vm134_vm9, 0.0, %v70_v35  ;;  %v4679_v43 = vsel %vm134_vm9, 1.0, %v10532_v6  ;;  %vm137_vm14 = vcmp.ne.f32.partialorder %v73_v59, %v73_v59 }
  0x43   :  { %10560 = vst [vmem:[#allocation57_spill] sm:$0xff] %v5590_v20  ;;  %v479_v41 = vsel %vm10299_vm3, %v476_v56, %v478_v63  ;;  %v5595_v52 = vsel %vm10297_vm12, %v1614_v30, %v1616_v24  ;;  %v5601_v47 = vsel %vm135_vm10, 0.0, %v71_v31  ;;  %v4680_v61 = vsel %vm135_vm10, 1.0, %v10532_v6 }
  0x44   :  { %10561 = vst [vmem:[#allocation58_spill] sm:$0xff] %v5595_v52  ;;  %581 = vrot.lane.b32.xlu0 %v479_v41, %s5026_s23  ;;  %10562 = vst [vmem:[#allocation59_spill] sm:$0xff] %v5601_v47  ;;  %v483_v35 = vrot.slane %v5590_v20, 1  ;;  %v485_v14 = vrot.slane %v5601_v47, 1  ;;  %v1621_v48 = vrot.slane %v4679_v43, 2  ;;  %v1623_v56 = vrot.slane %v4680_v61, 2 }
  0x45   :  { %v3743_v63 = vrot.slane %v4679_v43, 4  ;;  %vm138_vm15 = vcmp.ne.f32.partialorder %v74_v54, %v74_v54  ;;  %v5608_v30 = vsel %vm137_vm14, 0.0, %v73_v59  ;;  %v72_v43 = vld [vmem:[%s10033_s0 + $0x140] sm:$0xff]  ;;  %v6045_v8 = vsel %vm96_vm2, 1.0, %v10532_v6 }
  0x46   :  { %v484_v24 = vsel %vm10299_vm3, %v481_v44, %v483_v35  ;;  %10563 = vst [vmem:[#allocation60_spill] sm:$0xff] %v5608_v30  ;;  %v486_v52 = vsel %vm10299_vm3, %v483_v35, %v485_v14  ;;  %v5612_v31 = vsel %vm10297_vm12, %v1619_v38, %v1621_v48  ;;  %v5615_v41 = vsel %vm10297_vm12, %v1621_v48, %v1623_v56 }
  0x47   :  { %10564 = vst [vmem:[#allocation61_spill] sm:$0xff] %v5612_v31  ;;  %10565 = vst [vmem:[#allocation62_spill] sm:$0xff] %v5615_v41  ;;  %v5618_v20 = vsel %vm10160_vm13, %v3741_v7, %v3743_v63  ;;  %587 = vrot.lane.b32.xlu1 %v486_v52, %s5026_s23  ;;  %v5622_v44 = vsel %vm138_vm15, 0.0, %v74_v54  ;;  %v4682_v14 = vsel %vm137_vm14, 1.0, %v10532_v6  ;;  %v4683_v38 = vsel %vm138_vm15, 1.0, %v10532_v6  ;;  %v76_v52 = vld [vmem:[%s10033_s0 + $0x160] sm:$0xff] }
  0x48   :  { %10566 = vst [vmem:[#allocation63_spill] sm:$0xff] %v5618_v20  ;;  %585 = vrot.lane.b32.xlu0 %v484_v24, %s5026_s23  ;;  %10567 = vst [vmem:[#allocation64_spill] sm:$0xff] %v5622_v44  ;;  %v488_v48 = vrot.slane %v5608_v30, 1  ;;  %v490_v7 = vrot.slane %v5622_v44, 1  ;;  %v77_v54 = vld [vmem:[%s10033_s0 + $0x168] sm:$0xff]  ;;  %v1626_v61 = vrot.slane %v4682_v14, 2  ;;  %vm136_vm9 = vcmp.ne.f32.partialorder %v72_v43, %v72_v43 }
  0x49   :  { %v1628_v56 = vrot.slane %v4683_v38, 2  ;;  %v3746_v59 = vrot.slane %v4682_v14, 4  ;;  %v3748_v63 = vrot.slane %v4683_v38, 4  ;;  %vm140_vm10 = vcmp.ne.f32.partialorder %v76_v52, %v76_v52  ;;  %v75_v14 = vld [vmem:[%s10033_s0 + $0x158] sm:$0x3]  ;;  %10622 = vst [vmem:[#allocation118_spill] sm:$0xff] %v6045_v8 }
  0x4a   :  { %v491_v35 = vsel %vm10299_vm3, %v488_v48, %v490_v7  ;;  %vm141_vm14 = vcmp.ne.f32.partialorder %v77_v54, %v77_v54  ;;  %v5646_v41 = vsel %vm136_vm9, 0.0, %v72_v43  ;;  %v4681_v31 = vsel %vm136_vm9, 1.0, %v10532_v6 }
  0x4b   :  { %591 = vrot.lane.b32.xlu1 %v491_v35, %s5026_s23  ;;  %v5641_v24 = vsel %vm10297_vm12, %v1626_v61, %v1628_v56  ;;  %v5644_v20 = vsel %vm10160_vm13, %v3746_v59, %v3748_v63  ;;  %10570 = vst [vmem:[#allocation67_spill] sm:$0xff] %v5646_v41  ;;  %v487_v38 = vrot.slane %v5646_v41, 1  ;;  %v1625_v35 = vrot.slane %v4681_v31, 2 }
  0x4c   :  { %10568 = vst [vmem:[#allocation65_spill] sm:$0xff] %v5641_v24  ;;  %10569 = vst [vmem:[#allocation66_spill] sm:$0xff] %v5644_v20  ;;  %v3745_v44 = vrot.slane %v4681_v31, 4  ;;  %v5653_v30 = vsel %vm140_vm10, 0.0, %v76_v52  ;;  %v5656_v47 = vsel %vm141_vm14, 0.0, %v77_v54  ;;  %v4685_v63 = vsel %vm140_vm10, 1.0, %v10532_v6 }
  0x4d   :  { %10571 = vst [vmem:[#allocation68_spill] sm:$0xff] %v5653_v30  ;;  %10572 = vst [vmem:[#allocation69_spill] sm:$0xff] %v5656_v47  ;;  %v489_v43 = vsel %vm10299_vm3, %v487_v38, %v488_v48  ;;  %v5661_v20 = vsel %vm10297_vm12, %v1625_v35, %v1626_v61  ;;  %vm139_vm15 = vcmp.ne.f32.partialorder %v75_v14, %v75_v14  ;;  %v4686_v31 = vsel %vm141_vm14, 1.0, %v10532_v6  ;;  %v79_v61 = vld [vmem:[%s10033_s0 + $0x178] sm:$0x3] }
  0x4e   :  { %10573 = vst [vmem:[#allocation70_spill] sm:$0xff] %v5661_v20  ;;  %v5664_v24 = vsel %vm10160_vm13, %v3745_v44, %v3746_v59  ;;  %589 = vrot.lane.b32.xlu0 %v489_v43, %s5026_s23  ;;  %v494_v52 = vrot.slane %v5653_v30, 1  ;;  %v495_v41 = vrot.slane %v5656_v47, 1  ;;  %v1632_v39 = vrot.slane %v4685_v63, 2  ;;  %v78_v44 = vld [vmem:[%s10033_s0 + $0x170] sm:$0xff] }
  0x4f   :  { %10574 = vst [vmem:[#allocation71_spill] sm:$0xff] %v5664_v24  ;;  %v1633_v21 = vrot.slane %v4686_v31, 2  ;;  %v3750_v51 = vrot.slane %v4685_v63, 4  ;;  %v3751_v48 = vrot.slane %v4686_v31, 4  ;;  %v5671_v38 = vsel %vm139_vm15, 0.0, %v75_v14  ;;  %v81_v31 = vld [vmem:[%s10033_s0 + $0x188] sm:$0xff] }
  0x50   :  { %10575 = vst [vmem:[#allocation72_spill] sm:$0xff] %v5671_v38  ;;  %v496_v54 = vsel %vm10299_vm3, %v494_v52, %v495_v41  ;;  %v4684_v35 = vsel %vm139_vm15, 1.0, %v10532_v6  ;;  %v492_v14 = vrot.slane %v5671_v38, 1  ;;  %vm142_vm9 = vcmp.ne.f32.partialorder %v78_v44, %v78_v44 }
  0x51   :  { %v5681_v59 = vsel %vm10297_vm12, %v1632_v39, %v1633_v21  ;;  %v5685_v63 = vsel %vm10160_vm13, %v3750_v51, %v3751_v48  ;;  %595 = vrot.lane.b32.xlu1 %v496_v54, %s5026_s23  ;;  %v1630_v43 = vrot.slane %v4684_v35, 2  ;;  %vm143_vm10 = vcmp.ne.f32.partialorder %v79_v61, %v79_v61  ;;  %v82_v51 = vld [vmem:[%s10033_s0 + $0x190] sm:$0xff] }
  0x52   :  { %10576 = vst [vmem:[#allocation73_spill] sm:$0xff] %v5681_v59  ;;  %10577 = vst [vmem:[#allocation74_spill] sm:$0xff] %v5685_v63  ;;  %v493_v52 = vsel %vm10299_vm3, %v490_v7, %v492_v14  ;;  %v5696_v24 = vsel %vm142_vm9, 0.0, %v78_v44  ;;  %v5702_v54 = vsel %vm143_vm10, 0.0, %v79_v61  ;;  %v4687_v35 = vsel %vm142_vm9, 1.0, %v10532_v6 }
  0x53   :  { %v5694_v39 = vsel %vm10297_vm12, %v1628_v56, %v1630_v43  ;;  %10579 = vst [vmem:[#allocation76_spill] sm:$0xff] %v5696_v24  ;;  %593 = vrot.lane.b32.xlu0 %v493_v52, %s5026_s23  ;;  %10580 = vst [vmem:[#allocation77_spill] sm:$0xff] %v5702_v54  ;;  %vm145_vm14 = vcmp.ne.f32.partialorder %v81_v31, %v81_v31  ;;  %v4688_v63 = vsel %vm143_vm10, 1.0, %v10532_v6  ;;  %v497_v7 = vrot.slane %v5696_v24, 1 }
  0x54   :  { %10578 = vst [vmem:[#allocation75_spill] sm:$0xff] %v5694_v39  ;;  %v499_v56 = vrot.slane %v5702_v54, 1  ;;  %v1635_v14 = vrot.slane %v4687_v35, 2  ;;  %v1637_v44 = vrot.slane %v4688_v63, 2  ;;  %v3753_v43 = vrot.slane %v4687_v35, 4  ;;  %v80_v35 = vld [vmem:[%s10033_s0 + $0x180] sm:$0xff] }
  0x55   :  { %vm146_vm15 = vcmp.ne.f32.partialorder %v82_v51, %v82_v51  ;;  %v498_v61 = vsel %vm10299_vm3, %v495_v41, %v497_v7  ;;  %v5714_v52 = vsel %vm145_vm14, 0.0, %v81_v31  ;;  %vm144_vm9 = vcmp.ne.f32.partialorder %v80_v35, %v80_v35 }
  0x56   :  { %v500_v59 = vsel %vm10299_vm3, %v497_v7, %v499_v56  ;;  %v5710_v39 = vsel %vm10297_vm12, %v1633_v21, %v1635_v14  ;;  %10582 = vst [vmem:[#allocation79_spill] sm:$0xff] %v5714_v52  ;;  %v5717_v20 = vsel %vm10297_vm12, %v1635_v14, %v1637_v44  ;;  %v5720_v24 = vsel %vm10160_vm13, %v3751_v48, %v3753_v43  ;;  %v84_v48 = vld [vmem:[%s10033_s0 + $0x1a0] sm:$0xff] }
  0x57   :  { %10581 = vst [vmem:[#allocation78_spill] sm:$0xff] %v5710_v39  ;;  %10583 = vst [vmem:[#allocation80_spill] sm:$0xff] %v5717_v20  ;;  %599 = vrot.lane.b32.xlu1 %v500_v59, %s5026_s23  ;;  %597 = vrot.lane.b32.xlu0 %v498_v61, %s5026_s23  ;;  %v5724_v63 = vsel %vm146_vm15, 0.0, %v82_v51  ;;  %v4690_v21 = vsel %vm145_vm14, 1.0, %v10532_v6  ;;  %v4691_v41 = vsel %vm146_vm15, 1.0, %v10532_v6  ;;  %v502_v7 = vrot.slane %v5714_v52, 1 }
  0x58   :  { %10584 = vst [vmem:[#allocation81_spill] sm:$0xff] %v5720_v24  ;;  %10585 = vst [vmem:[#allocation82_spill] sm:$0xff] %v5724_v63  ;;  %v504_v59 = vrot.slane %v5724_v63, 1  ;;  %v85_v51 = vld [vmem:[%s10033_s0 + $0x1a8] sm:$0xff]  ;;  %v1640_v31 = vrot.slane %v4690_v21, 2  ;;  %v1642_v56 = vrot.slane %v4691_v41, 2  ;;  %vm148_vm10 = vcmp.ne.f32.partialorder %v84_v48, %v84_v48 }
  0x59   :  { %v3756_v14 = vrot.slane %v4690_v21, 4  ;;  %v3758_v43 = vrot.slane %v4691_v41, 4  ;;  %v5745_v24 = vsel %vm144_vm9, 0.0, %v80_v35  ;;  %v4689_v20 = vsel %vm144_vm9, 1.0, %v10532_v6 }
  0x5a   :  { %v505_v44 = vsel %vm10299_vm3, %v502_v7, %v504_v59  ;;  %v5742_v61 = vsel %vm10297_vm12, %v1640_v31, %v1642_v56  ;;  %10587 = vst [vmem:[#allocation84_spill] sm:$0xff] %v5745_v24  ;;  %vm149_vm14 = vcmp.ne.f32.partialorder %v85_v51, %v85_v51  ;;  %v501_v21 = vrot.slane %v5745_v24, 1 }
  0x5b   :  { %10586 = vst [vmem:[#allocation83_spill] sm:$0xff] %v5742_v61  ;;  %603 = vrot.lane.b32.xlu1 %v505_v44, %s5026_s23  ;;  %v5749_v39 = vsel %vm10160_vm13, %v3756_v14, %v3758_v43  ;;  %v1639_v63 = vrot.slane %v4689_v20, 2  ;;  %v3755_v52 = vrot.slane %v4689_v20, 4  ;;  %v5752_v41 = vsel %vm148_vm10, 0.0, %v84_v48  ;;  %v83_v43 = vld [vmem:[%s10033_s0 + $0x198] sm:$0x3] }
  0x5c   :  { %10588 = vst [vmem:[#allocation85_spill] sm:$0xff] %v5749_v39  ;;  %10589 = vst [vmem:[#allocation86_spill] sm:$0xff] %v5752_v41  ;;  %v5754_v54 = vsel %vm149_vm14, 0.0, %v85_v51  ;;  %v503_v61 = vsel %vm10299_vm3, %v501_v21, %v502_v7  ;;  %v4693_v35 = vsel %vm148_vm10, 1.0, %v10532_v6  ;;  %v5769_v20 = vsel %vm149_vm14, 1.0, %v10532_v6 }
  0x5d   :  { %10590 = vst [vmem:[#allocation87_spill] sm:$0xff] %v5754_v54  ;;  %v5758_v44 = vsel %vm10297_vm12, %v1639_v63, %v1640_v31  ;;  %v5765_v39 = vsel %vm10160_vm13, %v3755_v52, %v3756_v14  ;;  %601 = vrot.lane.b32.xlu0 %v503_v61, %s5026_s23  ;;  %10593 = vst [vmem:[#allocation90_spill] sm:$0xff] %v5769_v20  ;;  %v508_v48 = vrot.slane %v5752_v41, 1  ;;  %v509_v7 = vrot.slane %v5754_v54, 1  ;;  %v86_v31 = vld [vmem:[%s10033_s0 + $0x1b0] sm:$0xff]  ;;  %v5784_v61 = vld [vmem:[%s10033_s0 + $0x1c8] sm:$0xff] }
  0x5e   :  { %10591 = vst [vmem:[#allocation88_spill] sm:$0xff] %v5758_v44  ;;  %10592 = vst [vmem:[#allocation89_spill] sm:$0xff] %v5765_v39  ;;  %v1646_v63 = vrot.slane %v4693_v35, 2  ;;  %v1647_v51 = vrot.slane %v5769_v20, 2  ;;  %v3760_v21 = vrot.slane %v4693_v35, 4  ;;  %vm147_vm15 = vcmp.ne.f32.partialorder %v83_v43, %v83_v43  ;;  %v5789_v39 = vld [vmem:[%s10033_s0 + $0x1d0] sm:$0xff] }
  0x5f   :  { %v87_v14 = vld [vmem:[%s10033_s0 + $0x1b8] sm:$0x3]  ;;  %v510_v44 = vsel %vm10299_vm3, %v508_v48, %v509_v7  ;;  %v5795_v52 = vsel %vm147_vm15, 0.0, %v83_v43  ;;  %v4692_v54 = vsel %vm147_vm15, 1.0, %v10532_v6  ;;  %v10596_v41 = vrot.slane %v5769_v20, 4 }
  0x60   :  { %v5793_v35 = vsel %vm10297_vm12, %v1646_v63, %v1647_v51  ;;  %10595 = vst [vmem:[#allocation92_spill] sm:$0xff] %v5795_v52  ;;  %607 = vrot.lane.b32.xlu1 %v510_v44, %s5026_s23  ;;  %v506_v38 = vrot.slane %v5795_v52, 1  ;;  %v1644_v47 = vrot.slane %v4692_v54, 2  ;;  %vm150_vm9 = vcmp.ne.f32.partialorder %v86_v31, %v86_v31 }
  0x61   :  { %10594 = vst [vmem:[#allocation91_spill] sm:$0xff] %v5793_v35  ;;  %v5801_v24 = vsel %vm10160_vm13, %v3760_v21, %v10596_v41  ;;  %vm151_vm10 = vcmp.ne.f32.partialorder %v87_v14, %v87_v14  ;;  %vm153_vm14 = vcmp.ne.f32.partialorder %v5784_v61, %v5784_v61  ;;  %vm154_vm11 = vcmp.ne.f32.partialorder %v5789_v39, %v5789_v39  ;;  %v1029_v35 = vld [vmem:[%s10034_s1 + $0x8] sm:$0xf] }
  0x62   :  { %10597 = vst [vmem:[#allocation93_spill] sm:$0xff] %v5801_v24  ;;  %v507_v48 = vsel %vm10299_vm3, %v504_v59, %v506_v38  ;;  %v5813_v41 = vsel %vm10297_vm12, %v1642_v56, %v1644_v47  ;;  %v5815_v63 = vsel %vm150_vm9, 0.0, %v86_v31  ;;  %v5817_v44 = vsel %vm151_vm10, 0.0, %v87_v14  ;;  %4877 = vmatprep.subr.msk.mxu0 %vm10160_vm13, %v1029_v35  ;;  %5007 = vmatprep.subr.msk.mxu1 %vm10160_vm13, %v1029_v35 }
  0x63   :  { %10599 = vst [vmem:[#allocation95_spill] sm:$0xff] %v5813_v41  ;;  %10600 = vst [vmem:[#allocation96_spill] sm:$0xff] %v5815_v63  ;;  %605 = vrot.lane.b32.xlu0 %v507_v48, %s5026_s23  ;;  %v5821_v54 = vsel %vm150_vm9, 1.0, %v10532_v6  ;;  %v4696_v21 = vsel %vm151_vm10, 1.0, %v10532_v6  ;;  %v511_v24 = vrot.slane %v5815_v63, 1  ;;  %v513_v38 = vrot.slane %v5817_v44, 1  ;;  %4878 = vmatpush3.msk.msra.mxu0 %vm10160_vm13, %v1029_v35 }
  0x64   :  { %10601 = vst [vmem:[#allocation97_spill] sm:$0xff] %v5817_v44  ;;  %10602 = vst [vmem:[#allocation98_spill] sm:$0xff] %v5821_v54  ;;  %v1649_v47 = vrot.slane %v5821_v54, 2  ;;  %v1651_v59 = vrot.slane %v4696_v21, 2  ;;  %v5834_v31 = vsel %vm153_vm14, 0.0, %v5784_v61  ;;  %v5840_v14 = vsel %vm154_vm11, 0.0, %v5789_v39  ;;  %5009 = vmatpush3.msk.msra.mxu1 %vm10160_vm13, %v1029_v35 }
  0x65   :  { %v512_v56 = vsel %vm10299_vm3, %v509_v7, %v511_v24  ;;  %10604 = vst [vmem:[#allocation100_spill] sm:$0xff] %v5834_v31  ;;  %10605 = vst [vmem:[#allocation101_spill] sm:$0xff] %v5840_v14  ;;  %v514_v48 = vsel %vm10299_vm3, %v511_v24, %v513_v38  ;;  %v5852_v7 = vld [vmem:[%s10033_s0 + $0x1c0] sm:$0xff]  ;;  %v5862_v24 = vld [vmem:[%s10033_s0 + $0x1e8] sm:$0xff]  ;;  %v675_v63 = vrot.slane %v5149_v13, 2  ;;  %v6064_v2 = vsel %vm102_vm7, 1.0, %v10532_v6 }
  0x66   :  { %v5847_v21 = vsel %vm10297_vm12, %v1649_v47, %v1651_v59  ;;  %v5857_v54 = vld [vmem:[%s10033_s0 + $0x1e0] sm:$0xff]  ;;  %611 = vrot.lane.b32.xlu1 %v514_v48, %s5026_s23  ;;  %vm152_vm15 = vcmp.ne.f32.partialorder %v5852_v7, %v5852_v7  ;;  %vm10158_vm10 = vcmp.ne.f32.partialorder %v5862_v24, %v5862_v24  ;;  %10625 = vst [vmem:[#allocation121_spill] sm:$0xff] %v6064_v2  ;;  %v6073_v3 = vsel %vm103_vm8, 1.0, %v10532_v6 }
  0x67   :  { %10607 = vst [vmem:[#allocation103_spill] sm:$0xff] %v5847_v21  ;;  %609 = vrot.lane.b32.xlu0 %v512_v56, %s5026_s23  ;;  %vm10159_vm9 = vcmp.ne.f32.partialorder %v5857_v54, %v5857_v54  ;;  %v5883_v56 = vsel %vm152_vm15, 0.0, %v5852_v7  ;;  %v5902_v21 = vsel %vm10158_vm10, 0.0, %v5862_v24  ;;  %v6101_v61 = vsel %vm154_vm11, 1.0, %v10532_v6 }
  0x68   :  { %10610 = vst [vmem:[#allocation106_spill] sm:$0xff] %v5883_v56  ;;  %10612 = vst [vmem:[#allocation108_spill] sm:$0xff] %v5902_v21  ;;  %vm10632_vm2 = vcmp.ne.f32.partialorder %v5857_v54, %v5857_v54  ;;  %v707_v7 = vrot.slane %v5380_v29, 2  ;;  %vm1037_vm7 = vcmask 97280  }
  0x69   :  { %10630 = vst [vmem:[#allocation125_spill] sm:$0xff] %v6101_v61 }
  0x79   :  { %v5809_v43 = vpop.permute.xlu1 %533 }
  0x7a   :  { %10598 = vst [vmem:[#allocation94_spill] sm:$0xff] %v5809_v43  ;;  %v5825_v20 = vpop.permute.xlu0 %529  ;;  %v5844_v43 = vsel %vm10297_vm12, %v1647_v51, %v1649_v47  ;;  %v516_v51 = vrot.slane %v5834_v31, 1  ;;  %v518_v47 = vrot.slane %v5840_v14, 1 }
  0x7b   :  { %10603 = vst [vmem:[#allocation99_spill] sm:$0xff] %v5825_v20  ;;  %10606 = vst [vmem:[#allocation102_spill] sm:$0xff] %v5844_v43  ;;  %v5894_v20 = vld [vmem:[%s10033_s0 + $0x1d8] sm:$0x3]  ;;  %v5907_v43 = vld [vmem:[%s10033_s0 + $0x1f0] sm:$0xff] }
  0x7c   :  { %v519_v48 = vsel %vm10299_vm3, %v516_v51, %v518_v47  ;;  %vm155_vm10 = vcmp.ne.f32.partialorder %v5894_v20, %v5894_v20 }
  0x7d   :  { %v5867_v38 = vpop.permute.xlu1 %535  ;;  %615 = vrot.lane.b32.xlu1 %v519_v48, %s5026_s23  ;;  %v523_v48 = vrot.slane %v5902_v21, 1  ;;  %v6125_v39 = vsel %vm155_vm10, 1.0, %v10532_v6 }
  0x7e   :  { %10608 = vst [vmem:[#allocation104_spill] sm:$0xff] %v5867_v38  ;;  %v5876_v59 = vpop.permute.xlu0 %531  ;;  %v5889_v38 = vsel %vm10159_vm9, 0.0, %v5857_v54  ;;  %vm158_vm9 = vcmp.ne.f32.partialorder %v5907_v43, %v5907_v43  ;;  %v1567_v54 = vrot.slane %v6073_v3, 2 }
  0x7f   :  { %10609 = vst [vmem:[#allocation105_spill] sm:$0xff] %v5876_v59  ;;  %10611 = vst [vmem:[#allocation107_spill] sm:$0xff] %v5889_v38  ;;  %v515_v59 = vrot.slane %v5883_v56, 1  ;;  %v522_v41 = vrot.slane %v5889_v38, 1  ;;  %v5917_v56 = vld [vmem:[%s10033_s0 + $0x1f8] sm:$0x3] }
  0x80   :  { %v1028_v38 = vld [vmem:[%s10034_s1] sm:$0xff]  ;;  %vm159_vm13 = vcmp.ne.f32.partialorder %v5917_v56, %v5917_v56  ;;  %v5948_v35 = vsel %vm158_vm9, 0.0, %v5907_v43  ;;  %s5028_s0 = smov 8  }
  0x81   :  { %v517_v14 = vsel %vm10299_vm3, %v515_v59, %v516_v51  ;;  %v5922_v31 = vpop.permute.xlu1 %539  ;;  %v524_v21 = vsel %vm10299_vm3, %v522_v41, %v523_v48  ;;  %4879 = vmatprep.subr.mxu0 %v1028_v38  ;;  %v5940_v51 = vsel %vm155_vm10, 0.0, %v5894_v20  ;;  %10615 = vst [vmem:[#allocation111_spill] sm:$0xff] %v5948_v35  ;;  %5008 = vmatprep.subr.mxu1 %v1028_v38  ;;  %v525_v59 = vrot.slane %v5948_v35, 1 }
  0x82   :  { %10613 = vst [vmem:[#allocation109_spill] sm:$0xff] %v5922_v31  ;;  %613 = vrot.lane.b32.xlu0 %v517_v14, %s5026_s23  ;;  %619 = vrot.lane.b32.xlu1 %v524_v21, %s5026_s23  ;;  %10614 = vst [vmem:[#allocation110_spill] sm:$0xff] %v5940_v51  ;;  %v5950_v41 = vpop.permute.xlu0 %537  ;;  %v520_v14 = vrot.slane %v5940_v51, 1  ;;  %v5957_v21 = vsel %vm159_vm13, 0.0, %v5917_v56  ;;  %v674_v35 = vrot.slane %v5132_v9, 2 }
  0x83   :  { %10616 = vst [vmem:[#allocation112_spill] sm:$0xff] %v5950_v41  ;;  %4880 = vmatpush3.msra.mxu0 %v1028_v38  ;;  %v527_v31 = vrot.slane %v5957_v21, 1  ;;  %5010 = vmatpush3.msra.mxu1 %v1028_v38  ;;  %v677_v41 = vrot.slane %v5111_v4, 2  ;;  %v526_v30 = vsel %vm10299_vm3, %v523_v48, %v525_v59 }
  0x84   :  { %v521_v44 = vsel %vm10299_vm3, %v518_v47, %v520_v14  ;;  %v681_v47 = vrot.slane %v5162_v16, 2  ;;  %v682_v14 = vrot.slane %v5176_v19, 2 }
  0x85   :  { %v528_v51 = vsel %vm10299_vm3, %v525_v59, %v527_v31  ;;  %v5966_v52 = vpop.permute.xlu1 %543  ;;  %v678_v38 = vsel %vm10297_vm12, %v675_v63, %v677_v41  ;;  %v679_v31 = vrot.slane %v5117_v5, 2  ;;  %v686_v59 = vrot.slane %v5206_v28, 2 }
  0x86   :  { %617 = vrot.lane.b32.xlu0 %v521_v44, %s5026_s23  ;;  %10617 = vst [vmem:[#allocation113_spill] sm:$0xff] %v5966_v52  ;;  %623 = vrot.lane.b32.xlu1 %v528_v51, %s5026_s23  ;;  %v5974_v13 = vpop.permute.xlu0 %541  ;;  %v676_v44 = vsel %vm10297_vm12, %v674_v35, %v675_v63  ;;  %v683_v48 = vsel %vm10297_vm12, %v681_v47, %v682_v14  ;;  %v684_v51 = vrot.slane %v5188_v23, 2  ;;  %v689_v5 = vrot.slane %v5216_v33, 2 }
  0x87   :  { %10618 = vst [vmem:[#allocation114_spill] sm:$0xff] %v5974_v13  ;;  %v691_v35 = vrot.slane %v5218_v34, 2  ;;  %v688_v47 = vrot.slane %v5246_v46, 2 }
  0x88   :  { %v687_v63 = vsel %vm10297_vm12, %v684_v51, %v686_v59  ;;  %v685_v28 = vsel %vm10297_vm12, %v682_v14, %v684_v51  ;;  %v698_v51 = vrot.slane %v5286_v12, 2 }
  0x89   :  { %v5983_v52 = vpop.permute.xlu1 %547  ;;  %v690_v59 = vsel %vm10297_vm12, %v688_v47, %v689_v5  ;;  %v705_v47 = vrot.slane %v5322_v45, 2 }
  0x8a   :  { %621 = vrot.lane.b32.xlu0 %v526_v30, %s5026_s23  ;;  %788 = vrot.lane.b32.xlu1 %v678_v38, %s5028_s0  ;;  %v5986_v13 = vpop.permute.xlu0 %545  ;;  %v680_v30 = vsel %vm10297_vm12, %v677_v41, %v679_v31  ;;  %v695_v41 = vrot.slane %v5254_v49, 2  ;;  %v696_v31 = vrot.slane %v5264_v53, 2  ;;  %v6017_v53 = vsel %vm98_vm0, 1.0, %v10532_v6 }
  0x8b   :  { %10620 = vst [vmem:[#allocation116_spill] sm:$0xff] %v6017_v53  ;;  %vm10626_vm0 = vcmp.ne.f32.partialorder %v5199_v26, %v5199_v26  ;;  %v706_v17 = vsel %vm10297_vm12, %v703_v1, %v705_v47  ;;  %v710_v26 = vrot.slane %v5360_v40, 2  ;;  %v717_v40 = vrot.slane %v5418_v36, 2 }
  0x8c   :  { %v697_v14 = vsel %vm10297_vm12, %v695_v41, %v696_v31  ;;  %v6079_v10 = vsel %vm10626_vm0, 1.0, %v10532_v6  ;;  %v699_v11 = vsel %vm10297_vm12, %v696_v31, %v698_v51  ;;  %v1565_v31 = vrot.slane %v6064_v2, 2 }
  0x8d   :  { %v5994_v38 = vpop.permute.xlu1 %551  ;;  %10627 = vst [vmem:[#allocation122_spill] sm:$0xff] %v6079_v10  ;;  %v10639_v43 = vrot.slane %v6017_v53, 2 }
  0x8e   :  { %786 = vrot.lane.b32.xlu0 %v676_v44, %s5028_s0  ;;  %792 = vrot.lane.b32.xlu1 %v683_v48, %s5028_s0  ;;  %10619 = vst [vmem:[#allocation115_spill] sm:$0xff] %v5994_v38  ;;  %v692_v44 = vsel %vm10297_vm12, %v689_v5, %v691_v35  ;;  %v6002_v48 = vpop.permute.xlu0 %549  ;;  %v6023_v5 = vsel %vm99_vm1, 1.0, %v10532_v6  ;;  %vm10298_vm1 = vcmask 7168  }
  0x8f   :  { %v1560_v41 = vrot.slane %v6023_v5, 2  ;;  %v6088_v5 = vsel %vm153_vm14, 1.0, %v10532_v6 }
  0x90   :  { %10628 = vst [vmem:[#allocation123_spill] sm:$0xff] %v6088_v5 }
  0x91   :  { %v6011_v38 = vpop.permute.xlu1 %555 }
  0x92   :  { %790 = vrot.lane.b32.xlu0 %v680_v30, %s5028_s0  ;;  %796 = vrot.lane.b32.xlu1 %v687_v63, %s5028_s0  ;;  %v693_v30 = vrot.slane %v5277_v60, 2  ;;  %v700_v63 = vrot.slane %v5299_v22, 2  ;;  %v6026_v60 = vpop.permute.xlu0 %553  ;;  %v6032_v22 = vsel %vm100_vm5, 1.0, %v10532_v6  ;;  %vm930_vm5 = vcmask 31744  }
  0x93   :  { %10621 = vst [vmem:[#allocation117_spill] sm:$0xff] %v6032_v22 }
  0x94   :  { %v694_v0 = vsel %vm10297_vm12, %v691_v35, %v693_v30  ;;  %v6051_v35 = vsel %vm97_vm4, 1.0, %v10532_v6  ;;  %v1562_v30 = vrot.slane %v6032_v22, 2  ;;  %vm10634_vm4 = vcmp.ne.f32.partialorder %v5862_v24, %v5862_v24 }
  0x95   :  { %10623 = vst [vmem:[#allocation119_spill] sm:$0xff] %v6051_v35  ;;  %v6119_v2 = vsel %vm10634_vm4, 1.0, %v10532_v6  ;;  %v1569_v22 = vrot.slane %v6079_v10, 2  ;;  %v1556_v45 = vrot.slane %v6051_v35, 2  ;;  %v723_v35 = vrot.slane %v5451_v58, 2 }
  0x96   :  { %794 = vrot.lane.b32.xlu0 %v685_v28, %s5028_s0  ;;  %800 = vrot.lane.b32.xlu1 %v692_v44, %s5028_s0  ;;  %v701_v28 = vsel %vm10297_vm12, %v698_v51, %v700_v63  ;;  %v702_v63 = vrot.slane %v5342_v15, 2  ;;  %v6093_v44 = vpop.permute.xlu0 %557  ;;  %v6107_v51 = vsel %vm152_vm15, 1.0, %v10532_v6  ;;  %10635 = vst [vmem:[#allocation128_spill] sm:$0xff] %v6119_v2 }
  0x97   :  { %10629 = vst [vmem:[#allocation124_spill] sm:$0xff] %v6093_v44  ;;  %10631 = vst [vmem:[#allocation126_spill] sm:$0xff] %v6107_v51  ;;  %v712_v44 = vrot.slane %v5387_v57, 2  ;;  %v1653_v29 = vrot.slane %v6107_v51, 2 }
  0x98   :  { %v704_v24 = vsel %vm10297_vm12, %v702_v63, %v703_v1  ;;  %v6148_v1 = vsel %vm158_vm9, 1.0, %v10532_v6 }
  0x99   :  { %10637 = vst [vmem:[#allocation130_spill] sm:$0xff] %v6148_v1 }
  0x9a   :  { %798 = vrot.lane.b32.xlu0 %v690_v59, %s5028_s0  ;;  %804 = vrot.lane.b32.xlu1 %v697_v14, %s5028_s0  ;;  %v6057_v59 = vsel %vm101_vm6, 1.0, %v10532_v6  ;;  %v6067_v14 = vpop.permute.xlu1 %559  ;;  %v6152_v63 = vpop.permute.xlu0 %561  ;;  %vm10296_vm6 = vcmask 64512  }
  0x9b   :  { %10624 = vst [vmem:[#allocation120_spill] sm:$0xff] %v6057_v59  ;;  %10638 = vst [vmem:[#allocation131_spill] sm:$0xff] %v6152_v63  ;;  %v10693_v63 = vld [vmem:[#allocation21_spill] sm:$0xff] }
  0x9e   :  { %802 = vrot.lane.b32.xlu0 %v694_v0, %s5028_s0  ;;  %808 = vrot.lane.b32.xlu1 %v701_v28, %s5028_s0  ;;  %v709_v0 = vrot.slane %v5354_v32, 2  ;;  %v1563_v28 = vrot.slane %v6057_v59, 2  ;;  %v6113_v59 = vsel %vm10632_vm2, 1.0, %v10532_v6  ;;  %v6138_v32 = vpop.permute.xlu1 %563 }
  0x9f   :  { %10633 = vst [vmem:[#allocation127_spill] sm:$0xff] %v6113_v59  ;;  %10636 = vst [vmem:[#allocation129_spill] sm:$0xff] %v6138_v32  ;;  %v1660_v3 = vrot.slane %v6113_v59, 2  ;;  %v6162_v59 = vsel %vm10297_vm12, %v10639_v43, %v1560_v41  ;;  %v4704_v41 = vsel %vm159_vm13, 1.0, %v10532_v6  ;;  %v716_v43 = vrot.slane %v5444_v50, 2  ;;  %v10677_v50 = vld [vmem:[#allocation12_spill] sm:$0xff] }
  0xa0   :  { %v711_v20 = vsel %vm10297_vm12, %v709_v0, %v710_v26  ;;  %v1555_v0 = vrot.slane %v6045_v8, 2  ;;  %10640 = vst [vmem:[#allocation132_spill] sm:$0xff] %v6162_v59  ;;  %v6172_v51 = vsel %vm10297_vm12, %v1563_v28, %v1565_v31  ;;  %v10710_v32 = vld [vmem:[#allocation30_spill] sm:$0xff] }
  0xa1   :  { %10642 = vst [vmem:[#allocation134_spill] sm:$0xff] %v6172_v51  ;;  %v10202_v8 = vsub.f32 1.0, %v6172_v51 }
  0xa2   :  { %806 = vrot.lane.b32.xlu0 %v699_v11, %s5028_s0  ;;  %812 = vrot.lane.b32.xlu1 %v706_v17, %s5028_s0  ;;  %v714_v11 = vrot.slane %v5389_v55, 2  ;;  %v1658_v17 = vrot.slane %v6125_v39, 2  ;;  %v708_v55 = vsel %vm10297_vm12, %v705_v47, %v707_v7  ;;  %v719_v39 = vrot.slane %v5421_v62, 2 }
  0xa3   :  { %v6180_v10 = vsel %vm10297_vm12, %v1555_v0, %v1556_v45 }
  0xa4   :  { %v715_v47 = vsel %vm10297_vm12, %v712_v44, %v714_v11  ;;  %10643 = vst [vmem:[#allocation135_spill] sm:$0xff] %v6180_v10  ;;  %v10644_v11 = vrot.slane %v6017_v53, 2  ;;  %v10198_v7 = vsub.f32 1.0, %v6180_v10  ;;  %v720_v0 = vsel %vm10297_vm12, %v717_v40, %v719_v39 }
  0xa5   :  { %v1665_v53 = vrot.slane %v4704_v41, 2  ;;  %v10652_v41 = vrot.slane %v6088_v5, 2 }
  0xa6   :  { %810 = vrot.lane.b32.xlu0 %v704_v24, %s5028_s0  ;;  %816 = vrot.lane.b32.xlu1 %v711_v20, %s5028_s0  ;;  %v10187_v24 = vmov 0   ;;  %v6169_v20 = vsel %vm10297_vm12, %v1562_v30, %v1563_v28  ;;  %v713_v30 = vsel %vm10297_vm12, %v710_v26, %v712_v44  ;;  %v6189_v28 = vpop.permute.xlu1 %567  ;;  %v6201_v44 = vpop.permute.xlu0 %565 }
  0xa7   :  { %5021 = vset.pattern.permute.xlu0 %v10187_v24  ;;  %5020 = vset.pattern.permute.xlu1 %v10187_v24  ;;  %10641 = vst [vmem:[#allocation133_spill] sm:$0xff] %v6169_v20  ;;  %v6185_v24 = vsel %vm10297_vm12, %v1556_v45, %v10644_v11  ;;  %10646 = vst [vmem:[#allocation137_spill] sm:$0xff] %v6189_v28  ;;  %v724_v45 = vrot.slane %v5454_v27, 2  ;;  %v1812_v11 = vsel %vm10298_vm1, %v10198_v7, 0.0  ;;  %v10650_v27 = vrot.slane %v5224_v37, 2 }
  0xa8   :  { %10645 = vst [vmem:[#allocation136_spill] sm:$0xff] %v6185_v24  ;;  %v10197_v6 = vsub.f32 1.0, %v6185_v24  ;;  %10648 = vst [vmem:[#allocation139_spill] sm:$0xff] %v6201_v44  ;;  %v10651_v7 = vsub.f32 1.0, %v6169_v20  ;;  %v10683_v44 = vld [vmem:[#allocation59_spill] sm:$0xff] }
  0xa9   :  { %v6217_v62 = vsel %vm10297_vm12, %v1569_v22, %v10650_v27  ;;  %v725_v27 = vsel %vm10297_vm12, %v723_v35, %v724_v45  ;;  %v726_v22 = vrot.slane %v5494_v18, 2  ;;  %v742_v36 = vrot.slane %v10683_v44, 2 }
  0xaa   :  { %814 = vrot.lane.b32.xlu0 %v708_v55, %s5028_s0  ;;  %820 = vrot.lane.b32.xlu1 %v715_v47, %s5028_s0  ;;  %v6199_v55 = vsel %vm10297_vm12, %v1565_v31, %v1567_v54  ;;  %v1813_v26 = vsel %vm10298_vm1, %v10197_v6, 0.0  ;;  %v10649_v47 = vsub.f32 1.0, %v6162_v59  ;;  %v718_v31 = vsel %vm10297_vm12, %v716_v43, %v717_v40 }
  0xab   :  { %10647 = vst [vmem:[#allocation138_spill] sm:$0xff] %v6199_v55  ;;  %v1814_v54 = vadd.f32 %v1813_v26, %v1812_v11  ;;  %v721_v6 = vrot.slane %v5469_v25, 2  ;;  %v1817_v58 = vsel %vm10298_vm1, %v10651_v7, 0.0  ;;  %v6228_v40 = vsel %vm10297_vm12, %v1653_v29, %v10652_v41  ;;  %v10656_v26 = vld [vmem:[#allocation41_spill] sm:$0xff] }
  0xac   :  { %v1815_v56 = vsel %vm10298_vm1, %v10649_v47, 0.0  ;;  %v10653_v25 = vrot.slane %v6101_v61, 2  ;;  %v728_v11 = vrot.slane %v10656_v26, 2  ;;  %v6241_v47 = vpop.permute.xlu1 %571  ;;  %v1819_v29 = vsel %vm10298_vm1, %v10202_v8, 0.0  ;;  %v10660_v26 = vld [vmem:[#allocation10_spill] sm:$0xff]  ;;  %v6260_v8 = vpop.permute.xlu0 %569 }
  0xad   :  { %v1816_v43 = vadd.f32 %v1815_v56, %v1814_v54  ;;  %10657 = vst [vmem:[#allocation41_spill] sm:$0xff] %v6241_v47  ;;  %10661 = vst [vmem:[#allocation141_spill] sm:$0xff] %v6260_v8  ;;  %v10662_v35 = vsub.f32 1.0, %v6199_v55  ;;  %v10676_v47 = vsub.f32 1.0, %v10660_v26  ;;  %vm1721_vm14 = vcmp.gt.f32.partialorder %v6217_v62, 0.5 }
  0xae   :  { %818 = vrot.lane.b32.xlu0 %v713_v30, %s5028_s0  ;;  %824 = vrot.lane.b32.xlu1 %v720_v0, %s5028_s0  ;;  %v10654_v30 = vmov %v10652_v41  ;;  %v10658_v0 = vmov %v10653_v25  ;;  %v10659_v41 = vrot.slane %v6119_v2, 2  ;;  %v729_v5 = vsel %vm10297_vm12, %v726_v22, %v728_v11  ;;  %v10671_v11 = vld [vmem:[#allocation11_spill] sm:$0xff] }
  0xaf   :  { %v6238_v7 = vsel %vm10297_vm12, %v10654_v30, %v10653_v25  ;;  %v6250_v56 = vsel %vm10297_vm12, %v10658_v0, %v1658_v17  ;;  %v1818_v54 = vadd.f32 %v1817_v58, %v1816_v43  ;;  %v1663_v30 = vrot.slane %v6148_v1, 2  ;;  %v10663_v17 = vld [vmem:[#allocation5_spill] sm:$0xff]  ;;  %v10665_v1 = vld [vmem:[#allocation43_spill] sm:$0xff] }
  0xb0   :  { %10655 = vst [vmem:[#allocation140_spill] sm:$0xff] %v6238_v7  ;;  %v6255_v25 = vsel %vm10297_vm12, %v1660_v3, %v10659_v41  ;;  %v1821_v61 = vsel %vm10298_vm1, %v10662_v35, 0.0  ;;  %v722_v58 = vsel %vm10297_vm12, %v719_v39, %v721_v6  ;;  %v10664_v43 = vmov %v10659_v41  ;;  %v10666_v35 = vld [vmem:[#allocation46_spill] sm:$0xff]  ;;  %v10668_v6 = vld [vmem:[#allocation9_spill] sm:$0xff] }
  0xb1   :  { %v1820_v3 = vadd.f32 %v1819_v29, %v1818_v54  ;;  %v6271_v41 = vsel %vm10297_vm12, %v10664_v43, %v1663_v30  ;;  %v731_v37 = vrot.slane %v10665_v1, 2  ;;  %v733_v18 = vrot.slane %v10666_v35, 2  ;;  %v6284_v54 = vpop.permute.xlu1 %575  ;;  %v10672_v35 = vld [vmem:[#allocation48_spill] sm:$0xff] }
  0xb2   :  { %822 = vrot.lane.b32.xlu0 %v718_v31, %s5028_s0  ;;  %828 = vrot.lane.b32.xlu1 %v725_v27, %s5028_s0  ;;  %v6274_v31 = vsel %vm10297_vm12, %v1663_v30, %v1665_v53  ;;  %v10667_v0 = vsub.f32 1.0, %v6217_v62  ;;  %10669 = vst [vmem:[#allocation5_spill] sm:$0xff] %v6284_v54  ;;  %v10670_v53 = vsub.f32 1.0, %v10663_v17  ;;  %v727_v2 = vsel %vm10297_vm12, %v724_v45, %v726_v22  ;;  %v6296_v54 = vpop.permute.xlu0 %573 }
  0xb3   :  { %v1822_v39 = vadd.f32 %v1821_v61, %v1820_v3  ;;  %v730_v1 = vrot.slane %v10672_v35, 2  ;;  %v734_v61 = vsel %vm10297_vm12, %v731_v37, %v733_v18  ;;  %v10673_v3 = vld [vmem:[#allocation50_spill] sm:$0xff]  ;;  %10675 = vst [vmem:[#allocation9_spill] sm:$0xff] %v6296_v54  ;;  %v10678_v45 = vsub.f32 1.0, %v10668_v6 }
  0xb4   :  { %v1823_v27 = vsel %vm10298_vm1, %v10667_v0, 0.0  ;;  %v1825_v30 = vsel %vm10298_vm1, %v10670_v53, 0.0  ;;  %v737_v29 = vrot.slane %v10673_v3, 2  ;;  %v1827_v53 = vsel %vm10298_vm1, %v10676_v47, 0.0  ;;  %v10680_v3 = vld [vmem:[#allocation56_spill] sm:$0xff] }
  0xb5   :  { %v1824_v0 = vadd.f32 %v1823_v27, %v1822_v39  ;;  %v1829_v22 = vsel %vm10298_vm1, %v10678_v45, 0.0  ;;  %v10679_v27 = vld [vmem:[#allocation17_spill] sm:$0xff]  ;;  %v735_v35 = vrot.slane %v10680_v3, 2  ;;  %v10681_v47 = vsub.f32 1.0, %v10671_v11  ;;  %v6316_v45 = vpop.permute.xlu1 %579  ;;  %v10691_v3 = vld [vmem:[#allocation64_spill] sm:$0xff] }
  0xb6   :  { %826 = vrot.lane.b32.xlu0 %v722_v58, %s5028_s0  ;;  %832 = vrot.lane.b32.xlu1 %v729_v5, %s5028_s0  ;;  %v10674_v58 = vld [vmem:[#allocation51_spill] sm:$0xff]  ;;  %10684 = vst [vmem:[#allocation11_spill] sm:$0xff] %v6316_v45  ;;  %v747_v28 = vrot.slane %v10691_v3, 2  ;;  %vm1725_vm10 = vcmp.gt.f32.partialorder %v10671_v11, 0.5  ;;  %vm1727_vm2 = vcmp.gt.f32.partialorder %v10679_v27, 0.5 }
  0xb7   :  { %v738_v8 = vrot.slane %v10674_v58, 2  ;;  %v1826_v43 = vadd.f32 %v1825_v30, %v1824_v0  ;;  %v732_v58 = vsel %vm10297_vm12, %v730_v1, %v731_v37  ;;  %v1831_v30 = vsel %vm10298_vm1, %v10681_v47, 0.0  ;;  %v10686_v1 = vld [vmem:[#allocation15_spill] sm:$0xff] }
  0xb8   :  { %v736_v44 = vsel %vm10297_vm12, %v733_v18, %v735_v35  ;;  %v10695_v18 = vld [vmem:[#allocation25_spill] sm:$0xff] }
  0xb9   :  { %v1828_v54 = vadd.f32 %v1827_v53, %v1826_v43  ;;  %v739_v0 = vsel %vm10297_vm12, %v737_v29, %v738_v8  ;;  %v6323_v43 = vpop.permute.xlu0 %577  ;;  %v10688_v53 = vsub.f32 1.0, %v10679_v27 }
  0xba   :  { %830 = vrot.lane.b32.xlu0 %v727_v2, %s5028_s0  ;;  %836 = vrot.lane.b32.xlu1 %v734_v61, %s5028_s0  ;;  %v10682_v2 = vld [vmem:[#allocation57_spill] sm:$0xff]  ;;  %v10685_v61 = vsub.f32 1.0, %v10677_v50  ;;  %10687 = vst [vmem:[#allocation12_spill] sm:$0xff] %v6323_v43  ;;  %v10692_v43 = vsub.f32 1.0, %v10686_v1 }
  0xbb   :  { %v740_v5 = vrot.slane %v10682_v2, 2  ;;  %v1830_v39 = vadd.f32 %v1829_v22, %v1828_v54  ;;  %v1835_v29 = vsel %vm10298_vm1, %v10688_v53, 0.0  ;;  %v10689_v54 = vld [vmem:[#allocation24_spill] sm:$0xff] }
  0xbc   :  { %v1833_v37 = vsel %vm10298_vm1, %v10685_v61, 0.0  ;;  %v10690_v61 = vld [vmem:[#allocation60_spill] sm:$0xff]  ;;  %v1837_v26 = vsel %vm10298_vm1, %v10692_v43, 0.0 }
  0xbd   :  { %v1832_v47 = vadd.f32 %v1831_v30, %v1830_v39  ;;  %v743_v2 = vsel %vm10297_vm12, %v740_v5, %v742_v36  ;;  %v745_v45 = vrot.slane %v10690_v61, 2  ;;  %v741_v36 = vsel %vm10297_vm12, %v738_v8, %v740_v5  ;;  %v10696_v39 = vld [vmem:[#allocation67_spill] sm:$0xff]  ;;  %v10698_v53 = vld [vmem:[#allocation68_spill] sm:$0xff]  ;;  %v10702_v5 = vld [vmem:[#allocation26_spill] sm:$0xff] }
  0xbe   :  { %834 = vrot.lane.b32.xlu0 %v732_v58, %s5028_s0  ;;  %840 = vrot.lane.b32.xlu1 %v739_v0, %s5028_s0  ;;  %v6339_v0 = vpop.permute.xlu1 %583  ;;  %v744_v30 = vrot.slane %v10696_v39, 2  ;;  %v751_v3 = vrot.slane %v10698_v53, 2  ;;  %v10707_v39 = vld [vmem:[#allocation77_spill] sm:$0xff] }
  0xbf   :  { %v1834_v58 = vadd.f32 %v1833_v37, %v1832_v47  ;;  %10694 = vst [vmem:[#allocation17_spill] sm:$0xff] %v6339_v0  ;;  %v10697_v37 = vsub.f32 1.0, %v10689_v54  ;;  %v748_v43 = vsel %vm10297_vm12, %v745_v45, %v747_v28  ;;  %v6351_v0 = vpop.permute.xlu0 %581  ;;  %v756_v57 = vrot.slane %v10707_v39, 2 }
  0xc0   :  { %10700 = vst [vmem:[#allocation56_spill] sm:$0xff] %v6351_v0 }
  0xc1   :  { %v1836_v22 = vadd.f32 %v1835_v29, %v1834_v58  ;;  %v1839_v47 = vsel %vm10298_vm1, %v10697_v37, 0.0  ;;  %v10703_v29 = vsub.f32 1.0, %v10695_v18  ;;  %v746_v37 = vsel %vm10297_vm12, %v744_v30, %v745_v45  ;;  %v10712_v30 = vld [vmem:[#allocation39_spill] sm:$0xff]  ;;  %v10714_v45 = vld [vmem:[#allocation82_spill] sm:$0xff] }
  0xc2   :  { %838 = vrot.lane.b32.xlu0 %v736_v44, %s5028_s0  ;;  %844 = vrot.lane.b32.xlu1 %v743_v2, %s5028_s0  ;;  %v10699_v44 = vld [vmem:[#allocation69_spill] sm:$0xff]  ;;  %v10701_v2 = vsub.f32 1.0, %v10693_v63 }
  0xc3   :  { %v752_v61 = vrot.slane %v10699_v44, 2  ;;  %v1838_v35 = vadd.f32 %v1837_v26, %v1836_v22  ;;  %v1843_v58 = vsel %vm10298_vm1, %v10703_v29, 0.0  ;;  %v10704_v44 = vld [vmem:[#allocation72_spill] sm:$0xff]  ;;  %v10705_v26 = vld [vmem:[#allocation35_spill] sm:$0xff]  ;;  %v10709_v29 = vsub.f32 1.0, %v10702_v5 }
  0xc4   :  { %v1841_v8 = vsel %vm10298_vm1, %v10701_v2, 0.0  ;;  %v749_v53 = vrot.slane %v10704_v44, 2  ;;  %v10219_v22 = vsub.f32 1.0, %v10705_v26  ;;  %v10706_v2 = vld [vmem:[#allocation76_spill] sm:$0xff] }
  0xc5   :  { %v1840_v0 = vadd.f32 %v1839_v47, %v1838_v35  ;;  %v753_v63 = vsel %vm10297_vm12, %v751_v3, %v752_v61  ;;  %v754_v54 = vrot.slane %v10706_v2, 2  ;;  %v6375_v35 = vpop.permute.xlu0 %585  ;;  %v761_v2 = vrot.slane %v10714_v45, 2  ;;  %v10725_v5 = vld [vmem:[#allocation44_spill] sm:$0xff] }
  0xc6   :  { %842 = vrot.lane.b32.xlu0 %v741_v36, %s5028_s0  ;;  %848 = vrot.lane.b32.xlu1 %v748_v43, %s5028_s0  ;;  %v6368_v36 = vpop.permute.xlu1 %587  ;;  %v1845_v43 = vsel %vm10298_vm1, %v10709_v29, 0.0  ;;  %10711 = vst [vmem:[#allocation15_spill] sm:$0xff] %v6375_v35  ;;  %v750_v3 = vsel %vm10297_vm12, %v747_v28, %v749_v53  ;;  %v10715_v35 = vsub.f32 1.0, %v10710_v32  ;;  %v10718_v53 = vsub.f32 1.0, %v10712_v30  ;;  %v10727_v45 = vld [vmem:[#allocation92_spill] sm:$0xff] }
  0xc7   :  { %10708 = vst [vmem:[#allocation59_spill] sm:$0xff] %v6368_v36  ;;  %v1842_v18 = vadd.f32 %v1841_v8, %v1840_v0  ;;  %v1847_v0 = vsel %vm10298_vm1, %v10219_v22, 0.0  ;;  %v757_v44 = vsel %vm10297_vm12, %v754_v54, %v756_v57  ;;  %v10713_v8 = vld [vmem:[#allocation79_spill] sm:$0xff]  ;;  %v10716_v36 = vld [vmem:[#allocation37_spill] sm:$0xff]  ;;  %v755_v57 = vsel %vm10297_vm12, %v752_v61, %v754_v54  ;;  %v10720_v22 = vld [vmem:[#allocation42_spill] sm:$0xff] }
  0xc8   :  { %v759_v29 = vrot.slane %v10713_v8, 2  ;;  %v1849_v47 = vsel %vm10298_vm1, %v10715_v35, 0.0  ;;  %v10726_v61 = vld [vmem:[#allocation52_spill] sm:$0xff]  ;;  %v10730_v54 = vld [vmem:[#allocation97_spill] sm:$0xff] }
  0xc9   :  { %v1844_v39 = vadd.f32 %v1843_v58, %v1842_v18  ;;  %v1851_v18 = vsel %vm10298_vm1, %v10718_v53, 0.0  ;;  %v10719_v58 = vld [vmem:[#allocation84_spill] sm:$0xff]  ;;  %v10724_v53 = vsub.f32 1.0, %v10716_v36  ;;  %v770_v36 = vrot.slane %v10730_v54, 2 }
  0xca   :  { %846 = vrot.lane.b32.xlu0 %v746_v37, %s5028_s0  ;;  %852 = vrot.lane.b32.xlu1 %v753_v63, %s5028_s0  ;;  %v6391_v28 = vpop.permute.xlu1 %591  ;;  %v762_v35 = vsel %vm10297_vm12, %v759_v29, %v761_v2  ;;  %v10721_v63 = vld [vmem:[#allocation86_spill] sm:$0xff] }
  0xcb   :  { %v1846_v37 = vadd.f32 %v1845_v43, %v1844_v39  ;;  %10717 = vst [vmem:[#allocation72_spill] sm:$0xff] %v6391_v28  ;;  %v758_v43 = vrot.slane %v10719_v58, 2  ;;  %v765_v8 = vrot.slane %v10721_v63, 2  ;;  %v6403_v28 = vpop.permute.xlu0 %589  ;;  %v763_v63 = vrot.slane %v10727_v45, 2  ;;  %v10738_v45 = vld [vmem:[#allocation101_spill] sm:$0xff] }
  0xcc   :  { %10723 = vst [vmem:[#allocation77_spill] sm:$0xff] %v6403_v28  ;;  %v10728_v58 = vsub.f32 1.0, %v10720_v22  ;;  %v10740_v22 = vld [vmem:[#allocation54_spill] sm:$0xff] }
  0xcd   :  { %v1848_v39 = vadd.f32 %v1847_v0, %v1846_v37  ;;  %v760_v37 = vsel %vm10297_vm12, %v758_v43, %v759_v29  ;;  %v10733_v43 = vld [vmem:[#allocation47_spill] sm:$0xff] }
  0xce   :  { %850 = vrot.lane.b32.xlu0 %v750_v3, %s5028_s0  ;;  %856 = vrot.lane.b32.xlu1 %v757_v44, %s5028_s0  ;;  %v10722_v3 = vld [vmem:[#allocation87_spill] sm:$0xff]  ;;  %v1853_v44 = vsel %vm10298_vm1, %v10724_v53, 0.0  ;;  %v10729_v53 = vld [vmem:[#allocation96_spill] sm:$0xff] }
  0xcf   :  { %v766_v32 = vrot.slane %v10722_v3, 2  ;;  %v1850_v26 = vadd.f32 %v1849_v47, %v1848_v39  ;;  %v1855_v47 = vsel %vm10298_vm1, %v10728_v58, 0.0  ;;  %v768_v28 = vrot.slane %v10729_v53, 2 }
  0xd0   :  { %v764_v58 = vsel %vm10297_vm12, %v761_v2, %v763_v63  ;;  %v10742_v2 = vld [vmem:[#allocation61_spill] sm:$0xff] }
  0xd1   :  { %v1852_v3 = vadd.f32 %v1851_v18, %v1850_v26  ;;  %v767_v39 = vsel %vm10297_vm12, %v765_v8, %v766_v32  ;;  %v6427_v26 = vpop.permute.xlu0 %593  ;;  %v10735_v18 = vsub.f32 1.0, %v10726_v61  ;;  %v771_v53 = vsel %vm10297_vm12, %v768_v28, %v770_v36 }
  0xd2   :  { %854 = vrot.lane.b32.xlu0 %v755_v57, %s5028_s0  ;;  %860 = vrot.lane.b32.xlu1 %v762_v35, %s5028_s0  ;;  %v6420_v57 = vpop.permute.xlu1 %595  ;;  %v10732_v35 = vsub.f32 1.0, %v10725_v5  ;;  %10734 = vst [vmem:[#allocation92_spill] sm:$0xff] %v6427_v26  ;;  %v775_v5 = vrot.slane %v10738_v45, 2  ;;  %v10739_v26 = vsub.f32 1.0, %v10733_v43  ;;  %v769_v36 = vsel %vm10297_vm12, %v766_v32, %v768_v28  ;;  %v10749_v28 = vld [vmem:[#allocation62_spill] sm:$0xff] }
  0xd3   :  { %10731 = vst [vmem:[#allocation39_spill] sm:$0xff] %v6420_v57  ;;  %v1854_v0 = vadd.f32 %v1853_v44, %v1852_v3  ;;  %v1859_v8 = vsel %vm10298_vm1, %v10735_v18, 0.0  ;;  %v10736_v3 = vld [vmem:[#allocation58_spill] sm:$0xff] }
  0xd4   :  { %v1857_v29 = vsel %vm10298_vm1, %v10732_v35, 0.0  ;;  %v10737_v35 = vld [vmem:[#allocation100_spill] sm:$0xff]  ;;  %v1861_v61 = vsel %vm10298_vm1, %v10739_v26, 0.0 }
  0xd5   :  { %v1856_v54 = vadd.f32 %v1855_v47, %v1854_v0  ;;  %v773_v57 = vrot.slane %v10737_v35, 2  ;;  %v10743_v0 = vld [vmem:[#allocation106_spill] sm:$0xff]  ;;  %v6453_v18 = vpop.permute.xlu0 %597  ;;  %v10747_v35 = vld [vmem:[#allocation108_spill] sm:$0xff] }
  0xd6   :  { %858 = vrot.lane.b32.xlu0 %v760_v37, %s5028_s0  ;;  %864 = vrot.lane.b32.xlu1 %v767_v39, %s5028_s0  ;;  %v6443_v39 = vpop.permute.xlu1 %599  ;;  %v772_v47 = vrot.slane %v10743_v0, 2  ;;  %10745 = vst [vmem:[#allocation142_spill] sm:$0xff] %v6453_v18  ;;  %v10753_v0 = vld [vmem:[#allocation111_spill] sm:$0xff] }
  0xd7   :  { %v1858_v37 = vadd.f32 %v1857_v29, %v1856_v54  ;;  %10741 = vst [vmem:[#allocation97_spill] sm:$0xff] %v6443_v39  ;;  %v10744_v29 = vsub.f32 1.0, %v10736_v3  ;;  %v776_v26 = vsel %vm10297_vm12, %v773_v57, %v775_v5  ;;  %v780_v39 = vrot.slane %v10747_v35, 2  ;;  %v10755_v3 = vld [vmem:[#allocation65_spill] sm:$0xff] }
  0xd8   :  { %v782_v43 = vrot.slane %v10753_v0, 2 }
  0xd9   :  { %v1860_v44 = vadd.f32 %v1859_v8, %v1858_v37  ;;  %v1863_v54 = vsel %vm10298_vm1, %v10744_v29, 0.0  ;;  %v10750_v8 = vsub.f32 1.0, %v10742_v2  ;;  %v774_v29 = vsel %vm10297_vm12, %v772_v47, %v773_v57 }
  0xda   :  { %862 = vrot.lane.b32.xlu0 %v764_v58, %s5028_s0  ;;  %868 = vrot.lane.b32.xlu1 %v771_v53, %s5028_s0  ;;  %v10746_v58 = vld [vmem:[#allocation107_spill] sm:$0xff]  ;;  %v10748_v53 = vsub.f32 1.0, %v10740_v22  ;;  %v10231_v57 = vsub.f32 1.0, %v10755_v3 }
  0xdb   :  { %v779_v45 = vrot.slane %v10746_v58, 2  ;;  %v1862_v63 = vadd.f32 %v1861_v61, %v1860_v44  ;;  %v1867_v37 = vsel %vm10298_vm1, %v10750_v8, 0.0  ;;  %v10751_v58 = vld [vmem:[#allocation110_spill] sm:$0xff]  ;;  %v10754_v8 = vsub.f32 1.0, %v10749_v28 }
  0xdc   :  { %v1865_v32 = vsel %vm10298_vm1, %v10748_v53, 0.0  ;;  %v777_v18 = vrot.slane %v10751_v58, 2  ;;  %v10752_v61 = vld [vmem:[#allocation70_spill] sm:$0xff]  ;;  %v6470_v53 = vpop.permute.xlu1 %603 }
  0xdd   :  { %v1864_v35 = vadd.f32 %v1863_v54, %v1862_v63  ;;  %v10232_v44 = vsub.f32 1.0, %v10752_v61  ;;  %v781_v22 = vsel %vm10297_vm12, %v779_v45, %v780_v39  ;;  %v6479_v63 = vpop.permute.xlu0 %601 }
  0xde   :  { %866 = vrot.lane.b32.xlu0 %v769_v36, %s5028_s0  ;;  %872 = vrot.lane.b32.xlu1 %v776_v26, %s5028_s0  ;;  %v784_v36 = vrot.slane %v5957_v21, 2  ;;  %v1869_v26 = vsel %vm10298_vm1, %v10754_v8, 0.0  ;;  %v778_v45 = vsel %vm10297_vm12, %v775_v5, %v777_v18  ;;  %v10757_v8 = vld [vmem:[#allocation73_spill] sm:$0xff]  ;;  %v783_v5 = vsel %vm10297_vm12, %v780_v39, %v782_v43 }
  0xdf   :  { %v1866_v2 = vadd.f32 %v1865_v32, %v1864_v35  ;;  %v1871_v21 = vsel %vm10298_vm1, %v10232_v44, 0.0  ;;  %v10756_v35 = vld [vmem:[#allocation75_spill] sm:$0xff]  ;;  %v10234_v0 = vsub.f32 1.0, %v10757_v8 }
  0xe0   :  { %v10233_v54 = vsub.f32 1.0, %v10756_v35  ;;  %v785_v58 = vsel %vm10297_vm12, %v782_v43, %v784_v36  ;;  %v10760_v43 = vsub.f32 1.0, %v6180_v10 }
  0xe1   :  { %v1868_v47 = vadd.f32 %v1867_v37, %v1866_v2  ;;  %v10758_v37 = vld [vmem:[#allocation78_spill] sm:$0xff] }
  0xe2   :  { %870 = vrot.lane.b32.xlu0 %v774_v29, %s5028_s0  ;;  %876 = vrot.lane.b32.xlu1 %v781_v22, %s5028_s0  ;;  %v1873_v29 = vsel %vm10298_vm1, %v10231_v57, 0.0  ;;  %v6493_v22 = vpop.permute.xlu1 %607  ;;  %v1875_v2 = vsel %vm10298_vm1, %v10233_v54, 0.0  ;;  %v10236_v36 = vsub.f32 1.0, %v10758_v37  ;;  %v10759_v57 = vld [vmem:[#allocation80_spill] sm:$0xff] }
  0xe3   :  { %v1870_v32 = vadd.f32 %v1869_v26, %v1868_v47  ;;  %v6501_v26 = vpop.permute.xlu0 %605  ;;  %v10238_v44 = vsub.f32 1.0, %v10759_v57 }
  0xe5   :  { %v1872_v18 = vadd.f32 %v1871_v21, %v1870_v32  ;;  %v1879_v21 = vsel %vm10298_vm1, %v10236_v36, 0.0  ;;  %v10766_v36 = vld [vmem:[#allocation95_spill] sm:$0xff] }
  0xe6   :  { %874 = vrot.lane.b32.xlu0 %v778_v45, %s5028_s0  ;;  %880 = vrot.lane.b32.xlu1 %v785_v58, %s5028_s0  ;;  %v1877_v45 = vsel %vm10298_vm1, %v10234_v0, 0.0  ;;  %v10761_v58 = vld [vmem:[#allocation88_spill] sm:$0xff]  ;;  %v6514_v54 = vpop.permute.xlu1 %611  ;;  %v1881_v0 = vsel %vm10298_vm1, %v10238_v44, 0.0  ;;  %v10244_v10 = vsub.f32 1.0, %v10766_v36 }
  0xe7   :  { %v1874_v47 = vadd.f32 %v1873_v29, %v1872_v18  ;;  %v10240_v32 = vsub.f32 1.0, %v10761_v58  ;;  %10762 = vst [vmem:[#allocation62_spill] sm:$0xff] %v6514_v54  ;;  %v6516_v29 = vpop.permute.xlu0 %609 }
  0xe8   :  { %10763 = vst [vmem:[#allocation110_spill] sm:$0xff] %v6516_v29 }
  0xe9   :  { %v1876_v39 = vadd.f32 %v1875_v2, %v1874_v47  ;;  %v1883_v47 = vsel %vm10298_vm1, %v10240_v32, 0.0  ;;  %v10771_v32 = vld [vmem:[#allocation102_spill] sm:$0xff] }
  0xea   :  { %878 = vrot.lane.b32.xlu0 %v783_v5, %s5028_s0  ;;  %1918 = vperm.xlu1 %5020, %v10760_v43   ;;  %v10764_v5 = vld [vmem:[#allocation83_spill] sm:$0xff]  ;;  %v10765_v43 = vsub.f32 1.0, %v6185_v24  ;;  %v10248_v24 = vsub.f32 1.0, %v10771_v32 }
  0xeb   :  { %v1878_v18 = vadd.f32 %v1877_v45, %v1876_v39  ;;  %v10243_v8 = vsub.f32 1.0, %v10764_v5  ;;  %v10768_v39 = vld [vmem:[#allocation91_spill] sm:$0xff] }
  0xec   :  { %v10246_v44 = vsub.f32 1.0, %v10768_v39 }
  0xed   :  { %v1880_v2 = vadd.f32 %v1879_v21, %v1878_v18  ;;  %v1885_v45 = vsel %vm10298_vm1, %v10243_v8, 0.0  ;;  %v1887_v18 = vsel %vm10298_vm1, %v10244_v10, 0.0  ;;  %v1891_v10 = vsel %vm10298_vm1, %v10248_v24, 0.0 }
  0xee   :  { %1923 = vperm.xlu1 %5020, %v10765_v43   ;;  %v10770_v43 = vsub.f32 1.0, %v6162_v59  ;;  %v1889_v8 = vsel %vm10298_vm1, %v10246_v44, 0.0 }
  0xef   :  { %v6528_v54 = vpop.permute.xlu1 %615  ;;  %v1882_v29 = vadd.f32 %v1881_v0, %v1880_v2  ;;  %v10772_v2 = vld [vmem:[#allocation103_spill] sm:$0xff] }
  0xf0   :  { %10767 = vst [vmem:[#allocation70_spill] sm:$0xff] %v6528_v54  ;;  %v10249_v5 = vsub.f32 1.0, %v10772_v2 }
  0xf1   :  { %v1884_v21 = vadd.f32 %v1883_v47, %v1882_v29  ;;  %v10779_v47 = vsub.f32 1.0, %v6199_v55 }
  0xf2   :  { %1928 = vperm.xlu1 %5020, %v10770_v43   ;;  %v1893_v44 = vsel %vm10298_vm1, %v10249_v5, 0.0  ;;  %v10776_v5 = vsub.f32 1.0, %v6238_v7 }
  0xf3   :  { %v1886_v0 = vadd.f32 %v1885_v45, %v1884_v21  ;;  %v1809_v21 = vsub.f32 1.0, %v6271_v41 }
  0xf4   :  { %v6534_v57 = vpop.permute.xlu0 %613  ;;  %v6542_v54 = vpop.permute.xlu1 %619  ;;  %v1897_v2 = vsel %vm10298_vm1, %v10776_v5, 0.0  ;;  %v10781_v5 = vsub.f32 1.0, %v6250_v56 }
  0xf5   :  { %10769 = vst [vmem:[#allocation65_spill] sm:$0xff] %v6534_v57  ;;  %v10773_v57 = vsub.f32 1.0, %v6169_v20  ;;  %v1888_v43 = vadd.f32 %v1887_v18, %v1886_v0  ;;  %v10775_v20 = vsub.f32 1.0, %v6228_v40 }
  0xf6   :  { %v1899_v7 = vsel %vm10298_vm1, %v10781_v5, 0.0  ;;  %v1903_v5 = vsel %vm10298_vm1, %v1809_v21, 0.0 }
  0xf7   :  { %1933 = vperm.xlu1 %5020, %v10773_v57   ;;  %v1890_v45 = vadd.f32 %v1889_v8, %v1888_v43  ;;  %v10774_v57 = vsub.f32 1.0, %v6172_v51  ;;  %v1895_v24 = vsel %vm10298_vm1, %v10775_v20, 0.0  ;;  %v10780_v20 = vld [vmem:[#allocation99_spill] sm:$0xff] }
  0xf8   :  { %v6550_v29 = vpop.permute.xlu0 %617  ;;  %v6556_v59 = vpop.permute.xlu1 %623  ;;  %v931_v39 = vsel %vm930_vm5, %v5132_v9, %v10780_v20  ;;  %v10785_v20 = vld [vmem:[#allocation94_spill] sm:$0xff] }
  0xf9   :  { %v1892_v18 = vadd.f32 %v1891_v10, %v1890_v45  ;;  %v10778_v10 = vld [vmem:[#allocation2_spill] sm:$0xff] }
  0xfb   :  { %1938 = vperm.xlu1 %5020, %v10774_v57   ;;  %v1894_v43 = vadd.f32 %v1893_v44, %v1892_v18  ;;  %v10777_v57 = vld [vmem:[#allocation105_spill] sm:$0xff] }
  0xfc   :  { %v6564_v0 = vpop.permute.xlu0 %621  ;;  %v789_v8 = vpop.permute.xlu1 %788  ;;  %v932_v45 = vsel %vm930_vm5, %v10778_v10, %v10777_v57 }
  0xfd   :  { %v1896_v51 = vadd.f32 %v1895_v24, %v1894_v43  ;;  %v981_v44 = vsel %vm10296_vm6, %v932_v45, %v789_v8  ;;  %v1810_v24 = vsub.f32 1.0, %v6274_v31  ;;  %v10783_v8 = vld [vmem:[#allocation104_spill] sm:$0xff]  ;;  %v10784_v45 = vsub.f32 1.0, %v6217_v62 }
  0xfe   :  { %v934_v43 = vsel %vm930_vm5, %v5162_v16, %v10783_v8  ;;  %v10788_v8 = vld [vmem:[#allocation112_spill] sm:$0xff] }
  0xff   :  { %1943 = vperm.xlu1 %5020, %v10779_v47   ;;  %v1898_v55 = vadd.f32 %v1897_v2, %v1896_v51  ;;  %v10782_v47 = vsub.f32 1.0, %v6255_v25  ;;  %v933_v51 = vsel %vm930_vm5, %v5111_v4, %v10785_v20 }
 0x100   :  { %v787_v18 = vpop.permute.xlu0 %786  ;;  %v793_v10 = vpop.permute.xlu1 %792 }
 0x101   :  { %v980_v57 = vsel %vm10296_vm6, %v931_v39, %v787_v18  ;;  %v1901_v9 = vsel %vm10298_vm1, %v10782_v47, 0.0  ;;  %v1900_v39 = vadd.f32 %v1899_v7, %v1898_v55  ;;  %v983_v2 = vsel %vm10296_vm6, %v934_v43, %v793_v10  ;;  %v10786_v7 = vld [vmem:[#allocation109_spill] sm:$0xff] }
 0x102   :  { %4881 = vmatprep.mubr.msk.f32.mxu0 %vm1037_vm7, %v980_v57  ;;  %v1905_v55 = vsel %vm10298_vm1, %v1810_v24, 0.0  ;;  %v936_v4 = vsel %vm930_vm5, %v5188_v23, %v10786_v7  ;;  %v10787_v10 = vsub.f32 1.0, %v10663_v17  ;;  %v10789_v23 = vld [vmem:[#allocation113_spill] sm:$0xff] }
 0x103   :  { %4882 = vmatmul.mubr.msk.f32.vlgmr.msra.gmra.mxu0 %vm1037_vm7, %v981_v44  ;;  %1948 = vperm.xlu1 %5020, %v10784_v45   ;;  %v1902_v47 = vadd.f32 %v1901_v9, %v1900_v39  ;;  %v935_v9 = vsel %vm930_vm5, %v5176_v19, %v10788_v8 }
 0x104   :  { %v791_v18 = vpop.permute.xlu0 %790  ;;  %v797_v16 = vpop.permute.xlu1 %796 }
 0x105   :  { %v982_v57 = vsel %vm10296_vm6, %v933_v51, %v791_v18  ;;  %v1904_v44 = vadd.f32 %v1903_v5, %v1902_v47  ;;  %v985_v43 = vsel %vm10296_vm6, %v936_v4, %v797_v16  ;;  %v10790_v18 = vld [vmem:[#allocation114_spill] sm:$0xff]  ;;  %v10791_v16 = vsub.f32 1.0, %v10668_v6 }
 0x106   :  { %4884 = vmatprep.mubr.msk.f32.mxu0 %vm1037_vm7, %v982_v57  ;;  %v937_v19 = vsel %vm930_vm5, %v5246_v46, %v10790_v18  ;;  %v939_v46 = vsel %vm930_vm5, %v5218_v34, %v5986_v13 }
 0x107   :  { %4885 = vmatmul.mubr.msk.f32.gmra.mxu0 %vm1037_vm7, %v983_v2  ;;  %1953 = vperm.xlu1 %5020, %v10787_v10   ;;  %v1906_v20 = vadd.f32 %v1905_v55, %v1904_v44  ;;  %v938_v2 = vsel %vm930_vm5, %v5216_v33, %v10789_v23  ;;  %v940_v33 = vsel %vm930_vm5, %v5254_v49, %v5983_v52  ;;  %v10792_v44 = vsub.f32 1.0, %v10671_v11  ;;  %v10794_v52 = vld [vmem:[#allocation7_spill] sm:$0xff] }
 0x108   :  { %v795_v45 = vpop.permute.xlu0 %794  ;;  %v801_v51 = vpop.permute.xlu1 %800  ;;  %v941_v13 = vsel %vm930_vm5, %v10794_v52, %v6002_v48  ;;  %v943_v48 = vsel %vm930_vm5, %v5342_v15, %v6026_v60 }
 0x109   :  { %v984_v39 = vsel %vm10296_vm6, %v935_v9, %v795_v45  ;;  %1907 = vadd.xlane.f32.xlu0 %v1906_v20  ;;  %v987_v5 = vsel %vm10296_vm6, %v938_v2, %v801_v51  ;;  %v10793_v9 = vld [vmem:[#allocation115_spill] sm:$0xff]  ;;  %v10795_v45 = vsub.f32 1.0, %v10677_v50  ;;  %v10796_v2 = vsub.f32 1.0, %v10679_v27 }
 0x10a   :  { %4887 = vmatprep.mubr.msk.f32.mxu0 %vm1037_vm7, %v984_v39  ;;  %v942_v49 = vsel %vm930_vm5, %v5286_v12, %v10793_v9  ;;  %v944_v12 = vsel %vm930_vm5, %v5311_v42, %v6011_v38  ;;  %v10798_v38 = vld [vmem:[#allocation124_spill] sm:$0xff] }
 0x10b   :  { %4888 = vmatmul.mubr.msk.f32.gmra.mxu0 %vm1037_vm7, %v985_v43  ;;  %1963 = vperm.xlu1 %5020, %v10791_v16  }
 0x10c   :  { %v799_v57 = vpop.permute.xlu0 %798  ;;  %v805_v55 = vpop.permute.xlu1 %804 }
 0x10d   :  { %v986_v47 = vsel %vm10296_vm6, %v937_v19, %v799_v57  ;;  %v989_v7 = vsel %vm10296_vm6, %v940_v33, %v805_v55  ;;  %v10799_v57 = vld [vmem:[#allocation14_spill] sm:$0xff] }
 0x10e   :  { %4890 = vmatprep.mubr.msk.f32.mxu0 %vm1037_vm7, %v986_v47  ;;  %v945_v15 = vsel %vm930_vm5, %v10799_v57, %v10798_v38  ;;  %v10800_v47 = vsub.f32 1.0, %v10686_v1 }
 0x10f   :  { %4891 = vmatmul.mubr.msk.f32.gmra.mxu0 %vm1037_vm7, %v987_v5  ;;  %1968 = vperm.xlu1 %5020, %v10792_v44   ;;  %v10797_v5 = vld [vmem:[#allocation18_spill] sm:$0xff]  ;;  %v10804_v44 = vld [vmem:[#allocation20_spill] sm:$0xff] }
 0x110   :  { %v803_v4 = vpop.permute.xlu0 %802  ;;  %v809_v8 = vpop.permute.xlu1 %808  ;;  %v946_v42 = vsel %vm930_vm5, %v10797_v5, %v6067_v14 }
 0x111   :  { %v988_v10 = vsel %vm10296_vm6, %v939_v46, %v803_v4  ;;  %v991_v34 = vsel %vm10296_vm6, %v942_v49, %v809_v8  ;;  %v10801_v46 = vld [vmem:[#allocation129_spill] sm:$0xff]  ;;  %v10803_v4 = vld [vmem:[#allocation131_spill] sm:$0xff]  ;;  %v10805_v49 = vld [vmem:[#allocation24_spill] sm:$0xff] }
 0x112   :  { %4893 = vmatprep.mubr.msk.f32.mxu0 %vm1037_vm7, %v988_v10  ;;  %v947_v10 = vsel %vm930_vm5, %v10804_v44, %v10803_v4  ;;  %v10806_v52 = vsub.f32 1.0, %v10805_v49  ;;  %v10822_v44 = vld [vmem:[#allocation42_spill] sm:$0xff] }
 0x113   :  { %4894 = vmatmul.mubr.msk.f32.gmra.mxu0 %vm1037_vm7, %v989_v7  ;;  %1973 = vperm.xlu1 %5020, %v10795_v45   ;;  %v10802_v7 = vld [vmem:[#allocation23_spill] sm:$0xff] }
 0x114   :  { %v807_v43 = vpop.permute.xlu0 %806  ;;  %v813_v20 = vpop.permute.xlu1 %812  ;;  %v948_v14 = vsel %vm930_vm5, %v10802_v7, %v10801_v46 }
 0x115   :  { %v990_v39 = vsel %vm10296_vm6, %v941_v13, %v807_v43  ;;  %v993_v51 = vsel %vm10296_vm6, %v944_v12, %v813_v20  ;;  %v10807_v13 = vld [vmem:[#allocation10_spill] sm:$0xff]  ;;  %v10810_v20 = vld [vmem:[#allocation28_spill] sm:$0xff] }
 0x116   :  { %4896 = vmatprep.mubr.msk.f32.mxu0 %vm1037_vm7, %v990_v39  ;;  %v10809_v39 = vld [vmem:[#allocation137_spill] sm:$0xff]  ;;  %vm1723_vm15 = vcmp.gt.f32.partialorder %v10807_v13, 0.5 }
 0x117   :  { %4897 = vmatmul.mubr.msk.f32.gmra.mxu0 %vm1037_vm7, %v991_v34  ;;  %1978 = vperm.xlu1 %5020, %v10796_v2   ;;  %v10808_v34 = vsub.f32 1.0, %v10807_v13  ;;  %v950_v12 = vsel %vm930_vm5, %v10810_v20, %v10809_v39  ;;  %v10827_v39 = vld [vmem:[#allocation34_spill] sm:$0xff] }
 0x118   :  { %v811_v23 = vpop.permute.xlu0 %810  ;;  %v817_v19 = vpop.permute.xlu1 %816 }
 0x119   :  { %v992_v18 = vsel %vm10296_vm6, %v943_v48, %v811_v23  ;;  %v995_v60 = vsel %vm10296_vm6, %v946_v42, %v817_v19  ;;  %v10811_v48 = vld [vmem:[#allocation139_spill] sm:$0xff]  ;;  %v10813_v19 = vld [vmem:[#allocation21_spill] sm:$0xff]  ;;  %v10815_v42 = vsub.f32 1.0, %v10712_v30 }
 0x11a   :  { %4899 = vmatprep.mubr.msk.f32.mxu0 %vm1037_vm7, %v992_v18  ;;  %v10814_v5 = vsub.f32 1.0, %v10813_v19 }
 0x11b   :  { %4900 = vmatmul.mubr.msk.f32.gmra.mxu0 %vm1037_vm7, %v993_v51  ;;  %1983 = vperm.xlu1 %5020, %v10800_v47   ;;  %v10812_v51 = vld [vmem:[#allocation32_spill] sm:$0xff]  ;;  %v10818_v47 = vld [vmem:[#allocation141_spill] sm:$0xff] }
 0x11c   :  { %v815_v16 = vpop.permute.xlu0 %814  ;;  %v821_v33 = vpop.permute.xlu1 %820  ;;  %v949_v23 = vsel %vm930_vm5, %v10812_v51, %v10811_v48  ;;  %v10828_v51 = vld [vmem:[#allocation26_spill] sm:$0xff] }
 0x11d   :  { %v994_v55 = vsel %vm10296_vm6, %v945_v15, %v815_v16  ;;  %v997_v8 = vsel %vm10296_vm6, %v948_v14, %v821_v33  ;;  %v10816_v15 = vld [vmem:[#allocation41_spill] sm:$0xff] }
 0x11e   :  { %4902 = vmatprep.mubr.msk.f32.mxu0 %vm1037_vm7, %v994_v55  ;;  %v10819_v55 = vld [vmem:[#allocation29_spill] sm:$0xff] }
 0x11f   :  { %4903 = vmatmul.mubr.msk.f32.gmra.mxu0 %vm1037_vm7, %v995_v60  ;;  %1988 = vperm.xlu1 %5020, %v10806_v52   ;;  %v10817_v60 = vld [vmem:[#allocation33_spill] sm:$0xff]  ;;  %v951_v33 = vsel %vm930_vm5, %v10819_v55, %v10818_v47 }
 0x120   :  { %v819_v9 = vpop.permute.xlu0 %818  ;;  %1958 = vperm.xlu0 %5021, %v10808_v34   ;;  %v825_v45 = vpop.permute.xlu1 %824  ;;  %v952_v16 = vsel %vm930_vm5, %v10817_v60, %v10816_v15  ;;  %v10820_v14 = vld [vmem:[#allocation25_spill] sm:$0xff]  ;;  %v10825_v34 = vld [vmem:[#allocation40_spill] sm:$0xff] }
 0x121   :  { %v996_v43 = vsel %vm10296_vm6, %v947_v10, %v819_v9  ;;  %v999_v2 = vsel %vm10296_vm6, %v950_v12, %v825_v45  ;;  %v10821_v4 = vsub.f32 1.0, %v10820_v14  ;;  %v10823_v10 = vsub.f32 1.0, %v10822_v44  ;;  %v10824_v52 = vld [vmem:[#allocation5_spill] sm:$0xff]  ;;  %v10834_v60 = vld [vmem:[#allocation12_spill] sm:$0xff] }
 0x122   :  { %4905 = vmatprep.mubr.msk.f32.mxu0 %vm1037_vm7, %v996_v43  ;;  %v954_v43 = vsel %vm930_vm5, %v10825_v34, %v10824_v52  ;;  %v10826_v45 = vld [vmem:[#allocation9_spill] sm:$0xff]  ;;  %v10841_v34 = vld [vmem:[#allocation50_spill] sm:$0xff] }
 0x123   :  { %4906 = vmatmul.mubr.msk.f32.gmra.mxu0 %vm1037_vm7, %v997_v8  ;;  %1993 = vperm.xlu1 %5020, %v10814_v5   ;;  %v953_v20 = vsel %vm930_vm5, %v10827_v39, %v10826_v45  ;;  %v10840_v52 = vld [vmem:[#allocation17_spill] sm:$0xff]  ;;  %v10842_v45 = vld [vmem:[#allocation56_spill] sm:$0xff]  ;;  %v10843_v39 = vld [vmem:[#allocation46_spill] sm:$0xff] }
 0x124   :  { %v823_v18 = vpop.permute.xlu0 %822  ;;  %2018 = vperm.xlu0 %5021, %v10815_v42   ;;  %v829_v57 = vpop.permute.xlu1 %828 }
 0x125   :  { %v998_v38 = vsel %vm10296_vm6, %v949_v23, %v823_v18  ;;  %v1001_v46 = vsel %vm10296_vm6, %v952_v16, %v829_v57  ;;  %v10829_v23 = vsub.f32 1.0, %v10828_v51  ;;  %v10833_v57 = vld [vmem:[#allocation43_spill] sm:$0xff]  ;;  %v10835_v16 = vld [vmem:[#allocation48_spill] sm:$0xff] }
 0x126   :  { %4908 = vmatprep.mubr.msk.f32.mxu0 %vm1037_vm7, %v998_v38  ;;  %v10832_v38 = vld [vmem:[#allocation11_spill] sm:$0xff]  ;;  %v955_v47 = vsel %vm930_vm5, %v10835_v16, %v10834_v60  ;;  %v10849_v60 = vld [vmem:[#allocation57_spill] sm:$0xff] }
 0x127   :  { %4909 = vmatmul.mubr.msk.f32.gmra.mxu0 %vm1037_vm7, %v999_v2  ;;  %1998 = vperm.xlu1 %5020, %v10821_v4   ;;  %v10830_v2 = vld [vmem:[#allocation52_spill] sm:$0xff]  ;;  %v956_v15 = vsel %vm930_vm5, %v10833_v57, %v10832_v38  ;;  %v10838_v4 = vld [vmem:[#allocation58_spill] sm:$0xff] }
 0x128   :  { %v827_v7 = vpop.permute.xlu0 %826  ;;  %2028 = vperm.xlu0 %5021, %v10823_v10   ;;  %v833_v9 = vpop.permute.xlu1 %832  ;;  %v10831_v18 = vsub.f32 1.0, %v10830_v2  ;;  %v10839_v10 = vsub.f32 1.0, %v10838_v4 }
 0x129   :  { %v1000_v8 = vsel %vm10296_vm6, %v951_v33, %v827_v7  ;;  %v1003_v12 = vsel %vm10296_vm6, %v954_v43, %v833_v9  ;;  %v958_v43 = vsel %vm930_vm5, %v10841_v34, %v10840_v52  ;;  %v10854_v52 = vsub.f32 1.0, %v10752_v61 }
 0x12a   :  { %4911 = vmatprep.mubr.msk.f32.mxu0 %vm1037_vm7, %v1000_v8 }
 0x12b   :  { %4912 = vmatmul.mubr.msk.f32.gmra.mxu0 %vm1037_vm7, %v1001_v46  ;;  %2003 = vperm.xlu1 %5020, %v10829_v23   ;;  %v10836_v46 = vld [vmem:[#allocation35_spill] sm:$0xff]  ;;  %v10844_v23 = vld [vmem:[#allocation30_spill] sm:$0xff] }
 0x12c   :  { %v831_v48 = vpop.permute.xlu0 %830  ;;  %2038 = vperm.xlu0 %5021, %v10831_v18   ;;  %v837_v42 = vpop.permute.xlu1 %836  ;;  %v10837_v7 = vsub.f32 1.0, %v10836_v46  ;;  %v10845_v18 = vsub.f32 1.0, %v10844_v23 }
 0x12d   :  { %v1002_v5 = vsel %vm10296_vm6, %v953_v20, %v831_v48  ;;  %v1005_v55 = vsel %vm10296_vm6, %v956_v15, %v837_v42  ;;  %v957_v20 = vsel %vm930_vm5, %v10843_v39, %v10842_v45  ;;  %v10848_v15 = vld [vmem:[#allocation59_spill] sm:$0xff]  ;;  %v10855_v45 = vld [vmem:[#allocation72_spill] sm:$0xff] }
 0x12e   :  { %4914 = vmatprep.mubr.msk.f32.mxu0 %vm1037_vm7, %v1002_v5  ;;  %v10846_v5 = vld [vmem:[#allocation61_spill] sm:$0xff]  ;;  %v960_v16 = vsel %vm930_vm5, %v10849_v60, %v10848_v15  ;;  %v10856_v39 = vld [vmem:[#allocation60_spill] sm:$0xff]  ;;  %v10861_v60 = vsub.f32 1.0, %v10756_v35 }
 0x12f   :  { %4915 = vmatmul.mubr.msk.f32.gmra.mxu0 %vm1037_vm7, %v1003_v12  ;;  %2008 = vperm.xlu1 %5020, %v10837_v7   ;;  %v10847_v42 = vsub.f32 1.0, %v10846_v5 }
 0x130   :  { %v835_v33 = vpop.permute.xlu0 %834  ;;  %2048 = vperm.xlu0 %5021, %v10839_v10   ;;  %v841_v9 = vpop.permute.xlu1 %840 }
 0x131   :  { %v1004_v8 = vsel %vm10296_vm6, %v955_v47, %v835_v33  ;;  %v1007_v12 = vsel %vm10296_vm6, %v958_v43, %v841_v9  ;;  %v10850_v47 = vld [vmem:[#allocation15_spill] sm:$0xff] }
 0x132   :  { %4917 = vmatprep.mubr.msk.f32.mxu0 %vm1037_vm7, %v1004_v8  ;;  %v10852_v8 = vld [vmem:[#allocation37_spill] sm:$0xff] }
 0x133   :  { %4918 = vmatmul.mubr.msk.f32.gmra.mxu0 %vm1037_vm7, %v1005_v55  ;;  %2013 = vperm.xlu1 %5020, %v10845_v18   ;;  %v10851_v55 = vld [vmem:[#allocation51_spill] sm:$0xff]  ;;  %v10853_v9 = vsub.f32 1.0, %v10852_v8 }
 0x134   :  { %v839_v48 = vpop.permute.xlu0 %838  ;;  %2058 = vperm.xlu0 %5021, %v10847_v42   ;;  %v845_v57 = vpop.permute.xlu1 %844  ;;  %v959_v33 = vsel %vm930_vm5, %v10851_v55, %v10850_v47  ;;  %v10862_v55 = vld [vmem:[#allocation39_spill] sm:$0xff] }
 0x135   :  { %v1006_v38 = vsel %vm10296_vm6, %v957_v20, %v839_v48  ;;  %v1009_v7 = vsel %vm10296_vm6, %v960_v16, %v845_v57  ;;  %v962_v20 = vsel %vm930_vm5, %v10856_v39, %v10855_v45  ;;  %v10858_v48 = vld [vmem:[#allocation67_spill] sm:$0xff]  ;;  %v10859_v57 = vld [vmem:[#allocation44_spill] sm:$0xff] }
 0x136   :  { %4920 = vmatprep.mubr.msk.f32.mxu0 %vm1037_vm7, %v1006_v38  ;;  %v10860_v15 = vsub.f32 1.0, %v10859_v57  ;;  %v10866_v45 = vld [vmem:[#allocation47_spill] sm:$0xff] }
 0x137   :  { %4921 = vmatmul.mubr.msk.f32.gmra.mxu0 %vm1037_vm7, %v1007_v12  ;;  %2023 = vperm.xlu1 %5020, %v10853_v9   ;;  %v10857_v12 = vld [vmem:[#allocation77_spill] sm:$0xff]  ;;  %v10865_v9 = vld [vmem:[#allocation64_spill] sm:$0xff]  ;;  %v10867_v39 = vsub.f32 1.0, %v10866_v45 }
 0x138   :  { %v843_v10 = vpop.permute.xlu0 %842  ;;  %2068 = vperm.xlu0 %5021, %v10854_v52   ;;  %v849_v43 = vpop.permute.xlu1 %848  ;;  %v961_v18 = vsel %vm930_vm5, %v10858_v48, %v10857_v12 }
 0x139   :  { %v1008_v34 = vsel %vm10296_vm6, %v959_v33, %v843_v10  ;;  %v1011_v42 = vsel %vm10296_vm6, %v962_v20, %v849_v43  ;;  %v10863_v33 = vld [vmem:[#allocation68_spill] sm:$0xff]  ;;  %v10868_v20 = vsub.f32 1.0, %v10758_v37 }
 0x13a   :  { %4923 = vmatprep.mubr.msk.f32.mxu0 %vm1037_vm7, %v1008_v34  ;;  %v10864_v10 = vld [vmem:[#allocation92_spill] sm:$0xff] }
 0x13b   :  { %4924 = vmatmul.mubr.msk.f32.gmra.mxu0 %vm1037_vm7, %v1009_v7  ;;  %2033 = vperm.xlu1 %5020, %v10860_v15   ;;  %v964_v7 = vsel %vm930_vm5, %v10863_v33, %v10862_v55  ;;  %v963_v52 = vsel %vm930_vm5, %v10865_v9, %v10864_v10  ;;  %v10871_v15 = vld [vmem:[#allocation142_spill] sm:$0xff]  ;;  %v10875_v10 = vsub.f32 1.0, %v10761_v58 }
 0x13c   :  { %v847_v38 = vpop.permute.xlu0 %846  ;;  %2078 = vperm.xlu0 %5021, %v10861_v60   ;;  %v853_v47 = vpop.permute.xlu1 %852  ;;  %v10872_v60 = vld [vmem:[#allocation69_spill] sm:$0xff]  ;;  %v10873_v33 = vld [vmem:[#allocation54_spill] sm:$0xff] }
 0x13d   :  { %v1010_v16 = vsel %vm10296_vm6, %v961_v18, %v847_v38  ;;  %v1013_v34 = vsel %vm10296_vm6, %v964_v7, %v853_v47  ;;  %v10869_v18 = vld [vmem:[#allocation97_spill] sm:$0xff]  ;;  %v10874_v7 = vsub.f32 1.0, %v10873_v33 }
 0x13e   :  { %4926 = vmatprep.mubr.msk.f32.mxu0 %vm1037_vm7, %v1010_v16  ;;  %v965_v16 = vsel %vm930_vm5, %v10872_v60, %v10871_v15 }
 0x13f   :  { %4927 = vmatmul.mubr.msk.f32.gmra.mxu0 %vm1037_vm7, %v1011_v42  ;;  %2043 = vperm.xlu1 %5020, %v10867_v39   ;;  %v10870_v42 = vld [vmem:[#allocation76_spill] sm:$0xff] }
 0x140   :  { %v851_v43 = vpop.permute.xlu0 %850  ;;  %2088 = vperm.xlu0 %5021, %v10868_v20   ;;  %v857_v48 = vpop.permute.xlu1 %856  ;;  %v966_v38 = vsel %vm930_vm5, %v10870_v42, %v10869_v18  ;;  %v10877_v39 = vld [vmem:[#allocation84_spill] sm:$0xff]  ;;  %v10878_v18 = vsub.f32 1.0, %v10749_v28  ;;  %v10879_v42 = vsub.f32 1.0, %v10766_v36 }
 0x141   :  { %v1012_v12 = vsel %vm10296_vm6, %v963_v52, %v851_v43  ;;  %v1015_v47 = vsel %vm10296_vm6, %v966_v38, %v857_v48  ;;  %v967_v20 = vsel %vm930_vm5, %v10877_v39, %v6479_v63  ;;  %v10881_v63 = vld [vmem:[#allocation82_spill] sm:$0xff]  ;;  %v10887_v39 = vld [vmem:[#allocation87_spill] sm:$0xff] }
 0x142   :  { %4929 = vmatprep.mubr.msk.f32.mxu0 %vm1037_vm7, %v1012_v12 }
 0x143   :  { %4930 = vmatmul.mubr.msk.f32.gmra.mxu0 %vm1037_vm7, %v1013_v34  ;;  %2053 = vperm.xlu1 %5020, %v10874_v7   ;;  %v10876_v34 = vld [vmem:[#allocation79_spill] sm:$0xff]  ;;  %v10882_v7 = vsub.f32 1.0, %v10755_v3 }
 0x144   :  { %v855_v55 = vpop.permute.xlu0 %854  ;;  %2098 = vperm.xlu0 %5021, %v10875_v10   ;;  %v861_v52 = vpop.permute.xlu1 %860  ;;  %v968_v43 = vsel %vm930_vm5, %v10876_v34, %v6470_v53  ;;  %v10880_v53 = vld [vmem:[#allocation86_spill] sm:$0xff]  ;;  %v10883_v10 = vsub.f32 1.0, %v10771_v32  ;;  %v10885_v34 = vld [vmem:[#allocation96_spill] sm:$0xff] }
 0x145   :  { %v1014_v9 = vsel %vm10296_vm6, %v965_v16, %v855_v55  ;;  %v1017_v12 = vsel %vm10296_vm6, %v968_v43, %v861_v52  ;;  %v970_v60 = vsel %vm930_vm5, %v10880_v53, %v6493_v22  ;;  %v969_v16 = vsel %vm930_vm5, %v10881_v63, %v6501_v26  ;;  %v10884_v22 = vld [vmem:[#allocation62_spill] sm:$0xff]  ;;  %v10892_v63 = vld [vmem:[#allocation100_spill] sm:$0xff] }
 0x146   :  { %4932 = vmatprep.mubr.msk.f32.mxu0 %vm1037_vm7, %v1014_v9  ;;  %v972_v43 = vsel %vm930_vm5, %v10885_v34, %v10884_v22  ;;  %v10886_v26 = vld [vmem:[#allocation110_spill] sm:$0xff]  ;;  %v10897_v34 = vsub.f32 1.0, %v6250_v56 }
 0x147   :  { %4933 = vmatmul.mubr.msk.f32.gmra.mxu0 %vm1037_vm7, %v1015_v47  ;;  %2063 = vperm.xlu1 %5020, %v10878_v18   ;;  %v10888_v18 = vld [vmem:[#allocation73_spill] sm:$0xff] }
 0x148   :  { %v859_v48 = vpop.permute.xlu0 %858  ;;  %2108 = vperm.xlu0 %5021, %v10879_v42   ;;  %v865_v15 = vpop.permute.xlu1 %864  ;;  %v10889_v42 = vsub.f32 1.0, %v10888_v18 }
 0x149   :  { %v1016_v38 = vsel %vm10296_vm6, %v967_v20, %v859_v48  ;;  %v1019_v47 = vsel %vm10296_vm6, %v970_v60, %v865_v15  ;;  %v971_v20 = vsel %vm930_vm5, %v10887_v39, %v10886_v26  ;;  %v10891_v60 = vld [vmem:[#allocation70_spill] sm:$0xff]  ;;  %v10898_v39 = vld [vmem:[#allocation107_spill] sm:$0xff] }
 0x14a   :  { %4935 = vmatprep.mubr.msk.f32.mxu0 %vm1037_vm7, %v1016_v38  ;;  %v10890_v38 = vsub.f32 1.0, %v6228_v40 }
 0x14b   :  { %4936 = vmatmul.mubr.msk.f32.gmra.mxu0 %vm1037_vm7, %v1017_v12  ;;  %2073 = vperm.xlu1 %5020, %v10882_v7  }
 0x14c   :  { %v863_v55 = vpop.permute.xlu0 %862  ;;  %2118 = vperm.xlu0 %5021, %v10883_v10   ;;  %v869_v52 = vpop.permute.xlu1 %868 }
 0x14d   :  { %v1018_v9 = vsel %vm10296_vm6, %v969_v16, %v863_v55  ;;  %v1021_v12 = vsel %vm10296_vm6, %v972_v43, %v869_v52  ;;  %v974_v16 = vsel %vm930_vm5, %v10892_v63, %v10891_v60  ;;  %v10894_v55 = vld [vmem:[#allocation106_spill] sm:$0xff]  ;;  %v10895_v52 = vld [vmem:[#allocation80_spill] sm:$0xff] }
 0x14e   :  { %4938 = vmatprep.mubr.msk.f32.mxu0 %vm1037_vm7, %v1018_v9  ;;  %v10896_v22 = vsub.f32 1.0, %v10895_v52 }
 0x14f   :  { %4939 = vmatmul.mubr.msk.f32.gmra.mxu0 %vm1037_vm7, %v1019_v47  ;;  %2083 = vperm.xlu1 %5020, %v10889_v42   ;;  %v10893_v47 = vld [vmem:[#allocation65_spill] sm:$0xff] }
 0x150   :  { %v867_v48 = vpop.permute.xlu0 %866  ;;  %2128 = vperm.xlu0 %5021, %v10890_v38   ;;  %v873_v53 = vpop.permute.xlu1 %872  ;;  %v973_v7 = vsel %vm930_vm5, %v10894_v55, %v10893_v47  ;;  %v10904_v55 = vld [vmem:[#allocation111_spill] sm:$0xff] }
 0x151   :  { %v1020_v15 = vsel %vm10296_vm6, %v971_v20, %v867_v48  ;;  %v1023_v10 = vsel %vm10296_vm6, %v974_v16, %v873_v53  ;;  %v976_v20 = vsel %vm930_vm5, %v10898_v39, %v6542_v54  ;;  %v10900_v48 = vld [vmem:[#allocation101_spill] sm:$0xff]  ;;  %v10901_v53 = vld [vmem:[#allocation83_spill] sm:$0xff]  ;;  %v10903_v16 = vmov 0   ;;  %v10909_v39 = vld [vmem:[#allocation134_spill] sm:$0xff] }
 0x152   :  { %4941 = vmatprep.mubr.msk.f32.mxu1 %vm1037_vm7, %v1020_v15  ;;  %v975_v42 = vsel %vm930_vm5, %v10900_v48, %v6550_v29  ;;  %v10902_v60 = vsub.f32 1.0, %v10901_v53  ;;  %v978_v29 = vsel %vm930_vm5, %v10904_v55, %v6556_v59  ;;  %vm1719_vm13 = vcmp.gt.f32.partialorder %v10909_v39, 0.5  ;;  %v10912_v48 = vld [vmem:[#allocation140_spill] sm:$0xff] }
 0x153   :  { %4942 = vmatmul.mubr.msk.f32.vlgmr.msra.gmra.mxu1 %vm1037_vm7, %v1021_v12  ;;  %2093 = vperm.xlu1 %5020, %v10896_v22   ;;  %v10899_v12 = vld [vmem:[#allocation135_spill] sm:$0xff]  ;;  %v2318_v13 = vsel %vm1725_vm10, 1, %v10903_v16  ;;  %v2320_v11 = vsel %vm1727_vm2, 1, %v10903_v16  ;;  %vm1737_vm10 = vcmp.gt.f32.partialorder %v10822_v44, 0.5  ;;  %vm1739_vm2 = vcmp.gt.f32.partialorder %v10830_v2, 0.5 }
 0x154   :  { %v871_v9 = vpop.permute.xlu0 %870  ;;  %2138 = vperm.xlu0 %5021, %v10897_v34   ;;  %v877_v26 = vpop.permute.xlu1 %876  ;;  %vm1715_vm8 = vcmp.gt.f32.partialorder %v10899_v12, 0.5  ;;  %v10907_v34 = vld [vmem:[#allocation91_spill] sm:$0xff] }
 0x155   :  { %v1022_v43 = vsel %vm10296_vm6, %v973_v7, %v871_v9  ;;  %v1025_v38 = vsel %vm10296_vm6, %v976_v20, %v877_v26  ;;  %v2308_v47 = vsel %vm1715_vm8, 1, %v10903_v16  ;;  %v10905_v7 = vld [vmem:[#allocation132_spill] sm:$0xff]  ;;  %v10910_v20 = vld [vmem:[#allocation103_spill] sm:$0xff]  ;;  %vm1731_vm8 = vcmp.gt.f32.partialorder %v10820_v14, 0.5 }
 0x156   :  { %4944 = vmatprep.mubr.msk.f32.mxu1 %vm1037_vm7, %v1022_v43  ;;  %vm1717_vm11 = vcmp.gt.f32.partialorder %v10905_v7, 0.5  ;;  %v10908_v43 = vsub.f32 1.0, %v10907_v34  ;;  %v10911_v12 = vsub.f32 1.0, %v10910_v20 }
 0x157   :  { %4945 = vmatmul.mubr.msk.f32.gmra.mxu1 %vm1037_vm7, %v1023_v10  ;;  %2103 = vperm.xlu1 %5020, %v10902_v60   ;;  %v10906_v10 = vld [vmem:[#allocation108_spill] sm:$0xff]  ;;  %v2310_v59 = vsel %vm1717_vm11, 1, %v10903_v16  ;;  %v10914_v60 = vsub.f32 1.0, %v6255_v25  ;;  %vm1724_vm11 = vcmp.gt.f32.partialorder %v10668_v6, 0.5 }
 0x158   :  { %v875_v15 = vpop.permute.xlu0 %874  ;;  %2148 = vperm.xlu0 %5021, %v1809_v21   ;;  %v881_v54 = vpop.permute.xlu1 %880  ;;  %v977_v9 = vsel %vm930_vm5, %v10906_v10, %v6564_v0  ;;  %v2312_v0 = vsel %vm1719_vm13, 1, %v10903_v16  ;;  %vm1729_vm5 = vcmp.gt.f32.partialorder %v10805_v49, 0.5  ;;  %vm1733_vm13 = vcmp.gt.f32.partialorder %v10836_v46, 0.5 }
 0x159   :  { %v1024_v63 = vsel %vm10296_vm6, %v975_v42, %v875_v15  ;;  %v1027_v21 = vsel %vm10296_vm6, %v978_v29, %v881_v54  ;;  %v10913_v42 = vsub.f32 1.0, %v10912_v48  ;;  %v10916_v29 = vld [vmem:[#allocation133_spill] sm:$0xff]  ;;  %v2317_v49 = vsel %vm1724_vm11, 1, %v10903_v16 }
 0x15a   :  { %4947 = vmatprep.mubr.msk.f32.mxu1 %vm1037_vm7, %v1024_v63  ;;  %v2316_v63 = vsel %vm1723_vm15, 1, %v10903_v16  ;;  %vm1718_vm0 = vcmp.gt.f32.partialorder %v10916_v29, 0.5  ;;  %vm1735_vm15 = vcmp.gt.f32.partialorder %v10712_v30, 0.5  ;;  %vm1736_vm11 = vcmp.gt.f32.partialorder %v10852_v8, 0.5 }
 0x15b   :  { %4948 = vmatmul.mubr.msk.f32.gmra.mxu1 %vm1037_vm7, %v1025_v38  ;;  %2113 = vperm.xlu1 %5020, %v10908_v43   ;;  %v2314_v38 = vsel %vm1721_vm14, 1, %v10903_v16  ;;  %v2311_v7 = vsel %vm1718_vm0, 1, %v10903_v16  ;;  %v2324_v43 = vsel %vm1731_vm8, 1, %v10903_v16  ;;  %vm1726_vm14 = vcmp.gt.f32.partialorder %v10677_v50, 0.5 }
 0x15c   :  { %v879_v22 = vpop.permute.xlu0 %878  ;;  %2357 = vperm.xlu0 %5021, %v2308_v47   ;;  %v10915_v47 = vld [vmem:[#allocation136_spill] sm:$0xff]  ;;  %v2319_v14 = vsel %vm1726_vm14, 1, %v10903_v16  ;;  %v2328_v6 = vsel %vm1735_vm15, 1, %v10903_v16  ;;  %v2330_v50 = vsel %vm1737_vm10, 1, %v10903_v16  ;;  %vm1730_vm0 = vcmp.gt.f32.partialorder %v10813_v19, 0.5 }
 0x15d   :  { %v1026_v26 = vsel %vm10296_vm6, %v977_v9, %v879_v22  ;;  %vm1716_vm9 = vcmp.gt.f32.partialorder %v10915_v47, 0.5  ;;  %vm1743_vm8 = vcmp.gt.f32.partialorder %v10846_v5, 0.5  ;;  %vm1738_vm14 = vcmp.gt.f32.partialorder %v10859_v57, 0.5 }
 0x15e   :  { %4950 = vmatprep.mubr.msk.f32.mxu1 %vm1037_vm7, %v1026_v26  ;;  %v2309_v62 = vsel %vm1716_vm9, 1, %v10903_v16  ;;  %vm1728_vm9 = vcmp.gt.f32.partialorder %v10686_v1, 0.5  ;;  %v2332_v1 = vsel %vm1739_vm2, 1, %v10903_v16  ;;  %vm1747_vm15 = vcmp.gt.f32.partialorder %v10756_v35, 0.5 }
 0x15f   :  { %4951 = vmatmul.mubr.msk.f32.gmra.mxu1 %vm1037_vm7, %v1027_v21  ;;  %2123 = vperm.xlu1 %5020, %v10911_v12   ;;  %v2322_v21 = vsel %vm1729_vm5, 1, %v10903_v16  ;;  %vm1722_vm7 = vcmp.gt.f32.partialorder %v10663_v17, 0.5  ;;  %v2326_v17 = vsel %vm1733_vm13, 1, %v10903_v16  ;;  %v2321_v46 = vsel %vm1728_vm9, 1, %v10903_v16 }
 0x160   :  { %2363 = vperm.xlu0 %5021, %v2310_v59   ;;  %v2315_v27 = vsel %vm1722_vm7, 1, %v10903_v16  ;;  %v2323_v12 = vsel %vm1730_vm0, 1, %v10903_v16  ;;  %vm1741_vm5 = vcmp.gt.f32.partialorder %v10838_v4, 0.5  ;;  %vm1734_vm7 = vcmp.gt.f32.partialorder %v10844_v23, 0.5 }
 0x161   :  { %vm1745_vm13 = vcmp.gt.f32.partialorder %v10752_v61, 0.5  ;;  %v2331_v8 = vsel %vm1738_vm14, 1, %v10903_v16  ;;  %vm1740_vm9 = vcmp.gt.f32.partialorder %v10866_v45, 0.5  ;;  %vm1749_vm10 = vcmp.gt.f32.partialorder %v10758_v37, 0.5 }
 0x162   :  { %v2338_v5 = vsel %vm1745_vm13, 1, %v10903_v16  ;;  %v2333_v35 = vsel %vm1740_vm9, 1, %v10903_v16  ;;  %vm1742_vm0 = vcmp.gt.f32.partialorder %v10873_v33, 0.5  ;;  %vm1751_vm2 = vcmp.gt.f32.partialorder %v10761_v58, 0.5 }
 0x163   :  { %2133 = vperm.xlu1 %5020, %v10913_v42   ;;  %v2336_v42 = vsel %vm1743_vm8, 1, %v10903_v16  ;;  %v2335_v37 = vsel %vm1742_vm0, 1, %v10903_v16  ;;  %vm1755_vm8 = vcmp.gt.f32.partialorder %v10771_v32, 0.5  ;;  %vm1757_vm13 = vcmp.gt.f32.partialorder %v6228_v40, 0.5 }
 0x164   :  { %2369 = vperm.xlu0 %5021, %v2312_v0   ;;  %v2334_v0 = vsel %vm1741_vm5, 1, %v10903_v16  ;;  %vm1753_vm5 = vcmp.gt.f32.partialorder %v10766_v36, 0.5  ;;  %v2348_v36 = vsel %vm1755_vm8, 1, %v10903_v16  ;;  %v2350_v32 = vsel %vm1757_vm13, 1, %v10903_v16 }
 0x165   :  { %v6918_v15 = vpop.permute.xlu1 %1918  ;;  %vm1750_vm14 = vcmp.gt.f32.partialorder %v10895_v52, 0.5  ;;  %vm1752_vm9 = vcmp.gt.f32.partialorder %v10901_v53, 0.5  ;;  %vm1754_vm0 = vcmp.gt.f32.partialorder %v10907_v34, 0.5  ;;  %v7062_v34 = vld [vmem:[%s10035_s2] ss:$0 sm:$0xff] }
 0x166   :  { %v2345_v52 = vsel %vm1752_vm9, 1, %v10903_v16 }
 0x167   :  { %2143 = vperm.xlu1 %5020, %v10914_v60   ;;  %v2329_v60 = vsel %vm1736_vm11, 1, %v10903_v16  ;;  %vm1748_vm11 = vcmp.gt.f32.partialorder %v10888_v18, 0.5  ;;  %v2343_v18 = vsel %vm1750_vm14, 1, %v10903_v16 }
 0x168   :  { %2375 = vperm.xlu0 %5021, %v2314_v38  }
 0x169   :  { %v6924_v54 = vpop.permute.xlu1 %1923 }
 0x16b   :  { %2153 = vperm.xlu1 %5020, %v1810_v24   ;;  %v10917_v24 = vld [vmem:[#allocation138_spill] sm:$0xff] }
 0x16c   :  { %2381 = vperm.xlu0 %5021, %v2316_v63   ;;  %vm1720_vm4 = vcmp.gt.f32.partialorder %v10917_v24, 0.5 }
 0x16d   :  { %v6932_v55 = vpop.permute.xlu1 %1928  ;;  %v2313_v9 = vsel %vm1720_vm4, 1, %v10903_v16  ;;  %vm1732_vm4 = vcmp.gt.f32.partialorder %v10828_v51, 0.5  ;;  %v2327_v51 = vsel %vm1734_vm7, 1, %v10903_v16  ;;  %vm1746_vm7 = vcmp.gt.f32.partialorder %v10755_v3, 0.5 }
 0x16e   :  { %v2325_v19 = vsel %vm1732_vm4, 1, %v10903_v16  ;;  %vm1744_vm4 = vcmp.gt.f32.partialorder %v10749_v28, 0.5  ;;  %v2339_v28 = vsel %vm1746_vm7, 1, %v10903_v16  ;;  %v2341_v3 = vsel %vm1748_vm11, 1, %v10903_v16 }
 0x16f   :  { %2360 = vperm.xlu1 %5020, %v2309_v62   ;;  %v2340_v62 = vsel %vm1747_vm15, 1, %v10903_v16  ;;  %v2337_v58 = vsel %vm1744_vm4, 1, %v10903_v16  ;;  %vm1759_vm15 = vcmp.gt.f32.partialorder %v6250_v56, 0.5  ;;  %vm1758_vm4 = vcmp.gt.f32.partialorder %v10912_v48, 0.5 }
 0x170   :  { %2387 = vperm.xlu0 %5021, %v2318_v13   ;;  %v2352_v40 = vsel %vm1759_vm15, 1, %v10903_v16  ;;  %vm1762_vm7 = vcmp.gt.f32.partialorder %v6274_v31, 0.5 }
 0x172   :  { %v6938_v10 = vpop.permute.xlu1 %1933 }
 0x173   :  { %2366 = vperm.xlu1 %5020, %v2311_v7  }
 0x174   :  { %2393 = vperm.xlu0 %5021, %v2320_v11   ;;  %v2342_v11 = vsel %vm1749_vm10, 1, %v10903_v16  ;;  %vm1761_vm10 = vcmp.gt.f32.partialorder %v6271_v41, 0.5 }
 0x175   :  { %v2354_v56 = vsel %vm1761_vm10, 1, %v10903_v16 }
 0x176   :  { %v6944_v22 = vpop.permute.xlu1 %1938 }
 0x177   :  { %2372 = vperm.xlu1 %5020, %v2313_v9  }
 0x178   :  { %2399 = vperm.xlu0 %5021, %v2322_v21   ;;  %v2344_v21 = vsel %vm1751_vm2, 1, %v10903_v16  ;;  %vm1756_vm2 = vcmp.gt.f32.partialorder %v10910_v20, 0.5 }
 0x179   :  { %v2349_v53 = vsel %vm1756_vm2, 1, %v10903_v16 }
 0x17a   :  { %v6950_v26 = vpop.permute.xlu1 %1943 }
 0x17b   :  { %2378 = vperm.xlu1 %5020, %v2315_v27   ;;  %v2346_v27 = vsel %vm1753_vm5, 1, %v10903_v16  ;;  %vm1760_vm5 = vcmp.gt.f32.partialorder %v6255_v25, 0.5 }
 0x17c   :  { %2405 = vperm.xlu0 %5021, %v2324_v43  }
 0x17e   :  { %v6956_v59 = vpop.permute.xlu1 %1948 }
 0x17f   :  { %2384 = vperm.xlu1 %5020, %v2317_v49  }
 0x180   :  { %2411 = vperm.xlu0 %5021, %v2326_v17  }
 0x182   :  { %v6962_v39 = vpop.permute.xlu1 %1953 }
 0x183   :  { %2390 = vperm.xlu1 %5020, %v2319_v14  }
 0x184   :  { %2417 = vperm.xlu0 %5021, %v2328_v6  }
 0x186   :  { %v6969_v30 = vpop.permute.xlu1 %1963 }
 0x187   :  { %2396 = vperm.xlu1 %5020, %v2321_v46  }
 0x188   :  { %2423 = vperm.xlu0 %5021, %v2330_v50   ;;  %v2347_v50 = vsel %vm1754_vm0, 1, %v10903_v16 }
 0x18a   :  { %v6975_v44 = vpop.permute.xlu1 %1968 }
 0x18b   :  { %2402 = vperm.xlu1 %5020, %v2323_v12  }
 0x18c   :  { %2429 = vperm.xlu0 %5021, %v2332_v1  }
 0x18e   :  { %v6981_v2 = vpop.permute.xlu1 %1973 }
 0x18f   :  { %2408 = vperm.xlu1 %5020, %v2325_v19   ;;  %v2351_v19 = vsel %vm1758_vm4, 1, %v10903_v16 }
 0x190   :  { %2435 = vperm.xlu0 %5021, %v2334_v0  }
 0x192   :  { %v6987_v4 = vpop.permute.xlu1 %1978  ;;  %v1908_v38 = vpop.xlane.xlu0 %1907 }
 0x193   :  { %2414 = vperm.xlu1 %5020, %v2327_v51   ;;  %v1909_v23 = vrot.slane %v1908_v38, 4 }
 0x194   :  { %2441 = vperm.xlu0 %5021, %v2336_v42   ;;  %v2353_v42 = vsel %vm1760_vm5, 1, %v10903_v16 }
 0x195   :  { %v1910_v63 = vadd.f32 %v1909_v23, %v1908_v38 }
 0x196   :  { %v6993_v47 = vpop.permute.xlu1 %1983 }
 0x197   :  { %2420 = vperm.xlu1 %5020, %v2329_v60   ;;  %v1911_v61 = vrot.slane %v1910_v63, 2 }
 0x198   :  { %2447 = vperm.xlu0 %5021, %v2338_v5  }
 0x199   :  { %v1912_v13 = vadd.f32 %v1911_v61, %v1910_v63 }
 0x19a   :  { %v7002_v57 = vpop.permute.xlu1 %1988 }
 0x19b   :  { %v7000_v29 = vpop.permute.xlu0 %1958  ;;  %2426 = vperm.xlu1 %5020, %v2331_v8   ;;  %v1913_v7 = vrot.slane %v1912_v13, 1 }
 0x19c   :  { %2453 = vperm.xlu0 %5021, %v2340_v62   ;;  %v2355_v62 = vsel %vm1762_vm7, 1, %v10903_v16 }
 0x19d   :  { %v1914_v24 = vadd.f32 %v1913_v7, %v1912_v13 }
 0x19e   :  { %v7011_v9 = vpop.permute.xlu1 %1993 }
 0x19f   :  { %v7008_v45 = vpop.permute.xlu0 %2018  ;;  %2432 = vperm.xlu1 %5020, %v2333_v35   ;;  %5011 = vpush %v1914_v24 }
 0x1a0   :  { %2459 = vperm.xlu0 %5021, %v2342_v11  }
 0x1a2   :  { %v7022_v43 = vpop.permute.xlu1 %1998 }
 0x1a3   :  { %2438 = vperm.xlu1 %5020, %v2335_v37   ;;  %v7016_v33 = vpop.permute.xlu0 %2028 }
 0x1a4   :  { %2465 = vperm.xlu0 %5021, %v2344_v21  }
 0x1a6   :  { %v7031_v17 = vpop.permute.xlu1 %2003 }
 0x1a7   :  { %2444 = vperm.xlu1 %5020, %v2337_v58   ;;  %v7027_v49 = vpop.permute.xlu0 %2038 }
 0x1a8   :  { %2471 = vperm.xlu0 %5021, %v2346_v27  }
 0x1aa   :  { %v7042_v6 = vpop.permute.xlu1 %2008 }
 0x1ab   :  { %2450 = vperm.xlu1 %5020, %v2339_v28   ;;  %v7036_v14 = vpop.permute.xlu0 %2048 }
 0x1ac   :  { %2477 = vperm.xlu0 %5021, %v2348_v36  }
 0x1ae   :  { %v7050_v12 = vpop.permute.xlu1 %2013 }
 0x1af   :  { %2456 = vperm.xlu1 %5020, %v2341_v3   ;;  %v7047_v46 = vpop.permute.xlu0 %2058 }
 0x1b0   :  { %2483 = vperm.xlu0 %5021, %v2350_v32  }
 0x1b2   :  { %v7057_v1 = vpop.permute.xlu1 %2023 }
 0x1b3   :  { %2462 = vperm.xlu1 %5020, %v2343_v18   ;;  %v7053_v41 = vpop.permute.xlu0 %2068 }
 0x1b4   :  { %2489 = vperm.xlu0 %5021, %v2352_v40  }
 0x1b6   :  { %v7072_v38 = vpop.permute.xlu1 %2033 }
 0x1b7   :  { %2468 = vperm.xlu1 %5020, %v2345_v52   ;;  %v7066_v20 = vpop.permute.xlu0 %2078 }
 0x1b8   :  { %2495 = vperm.xlu0 %5021, %v2354_v56  }
 0x1ba   :  { %v7092_v7 = vpop.permute.xlu1 %2043 }
 0x1bb   :  { %2474 = vperm.xlu1 %5020, %v2347_v50   ;;  %v7085_v8 = vpop.permute.xlu0 %2088 }
 0x1be   :  { %v7116_v56 = vpop.permute.xlu1 %2053 }
 0x1bf   :  { %2480 = vperm.xlu1 %5020, %v2349_v53   ;;  %v7106_v28 = vpop.permute.xlu0 %2098 }
 0x1c3   :  { %v4883_v0 = vpop.f32.mrf.mxu0  ;;  %2486 = vperm.xlu1 %5020, %v2351_v19  }
 0x1c4   :  { %v7069_v51 = vadd.f32 %v4883_v0, %v7062_v34 }
 0x1c5   :  { %v1252_v48 = vpop.f32.mrf.mxu0 }
 0x1c6   :  { %v7075_v23 = vadd.f32 %v7062_v34, %v1252_v48  ;;  %v2157_v25 = vmul.f32 %v6924_v54, %v7069_v51 }
 0x1c7   :  { %v4886_v60 = vpop.f32.mrf.mxu0  ;;  %2492 = vperm.xlu1 %5020, %v2353_v42  }
 0x1c8   :  { %v2156_v5 = vmul.f32 %v6918_v15, %v7075_v23  ;;  %v7083_v63 = vadd.f32 %v4886_v60, %v7062_v34  ;;  %v2205_v54 = vsel %vm10296_vm6, %v2157_v25, 0.0  ;;  %v7130_v60 = vpop.permute.xlu0 %2108 }
 0x1c9   :  { %v1262_v61 = vpop.f32.mrf.mxu0 }
 0x1ca   :  { %v2204_v13 = vsel %vm10296_vm6, %v2156_v5, 0.0  ;;  %v7090_v31 = vadd.f32 %v7062_v34, %v1262_v61  ;;  %v2159_v15 = vmul.f32 %v6938_v10, %v7083_v63 }
 0x1cb   :  { %v4889_v35 = vpop.f32.mrf.mxu0  ;;  %2498 = vperm.xlu1 %5020, %v2355_v62   ;;  %v2206_v37 = vadd.f32 %v2205_v54, %v2204_v13  ;;  %v7136_v54 = vpop.permute.xlu1 %2063 }
 0x1cc   :  { %v2158_v11 = vmul.f32 %v6932_v55, %v7090_v31  ;;  %v7100_v24 = vadd.f32 %v4889_v35, %v7062_v34  ;;  %v2209_v10 = vsel %vm10296_vm6, %v2159_v15, 0.0 }
 0x1cd   :  { %v1272_v21 = vpop.f32.mrf.mxu0 }
 0x1ce   :  { %v2207_v58 = vsel %vm10296_vm6, %v2158_v11, 0.0  ;;  %v7104_v27 = vadd.f32 %v7062_v34, %v1272_v21  ;;  %v2161_v55 = vmul.f32 %v6950_v26, %v7100_v24 }
 0x1cf   :  { %v2208_v36 = vadd.f32 %v2207_v58, %v2206_v37  ;;  %v4892_v3 = vpop.f32.mrf.mxu0 }
 0x1d0   :  { %v2160_v32 = vmul.f32 %v6944_v22, %v7104_v27  ;;  %v7114_v18 = vadd.f32 %v4892_v3, %v7062_v34  ;;  %v2213_v48 = vsel %vm10296_vm6, %v2161_v55, 0.0  ;;  %v7150_v3 = vpop.permute.xlu0 %2118  ;;  %s5012_s2 = spop %5011 }
 0x1d1   :  { %v2210_v40 = vadd.f32 %v2209_v10, %v2208_v36  ;;  %v1282_v52 = vpop.f32.mrf.mxu0 }
 0x1d2   :  { %v2211_v50 = vsel %vm10296_vm6, %v2160_v32, 0.0  ;;  %v7120_v53 = vadd.f32 %v7062_v34, %v1282_v52  ;;  %v2163_v26 = vmul.f32 %v6962_v39, %v7114_v18 }
 0x1d3   :  { %v2212_v19 = vadd.f32 %v2211_v50, %v2210_v40  ;;  %v4895_v0 = vpop.f32.mrf.mxu0 }
 0x1d4   :  { %v2162_v22 = vmul.f32 %v6956_v59, %v7120_v53  ;;  %v7128_v42 = vadd.f32 %v4895_v0, %v7062_v34  ;;  %v2217_v39 = vsel %vm10296_vm6, %v2163_v26, 0.0 }
 0x1d5   :  { %v2214_v25 = vadd.f32 %v2213_v48, %v2212_v19  ;;  %v1292_v5 = vpop.f32.mrf.mxu0  ;;  %v7160_v19 = vpop.permute.xlu1 %2073 }
 0x1d6   :  { %10918 = vst [vmem:[#allocation75_spill] sm:$0xff] %v7128_v42  ;;  %v2215_v61 = vsel %vm10296_vm6, %v2162_v22, 0.0  ;;  %v7134_v62 = vadd.f32 %v7062_v34, %v1292_v5  ;;  %v2165_v59 = vmul.f32 %v6969_v30, %v7128_v42 }
 0x1d7   :  { %v2216_v13 = vadd.f32 %v2215_v61, %v2214_v25  ;;  %v4898_v35 = vpop.f32.mrf.mxu0  ;;  %v7174_v61 = vpop.permute.xlu0 %2128 }
 0x1d8   :  { %10919 = vst [vmem:[#allocation78_spill] sm:$0xff] %v7134_v62  ;;  %v2164_v15 = vmul.f32 %v7000_v29, %v7134_v62  ;;  %v7144_v11 = vadd.f32 %v4898_v35, %v7062_v34  ;;  %v2221_v32 = vsel %vm10296_vm6, %v2165_v59, 0.0  ;;  %v7554_v62 = vld [vmem:[%s10037_s4] ss:$0 sm:$0xff] }
 0x1d9   :  { %v2218_v37 = vadd.f32 %v2217_v39, %v2216_v13  ;;  %v1302_v21 = vpop.f32.mrf.mxu0  ;;  %11005 = vst [vmem:[#allocation76_spill] sm:$0xff] %v7554_v62 }
 0x1da   :  { %10920 = vst [vmem:[#allocation88_spill] sm:$0xff] %v7144_v11  ;;  %v2219_v58 = vsel %vm10296_vm6, %v2164_v15, 0.0  ;;  %v7148_v36 = vadd.f32 %v7062_v34, %v1302_v21  ;;  %v2167_v30 = vmul.f32 %v6981_v2, %v7144_v11  ;;  %v7180_v21 = vpop.permute.xlu1 %2083 }
 0x1db   :  { %v2220_v10 = vadd.f32 %v2219_v58, %v2218_v37  ;;  %v4901_v55 = vpop.f32.mrf.mxu0 }
 0x1dc   :  { %10921 = vst [vmem:[#allocation95_spill] sm:$0xff] %v7148_v36  ;;  %v2166_v29 = vmul.f32 %v6975_v44, %v7148_v36  ;;  %v7158_v40 = vadd.f32 %v4901_v55, %v7062_v34  ;;  %v2225_v25 = vsel %vm10296_vm6, %v2167_v30, 0.0 }
 0x1dd   :  { %v2222_v52 = vadd.f32 %v2221_v32, %v2220_v10  ;;  %v1312_v50 = vpop.f32.mrf.mxu0 }
 0x1de   :  { %10922 = vst [vmem:[#allocation102_spill] sm:$0xff] %v7158_v40  ;;  %v2223_v0 = vsel %vm10296_vm6, %v2166_v29, 0.0  ;;  %v7164_v48 = vadd.f32 %v7062_v34, %v1312_v50  ;;  %v2169_v2 = vmul.f32 %v6993_v47, %v7158_v40 }
 0x1df   :  { %v2224_v26 = vadd.f32 %v2223_v0, %v2222_v52  ;;  %v4904_v22 = vpop.f32.mrf.mxu0  ;;  %v7194_v52 = vpop.permute.xlu0 %2138 }
 0x1e0   :  { %10923 = vst [vmem:[#allocation105_spill] sm:$0xff] %v7164_v48  ;;  %v2168_v44 = vmul.f32 %v6987_v4, %v7164_v48  ;;  %v7172_v5 = vadd.f32 %v4904_v22, %v7062_v34  ;;  %v2229_v47 = vsel %vm10296_vm6, %v2169_v2, 0.0 }
 0x1e1   :  { %v2226_v13 = vadd.f32 %v2225_v25, %v2224_v26  ;;  %v1322_v35 = vpop.f32.mrf.mxu0 }
 0x1e2   :  { %10924 = vst [vmem:[#allocation2_spill] sm:$0xff] %v7172_v5  ;;  %v2227_v39 = vsel %vm10296_vm6, %v2168_v44, 0.0  ;;  %v7178_v59 = vadd.f32 %v7062_v34, %v1322_v35  ;;  %v2171_v4 = vmul.f32 %v7011_v9, %v7172_v5  ;;  %v7204_v44 = vpop.permute.xlu1 %2093 }
 0x1e3   :  { %v2228_v15 = vadd.f32 %v2227_v39, %v2226_v13  ;;  %v4907_v37 = vpop.f32.mrf.mxu0 }
 0x1e4   :  { %10925 = vst [vmem:[#allocation99_spill] sm:$0xff] %v7178_v59  ;;  %v2170_v58 = vmul.f32 %v7002_v57, %v7178_v59  ;;  %v7188_v10 = vadd.f32 %v4907_v37, %v7062_v34  ;;  %v2233_v26 = vsel %vm10296_vm6, %v2171_v4, 0.0  ;;  %v7218_v4 = vpop.permute.xlu0 %2148 }
 0x1e5   :  { %v2230_v55 = vadd.f32 %v2229_v47, %v2228_v15  ;;  %v1332_v32 = vpop.f32.mrf.mxu0 }
 0x1e6   :  { %10926 = vst [vmem:[#allocation104_spill] sm:$0xff] %v7188_v10  ;;  %v2231_v30 = vsel %vm10296_vm6, %v2170_v58, 0.0  ;;  %v7192_v29 = vadd.f32 %v7062_v34, %v1332_v32  ;;  %v2173_v9 = vmul.f32 %v7031_v17, %v7188_v10 }
 0x1e7   :  { %v2232_v50 = vadd.f32 %v2231_v30, %v2230_v55  ;;  %v4910_v0 = vpop.f32.mrf.mxu0  ;;  %v11016_v40 = vld [vmem:[#allocation105_spill] sm:$0xff] }
 0x1e8   :  { %10927 = vst [vmem:[#allocation94_spill] sm:$0xff] %v7192_v29  ;;  %v2172_v57 = vmul.f32 %v7022_v43, %v7192_v29  ;;  %v7202_v22 = vadd.f32 %v4910_v0, %v7062_v34  ;;  %v2237_v37 = vsel %vm10296_vm6, %v2173_v9, 0.0 }
 0x1e9   :  { %v2234_v25 = vadd.f32 %v2233_v26, %v2232_v50  ;;  %v1342_v2 = vpop.f32.mrf.mxu0  ;;  %v7224_v26 = vpop.permute.xlu1 %2103  ;;  %v11022_v42 = vld [vmem:[#allocation2_spill] sm:$0xff] }
 0x1ea   :  { %10928 = vst [vmem:[#allocation109_spill] sm:$0xff] %v7202_v22  ;;  %v2235_v13 = vsel %vm10296_vm6, %v2172_v57, 0.0  ;;  %v7208_v35 = vadd.f32 %v7062_v34, %v1342_v2  ;;  %v2175_v17 = vmul.f32 %v7050_v12, %v7202_v22 }
 0x1eb   :  { %v2236_v39 = vadd.f32 %v2235_v13, %v2234_v25  ;;  %v4913_v15 = vpop.f32.mrf.mxu0  ;;  %v11020_v29 = vld [vmem:[#allocation99_spill] sm:$0xff] }
 0x1ec   :  { %10929 = vst [vmem:[#allocation112_spill] sm:$0xff] %v7208_v35  ;;  %v2174_v43 = vmul.f32 %v7042_v6, %v7208_v35  ;;  %v7216_v47 = vadd.f32 %v4913_v15, %v7062_v34  ;;  %v2241_v12 = vsel %vm10296_vm6, %v2175_v17, 0.0  ;;  %v7238_v15 = vpop.permute.xlu0 %2357 }
 0x1ed   :  { %v2238_v58 = vadd.f32 %v2237_v37, %v2236_v39  ;;  %v1352_v55 = vpop.f32.mrf.mxu0  ;;  %vm10338_vm8 = vcmp.eq.s32.totalorder %v7238_v15, 1 }
 0x1ee   :  { %10930 = vst [vmem:[#allocation113_spill] sm:$0xff] %v7216_v47  ;;  %v2239_v32 = vsel %vm10296_vm6, %v2174_v43, 0.0  ;;  %v7222_v30 = vadd.f32 %v7062_v34, %v1352_v55  ;;  %v2177_v6 = vmul.f32 %v7057_v1, %v7216_v47 }
 0x1ef   :  { %v2240_v50 = vadd.f32 %v2239_v32, %v2238_v58  ;;  %v4916_v0 = vpop.f32.mrf.mxu0  ;;  %v11024_v47 = vld [vmem:[#allocation94_spill] sm:$0xff] }
 0x1f0   :  { %10931 = vst [vmem:[#allocation114_spill] sm:$0xff] %v7222_v30  ;;  %v2176_v9 = vmul.f32 %v7008_v45, %v7222_v30  ;;  %v7232_v57 = vadd.f32 %v4916_v0, %v7062_v34  ;;  %v2245_v43 = vsel %vm10296_vm6, %v2177_v6, 0.0 }
 0x1f1   :  { %v2242_v25 = vadd.f32 %v2241_v12, %v2240_v50  ;;  %v1362_v2 = vpop.f32.mrf.mxu0  ;;  %v7248_v50 = vpop.permute.xlu1 %2113 }
 0x1f2   :  { %10932 = vst [vmem:[#allocation115_spill] sm:$0xff] %v7232_v57  ;;  %v2243_v13 = vsel %vm10296_vm6, %v2176_v9, 0.0  ;;  %v7236_v39 = vadd.f32 %v7062_v34, %v1362_v2  ;;  %v2179_v1 = vmul.f32 %v7072_v38, %v7232_v57 }
 0x1f3   :  { %v2244_v37 = vadd.f32 %v2243_v13, %v2242_v25  ;;  %v4919_v17 = vpop.f32.mrf.mxu0  ;;  %v7262_v13 = vpop.permute.xlu0 %2363  ;;  %v11028_v48 = vld [vmem:[#allocation112_spill] sm:$0xff] }
 0x1f4   :  { %10933 = vst [vmem:[#allocation7_spill] sm:$0xff] %v7236_v39  ;;  %v2178_v45 = vmul.f32 %v7016_v33, %v7236_v39  ;;  %v7246_v58 = vadd.f32 %v4919_v17, %v7062_v34  ;;  %v2249_v25 = vsel %vm10296_vm6, %v2179_v1, 0.0  ;;  %vm10302_vm11 = vcmp.eq.s32.totalorder %v7262_v13, 1  ;;  %v11008_v39 = vld [vmem:[#allocation78_spill] sm:$0xff] }
 0x1f5   :  { %v2246_v55 = vadd.f32 %v2245_v43, %v2244_v37  ;;  %v1372_v32 = vpop.f32.mrf.mxu0 }
 0x1f6   :  { %10934 = vst [vmem:[#allocation18_spill] sm:$0xff] %v7246_v58  ;;  %v2247_v0 = vsel %vm10296_vm6, %v2178_v45, 0.0  ;;  %v7252_v12 = vadd.f32 %v7062_v34, %v1372_v32  ;;  %v2181_v38 = vmul.f32 %v7092_v7, %v7246_v58  ;;  %v7268_v32 = vpop.permute.xlu1 %2123 }
 0x1f7   :  { %v2248_v9 = vadd.f32 %v2247_v0, %v2246_v55  ;;  %v4922_v6 = vpop.f32.mrf.mxu0 }
 0x1f8   :  { %10935 = vst [vmem:[#allocation124_spill] sm:$0xff] %v7252_v12  ;;  %v2180_v33 = vmul.f32 %v7027_v49, %v7252_v12  ;;  %v7260_v2 = vadd.f32 %v4922_v6, %v7062_v34  ;;  %v2253_v7 = vsel %vm10296_vm6, %v2181_v38, 0.0 }
 0x1f9   :  { %v2250_v37 = vadd.f32 %v2249_v25, %v2248_v9  ;;  %v1382_v17 = vpop.f32.mrf.mxu0 }
 0x1fa   :  { %10936 = vst [vmem:[#allocation14_spill] sm:$0xff] %v7260_v2  ;;  %v2251_v43 = vsel %vm10296_vm6, %v2180_v33, 0.0  ;;  %v7266_v45 = vadd.f32 %v7062_v34, %v1382_v17  ;;  %v2183_v49 = vmul.f32 %v7116_v56, %v7260_v2  ;;  %v7282_v17 = vpop.permute.xlu0 %2369 }
 0x1fb   :  { %v2252_v55 = vadd.f32 %v2251_v43, %v2250_v37  ;;  %v4925_v1 = vpop.f32.mrf.mxu0  ;;  %10940 = vst [vmem:[#allocation20_spill] sm:$0xff] %v7282_v17  ;;  %vm10304_vm13 = vcmp.eq.s32.totalorder %v7282_v17, 1 }
 0x1fc   :  { %10937 = vst [vmem:[#allocation129_spill] sm:$0xff] %v7266_v45  ;;  %v2182_v0 = vmul.f32 %v7036_v14, %v7266_v45  ;;  %v7276_v9 = vadd.f32 %v4925_v1, %v7062_v34  ;;  %v2257_v16 = vsel %vm10296_vm6, %v2183_v49, 0.0 }
 0x1fd   :  { %v2254_v6 = vadd.f32 %v2253_v7, %v2252_v55  ;;  %v1392_v25 = vpop.f32.mrf.mxu0 }
 0x1fe   :  { %10938 = vst [vmem:[#allocation23_spill] sm:$0xff] %v7276_v9  ;;  %v2255_v33 = vsel %vm10296_vm6, %v2182_v0, 0.0  ;;  %v7280_v37 = vadd.f32 %v7062_v34, %v1392_v25  ;;  %v2185_v56 = vmul.f32 %v7136_v54, %v7276_v9  ;;  %v7292_v0 = vpop.permute.xlu1 %2133 }
 0x1ff   :  { %v2256_v43 = vadd.f32 %v2255_v33, %v2254_v6  ;;  %v4928_v38 = vpop.f32.mrf.mxu0 }
 0x200   :  { %10939 = vst [vmem:[#allocation131_spill] sm:$0xff] %v7280_v37  ;;  %v2184_v14 = vmul.f32 %v7047_v46, %v7280_v37  ;;  %v7290_v55 = vadd.f32 %v4928_v38, %v7062_v34  ;;  %v2261_v2 = vsel %vm10296_vm6, %v2185_v56, 0.0  ;;  %v7303_v38 = vpop.permute.xlu0 %2375 }
 0x201   :  { %v2258_v1 = vadd.f32 %v2257_v16, %v2256_v43  ;;  %v1402_v7 = vpop.f32.mrf.mxu0  ;;  %10943 = vst [vmem:[#allocation137_spill] sm:$0xff] %v7303_v38 }
 0x202   :  { %10941 = vst [vmem:[#allocation24_spill] sm:$0xff] %v7290_v55  ;;  %v2259_v25 = vsel %vm10296_vm6, %v2184_v14, 0.0  ;;  %v7296_v6 = vadd.f32 %v7062_v34, %v1402_v7  ;;  %v2187_v54 = vmul.f32 %v7160_v19, %v7290_v55 }
 0x203   :  { %v2260_v33 = vadd.f32 %v2259_v25, %v2258_v1  ;;  %v4931_v49 = vpop.f32.mrf.mxu0  ;;  %v7309_v25 = vpop.permute.xlu1 %2143 }
 0x204   :  { %10942 = vst [vmem:[#allocation10_spill] sm:$0xff] %v7296_v6  ;;  %v2186_v46 = vmul.f32 %v7053_v41, %v7296_v6  ;;  %v2265_v56 = vsel %vm10296_vm6, %v2187_v54, 0.0  ;;  %v7313_v19 = vadd.f32 %v4931_v49, %v7062_v34 }
 0x205   :  { %v2262_v16 = vadd.f32 %v2261_v2, %v2260_v33  ;;  %v1412_v43 = vpop.f32.mrf.mxu0 }
 0x206   :  { %v2263_v37 = vsel %vm10296_vm6, %v2186_v46, 0.0  ;;  %v7307_v14 = vadd.f32 %v7062_v34, %v1412_v43  ;;  %10945 = vst [vmem:[#allocation139_spill] sm:$0xff] %v7313_v19  ;;  %v7321_v43 = vpop.permute.xlu0 %2381 }
 0x207   :  { %v2264_v7 = vadd.f32 %v2263_v37, %v2262_v16  ;;  %v4934_v1 = vpop.f32.mrf.mxu0  ;;  %10947 = vst [vmem:[#allocation21_spill] sm:$0xff] %v7321_v43  ;;  %v2189_v16 = vmul.f32 %v7180_v21, %v7313_v19  ;;  %v7325_v6 = vpop.permute.xlu1 %2153 }
 0x208   :  { %10944 = vst [vmem:[#allocation28_spill] sm:$0xff] %v7307_v14  ;;  %v2188_v41 = vmul.f32 %v7066_v20, %v7307_v14 }
 0x209   :  { %v2266_v55 = vadd.f32 %v2265_v56, %v2264_v7  ;;  %v1422_v2 = vpop.f32.mrf.mxu0  ;;  %v2269_v7 = vsel %vm10296_vm6, %v2189_v16, 0.0  ;;  %v7331_v56 = vadd.f32 %v4934_v1, %v7062_v34 }
 0x20a   :  { %v2267_v33 = vsel %vm10296_vm6, %v2188_v41, 0.0  ;;  %v7319_v46 = vadd.f32 %v7062_v34, %v1422_v2  ;;  %v7333_v41 = vpop.permute.xlu0 %2387 }
 0x20b   :  { %v4937_v37 = vpop.f32.mrf.mxu0  ;;  %v2268_v54 = vadd.f32 %v2267_v33, %v2266_v55  ;;  %10948 = vst [vmem:[#allocation41_spill] sm:$0xff] %v7331_v56  ;;  %10949 = vst [vmem:[#allocation33_spill] sm:$0xff] %v7333_v41  ;;  %v7339_v55 = vpop.permute.xlu1 %2360 }
 0x20c   :  { %10946 = vst [vmem:[#allocation32_spill] sm:$0xff] %v7319_v46  ;;  %v2190_v49 = vmul.f32 %v7085_v8, %v7319_v46  ;;  %v2191_v8 = vmul.f32 %v7204_v44, %v7331_v56  ;;  %vm10303_vm10 = vcmp.eq.s32.totalorder %v7339_v55, 1 }
 0x20d   :  { %v1432_v20 = vpop.f32.mrf.mxu0  ;;  %v2270_v2 = vadd.f32 %v2269_v7, %v2268_v54 }
 0x20e   :  { %v2271_v14 = vsel %vm10296_vm6, %v2190_v49, 0.0  ;;  %v7337_v45 = vadd.f32 %v7062_v34, %v1432_v20  ;;  %v7345_v1 = vpop.permute.xlu0 %2393  ;;  %v2273_v54 = vsel %vm10296_vm6, %v2191_v8, 0.0  ;;  %v7349_v49 = vadd.f32 %v4937_v37, %v7062_v34 }
 0x20f   :  { %v4940_v21 = vpop.f32.mrf.mxu0  ;;  %v2272_v33 = vadd.f32 %v2271_v14, %v2270_v2  ;;  %10951 = vst [vmem:[#allocation29_spill] sm:$0xff] %v7345_v1  ;;  %v7351_v7 = vpop.permute.xlu1 %2366 }
 0x210   :  { %10950 = vst [vmem:[#allocation141_spill] sm:$0xff] %v7337_v45  ;;  %v2192_v16 = vmul.f32 %v7106_v28, %v7337_v45  ;;  %10952 = vst [vmem:[#allocation25_spill] sm:$0xff] %v7349_v49  ;;  %v2193_v28 = vmul.f32 %v7224_v26, %v7349_v49  ;;  %vm10301_vm0 = vcmp.eq.s32.totalorder %v7351_v7, 1 }
 0x211   :  { %v1442_v19 = vpop.f32.mrf.mxu0  ;;  %v2274_v20 = vadd.f32 %v2273_v54, %v2272_v33  ;;  %10953 = vst [vmem:[#allocation42_spill] sm:$0xff] %v7351_v7 }
 0x212   :  { %v2275_v46 = vsel %vm10296_vm6, %v2192_v16, 0.0  ;;  %v7355_v9 = vadd.f32 %v7062_v34, %v1442_v19  ;;  %v7359_v14 = vpop.permute.xlu0 %2399  ;;  %v2277_v33 = vsel %vm10296_vm6, %v2193_v28, 0.0  ;;  %v7367_v16 = vadd.f32 %v4940_v21, %v7062_v34 }
 0x213   :  { %v4943_v44 = vpop.f32.mrf.mxu1  ;;  %10954 = vst [vmem:[#allocation5_spill] sm:$0xff] %v7359_v14  ;;  %v2276_v2 = vadd.f32 %v2275_v46, %v2274_v20  ;;  %v7363_v56 = vpop.permute.xlu1 %2372 }
 0x214   :  { %v2194_v8 = vmul.f32 %v7130_v60, %v7355_v9  ;;  %10955 = vst [vmem:[#allocation40_spill] sm:$0xff] %v7363_v56  ;;  %10956 = vst [vmem:[#allocation9_spill] sm:$0xff] %v7367_v16  ;;  %v2195_v60 = vmul.f32 %v7248_v50, %v7367_v16  ;;  %vm10305_vm5 = vcmp.eq.s32.totalorder %v7363_v56, 1 }
 0x215   :  { %v1452_v37 = vpop.f32.mrf.mxu1  ;;  %v2278_v19 = vadd.f32 %v2277_v33, %v2276_v2 }
 0x216   :  { %v2279_v54 = vsel %vm10296_vm6, %v2194_v8, 0.0  ;;  %v7371_v45 = vadd.f32 %v7062_v34, %v1452_v37  ;;  %v7373_v26 = vpop.permute.xlu0 %2405  ;;  %v2281_v2 = vsel %vm10296_vm6, %v2195_v60, 0.0  ;;  %v7383_v8 = vadd.f32 %v4943_v44, %v7062_v34 }
 0x217   :  { %10958 = vst [vmem:[#allocation26_spill] sm:$0xff] %v7373_v26  ;;  %v4946_v46 = vpop.f32.mrf.mxu1  ;;  %v2280_v20 = vadd.f32 %v2279_v54, %v2278_v19  ;;  %v7377_v49 = vpop.permute.xlu1 %2378 }
 0x218   :  { %10957 = vst [vmem:[#allocation34_spill] sm:$0xff] %v7371_v45  ;;  %10959 = vst [vmem:[#allocation52_spill] sm:$0xff] %v7377_v49  ;;  %v2196_v28 = vmul.f32 %v7150_v3, %v7371_v45  ;;  %v2197_v3 = vmul.f32 %v7268_v32, %v7383_v8 }
 0x219   :  { %v1462_v21 = vpop.f32.mrf.mxu1  ;;  %10960 = vst [vmem:[#allocation11_spill] sm:$0xff] %v7383_v8  ;;  %v2282_v33 = vadd.f32 %v2281_v2, %v2280_v20 }
 0x21a   :  { %v7385_v37 = vpop.permute.xlu0 %2411  ;;  %v2283_v58 = vsel %vm10296_vm6, %v2196_v28, 0.0  ;;  %v7389_v12 = vadd.f32 %v7062_v34, %v1462_v21  ;;  %v2285_v20 = vsel %vm10296_vm6, %v2197_v3, 0.0  ;;  %v7401_v28 = vadd.f32 %v4946_v46, %v7062_v34 }
 0x21b   :  { %10961 = vst [vmem:[#allocation43_spill] sm:$0xff] %v7385_v37  ;;  %v4949_v50 = vpop.f32.mrf.mxu1  ;;  %v7391_v19 = vpop.permute.xlu1 %2384  ;;  %v2284_v54 = vadd.f32 %v2283_v58, %v2282_v33 }
 0x21c   :  { %10962 = vst [vmem:[#allocation12_spill] sm:$0xff] %v7389_v12  ;;  %10963 = vst [vmem:[#allocation48_spill] sm:$0xff] %v7391_v19  ;;  %v2198_v60 = vmul.f32 %v7174_v61, %v7389_v12  ;;  %v2199_v61 = vmul.f32 %v7292_v0, %v7401_v28 }
 0x21d   :  { %v1472_v16 = vpop.f32.mrf.mxu1  ;;  %10965 = vst [vmem:[#allocation58_spill] sm:$0xff] %v7401_v28  ;;  %v2286_v21 = vadd.f32 %v2285_v20, %v2284_v54 }
 0x21e   :  { %v7397_v44 = vpop.permute.xlu0 %2417  ;;  %v2287_v45 = vsel %vm10296_vm6, %v2198_v60, 0.0  ;;  %v7407_v57 = vadd.f32 %v7062_v34, %v1472_v16  ;;  %v2289_v54 = vsel %vm10296_vm6, %v2199_v61, 0.0  ;;  %v7419_v60 = vadd.f32 %v4949_v50, %v7062_v34 }
 0x21f   :  { %10964 = vst [vmem:[#allocation35_spill] sm:$0xff] %v7397_v44  ;;  %v7403_v2 = vpop.permute.xlu1 %2390  ;;  %v4952_v58 = vpop.f32.mrf.mxu1  ;;  %v2288_v33 = vadd.f32 %v2287_v45, %v2286_v21 }
 0x220   :  { %10966 = vst [vmem:[#allocation17_spill] sm:$0xff] %v7403_v2  ;;  %10967 = vst [vmem:[#allocation50_spill] sm:$0xff] %v7407_v57  ;;  %v2200_v3 = vmul.f32 %v7194_v52, %v7407_v57  ;;  %v2201_v45 = vmul.f32 %v7309_v25, %v7419_v60 }
 0x221   :  { %v1482_v46 = vpop.f32.mrf.mxu1  ;;  %10970 = vst [vmem:[#allocation30_spill] sm:$0xff] %v7419_v60  ;;  %v2290_v16 = vadd.f32 %v2289_v54, %v2288_v33  ;;  %v7435_v33 = vadd.f32 %v4952_v58, %v7062_v34 }
 0x222   :  { %v7411_v32 = vpop.permute.xlu0 %2423  ;;  %v2291_v20 = vsel %vm10296_vm6, %v2200_v3, 0.0  ;;  %v7423_v12 = vadd.f32 %v7062_v34, %v1482_v46  ;;  %v2293_v50 = vsel %vm10296_vm6, %v2201_v45, 0.0 }
 0x223   :  { %10968 = vst [vmem:[#allocation56_spill] sm:$0xff] %v7411_v32  ;;  %v7415_v8 = vpop.permute.xlu1 %2396  ;;  %v2292_v52 = vadd.f32 %v2291_v20, %v2290_v16  ;;  %10974 = vst [vmem:[#allocation15_spill] sm:$0xff] %v7435_v33  ;;  %v2203_v25 = vmul.f32 %v7325_v6, %v7435_v33  ;;  %v11026_v33 = vld [vmem:[#allocation104_spill] sm:$0xff] }
 0x224   :  { %10969 = vst [vmem:[#allocation46_spill] sm:$0xff] %v7415_v8  ;;  %10971 = vst [vmem:[#allocation61_spill] sm:$0xff] %v7423_v12  ;;  %v2202_v61 = vmul.f32 %v7218_v4, %v7423_v12 }
 0x225   :  { %v2294_v46 = vadd.f32 %v2293_v50, %v2292_v52  ;;  %v2297_v4 = vsel %vm10296_vm6, %v2203_v25, 0.0  ;;  %v2305_v50 = vstv %s5012_s2 }
 0x226   :  { %v7425_v0 = vpop.permute.xlu0 %2429  ;;  %v2295_v54 = vsel %vm10296_vm6, %v2202_v61, 0.0  ;;  %5022 = vrcp.f32 %v2305_v50  ;;  %v11014_v50 = vld [vmem:[#allocation88_spill] sm:$0xff] }
 0x227   :  { %10972 = vst [vmem:[#allocation59_spill] sm:$0xff] %v7425_v0  ;;  %v7429_v21 = vpop.permute.xlu1 %2402  ;;  %v2296_v16 = vadd.f32 %v2295_v54, %v2294_v46 }
 0x228   :  { %10973 = vst [vmem:[#allocation57_spill] sm:$0xff] %v7429_v21 }
 0x229   :  { %v2298_v60 = vadd.f32 %v2297_v4, %v2296_v16  ;;  %v11010_v4 = vld [vmem:[#allocation75_spill] sm:$0xff] }
 0x22a   :  { %v7437_v3 = vpop.permute.xlu0 %2435 }
 0x22b   :  { %10975 = vst [vmem:[#allocation51_spill] sm:$0xff] %v7437_v3  ;;  %v7440_v28 = vpop.permute.xlu1 %2408  ;;  %v2299_v58 = vrot.slane %v2298_v60, 4  ;;  %vm10333_vm15 = vcmp.eq.s32.totalorder %v7437_v3, 1  ;;  %v11048_v3 = vld [vmem:[#allocation32_spill] sm:$0xff] }
 0x22c   :  { %10976 = vst [vmem:[#allocation37_spill] sm:$0xff] %v7440_v28 }
 0x22d   :  { %v2300_v52 = vadd.f32 %v2299_v58, %v2298_v60  ;;  %v11018_v58 = vld [vmem:[#allocation102_spill] sm:$0xff] }
 0x22e   :  { %v7444_v20 = vpop.permute.xlu0 %2441 }
 0x22f   :  { %10977 = vst [vmem:[#allocation72_spill] sm:$0xff] %v7444_v20  ;;  %v7447_v45 = vpop.permute.xlu1 %2414  ;;  %v2301_v57 = vrot.slane %v2300_v52, 2  ;;  %vm10331_vm4 = vcmp.eq.s32.totalorder %v7444_v20, 1 }
 0x230   :  { %10978 = vst [vmem:[#allocation60_spill] sm:$0xff] %v7447_v45 }
 0x231   :  { %v2302_v54 = vadd.f32 %v2301_v57, %v2300_v52  ;;  %v11012_v52 = vld [vmem:[#allocation95_spill] sm:$0xff] }
 0x232   :  { %v7449_v34 = vpop.permute.xlu0 %2447 }
 0x233   :  { %10979 = vst [vmem:[#allocation77_spill] sm:$0xff] %v7449_v34  ;;  %v7451_v12 = vpop.permute.xlu1 %2420  ;;  %v2303_v16 = vrot.slane %v2302_v54, 1  ;;  %v5023_v11 = vpop.eup %5022 }
 0x234   :  { %10980 = vst [vmem:[#allocation67_spill] sm:$0xff] %v7451_v12  ;;  %vm10336_vm3 = vcmp.eq.s32.totalorder %v7451_v12, 1  ;;  %v11041_v12 = vld [vmem:[#allocation23_spill] sm:$0xff] }
 0x235   :  { %v2304_v36 = vadd.f32 %v2303_v16, %v2302_v54 }
 0x236   :  { %v7453_v61 = vpop.permute.xlu0 %2453 }
 0x237   :  { %10981 = vst [vmem:[#allocation44_spill] sm:$0xff] %v7453_v61  ;;  %v7455_v6 = vpop.permute.xlu1 %2426  ;;  %v7490_v54 = vmul.f32 %v5023_v11, %v2304_v36  ;;  %v7512_v36 = vld [vmem:[%s10036_s3] ss:$0 sm:$0xff]  ;;  %vm10330_vm6 = vcmp.eq.s32.totalorder %v7453_v61, 1 }
 0x238   :  { %10982 = vst [vmem:[#allocation39_spill] sm:$0xff] %v7455_v6  ;;  %11004 = vst [vmem:[#allocation97_spill] sm:$0xff] %v7512_v36  ;;  %vm10335_vm1 = vcmp.eq.s32.totalorder %v7455_v6, 1  ;;  %v11043_v6 = vld [vmem:[#allocation14_spill] sm:$0xff] }
 0x239   :  { %v2549_v5 = vsel %vm10303_vm10, %v7490_v54, %v7069_v51  ;;  %v2550_v59 = vsel %vm10302_vm11, %v7490_v54, %v7090_v31  ;;  %v2551_v60 = vsel %vm10301_vm0, %v7490_v54, %v7083_v63  ;;  %v2552_v51 = vsel %vm10304_vm13, %v7490_v54, %v7104_v27 }
 0x23a   :  { %v7457_v46 = vpop.permute.xlu0 %2459  ;;  %v2553_v31 = vsel %vm10305_vm5, %v7490_v54, %v7100_v24  ;;  %vm11006_vm0 = vcmp.eq.s32.totalorder %v7303_v38, 1  ;;  %vm11007_vm11 = vcmp.eq.s32.totalorder %v7377_v49, 1  ;;  %vm11009_vm10 = vcmp.eq.s32.totalorder %v7321_v43, 1 }
 0x23b   :  { %10983 = vst [vmem:[#allocation68_spill] sm:$0xff] %v7457_v46  ;;  %v7459_v25 = vpop.permute.xlu1 %2432  ;;  %vm10329_vm9 = vcmp.eq.s32.totalorder %v7457_v46, 1  ;;  %v2554_v63 = vsel %vm11006_vm0, %v7490_v54, %v7120_v53  ;;  %v2556_v27 = vsel %vm11009_vm10, %v7490_v54, %v11008_v39  ;;  %vm11011_vm13 = vcmp.eq.s32.totalorder %v7391_v19, 1 }
 0x23c   :  { %10984 = vst [vmem:[#allocation92_spill] sm:$0xff] %v7459_v25  ;;  %vm10334_vm12 = vcmp.eq.s32.totalorder %v7459_v25, 1  ;;  %v2557_v24 = vsel %vm11011_vm13, %v7490_v54, %v11010_v4  ;;  %vm11013_vm5 = vcmp.eq.s32.totalorder %v7333_v41, 1  ;;  %vm11015_vm0 = vcmp.eq.s32.totalorder %v7403_v2, 1  ;;  %v11045_v25 = vld [vmem:[#allocation10_spill] sm:$0xff] }
 0x23d   :  { %v2558_v53 = vsel %vm11013_vm5, %v7490_v54, %v11012_v52  ;;  %vm11019_vm10 = vcmp.eq.s32.totalorder %v7415_v8, 1  ;;  %vm11021_vm13 = vcmp.eq.s32.totalorder %v7359_v14, 1  ;;  %vm11023_vm5 = vcmp.eq.s32.totalorder %v7429_v21, 1  ;;  %v11032_v14 = vld [vmem:[#allocation114_spill] sm:$0xff] }
 0x23e   :  { %v7463_v30 = vpop.permute.xlu0 %2465  ;;  %v2561_v4 = vsel %vm11019_vm10, %v7490_v54, %v11018_v58  ;;  %v2562_v52 = vsel %vm11021_vm13, %v7490_v54, %v11020_v29  ;;  %vm11027_vm10 = vcmp.eq.s32.totalorder %v7440_v28, 1  ;;  %vm11029_vm13 = vcmp.eq.s32.totalorder %v7385_v37, 1  ;;  %v11035_v28 = vld [vmem:[#allocation7_spill] sm:$0xff]  ;;  %v11047_v37 = vld [vmem:[#allocation28_spill] sm:$0xff] }
 0x23f   :  { %10987 = vst [vmem:[#allocation64_spill] sm:$0xff] %v7463_v30  ;;  %v7476_v35 = vpop.permute.xlu1 %2438  ;;  %vm10328_vm7 = vcmp.eq.s32.totalorder %v7463_v30, 1  ;;  %v2565_v58 = vsel %vm11027_vm10, %v7490_v54, %v11026_v33  ;;  %v2566_v29 = vsel %vm11029_vm13, %v7490_v54, %v11028_v48  ;;  %vm11036_vm10 = vcmp.eq.s32.totalorder %v7411_v32, 1  ;;  %v11042_v32 = vld [vmem:[#allocation129_spill] sm:$0xff] }
 0x240   :  { %10999 = vst [vmem:[#allocation47_spill] sm:$0xff] %v7476_v35  ;;  %v2570_v48 = vsel %vm11036_vm10, %v7490_v54, %v11035_v28  ;;  %vm11039_vm13 = vcmp.eq.s32.totalorder %v7425_v0, 1  ;;  %v11044_v0 = vld [vmem:[#allocation131_spill] sm:$0xff]  ;;  %v2606_v61 = vmul.f32 %v7512_v36, %v2551_v60  ;;  %v2607_v46 = vmul.f32 %v7512_v36, %v2552_v51 }
 0x241   :  { %v2611_v30 = vmul.f32 %v7512_v36, %v2556_v27 }
 0x242   :  { %v7492_v16 = vpop.permute.xlu0 %2471 }
 0x243   :  { %vm10300_vm14 = vcmp.eq.s32.totalorder %v7492_v16, 1  ;;  %v7507_v11 = vpop.permute.xlu1 %2444  ;;  %vm11051_vm10 = vcmp.eq.s32.totalorder %v7492_v16, 1 }
 0x244   :  { %v2586_v57 = vsel %vm10300_vm14, %v7490_v54, %v7355_v9  ;;  %vm10332_vm14 = vcmp.eq.s32.totalorder %v7476_v35, 1  ;;  %v2548_v9 = vsel %vm10338_vm8, %v7490_v54, %v7075_v23  ;;  %vm2529_vm2 = vcmp.eq.s32.totalorder %v7507_v11, 1  ;;  %v11049_v35 = vld [vmem:[#allocation141_spill] sm:$0xff] }
 0x245   :  { %v2641_v22 = vmul.f32 %v7512_v36, %v2586_v57  ;;  %v2555_v57 = vsel %vm11007_vm11, %v7490_v54, %v7114_v18  ;;  %v2559_v18 = vsel %vm11015_vm0, %v7490_v54, %v11014_v50  ;;  %vm11017_vm11 = vcmp.eq.s32.totalorder %v7345_v1, 1 }
 0x246   :  { %v7549_v23 = vpop.permute.xlu0 %2477  ;;  %v2560_v39 = vsel %vm11017_vm11, %v7490_v54, %v11016_v40  ;;  %v2563_v50 = vsel %vm11023_vm5, %v7490_v54, %v11022_v42  ;;  %vm11025_vm11 = vcmp.eq.s32.totalorder %v7373_v26, 1  ;;  %v11030_v42 = vld [vmem:[#allocation109_spill] sm:$0xff]  ;;  %vm11031_vm5 = vcmp.eq.s32.totalorder %v7447_v45, 1  ;;  %v11038_v45 = vld [vmem:[#allocation124_spill] sm:$0xff] }
 0x247   :  { %vm2540_vm0 = vcmp.eq.s32.totalorder %v7549_v23, 1  ;;  %v2564_v40 = vsel %vm11025_vm11, %v7490_v54, %v11024_v47  ;;  %v2696_v10 = vadd.f32 %v7554_v62, %v2641_v22  ;;  %v2567_v21 = vsel %vm11031_vm5, %v7490_v54, %v11030_v42  ;;  %v11034_v26 = vld [vmem:[#allocation113_spill] sm:$0xff]  ;;  %v11037_v22 = vld [vmem:[#allocation115_spill] sm:$0xff] }
 0x248   :  { %vm11033_vm11 = vcmp.eq.s32.totalorder %v7397_v44, 1  ;;  %v2569_v33 = vsel %vm10336_vm3, %v7490_v54, %v11034_v26  ;;  %v2571_v42 = vsel %vm10335_vm1, %v7490_v54, %v11037_v22  ;;  %v11040_v44 = vld [vmem:[#allocation18_spill] sm:$0xff]  ;;  %v2577_v28 = vsel %vm2529_vm2, %v7490_v54, %v11041_v12 }
 0x249   :  { %v2568_v47 = vsel %vm11033_vm11, %v7490_v54, %v11032_v14  ;;  %v2572_v14 = vsel %vm11039_vm13, %v7490_v54, %v11038_v45  ;;  %v2573_v26 = vsel %vm10334_vm12, %v7490_v54, %v11040_v44  ;;  %v2574_v22 = vsel %vm10333_vm15, %v7490_v54, %v11042_v32 }
 0x24a   :  { %v2575_v45 = vsel %vm10332_vm14, %v7490_v54, %v11043_v6  ;;  %v2576_v44 = vsel %vm10331_vm4, %v7490_v54, %v11044_v0  ;;  %vm11046_vm5 = vcmp.eq.s32.totalorder %v7449_v34, 1  ;;  %v2580_v32 = vsel %vm10330_vm6, %v7490_v54, %v11047_v37 }
 0x24b   :  { %v2578_v12 = vsel %vm11046_vm5, %v7490_v54, %v11045_v25  ;;  %v2582_v6 = vsel %vm10329_vm9, %v7490_v54, %v11048_v3  ;;  %v2584_v0 = vsel %vm10328_vm7, %v7490_v54, %v11049_v35  ;;  %v2792_v20 = vmul.f32 0.2, %v2696_v10 }
 0x24c   :  { %vm2744_vm11 = vcmp.ge.f32.partialorder %v2696_v10, 0.0  ;;  %v2603_v34 = vmul.f32 %v7512_v36, %v2548_v9  ;;  %v2604_v25 = vmul.f32 %v7512_v36, %v2549_v5  ;;  %v2632_v8 = vmul.f32 %v7512_v36, %v2577_v28 }
 0x24d   :  { %v2605_v37 = vmul.f32 %v7512_v36, %v2550_v59  ;;  %v2608_v3 = vmul.f32 %v7512_v36, %v2553_v31  ;;  %v2609_v1 = vmul.f32 %v7512_v36, %v2554_v63  ;;  %v2610_v35 = vmul.f32 %v7512_v36, %v2555_v57  ;;  %v11050_v59 = vld [vmem:[#allocation34_spill] sm:$0xff] }
 0x24e   :  { %v2612_v9 = vmul.f32 %v7512_v36, %v2557_v24  ;;  %v2840_v2 = vsel %vm2744_vm11, %v2696_v10, %v2792_v20  ;;  %v2613_v5 = vmul.f32 %v7512_v36, %v2558_v53  ;;  %v2614_v28 = vmul.f32 %v7512_v36, %v2559_v18 }
 0x24f   :  { %v2588_v60 = vsel %vm2540_vm0, %v7490_v54, %v11050_v59  ;;  %v2615_v51 = vmul.f32 %v7512_v36, %v2560_v39  ;;  %v2616_v31 = vmul.f32 %v7512_v36, %v2561_v4  ;;  %v2617_v63 = vmul.f32 %v7512_v36, %v2562_v52 }
 0x250   :  { %v2687_v57 = vadd.f32 %v7554_v62, %v2632_v8  ;;  %v2618_v27 = vmul.f32 %v7512_v36, %v2563_v50  ;;  %v2619_v10 = vmul.f32 %v7512_v36, %v2564_v40  ;;  %v2620_v20 = vmul.f32 %v7512_v36, %v2565_v58  ;;  %v7714_v58 = vpop.permute.xlu1 %2450 }
 0x251   :  { %v2621_v24 = vmul.f32 %v7512_v36, %v2566_v29  ;;  %v7705_v53 = vsel %vm11051_vm10, 0.0, %v2840_v2  ;;  %v2622_v18 = vmul.f32 %v7512_v36, %v2567_v21  ;;  %v2623_v39 = vmul.f32 %v7512_v36, %v2568_v47 }
 0x252   :  { %11052 = vst [vmem:[#allocation142_spill] sm:$0xff] %v7705_v53  ;;  %v2643_v4 = vmul.f32 %v7512_v36, %v2588_v60  ;;  %v2624_v8 = vmul.f32 %v7512_v36, %v2569_v33  ;;  %v2625_v52 = vmul.f32 %v7512_v36, %v2570_v48  ;;  %v2626_v50 = vmul.f32 %v7512_v36, %v2571_v42  ;;  %v7871_v53 = vpop.permute.xlu0 %2483 }
 0x253   :  { %v2627_v40 = vmul.f32 %v7512_v36, %v2572_v14  ;;  %v2628_v16 = vmul.f32 %v7512_v36, %v2573_v26  ;;  %v2629_v2 = vmul.f32 %v7512_v36, %v2574_v22  ;;  %v2630_v21 = vmul.f32 %v7512_v36, %v2575_v45 }
 0x254   :  { %v2783_v29 = vmul.f32 0.2, %v2687_v57  ;;  %v2631_v59 = vmul.f32 %v7512_v36, %v2576_v44  ;;  %v2633_v33 = vmul.f32 %v7512_v36, %v2578_v12  ;;  %vm2735_vm13 = vcmp.ge.f32.partialorder %v2687_v57, 0.0 }
 0x255   :  { %v2635_v48 = vmul.f32 %v7512_v36, %v2580_v32  ;;  %v2637_v42 = vmul.f32 %v7512_v36, %v2582_v6  ;;  %v7725_v14 = vmul.f32 %v7512_v36, %v2584_v0  ;;  %v2698_v26 = vadd.f32 %v7554_v62, %v2643_v4 }
 0x256   :  { %vm10337_vm5 = vcmp.eq.s32.totalorder %v7714_v58, 1  ;;  %v7730_v22 = vadd.f32 %v7554_v62, %v2603_v34  ;;  %v7733_v45 = vadd.f32 %v7554_v62, %v2604_v25  ;;  %v7736_v44 = vadd.f32 %v7554_v62, %v2605_v37 }
 0x257   :  { %v7739_v12 = vadd.f32 %v7554_v62, %v2606_v61  ;;  %v2831_v32 = vsel %vm2735_vm13, %v2687_v57, %v2783_v29  ;;  %v7742_v6 = vadd.f32 %v7554_v62, %v2607_v46  ;;  %v7745_v0 = vadd.f32 %v7554_v62, %v2608_v3 }
 0x258   :  { %v7748_v60 = vadd.f32 %v7554_v62, %v2609_v1  ;;  %v7751_v34 = vadd.f32 %v7554_v62, %v2610_v35  ;;  %v7754_v25 = vadd.f32 %v7554_v62, %v2611_v30  ;;  %v7757_v37 = vadd.f32 %v7554_v62, %v2612_v9 }
 0x259   :  { %v7760_v61 = vadd.f32 %v7554_v62, %v2613_v5  ;;  %v7763_v46 = vadd.f32 %v7554_v62, %v2614_v28  ;;  %v7766_v3 = vadd.f32 %v7554_v62, %v2615_v51  ;;  %v7769_v1 = vadd.f32 %v7554_v62, %v2616_v31 }
 0x25a   :  { %v2794_v35 = vmul.f32 0.2, %v2698_v26  ;;  %v7773_v30 = vsel %vm2529_vm2, 0.0, %v2831_v32  ;;  %v7776_v9 = vadd.f32 %v7554_v62, %v2617_v63  ;;  %v7779_v5 = vadd.f32 %v7554_v62, %v2618_v27 }
 0x25b   :  { %11053 = vst [vmem:[#allocation69_spill] sm:$0xff] %v7773_v30  ;;  %vm2746_vm11 = vcmp.ge.f32.partialorder %v2698_v26, 0.0  ;;  %v7782_v28 = vadd.f32 %v7554_v62, %v2619_v10  ;;  %v7785_v51 = vadd.f32 %v7554_v62, %v2620_v20  ;;  %v7788_v31 = vadd.f32 %v7554_v62, %v2621_v24 }
 0x25c   :  { %v7791_v11 = vadd.f32 %v7554_v62, %v2622_v18  ;;  %v7794_v57 = vadd.f32 %v7554_v62, %v2623_v39  ;;  %v7797_v63 = vadd.f32 %v7554_v62, %v2624_v8  ;;  %v7800_v27 = vadd.f32 %v7554_v62, %v2625_v52 }
 0x25d   :  { %11054 = vst [vmem:[#allocation54_spill] sm:$0xff] %v7788_v31  ;;  %v7803_v10 = vadd.f32 %v7554_v62, %v2626_v50  ;;  %v7807_v24 = vadd.f32 %v7554_v62, %v2627_v40  ;;  %v7810_v18 = vadd.f32 %v7554_v62, %v2628_v16  ;;  %v2842_v4 = vsel %vm2746_vm11, %v2698_v26, %v2794_v35  ;;  %v11058_v50 = vld [vmem:[#allocation24_spill] sm:$0xff] }
 0x25e   :  { %11055 = vst [vmem:[#allocation79_spill] sm:$0xff] %v7791_v11  ;;  %11056 = vst [vmem:[#allocation84_spill] sm:$0xff] %v7794_v57  ;;  %v7813_v39 = vadd.f32 %v7554_v62, %v2629_v2  ;;  %v7816_v8 = vadd.f32 %v7554_v62, %v2630_v21  ;;  %v7819_v52 = vadd.f32 %v7554_v62, %v2631_v59  ;;  %vm2706_vm2 = vcmp.ge.f32.partialorder %v7730_v22, 0.0 }
 0x25f   :  { %11057 = vst [vmem:[#allocation86_spill] sm:$0xff] %v7797_v63  ;;  %v2579_v29 = vsel %vm10337_vm5, %v7490_v54, %v11058_v50  ;;  %v7826_v40 = vadd.f32 %v7554_v62, %v2633_v33  ;;  %vm2707_vm10 = vcmp.ge.f32.partialorder %v7733_v45, 0.0  ;;  %vm2708_vm13 = vcmp.ge.f32.partialorder %v7736_v44, 0.0 }
 0x260   :  { %v7833_v16 = vsel %vm2540_vm0, 0.0, %v2842_v4  ;;  %vm2709_vm11 = vcmp.ge.f32.partialorder %v7739_v12, 0.0  ;;  %vm2710_vm7 = vcmp.ge.f32.partialorder %v7742_v6, 0.0  ;;  %vm2711_vm9 = vcmp.ge.f32.partialorder %v7745_v0, 0.0 }
 0x261   :  { %11059 = vst [vmem:[#allocation82_spill] sm:$0xff] %v7833_v16  ;;  %vm2712_vm6 = vcmp.ge.f32.partialorder %v7748_v60, 0.0  ;;  %vm2713_vm4 = vcmp.ge.f32.partialorder %v7751_v34, 0.0  ;;  %v2754_v2 = vmul.f32 0.2, %v7730_v22  ;;  %v2634_v23 = vmul.f32 %v7512_v36, %v2579_v29 }
 0x262   :  { %v2755_v21 = vmul.f32 0.2, %v7733_v45  ;;  %v2756_v59 = vmul.f32 0.2, %v7736_v44  ;;  %v7845_v33 = vadd.f32 %v7554_v62, %v2635_v48  ;;  %vm2714_vm0 = vcmp.ge.f32.partialorder %v7754_v25, 0.0 }
 0x263   :  { %vm2715_vm14 = vcmp.ge.f32.partialorder %v7757_v37, 0.0  ;;  %v2757_v26 = vmul.f32 0.2, %v7739_v12  ;;  %v2758_v32 = vmul.f32 0.2, %v7742_v6  ;;  %v7854_v4 = vadd.f32 %v7554_v62, %v2637_v42 }
 0x264   :  { %v2759_v35 = vmul.f32 0.2, %v7745_v0  ;;  %v2760_v48 = vmul.f32 0.2, %v7748_v60  ;;  %v2761_v50 = vmul.f32 0.2, %v7751_v34  ;;  %v7862_v47 = vadd.f32 %v7554_v62, %v7725_v14 }
 0x265   :  { %v2762_v29 = vmul.f32 0.2, %v7754_v25  ;;  %vm2718_vm1 = vcmp.ge.f32.partialorder %v7766_v3, 0.0  ;;  %vm2719_vm3 = vcmp.ge.f32.partialorder %v7769_v1, 0.0  ;;  %v2763_v42 = vmul.f32 0.2, %v7757_v37 }
 0x266   :  { %v2764_v20 = vmul.f32 0.2, %v7760_v61  ;;  %v2765_v16 = vmul.f32 0.2, %v7763_v46  ;;  %v2766_v14 = vmul.f32 0.2, %v7766_v3  ;;  %v2689_v19 = vadd.f32 %v7554_v62, %v2634_v23 }
 0x267   :  { %v2767_v30 = vmul.f32 0.2, %v7769_v1  ;;  %v2768_v41 = vmul.f32 0.2, %v7776_v9  ;;  %v2769_v43 = vmul.f32 0.2, %v7779_v5  ;;  %v2802_v36 = vsel %vm2706_vm2, %v7730_v22, %v2754_v2 }
 0x268   :  { %v2770_v49 = vmul.f32 0.2, %v7782_v28  ;;  %v2771_v38 = vmul.f32 0.2, %v7785_v51  ;;  %vm2724_vm15 = vcmp.ge.f32.partialorder %v7788_v31, 0.0  ;;  %v2803_v62 = vsel %vm2707_vm10, %v7733_v45, %v2755_v21 }
 0x269   :  { %v2772_v56 = vmul.f32 0.2, %v7788_v31  ;;  %v2773_v17 = vmul.f32 0.2, %v7791_v11  ;;  %v7890_v23 = vmul.f32 0.2, %v7794_v57  ;;  %v7904_v11 = vpop.permute.xlu1 %2456 }
 0x26a   :  { %vm2542_vm8 = vcmp.eq.s32.totalorder %v7871_v53, 1  ;;  %vm2726_vm5 = vcmp.ge.f32.partialorder %v7794_v57, 0.0  ;;  %vm2727_vm2 = vcmp.ge.f32.partialorder %v7797_v63, 0.0  ;;  %v2775_v22 = vmul.f32 0.2, %v7797_v63 }
 0x26b   :  { %11060 = vst [vmem:[#allocation62_spill] sm:$0xff] %v7890_v23  ;;  %v2776_v2 = vmul.f32 0.2, %v7800_v27  ;;  %v2777_v31 = vmul.f32 0.2, %v7803_v10  ;;  %v2804_v23 = vsel %vm2708_vm13, %v7736_v44, %v2756_v59  ;;  %v2805_v57 = vsel %vm2709_vm11, %v7739_v12, %v2757_v26 }
 0x26c   :  { %v7909_v45 = vmul.f32 0.2, %v7807_v24  ;;  %v7912_v21 = vmul.f32 0.2, %v7810_v18  ;;  %v2785_v63 = vmul.f32 0.2, %v2689_v19  ;;  %v2806_v59 = vsel %vm2710_vm7, %v7742_v6, %v2758_v32 }
 0x26d   :  { %v7918_v7 = vmul.f32 0.2, %v7813_v39  ;;  %v7921_v44 = vmul.f32 0.2, %v7816_v8  ;;  %vm2737_vm13 = vcmp.ge.f32.partialorder %v2689_v19, 0.0  ;;  %vm2731_vm10 = vcmp.ge.f32.partialorder %v7810_v18, 0.0 }
 0x26e   :  { %11061 = vst [vmem:[#allocation96_spill] sm:$0xff] %v7912_v21  ;;  %v7929_v21 = vmul.f32 0.2, %v7819_v52  ;;  %v7932_v12 = vmul.f32 0.2, %v7826_v40  ;;  %vm2732_vm11 = vcmp.ge.f32.partialorder %v7813_v39, 0.0 }
 0x26f   :  { %11062 = vst [vmem:[#allocation110_spill] sm:$0xff] %v7921_v44  ;;  %v7935_v26 = vmul.f32 0.2, %v7845_v33  ;;  %v2807_v44 = vsel %vm2711_vm9, %v7745_v0, %v2759_v35  ;;  %vm2733_vm7 = vcmp.ge.f32.partialorder %v7816_v8, 0.0  ;;  %v7944_v6 = vmul.f32 0.2, %v7854_v4 }
 0x270   :  { %11063 = vst [vmem:[#allocation87_spill] sm:$0xff] %v7932_v12  ;;  %v7947_v32 = vmul.f32 0.2, %v7862_v47  ;;  %v2809_v0 = vsel %vm2713_vm4, %v7751_v34, %v2761_v50  ;;  %vm2736_vm9 = vcmp.ge.f32.partialorder %v7826_v40, 0.0  ;;  %v2833_v35 = vsel %vm2737_vm13, %v2689_v19, %v2785_v63 }
 0x271   :  { %11064 = vst [vmem:[#allocation73_spill] sm:$0xff] %v7935_v26  ;;  %v2808_v26 = vsel %vm2712_vm6, %v7748_v60, %v2760_v48  ;;  %v2810_v12 = vsel %vm2714_vm0, %v7754_v25, %v2762_v29  ;;  %vm11066_vm12 = vcmp.ge.f32.partialorder %v7760_v61, 0.0  ;;  %vm11067_vm6 = vcmp.ge.f32.partialorder %v7763_v46, 0.0  ;;  %v11088_v29 = vld [vmem:[#allocation84_spill] sm:$0xff] }
 0x272   :  { %11065 = vst [vmem:[#allocation70_spill] sm:$0xff] %v7947_v32  ;;  %v2811_v32 = vsel %vm2715_vm14, %v7757_v37, %v2763_v42  ;;  %v2812_v60 = vsel %vm11066_vm12, %v7760_v61, %v2764_v20  ;;  %v2813_v34 = vsel %vm11067_vm6, %v7763_v46, %v2765_v16  ;;  %vm11068_vm4 = vcmp.eq.s32.totalorder %v7238_v15, 1  ;;  %v7981_v37 = vpop.permute.xlu1 %2462  ;;  %v11087_v50 = vld [vmem:[#allocation62_spill] sm:$0xff]  ;;  %v11186_v16 = vld [vmem:[#allocation25_spill] sm:$0xff] }
 0x273   :  { %v7971_v48 = vsel %vm11068_vm4, 0.0, %v2802_v36  ;;  %vm11069_vm13 = vcmp.eq.s32.totalorder %v7339_v55, 1  ;;  %vm11070_vm0 = vcmp.eq.s32.totalorder %v7262_v13, 1  ;;  %vm2738_vm12 = vcmp.ge.f32.partialorder %v7845_v33, 0.0  ;;  %v11089_v42 = vld [vmem:[#allocation86_spill] sm:$0xff] }
 0x274   :  { %v7975_v19 = vsel %vm11069_vm13, 0.0, %v2803_v62  ;;  %v7979_v25 = vsel %vm11070_vm0, 0.0, %v2804_v23  ;;  %v2814_v15 = vsel %vm2718_vm1, %v7766_v3, %v2766_v14  ;;  %v2815_v55 = vsel %vm2719_vm3, %v7769_v1, %v2767_v30  ;;  %v11078_v3 = vld [vmem:[#allocation42_spill] sm:$0xff]  ;;  %v11090_v14 = vld [vmem:[#allocation97_spill] sm:$0xff] }
 0x275   :  { %vm11071_vm6 = vcmp.ge.f32.partialorder %v7776_v9, 0.0  ;;  %vm11072_vm4 = vcmp.ge.f32.partialorder %v7779_v5, 0.0  ;;  %vm2533_vm13 = vcmp.eq.s32.totalorder %v7904_v11, 1  ;;  %vm2742_vm0 = vcmp.ge.f32.partialorder %v7862_v47, 0.0 }
 0x276   :  { %v2816_v62 = vsel %vm11071_vm6, %v7776_v9, %v2768_v41  ;;  %v7997_v13 = vsel %vm11072_vm4, %v7779_v5, %v2769_v43  ;;  %vm11073_vm14 = vcmp.eq.s32.totalorder %v7714_v58, 1  ;;  %vm11075_vm3 = vcmp.ge.f32.partialorder %v7782_v28, 0.0  ;;  %v11077_v43 = vld [vmem:[#allocation12_spill] sm:$0xff]  ;;  %v11080_v9 = vld [vmem:[#allocation54_spill] sm:$0xff]  ;;  %v11081_v5 = vld [vmem:[#allocation79_spill] sm:$0xff] }
 0x277   :  { %v8003_v36 = vsel %vm11073_vm14, 0.0, %v2833_v35  ;;  %v8008_v61 = vsel %vm11075_vm3, %v7782_v28, %v2770_v49  ;;  %vm11076_vm1 = vcmp.ge.f32.partialorder %v7785_v51, 0.0  ;;  %v2590_v46 = vsel %vm2542_vm8, %v7490_v54, %v11077_v43  ;;  %v11093_v35 = vld [vmem:[#allocation137_spill] sm:$0xff] }
 0x278   :  { %11074 = vst [vmem:[#allocation100_spill] sm:$0xff] %v8003_v36  ;;  %v8013_v41 = vsel %vm11076_vm1, %v7785_v51, %v2771_v38  ;;  %vm11079_vm6 = vcmp.eq.s32.totalorder %v11078_v3, 1  ;;  %v2946_v1 = vrot.slane %v7971_v48, 1  ;;  %v2947_v30 = vrot.slane %v7975_v19, 1  ;;  %v11083_v51 = vld [vmem:[#allocation20_spill] sm:$0xff] }
 0x279   :  { %v8021_v58 = vsel %vm11079_vm6, 0.0, %v2805_v57  ;;  %v2949_v49 = vrot.slane %v7979_v25, 1  ;;  %v2820_v38 = vsel %vm2724_vm15, %v11080_v9, %v2772_v56  ;;  %vm11082_vm14 = vcmp.ge.f32.partialorder %v11081_v5, 0.0  ;;  %v11085_v57 = vld [vmem:[#allocation40_spill] sm:$0xff]  ;;  %v8062_v9 = vpop.permute.xlu1 %2468 }
 0x27a   :  { %v8032_v28 = vsel %vm11082_vm14, %v11081_v5, %v2773_v17  ;;  %vm11084_vm4 = vcmp.eq.s32.totalorder %v11083_v51, 1  ;;  %vm11086_vm3 = vcmp.eq.s32.totalorder %v11085_v57, 1  ;;  %v2822_v56 = vsel %vm2726_vm5, %v11088_v29, %v11087_v50  ;;  %v11101_v57 = vld [vmem:[#allocation21_spill] sm:$0xff]  ;;  %v11107_v29 = vld [vmem:[#allocation48_spill] sm:$0xff] }
 0x27b   :  { %v8036_v63 = vsel %vm11084_vm4, 0.0, %v2806_v59  ;;  %v8040_v20 = vsel %vm11086_vm3, 0.0, %v2807_v44  ;;  %v2823_v17 = vsel %vm2727_vm2, %v11089_v42, %v2775_v22  ;;  %v2645_v23 = vmul.f32 %v11090_v14, %v2590_v46 }
 0x27c   :  { %vm11091_vm15 = vcmp.ge.f32.partialorder %v7800_v27, 0.0  ;;  %vm11092_vm1 = vcmp.ge.f32.partialorder %v7803_v10, 0.0  ;;  %vm11094_vm6 = vcmp.eq.s32.totalorder %v11093_v35, 1  ;;  %v2951_v3 = vrot.slane %v8021_v58, 1 }
 0x27d   :  { %v2824_v59 = vsel %vm11091_vm15, %v7800_v27, %v2776_v2  ;;  %v2825_v44 = vsel %vm11092_vm1, %v7803_v10, %v2777_v31  ;;  %v8059_v43 = vsel %vm11094_vm6, 0.0, %v2808_v26  ;;  %v2952_v22 = vrot.slane %v8036_v63, 1  ;;  %v11098_v10 = vld [vmem:[#allocation96_spill] sm:$0xff] }
 0x27e   :  { %v2954_v46 = vrot.slane %v8040_v20, 1  ;;  %vm11095_vm5 = vcmask 1046528   ;;  %vm11097_vm14 = vcmp.ge.f32.partialorder %v7807_v24, 0.0  ;;  %v2827_v2 = vsel %vm2731_vm10, %v7810_v18, %v11098_v10  ;;  %v11099_v26 = vld [vmem:[#allocation52_spill] sm:$0xff] }
 0x27f   :  { %v2948_v5 = vsel %vm11095_vm5, %v2946_v1, %v2947_v30  ;;  %vm11096_vm2 = vmmov %vm11095_vm5  ;;  %v2826_v31 = vsel %vm11097_vm14, %v7807_v24, %v7909_v45  ;;  %vm11100_vm4 = vcmp.eq.s32.totalorder %v11099_v26, 1  ;;  %vm11102_vm3 = vcmp.eq.s32.totalorder %v11101_v57, 1  ;;  %v11103_v45 = vld [vmem:[#allocation110_spill] sm:$0xff]  ;;  %v11116_v26 = vld [vmem:[#allocation17_spill] sm:$0xff] }
 0x280   :  { %v2950_v27 = vsel %vm11096_vm2, %v2947_v30, %v2949_v49  ;;  %v8078_v51 = vsel %vm11100_vm4, 0.0, %v2809_v0  ;;  %v8082_v50 = vsel %vm11102_vm3, 0.0, %v2810_v12  ;;  %3026 = vrot.lane.b32.xlu0 %v2948_v5, %s5028_s0  ;;  %v2828_v24 = vsel %vm2732_vm11, %v7813_v39, %v7918_v7  ;;  %v11105_v0 = vld [vmem:[#allocation76_spill] sm:$0xff]  ;;  %v11106_v30 = vld [vmem:[#allocation87_spill] sm:$0xff]  ;;  %vm11110_vm11 = vmmov %vm11096_vm2 }
 0x281   :  { %3028 = vrot.lane.b32.xlu1 %v2950_v27, %s5028_s0  ;;  %v2829_v18 = vsel %vm2733_vm7, %v7816_v8, %v11103_v45  ;;  %vm11104_vm10 = vcmp.ge.f32.partialorder %v7819_v52, 0.0  ;;  %v2700_v1 = vadd.f32 %v11105_v0, %v2645_v23  ;;  %v2832_v49 = vsel %vm2736_vm9, %v7826_v40, %v11106_v30  ;;  %v11109_v39 = vld [vmem:[#allocation139_spill] sm:$0xff]  ;;  %vm11111_vm7 = vmmov %vm11096_vm2  ;;  %v11112_v40 = vld [vmem:[#allocation73_spill] sm:$0xff] }
 0x282   :  { %v2830_v12 = vsel %vm11104_vm10, %v7819_v52, %v7929_v21  ;;  %vm11108_vm15 = vcmp.eq.s32.totalorder %v11107_v29, 1  ;;  %v2581_v8 = vsel %vm2533_vm13, %v7490_v54, %v11109_v39  ;;  %v2956_v42 = vrot.slane %v8059_v43, 1  ;;  %v11114_v27 = vld [vmem:[#allocation33_spill] sm:$0xff]  ;;  %vm11128_vm3 = vmmov %vm11111_vm7 }
 0x283   :  { %v8105_v7 = vsel %vm11108_vm15, 0.0, %v2811_v32  ;;  %v2957_v52 = vrot.slane %v8078_v51, 1  ;;  %v2959_v21 = vrot.slane %v8082_v50, 1  ;;  %v2955_v23 = vsel %vm11110_vm11, %v2952_v22, %v2954_v46  ;;  %v8132_v46 = vpop.permute.xlu1 %2474  ;;  %v11125_v30 = vld [vmem:[#allocation5_spill] sm:$0xff]  ;;  %vm11129_vm10 = vmmov %vm11128_vm3 }
 0x284   :  { %v2953_v35 = vsel %vm11111_vm7, %v2951_v3, %v2952_v22  ;;  %v2834_v32 = vsel %vm2738_vm12, %v7845_v33, %v11112_v40  ;;  %vm11113_vm9 = vcmp.ge.f32.partialorder %v7854_v4, 0.0  ;;  %vm11115_vm1 = vcmp.eq.s32.totalorder %v11114_v27, 1  ;;  %v11118_v33 = vld [vmem:[#allocation70_spill] sm:$0xff]  ;;  %v11136_v27 = vld [vmem:[#allocation37_spill] sm:$0xff] }
 0x285   :  { %v2836_v5 = vsel %vm11113_vm9, %v7854_v4, %v7944_v6  ;;  %v8126_v10 = vsel %vm11115_vm1, 0.0, %v2812_v60  ;;  %vm11117_vm6 = vcmp.eq.s32.totalorder %v11116_v26, 1  ;;  %3032 = vrot.lane.b32.xlu1 %v2955_v23, %s5028_s0  ;;  %3030 = vrot.lane.b32.xlu0 %v2953_v35, %s5028_s0  ;;  %v2838_v3 = vsel %vm2742_vm0, %v7862_v47, %v11118_v33  ;;  %v11119_v6 = vld [vmem:[#allocation29_spill] sm:$0xff]  ;;  %v11139_v33 = vld [vmem:[#allocation43_spill] sm:$0xff] }
 0x286   :  { %v8130_v57 = vsel %vm11117_vm6, 0.0, %v2813_v34  ;;  %v2796_v4 = vmul.f32 0.2, %v2700_v1  ;;  %vm11120_vm12 = vcmp.eq.s32.totalorder %v11119_v6, 1  ;;  %v2636_v22 = vmul.f32 %v11090_v14, %v2581_v8  ;;  %v11122_v34 = vld [vmem:[#allocation46_spill] sm:$0xff]  ;;  %v11130_v35 = vld [vmem:[#allocation57_spill] sm:$0xff] }
 0x287   :  { %v8142_v60 = vsel %vm11120_vm12, 0.0, %v2814_v15  ;;  %vm2535_vm5 = vcmp.eq.s32.totalorder %v7981_v37, 1  ;;  %vm2748_vm2 = vcmp.ge.f32.partialorder %v2700_v1, 0.0  ;;  %vm11123_vm14 = vcmp.eq.s32.totalorder %v11122_v34, 1 }
 0x288   :  { %11121 = vst [vmem:[#allocation65_spill] sm:$0xff] %v8142_v60  ;;  %v8148_v45 = vsel %vm11123_vm14, 0.0, %v2815_v55  ;;  %vm11126_vm4 = vcmp.eq.s32.totalorder %v11125_v30, 1  ;;  %v2961_v47 = vrot.slane %v8105_v7, 1  ;;  %v2962_v39 = vrot.slane %v8126_v10, 1  ;;  %v11151_v30 = vld [vmem:[#allocation56_spill] sm:$0xff] }
 0x289   :  { %11124 = vst [vmem:[#allocation106_spill] sm:$0xff] %v8148_v45  ;;  %v8152_v29 = vsel %vm11126_vm4, 0.0, %v2816_v62  ;;  %v2964_v15 = vrot.slane %v8130_v57, 1  ;;  %vm2539_vm0 = vcmp.eq.s32.totalorder %v8132_v46, 1  ;;  %v2958_v8 = vsel %vm11128_vm3, %v2956_v42, %v2957_v52  ;;  %v11133_v62 = vld [vmem:[#allocation26_spill] sm:$0xff] }
 0x28a   :  { %11127 = vst [vmem:[#allocation80_spill] sm:$0xff] %v8152_v29  ;;  %v2960_v23 = vsel %vm11129_vm10, %v2957_v52, %v2959_v21  ;;  %vm11131_vm15 = vcmp.eq.s32.totalorder %v11130_v35, 1  ;;  %vm11134_vm11 = vcmp.eq.s32.totalorder %v11133_v62, 1  ;;  %vm11137_vm7 = vcmp.eq.s32.totalorder %v11136_v27, 1  ;;  %3034 = vrot.lane.b32.xlu0 %v2958_v8, %s5028_s0  ;;  %v11142_v52 = vld [vmem:[#allocation60_spill] sm:$0xff]  ;;  %v11145_v21 = vld [vmem:[#allocation35_spill] sm:$0xff]  ;;  %vm11157_vm10 = vmmov %vm11128_vm3 }
 0x28b   :  { %v8163_v55 = vsel %vm11131_vm15, 0.0, %v7997_v13  ;;  %v8168_v40 = vsel %vm11134_vm11, 0.0, %v8008_v61  ;;  %v8173_v26 = vsel %vm11137_vm7, 0.0, %v8013_v41  ;;  %vm11140_vm9 = vcmp.eq.s32.totalorder %v11139_v33, 1  ;;  %3036 = vrot.lane.b32.xlu1 %v2960_v23, %s5028_s0  ;;  %v11158_v62 = vld [vmem:[#allocation59_spill] sm:$0xff]  ;;  %v11161_v27 = vld [vmem:[#allocation92_spill] sm:$0xff] }
 0x28c   :  { %11132 = vst [vmem:[#allocation107_spill] sm:$0xff] %v8163_v55  ;;  %11135 = vst [vmem:[#allocation135_spill] sm:$0xff] %v8168_v40  ;;  %v8177_v42 = vsel %vm11140_vm9, 0.0, %v2820_v38  ;;  %v8181_v13 = vsel %vm2748_vm2, %v2700_v1, %v2796_v4  ;;  %vm11143_vm1 = vcmp.eq.s32.totalorder %v11142_v52, 1  ;;  %vm11146_vm6 = vcmp.eq.s32.totalorder %v11145_v21, 1  ;;  %v11148_v38 = vld [vmem:[#allocation67_spill] sm:$0xff] }
 0x28d   :  { %11138 = vst [vmem:[#allocation101_spill] sm:$0xff] %v8173_v26  ;;  %11141 = vst [vmem:[#allocation83_spill] sm:$0xff] %v8177_v42  ;;  %v8186_v61 = vsel %vm11143_vm1, 0.0, %v8032_v28  ;;  %v8190_v6 = vsel %vm11146_vm6, 0.0, %v2822_v56  ;;  %v2691_v41 = vadd.f32 %v11105_v0, %v2636_v22  ;;  %vm2537_vm12 = vcmp.eq.s32.totalorder %v8062_v9, 1  ;;  %v11154_v4 = vld [vmem:[#allocation39_spill] sm:$0xff]  ;;  %v8207_v56 = vpop.permute.xlu1 %2480 }
 0x28e   :  { %11144 = vst [vmem:[#allocation111_spill] sm:$0xff] %v8186_v61  ;;  %11147 = vst [vmem:[#allocation132_spill] sm:$0xff] %v8190_v6  ;;  %vm11149_vm14 = vcmp.eq.s32.totalorder %v11148_v38, 1  ;;  %vm11152_vm2 = vcmp.eq.s32.totalorder %v11151_v30, 1  ;;  %vm11155_vm4 = vcmp.eq.s32.totalorder %v11154_v4, 1  ;;  %v2966_v8 = vrot.slane %v8142_v60, 1  ;;  %v8229_v30 = vpop.permute.xlu0 %2489 }
 0x28f   :  { %v8196_v34 = vsel %vm11149_vm14, 0.0, %v2823_v17  ;;  %v8200_v1 = vsel %vm11152_vm2, 0.0, %v2824_v59  ;;  %v8204_v28 = vsel %vm11155_vm4, 0.0, %v2825_v44  ;;  %v2967_v22 = vrot.slane %v8148_v45, 1  ;;  %v11164_v33 = vld [vmem:[#allocation51_spill] sm:$0xff]  ;;  %v11178_v4 = vld [vmem:[#allocation68_spill] sm:$0xff] }
 0x290   :  { %11150 = vst [vmem:[#allocation108_spill] sm:$0xff] %v8196_v34  ;;  %11153 = vst [vmem:[#allocation91_spill] sm:$0xff] %v8200_v1  ;;  %v2969_v23 = vrot.slane %v8152_v29, 1  ;;  %v2965_v35 = vsel %vm11128_vm3, %v2962_v39, %v2964_v15  ;;  %v2963_v17 = vsel %vm11157_vm10, %v2961_v47, %v2962_v39  ;;  %vm11159_vm15 = vcmp.eq.s32.totalorder %v11158_v62, 1  ;;  %v11167_v21 = vld [vmem:[#allocation47_spill] sm:$0xff] }
 0x291   :  { %11156 = vst [vmem:[#allocation134_spill] sm:$0xff] %v8204_v28  ;;  %v8215_v59 = vsel %vm11159_vm15, 0.0, %v2826_v31  ;;  %vm11162_vm11 = vcmp.eq.s32.totalorder %v11161_v27, 1  ;;  %vm11165_vm7 = vcmp.eq.s32.totalorder %v11164_v33, 1  ;;  %vm11168_vm9 = vcmp.eq.s32.totalorder %v11167_v21, 1  ;;  %3040 = vrot.lane.b32.xlu1 %v2965_v35, %s5028_s0  ;;  %3038 = vrot.lane.b32.xlu0 %v2963_v17, %s5028_s0  ;;  %v11170_v31 = vld [vmem:[#allocation72_spill] sm:$0xff]  ;;  %vm11182_vm15 = vmmov %vm11157_vm10 }
 0x292   :  { %11160 = vst [vmem:[#allocation103_spill] sm:$0xff] %v8215_v59  ;;  %v8219_v44 = vsel %vm11162_vm11, 0.0, %v2827_v2  ;;  %v8223_v52 = vsel %vm11165_vm7, 0.0, %v2828_v24  ;;  %v8227_v38 = vsel %vm11168_vm9, 0.0, %v2829_v18  ;;  %vm11171_vm1 = vcmp.eq.s32.totalorder %v11170_v31, 1  ;;  %v11173_v2 = vld [vmem:[#allocation77_spill] sm:$0xff]  ;;  %vm11188_vm9 = vmmov %vm11157_vm10 }
 0x293   :  { %11163 = vst [vmem:[#allocation140_spill] sm:$0xff] %v8219_v44  ;;  %11166 = vst [vmem:[#allocation136_spill] sm:$0xff] %v8223_v52  ;;  %v8235_v47 = vsel %vm11171_vm1, 0.0, %v2830_v12  ;;  %vm11174_vm6 = vcmp.eq.s32.totalorder %v11173_v2, 1  ;;  %v11176_v24 = vld [vmem:[#allocation44_spill] sm:$0xff]  ;;  %vm11179_vm2 = vcmp.eq.s32.totalorder %v11178_v4, 1  ;;  %v2970_v33 = vsel %vm11182_vm15, %v2967_v22, %v2969_v23  ;;  %v8266_v4 = vpop.permute.xlu1 %2486 }
 0x294   :  { %11169 = vst [vmem:[#allocation133_spill] sm:$0xff] %v8227_v38  ;;  %11172 = vst [vmem:[#allocation138_spill] sm:$0xff] %v8235_v47  ;;  %v8239_v39 = vsel %vm11174_vm6, 0.0, %v2832_v49  ;;  %vm11177_vm14 = vcmp.eq.s32.totalorder %v11176_v24, 1  ;;  %v2787_v18 = vmul.f32 0.2, %v2691_v41 }
 0x295   :  { %11175 = vst [vmem:[#allocation78_spill] sm:$0xff] %v8239_v39  ;;  %v8243_v15 = vsel %vm11177_vm14, 0.0, %v2834_v32  ;;  %v8247_v62 = vsel %vm11179_vm2, 0.0, %v2836_v5  ;;  %vm2739_vm4 = vcmp.ge.f32.partialorder %v2691_v41, 0.0  ;;  %v2971_v35 = vrot.slane %v8163_v55, 1  ;;  %v11181_v17 = vld [vmem:[#allocation41_spill] sm:$0xff]  ;;  %3044 = vrot.lane.b32.xlu1 %v2970_v33, %s5028_s0  ;;  %vm11189_vm1 = vmmov %vm11188_vm9 }
 0x296   :  { %11180 = vst [vmem:[#allocation75_spill] sm:$0xff] %v8247_v62  ;;  %v2583_v12 = vsel %vm2535_vm5, %v7490_v54, %v11181_v17  ;;  %v2972_v49 = vrot.slane %v8168_v40, 1  ;;  %v2974_v27 = vrot.slane %v8173_v26, 1  ;;  %vm2544_vm3 = vcmp.eq.s32.totalorder %v8229_v30, 1  ;;  %v11183_v5 = vld [vmem:[#allocation64_spill] sm:$0xff]  ;;  %vm11193_vm6 = vmmov %vm11189_vm1  ;;  %v11207_v40 = vld [vmem:[#allocation117_spill] sm:$0xff] }
 0x297   :  { %v2968_v32 = vsel %vm11157_vm10, %v2966_v8, %v2967_v22  ;;  %vm11184_vm11 = vcmp.eq.s32.totalorder %v11183_v5, 1  ;;  %v2976_v31 = vrot.slane %v8177_v42, 1  ;;  %v2977_v2 = vrot.slane %v8186_v61, 1  ;;  %v11187_v61 = vld [vmem:[#allocation9_spill] sm:$0xff]  ;;  %v11205_v26 = vld [vmem:[#allocation120_spill] sm:$0xff] }
 0x298   :  { %v8261_v21 = vsel %vm11184_vm11, 0.0, %v2838_v3  ;;  %v2979_v24 = vrot.slane %v8190_v6, 1  ;;  %3042 = vrot.lane.b32.xlu0 %v2968_v32, %s5028_s0  ;;  %v2835_v17 = vsel %vm2739_vm4, %v2691_v41, %v2787_v18  ;;  %v2981_v8 = vrot.slane %v8196_v34, 1 }
 0x299   :  { %11185 = vst [vmem:[#allocation95_spill] sm:$0xff] %v8261_v21  ;;  %v2982_v22 = vrot.slane %v8200_v1, 1  ;;  %v2638_v3 = vmul.f32 %v11090_v14, %v2583_v12  ;;  %v2984_v23 = vrot.slane %v8204_v28, 1  ;;  %v2585_v6 = vsel %vm2537_vm12, %v7490_v54, %v11186_v16  ;;  %v8306_v16 = vpop.permute.xlu1 %2492 }
 0x29a   :  { %v2587_v41 = vsel %vm2539_vm0, %v7490_v54, %v11187_v61  ;;  %v2987_v18 = vrot.slane %v8219_v44, 1  ;;  %vm2541_vm7 = vcmp.eq.s32.totalorder %v8207_v56, 1  ;;  %v2975_v12 = vsel %vm11188_vm9, %v2972_v49, %v2974_v27  ;;  %v8298_v44 = vpop.permute.xlu0 %2495  ;;  %v11194_v61 = vld [vmem:[#allocation119_spill] sm:$0xff] }
 0x29b   :  { %v2973_v32 = vsel %vm11189_vm1, %v2971_v35, %v2972_v49  ;;  %v8289_v33 = vsel %vm2533_vm13, 0.0, %v2835_v17  ;;  %v2989_v5 = vrot.slane %v8223_v52, 1  ;;  %3048 = vrot.lane.b32.xlu1 %v2975_v12, %s5028_s0  ;;  %v2693_v27 = vadd.f32 %v11105_v0, %v2638_v3  ;;  %v11191_v49 = vld [vmem:[#allocation11_spill] sm:$0xff]  ;;  %vm11192_vm13 = vmmov %vm11189_vm1  ;;  %v11196_v3 = vld [vmem:[#allocation118_spill] sm:$0xff] }
 0x29c   :  { %11190 = vst [vmem:[#allocation88_spill] sm:$0xff] %v8289_v33  ;;  %3046 = vrot.lane.b32.xlu0 %v2973_v32, %s5028_s0  ;;  %v2640_v11 = vmul.f32 %v11090_v14, %v2585_v6  ;;  %v2642_v35 = vmul.f32 %v11090_v14, %v2587_v41  ;;  %v2589_v17 = vsel %vm2541_vm7, %v7490_v54, %v11191_v49  ;;  %v11195_v28 = vrot.slane %v11194_v61, 4  ;;  %v11200_v41 = vld [vmem:[#allocation116_spill] sm:$0xff]  ;;  %v11216_v61 = vld [vmem:[#allocation50_spill] sm:$0xff] }
 0x29d   :  { %v2978_v12 = vsel %vm11192_vm13, %v2976_v31, %v2977_v2  ;;  %v2980_v32 = vsel %vm11193_vm6, %v2977_v2, %v2979_v24  ;;  %v11197_v52 = vrot.slane %v11196_v3, 4  ;;  %vm11198_vm14 = vcmask 1043456   ;;  %v11211_v3 = vld [vmem:[#allocation121_spill] sm:$0xff]  ;;  %v11230_v6 = vld [vmem:[#allocation6_spill] sm:$0xff] }
 0x29e   :  { %v11201_v34 = vrot.slane %v11200_v41, 4  ;;  %v11202_v42 = vmov %v11195_v28  ;;  %vm11203_vm2 = vmmov %vm11198_vm14  ;;  %v11206_v31 = vrot.slane %v11205_v26, 4  ;;  %v11208_v2 = vrot.slane %v11207_v40, 4 }
 0x29f   :  { %v8315_v1 = vsel %vm11198_vm14, %v11197_v52, %v11195_v28  ;;  %vm11209_vm4 = vmmov %vm11203_vm2  ;;  %v11212_v55 = vrot.slane %v11211_v3, 4  ;;  %vm2546_vm15 = vcmp.eq.s32.totalorder %v8298_v44, 1  ;;  %3052 = vrot.lane.b32.xlu1 %v2980_v32, %s5028_s0  ;;  %v2695_v3 = vadd.f32 %v11105_v0, %v2640_v11  ;;  %v11228_v32 = vld [vmem:[#allocation8_spill] sm:$0xff] }
 0x2a0   :  { %11199 = vst [vmem:[#allocation105_spill] sm:$0xff] %v8315_v1  ;;  %v8323_v49 = vsel %vm11203_vm2, %v11202_v42, %v11201_v34  ;;  %v8330_v24 = vsel %vm11209_vm4, %v11208_v2, %v11206_v31  ;;  %v11213_v28 = vmov %v11206_v31  ;;  %vm11214_vm10 = vmmov %vm11203_vm2  ;;  %v2592_v42 = vsel %vm2544_vm3, %v7490_v54, %v11216_v61  ;;  %3050 = vrot.lane.b32.xlu0 %v2978_v12, %s5028_s0  ;;  %v11217_v34 = vld [vmem:[#allocation3_spill] sm:$0xff]  ;;  %v11219_v31 = vld [vmem:[#allocation122_spill] sm:$0xff] }
 0x2a1   :  { %11204 = vst [vmem:[#allocation102_spill] sm:$0xff] %v8323_v49  ;;  %11210 = vst [vmem:[#allocation99_spill] sm:$0xff] %v8330_v24  ;;  %v8337_v52 = vsel %vm11214_vm10, %v11213_v28, %v11212_v55  ;;  %v11218_v26 = vrot.slane %v11217_v34, 4  ;;  %v11220_v55 = vrot.slane %v11219_v31, 4  ;;  %vm2543_vm9 = vcmp.eq.s32.totalorder %v8266_v4, 1  ;;  %v11223_v28 = vld [vmem:[#allocation4_spill] sm:$0xff] }
 0x2a2   :  { %11215 = vst [vmem:[#allocation2_spill] sm:$0xff] %v8337_v52  ;;  %vm11221_vm11 = vmmov %vm11203_vm2  ;;  %v11224_v61 = vrot.slane %v11223_v28, 4  ;;  %v11229_v40 = vrot.slane %v11228_v32, 4  ;;  %v11231_v29 = vrot.slane %v11230_v6, 4  ;;  %vm2741_vm6 = vcmp.ge.f32.partialorder %v2693_v27, 0.0  ;;  %v8379_v6 = vpop.permute.xlu1 %2498  ;;  %v11248_v32 = vld [vmem:[#allocation126_spill] sm:$0xff] }
 0x2a3   :  { %v8353_v2 = vsel %vm11221_vm11, %v11220_v55, %v11218_v26  ;;  %v11225_v41 = vmov %v11218_v26  ;;  %vm11226_vm1 = vmmov %vm11203_vm2  ;;  %v2789_v26 = vmul.f32 0.2, %v2693_v27  ;;  %v2697_v11 = vadd.f32 %v11105_v0, %v2642_v35 }
 0x2a4   :  { %11222 = vst [vmem:[#allocation94_spill] sm:$0xff] %v8353_v2  ;;  %v8362_v12 = vsel %vm11226_vm1, %v11225_v41, %v11224_v61  ;;  %vm11232_vm13 = vmmov %vm11226_vm1  ;;  %v2644_v55 = vmul.f32 %v11090_v14, %v2589_v17  ;;  %vm11234_vm14 = vcmask 1046528   ;;  %v11236_v41 = vsub.f32 1.0, %v8315_v1  ;;  %v11240_v17 = vld [vmem:[#allocation98_spill] sm:$0xff] }
 0x2a5   :  { %11227 = vst [vmem:[#allocation104_spill] sm:$0xff] %v8362_v12  ;;  %v8369_v31 = vsel %vm11232_vm13, %v11231_v29, %v11229_v40  ;;  %v2985_v28 = vsel %vm11234_vm14, %v2982_v22, %v2984_v23  ;;  %vm11235_vm2 = vmmov %vm11234_vm14  ;;  %vm11237_vm4 = vcmask 7168   ;;  %v11238_v29 = vsub.f32 1.0, %v8323_v49  ;;  %v11242_v40 = vld [vmem:[#allocation90_spill] sm:$0xff] }
 0x2a6   :  { %11233 = vst [vmem:[#allocation112_spill] sm:$0xff] %v8369_v31  ;;  %v2983_v34 = vsel %vm11235_vm2, %v2981_v8, %v2982_v22  ;;  %v3871_v61 = vsel %vm11237_vm4, %v11236_v41, 0.0  ;;  %3056 = vrot.lane.b32.xlu1 %v2985_v28, %s5028_s0  ;;  %vm11239_vm10 = vmmov %vm11237_vm4  ;;  %v11241_v23 = vrot.slane %v11240_v17, 4  ;;  %v11243_v8 = vrot.slane %v11242_v40, 4  ;;  %v11246_v41 = vld [vmem:[#allocation123_spill] sm:$0xff]  ;;  %v11251_v28 = vld [vmem:[#allocation125_spill] sm:$0xff] }
 0x2a7   :  { %3054 = vrot.lane.b32.xlu0 %v2983_v34, %s5028_s0  ;;  %v3872_v35 = vsel %vm11239_vm10, %v11238_v29, 0.0  ;;  %vm11244_vm11 = vmmov %vm11226_vm1  ;;  %v11247_v1 = vrot.slane %v11246_v41, 4  ;;  %v11249_v45 = vrot.slane %v11248_v32, 4  ;;  %v11252_v34 = vrot.slane %v11251_v28, 4  ;;  %v11256_v17 = vld [vmem:[#allocation58_spill] sm:$0xff]  ;;  %v11257_v40 = vld [vmem:[#allocation128_spill] sm:$0xff] }
 0x2a8   :  { %v8391_v22 = vsel %vm11244_vm11, %v11243_v8, %v11241_v23  ;;  %vm11254_vm13 = vmmov %vm11226_vm1  ;;  %vm2743_vm14 = vcmp.ge.f32.partialorder %v2695_v3, 0.0  ;;  %v2591_v23 = vsel %vm2543_vm9, %v7490_v54, %v11256_v17  ;;  %v11258_v8 = vrot.slane %v11257_v40, 4 }
 0x2a9   :  { %11245 = vst [vmem:[#allocation109_spill] sm:$0xff] %v8391_v22  ;;  %v8398_v60 = vsel %vm11226_vm1, %v11249_v45, %v11247_v1  ;;  %v11253_v49 = vmov %v11247_v1  ;;  %v11259_v22 = vld [vmem:[#allocation127_spill] sm:$0xff]  ;;  %vm11261_vm2 = vmmov %vm11226_vm1  ;;  %v11263_v1 = vld [vmem:[#allocation130_spill] sm:$0xff]  ;;  %vm2545_vm10 = vcmp.eq.s32.totalorder %v8306_v16, 1  ;;  %vm2547_vm11 = vcmp.eq.s32.totalorder %v8379_v6, 1 }
 0x2aa   :  { %11250 = vst [vmem:[#allocation114_spill] sm:$0xff] %v8398_v60  ;;  %v8405_v29 = vsel %vm11254_vm13, %v11253_v49, %v11252_v34  ;;  %v11260_v32 = vrot.slane %v11259_v22, 4  ;;  %v11264_v28 = vrot.slane %v11263_v1, 4  ;;  %v11265_v41 = vmov %v11258_v8  ;;  %vm11266_vm4 = vmmov %vm11226_vm1 }
 0x2ab   :  { %11255 = vst [vmem:[#allocation113_spill] sm:$0xff] %v8405_v29  ;;  %v2837_v34 = vsel %vm2741_vm6, %v2693_v27, %v2789_v26  ;;  %v2791_v29 = vmul.f32 0.2, %v2695_v3  ;;  %v2699_v60 = vadd.f32 %v11105_v0, %v2644_v55  ;;  %v11268_v22 = vrot.slane %v8215_v59, 1 }
 0x2ac   :  { %v8416_v45 = vsel %vm11261_vm2, %v11260_v32, %v11258_v8  ;;  %v8423_v49 = vsel %vm11266_vm4, %v11265_v41, %v11264_v28  ;;  %vm11269_vm1 = vcmask 1046528   ;;  %v3873_v32 = vadd.f32 %v3872_v35, %v3871_v61  ;;  %v11273_v28 = vld [vmem:[#allocation61_spill] sm:$0xff]  ;;  %v11275_v41 = vld [vmem:[#allocation15_spill] sm:$0xff] }
 0x2ad   :  { %11262 = vst [vmem:[#allocation7_spill] sm:$0xff] %v8416_v45  ;;  %11267 = vst [vmem:[#allocation115_spill] sm:$0xff] %v8423_v49  ;;  %v2988_v17 = vsel %vm11269_vm1, %v11268_v22, %v2987_v18  ;;  %v2647_v40 = vmul.f32 %v11090_v14, %v2592_v42  ;;  %v2646_v1 = vmul.f32 %v11090_v14, %v2591_v23  ;;  %v11271_v27 = vsub.f32 1.0, %v8330_v24  ;;  %v11274_v42 = vld [vmem:[#allocation30_spill] sm:$0xff] }
 0x2ae   :  { %vm11270_vm13 = vmmov %vm11269_vm1  ;;  %3058 = vrot.lane.b32.xlu0 %v2988_v17, %s5028_s0  ;;  %vm11272_vm6 = vcmask 7168   ;;  %vm2745_vm2 = vcmp.ge.f32.partialorder %v2697_v11, 0.0  ;;  %v2593_v61 = vsel %vm2545_vm10, %v7490_v54, %v11274_v42  ;;  %v8451_v35 = vsel %vm2535_vm5, 0.0, %v2837_v34 }
 0x2af   :  { %v2990_v8 = vsel %vm11270_vm13, %v2987_v18, %v2989_v5  ;;  %v3874_v26 = vsel %vm11272_vm6, %v11271_v27, 0.0  ;;  %v2594_v5 = vsel %vm2546_vm15, %v7490_v54, %v11273_v28  ;;  %v2793_v18 = vmul.f32 0.2, %v2697_v11  ;;  %vm11281_vm5 = vmmov %vm11269_vm1 }
 0x2b0   :  { %3060 = vrot.lane.b32.xlu1 %v2990_v8, %s5028_s0  ;;  %v2839_v23 = vsel %vm2743_vm14, %v2695_v3, %v2791_v29  ;;  %vm2747_vm4 = vcmp.ge.f32.partialorder %v2699_v60, 0.0  ;;  %v2595_v22 = vsel %vm2547_vm11, %v7490_v54, %v11275_v41  ;;  %v2795_v17 = vmul.f32 0.2, %v2699_v60  ;;  %v11276_v8 = vld [vmem:[#allocation69_spill] sm:$0xff]  ;;  %vm11283_vm14 = vmmov %vm11272_vm6 }
 0x2b1   :  { %v11277_v27 = vrot.slane %v11276_v8, 1  ;;  %v11278_v28 = vrot.slane %v8235_v47, 1  ;;  %v11280_v37 = vrot.slane %v8227_v38, 1  ;;  %v3875_v3 = vadd.f32 %v3874_v26, %v3873_v32  ;;  %vm11287_vm13 = vmmov %vm11269_vm1 }
 0x2b2   :  { %v2701_v29 = vadd.f32 %v11105_v0, %v2646_v1  ;;  %v2648_v49 = vmul.f32 %v11090_v14, %v2593_v61  ;;  %v11282_v54 = vsub.f32 1.0, %v8337_v52  ;;  %v3001_v32 = vrot.slane %v8289_v33, 1  ;;  %vm11290_vm6 = vmmov %vm11269_vm1 }
 0x2b3   :  { %v2995_v55 = vsel %vm11269_vm1, %v11278_v28, %v11277_v27  ;;  %v11279_v42 = vmov %v11278_v28  ;;  %v3365_v28 = vld [vmem:[%s10038_s5 + $0x10] sm:$0xff]  ;;  %v3002_v1 = vrot.slane %v8247_v62, 1  ;;  %v2649_v26 = vmul.f32 %v11090_v14, %v2594_v5 }
 0x2b4   :  { %v2993_v34 = vsel %vm11281_vm5, %v11280_v37, %v11279_v42  ;;  %3064 = vrot.lane.b32.xlu1 %v2995_v55, %s5028_s0  ;;  %v3876_v41 = vsel %vm11283_vm14, %v11282_v54, 0.0  ;;  %v2650_v55 = vmul.f32 %v11090_v14, %v2595_v22  ;;  %4953 = vmatprep.subr.mxu1 %v3365_v28  ;;  %v2702_v61 = vadd.f32 %v11105_v0, %v2647_v40  ;;  %vm11294_vm5 = vmmov %vm11269_vm1 }
 0x2b5   :  { %3062 = vrot.lane.b32.xlu0 %v2993_v34, %s5028_s0  ;;  %v3004_v42 = vrot.slane %v8451_v35, 1  ;;  %v8487_v37 = vsel %vm2537_vm12, 0.0, %v2839_v23  ;;  %v2841_v34 = vsel %vm2745_vm2, %v2697_v11, %v2793_v18  ;;  %4954 = vmatpush3.msra.mxu1 %v3365_v28  ;;  %v2843_v54 = vsel %vm2747_vm4, %v2699_v60, %v2795_v17  ;;  %vm11292_vm12 = vmmov %vm11283_vm14  ;;  %v3364_v17 = vld [vmem:[%s10038_s5 + $0x8] sm:$0xff] }
 0x2b6   :  { %11284 = vst [vmem:[#allocation124_spill] sm:$0xff] %v8487_v37  ;;  %v11285_v27 = vrot.slane %v8003_v36, 1  ;;  %v11286_v5 = vrot.slane %v8239_v39, 1  ;;  %v11288_v22 = vrot.slane %v8243_v15, 1  ;;  %v3877_v9 = vadd.f32 %v3876_v41, %v3875_v3  ;;  %4955 = vmatprep.subr.mxu1 %v3364_v17 }
 0x2b7   :  { %v2797_v23 = vmul.f32 0.2, %v2701_v29  ;;  %v2703_v52 = vadd.f32 %v11105_v0, %v2648_v49  ;;  %v11291_v60 = vsub.f32 1.0, %v8353_v2  ;;  %v10405_v18 = vsub.f32 1.0, %v8362_v12  ;;  %4956 = vmatpush3.msra.mxu1 %v3364_v17 }
 0x2b8   :  { %v2998_v14 = vsel %vm11287_vm13, %v11286_v5, %v11285_v27  ;;  %v11289_v40 = vmov %v11285_v27  ;;  %v3006_v27 = vrot.slane %v8261_v21, 1  ;;  %v2704_v3 = vadd.f32 %v11105_v0, %v2649_v26 }
 0x2b9   :  { %v3000_v45 = vsel %vm11290_vm6, %v11289_v40, %v11288_v22  ;;  %3066 = vrot.lane.b32.xlu0 %v2998_v14, %s5028_s0  ;;  %v3878_v11 = vsel %vm11292_vm12, %v11291_v60, 0.0  ;;  %vm2749_vm2 = vcmp.ge.f32.partialorder %v2701_v29, 0.0  ;;  %v2705_v49 = vadd.f32 %v11105_v0, %v2650_v55  ;;  %vm11297_vm6 = vmmov %vm11269_vm1 }
 0x2ba   :  { %3068 = vrot.lane.b32.xlu1 %v3000_v45, %s5028_s0  ;;  %vm2750_vm4 = vcmp.ge.f32.partialorder %v2702_v61, 0.0  ;;  %v2798_v45 = vmul.f32 0.2, %v2702_v61  ;;  %v3007_v41 = vrot.slane %v8487_v37, 1  ;;  %v8517_v28 = vsel %vm2539_vm0, 0.0, %v2841_v34  ;;  %vm11295_vm0 = vmmov %vm11292_vm12 }
 0x2bb   :  { %11293 = vst [vmem:[#allocation18_spill] sm:$0xff] %v8517_v28  ;;  %v8521_v5 = vsel %vm2541_vm7, 0.0, %v2843_v54  ;;  %v3005_v14 = vsel %vm11269_vm1, %v3002_v1, %v3004_v42  ;;  %v3003_v26 = vsel %vm11294_vm5, %v3001_v32, %v3002_v1  ;;  %v3879_v22 = vadd.f32 %v3878_v11, %v3877_v9  ;;  %v11298_v9 = vld [vmem:[#allocation142_spill] sm:$0xff]  ;;  %vm11300_vm12 = vmmov %vm11269_vm1 }
 0x2bc   :  { %v2845_v0 = vsel %vm2749_vm2, %v2701_v29, %v2797_v23  ;;  %v2799_v55 = vmul.f32 0.2, %v2703_v52  ;;  %v3880_v46 = vsel %vm11295_vm0, %v10405_v18, 0.0  ;;  %v10404_v34 = vsub.f32 1.0, %v8369_v31  ;;  %vm11306_vm2 = vmmov %vm11269_vm1 }
 0x2bd   :  { %3070 = vrot.lane.b32.xlu0 %v3003_v26, %s5028_s0  ;;  %vm2752_vm14 = vcmp.ge.f32.partialorder %v2704_v3, 0.0  ;;  %v2800_v56 = vmul.f32 0.2, %v2704_v3  ;;  %vm2751_vm7 = vcmp.ge.f32.partialorder %v2703_v52, 0.0  ;;  %v2801_v54 = vmul.f32 0.2, %v2705_v49  ;;  %vm11317_vm5 = vmmov %vm11295_vm0 }
 0x2be   :  { %3072 = vrot.lane.b32.xlu1 %v3005_v14, %s5028_s0  ;;  %v2846_v42 = vsel %vm2750_vm4, %v2702_v61, %v2798_v45  ;;  %v3011_v32 = vrot.slane %v8517_v28, 1  ;;  %v3014_v29 = vrot.slane %v8521_v5, 1  ;;  %vm2753_vm13 = vcmp.ge.f32.partialorder %v2705_v49, 0.0  ;;  %v3363_v61 = vld [vmem:[%s10038_s5] sm:$0xff]  ;;  %v11301_v45 = vld [vmem:[#allocation13_spill] sm:$0xff]  ;;  %vm11307_vm4 = vmmov %vm11269_vm1  ;;  %s5030_s5 = smov 16  }
 0x2bf   :  { %v8536_v1 = vsel %vm2543_vm9, 0.0, %v2845_v0  ;;  %v3008_v40 = vsel %vm11297_vm6, %v3006_v27, %v3007_v41  ;;  %v11299_v23 = vrot.slane %v11298_v9, 1  ;;  %v3881_v11 = vadd.f32 %v3880_v46, %v3879_v22  ;;  %vm11302_vm9 = vmmov %vm11295_vm0  ;;  %v11303_v14 = vld [vmem:[#allocation82_spill] sm:$0xff]  ;;  %4957 = vmatprep.subr.mxu1 %v3363_v61 }
 0x2c0   :  { %11296 = vst [vmem:[#allocation23_spill] sm:$0xff] %v8536_v1  ;;  %v2847_v17 = vsel %vm2751_vm7, %v2703_v52, %v2799_v55  ;;  %v10403_v4 = vsub.f32 1.0, %v11301_v45  ;;  %v3882_v27 = vsel %vm11302_vm9, %v10404_v34, 0.0  ;;  %v3012_v26 = vrot.slane %v11303_v14, 1  ;;  %4958 = vmatpush3.msra.mxu1 %v3363_v61  ;;  %vm11320_vm7 = vmmov %vm11317_vm5 }
 0x2c1   :  { %v3010_v60 = vsel %vm11300_vm12, %v3007_v41, %v11299_v23  ;;  %3074 = vrot.lane.b32.xlu0 %v3008_v40, %s5028_s0  ;;  %v2849_v0 = vsel %vm2753_vm13, %v2705_v49, %v2801_v54  ;;  %v8555_v41 = vsel %vm2542_vm8, 0.0, %v8181_v13  ;;  %v8559_v52 = vsel %vm2544_vm3, 0.0, %v2846_v42  ;;  %v11308_v13 = vld [vmem:[#allocation19_spill] sm:$0xff]  ;;  %vm11309_vm8 = vmmov %vm11295_vm0 }
 0x2c2   :  { %3076 = vrot.lane.b32.xlu1 %v3010_v60, %s5028_s0  ;;  %11304 = vst [vmem:[#allocation129_spill] sm:$0xff] %v8555_v41  ;;  %v2848_v22 = vsel %vm2752_vm14, %v2704_v3, %v2800_v56  ;;  %v3017_v55 = vrot.slane %v8536_v1, 1  ;;  %v8565_v46 = vsel %vm2545_vm10, 0.0, %v2847_v17  ;;  %v3015_v49 = vsel %vm11306_vm2, %v3012_v26, %v3014_v29  ;;  %vm11311_vm3 = vmmov %vm11269_vm1 }
 0x2c3   :  { %11305 = vst [vmem:[#allocation14_spill] sm:$0xff] %v8565_v46  ;;  %v3013_v54 = vsel %vm11307_vm4, %v3011_v32, %v3012_v26  ;;  %v3883_v53 = vadd.f32 %v3882_v27, %v3881_v11  ;;  %v10398_v40 = vsub.f32 1.0, %v11308_v13  ;;  %v8572_v30 = vsel %vm2547_vm11, 0.0, %v2849_v0  ;;  %vm11312_vm10 = vmmov %vm11269_vm1  ;;  %v11313_v11 = vld [vmem:[#allocation16_spill] sm:$0xff] }
 0x2c4   :  { %v3884_v16 = vsel %vm11309_vm8, %v10403_v4, 0.0  ;;  %v3016_v3 = vrot.slane %v8555_v41, 1  ;;  %v3019_v56 = vrot.slane %v8559_v52, 1  ;;  %v8583_v42 = vsel %vm2546_vm15, 0.0, %v2848_v22  ;;  %vm11314_vm11 = vmmov %vm11295_vm0  ;;  %v11338_v4 = vld [vmem:[#allocation135_spill] sm:$0xff] }
 0x2c5   :  { %3078 = vrot.lane.b32.xlu0 %v3013_v54, %s5028_s0  ;;  %11310 = vst [vmem:[#allocation131_spill] sm:$0xff] %v8583_v42  ;;  %v3021_v6 = vrot.slane %v8565_v46, 1  ;;  %v3024_v32 = vrot.slane %v8572_v30, 1  ;;  %v3885_v60 = vadd.f32 %v3884_v16, %v3883_v53  ;;  %v10401_v61 = vsub.f32 1.0, %v11313_v11  ;;  %vm11315_vm15 = vmmov %vm11269_vm1  ;;  %v11316_v54 = vld [vmem:[#allocation22_spill] sm:$0xff] }
 0x2c6   :  { %3080 = vrot.lane.b32.xlu1 %v3015_v49, %s5028_s0  ;;  %v3018_v29 = vsel %vm11311_vm3, %v3016_v3, %v3017_v55  ;;  %v3020_v23 = vsel %vm11312_vm10, %v3017_v55, %v3019_v56  ;;  %v3886_v44 = vsel %vm11314_vm11, %v10398_v40, 0.0  ;;  %v3022_v17 = vrot.slane %v8583_v42, 1  ;;  %vm11324_vm12 = vmmov %vm11317_vm5 }
 0x2c7   :  { %v3122_v27 = vrot.slane %v7971_v48, 2  ;;  %v3123_v26 = vrot.slane %v7975_v19, 2  ;;  %v3125_v0 = vrot.slane %v7979_v25, 2  ;;  %v3887_v49 = vadd.f32 %v3886_v44, %v3885_v60  ;;  %v11321_v60 = vld [vmem:[#allocation27_spill] sm:$0xff]  ;;  %vm11329_vm4 = vmmov %vm11317_vm5 }
 0x2c8   :  { %v3025_v22 = vsel %vm11315_vm15, %v3022_v17, %v3024_v32  ;;  %v3023_v55 = vsel %vm11269_vm1, %v3021_v6, %v3022_v17  ;;  %v10400_v53 = vsub.f32 1.0, %v11316_v54  ;;  %v3888_v16 = vsel %vm11317_vm5, %v10401_v61, 0.0  ;;  %vm11335_vm10 = vmmov %vm11329_vm4 }
 0x2c9   :  { %3082 = vrot.lane.b32.xlu0 %v3018_v29, %s5028_s0  ;;  %v3127_v3 = vrot.slane %v8021_v58, 2  ;;  %v3128_v56 = vrot.slane %v8036_v63, 2  ;;  %v3130_v25 = vrot.slane %v8040_v20, 2  ;;  %vm11318_vm0 = vcmask 1045504   ;;  %vm11342_vm1 = vmmov %vm11329_vm4 }
 0x2ca   :  { %3084 = vrot.lane.b32.xlu1 %v3020_v23, %s5028_s0  ;;  %v3126_v32 = vsel %vm11318_vm0, %v3123_v26, %v3125_v0  ;;  %vm11319_vm14 = vmmov %vm11318_vm0  ;;  %v3889_v29 = vadd.f32 %v3888_v16, %v3887_v49  ;;  %v3890_v23 = vsel %vm11320_vm7, %v10400_v53, 0.0  ;;  %v10399_v44 = vsub.f32 1.0, %v11321_v60  ;;  %v11325_v49 = vld [vmem:[#allocation36_spill] sm:$0xff] }
 0x2cb   :  { %v3124_v6 = vsel %vm11319_vm14, %v3122_v27, %v3123_v26  ;;  %v3132_v17 = vrot.slane %v8059_v43, 2  ;;  %v3133_v20 = vrot.slane %v8078_v51, 2  ;;  %v3135_v0 = vrot.slane %v8082_v50, 2  ;;  %vm11322_vm13 = vmmov %vm11318_vm0 }
 0x2cc   :  { %v3131_v27 = vsel %vm11322_vm13, %v3128_v56, %v3130_v25  ;;  %vm11323_vm6 = vmmov %vm11318_vm0  ;;  %v10402_v16 = vsub.f32 1.0, %v11325_v49  ;;  %v3140_v50 = vrot.slane %v8130_v57, 2  ;;  %v11332_v57 = vld [vmem:[#allocation80_spill] sm:$0xff]  ;;  %v3148_v34 = vrot.slane %v11338_v4, 2 }
 0x2cd   :  { %3086 = vrot.lane.b32.xlu0 %v3023_v55, %s5028_s0  ;;  %v3129_v26 = vsel %vm11323_vm6, %v3127_v3, %v3128_v56  ;;  %v3892_v55 = vsel %vm11324_vm12, %v10399_v44, 0.0  ;;  %vm11326_vm9 = vmmov %vm11318_vm0  ;;  %v11331_v44 = vld [vmem:[#allocation106_spill] sm:$0xff]  ;;  %v3145_v61 = vrot.slane %v11332_v57, 2  ;;  %v11339_v57 = vld [vmem:[#allocation101_spill] sm:$0xff] }
 0x2ce   :  { %3088 = vrot.lane.b32.xlu1 %v3025_v22, %s5028_s0  ;;  %v3891_v22 = vadd.f32 %v3890_v23, %v3889_v29  ;;  %v3136_v25 = vsel %vm11326_vm9, %v3133_v20, %v3135_v0  ;;  %vm11327_vm2 = vmmov %vm11318_vm0  ;;  %v11328_v29 = vld [vmem:[#allocation31_spill] sm:$0xff]  ;;  %v3894_v40 = vsel %vm11329_vm4, %v10402_v16, 0.0  ;;  %v3143_v53 = vrot.slane %v11331_v44, 2 }
 0x2cf   :  { %v3134_v3 = vsel %vm11327_vm2, %v3132_v17, %v3133_v20  ;;  %v10406_v23 = vsub.f32 1.0, %v11328_v29  ;;  %vm11333_vm8 = vmmov %vm11318_vm0  ;;  %v3150_v18 = vrot.slane %v11339_v57, 2  ;;  %v11346_v57 = vld [vmem:[#allocation132_spill] sm:$0xff] }
 0x2d0   :  { %v3893_v56 = vadd.f32 %v3892_v55, %v3891_v22  ;;  %vm11334_vm3 = vmmov %vm11318_vm0  ;;  %v11336_v55 = vld [vmem:[#allocation38_spill] sm:$0xff] }
 0x2d1   :  { %3202 = vrot.lane.b32.xlu0 %v3124_v6, %s5030_s5  ;;  %v3138_v6 = vrot.slane %v8126_v10, 2  ;;  %v3896_v22 = vsel %vm11335_vm10, %v10406_v23, 0.0  ;;  %v10407_v16 = vsub.f32 1.0, %v11336_v55  ;;  %vm11340_vm11 = vmmov %vm11318_vm0 }
 0x2d2   :  { %3204 = vrot.lane.b32.xlu1 %v3126_v32, %s5030_s5  ;;  %v3137_v32 = vrot.slane %v8105_v7, 2  ;;  %v3895_v20 = vadd.f32 %v3894_v40, %v3893_v56  ;;  %vm11341_vm15 = vmmov %vm11318_vm0  ;;  %v11343_v56 = vld [vmem:[#allocation45_spill] sm:$0xff] }
 0x2d3   :  { %v3141_v0 = vsel %vm11333_vm8, %v3138_v6, %v3140_v50  ;;  %v3146_v50 = vsel %vm11340_vm11, %v3143_v53, %v3145_v61  ;;  %v10408_v23 = vsub.f32 1.0, %v11343_v56  ;;  %vm11347_vm5 = vmmov %vm11318_vm0 }
 0x2d4   :  { %v3139_v17 = vsel %vm11334_vm3, %v3137_v32, %v3138_v6  ;;  %v3897_v32 = vadd.f32 %v3896_v22, %v3895_v20  ;;  %v3898_v6 = vsel %vm11342_vm1, %v10407_v16, 0.0  ;;  %v3151_v61 = vsel %vm11347_vm5, %v3148_v34, %v3150_v18  ;;  %vm11348_vm14 = vmmov %vm11342_vm1  ;;  %v11349_v22 = vld [vmem:[#allocation53_spill] sm:$0xff] }
 0x2d5   :  { %3206 = vrot.lane.b32.xlu0 %v3129_v26, %s5030_s5  ;;  %v3900_v20 = vsel %vm11348_vm14, %v10408_v23, 0.0  ;;  %v10409_v16 = vsub.f32 1.0, %v11349_v22  ;;  %vm11353_vm7 = vmmov %vm11318_vm0 }
 0x2d6   :  { %3208 = vrot.lane.b32.xlu1 %v3131_v27, %s5030_s5  ;;  %v11330_v27 = vld [vmem:[#allocation65_spill] sm:$0xff]  ;;  %vm11354_vm13 = vmmov %vm11318_vm0 }
 0x2d7   :  { %v3142_v26 = vrot.slane %v11330_v27, 2  ;;  %v3155_v27 = vrot.slane %v11346_v57, 2  ;;  %v11352_v57 = vld [vmem:[#allocation134_spill] sm:$0xff]  ;;  %vm11356_vm6 = vmmov %vm11342_vm1 }
 0x2d8   :  { %v3160_v44 = vrot.slane %v11352_v57, 2  ;;  %v3902_v23 = vsel %vm11356_vm6, %v10409_v16, 0.0  ;;  %v11358_v57 = vld [vmem:[#allocation136_spill] sm:$0xff]  ;;  %vm11359_vm12 = vmmov %vm11318_vm0 }
 0x2d9   :  { %3210 = vrot.lane.b32.xlu0 %v3134_v3, %s5030_s5  ;;  %v3144_v40 = vsel %vm11341_vm15, %v3142_v26, %v3143_v53  ;;  %v3899_v26 = vadd.f32 %v3898_v6, %v3897_v32  ;;  %v11355_v32 = vld [vmem:[#allocation49_spill] sm:$0xff]  ;;  %vm11360_vm9 = vmmov %vm11318_vm0 }
 0x2da   :  { %3212 = vrot.lane.b32.xlu1 %v3136_v25, %s5030_s5  ;;  %v11337_v25 = vld [vmem:[#allocation107_spill] sm:$0xff]  ;;  %v10410_v6 = vsub.f32 1.0, %v11355_v32  ;;  %vm11361_vm2 = vmmov %vm11342_vm1 }
 0x2db   :  { %v3147_v3 = vrot.slane %v11337_v25, 2  ;;  %v11345_v25 = vld [vmem:[#allocation111_spill] sm:$0xff]  ;;  %vm11363_vm4 = vmmov %vm11318_vm0 }
 0x2dc   :  { %v3153_v4 = vrot.slane %v11345_v25, 2  ;;  %vm11364_vm8 = vmmov %vm11318_vm0 }
 0x2dd   :  { %3214 = vrot.lane.b32.xlu0 %v3139_v17, %s5030_s5  ;;  %v3149_v53 = vsel %vm11318_vm0, %v3147_v3, %v3148_v34  ;;  %v3901_v3 = vadd.f32 %v3900_v20, %v3899_v26  ;;  %v3904_v26 = vsel %vm11361_vm2, %v10410_v6, 0.0  ;;  %v11362_v20 = vld [vmem:[#allocation55_spill] sm:$0xff]  ;;  %vm11365_vm3 = vmmov %vm11342_vm1 }
 0x2de   :  { %3216 = vrot.lane.b32.xlu1 %v3141_v0, %s5030_s5  ;;  %v11344_v0 = vld [vmem:[#allocation83_spill] sm:$0xff]  ;;  %v3156_v18 = vsel %vm11353_vm7, %v3153_v4, %v3155_v27  ;;  %v10411_v16 = vsub.f32 1.0, %v11362_v20  ;;  %vm11367_vm10 = vmmov %vm11318_vm0 }
 0x2df   :  { %v3152_v17 = vrot.slane %v11344_v0, 2  ;;  %v11351_v0 = vld [vmem:[#allocation91_spill] sm:$0xff]  ;;  %vm11368_vm11 = vmmov %vm11318_vm0 }
 0x2e0   :  { %v3158_v25 = vrot.slane %v11351_v0, 2  ;;  %v3165_v0 = vrot.slane %v11358_v57, 2  ;;  %v3168_v57 = vrot.slane %v8235_v47, 2  ;;  %vm11369_vm15 = vmmov %vm11342_vm1  ;;  %v11407_v47 = vld [vmem:[#allocation7_spill] sm:$0xff] }
 0x2e1   :  { %3218 = vrot.lane.b32.xlu0 %v3144_v40, %s5030_s5  ;;  %v3154_v34 = vsel %vm11354_vm13, %v3152_v17, %v3153_v4  ;;  %v3903_v17 = vadd.f32 %v3902_v23, %v3901_v3  ;;  %v11366_v3 = vld [vmem:[#allocation63_spill] sm:$0xff]  ;;  %vm11371_vm1 = vmmov %vm11318_vm0 }
 0x2e2   :  { %3220 = vrot.lane.b32.xlu1 %v3146_v50, %s5030_s5  ;;  %v11350_v50 = vld [vmem:[#allocation108_spill] sm:$0xff]  ;;  %v3161_v27 = vsel %vm11359_vm12, %v3158_v25, %v3160_v44  ;;  %v10412_v6 = vsub.f32 1.0, %v11366_v3  ;;  %vm11372_vm5 = vmmov %vm11318_vm0 }
 0x2e3   :  { %v3157_v40 = vrot.slane %v11350_v50, 2  ;;  %vm11374_vm0 = vmmov %vm11361_vm2 }
 0x2e4   :  { %vm11375_vm14 = vmmov %vm11371_vm1 }
 0x2e5   :  { %3222 = vrot.lane.b32.xlu0 %v3149_v53, %s5030_s5  ;;  %v11357_v53 = vld [vmem:[#allocation140_spill] sm:$0xff]  ;;  %v3159_v4 = vsel %vm11360_vm9, %v3157_v40, %v3158_v25  ;;  %v3905_v25 = vadd.f32 %v3904_v26, %v3903_v17  ;;  %v3906_v40 = vsel %vm11365_vm3, %v10411_v16, 0.0  ;;  %v3908_v17 = vsel %vm11369_vm15, %v10412_v6, 0.0  ;;  %v11370_v26 = vld [vmem:[#allocation71_spill] sm:$0xff]  ;;  %vm11376_vm7 = vmmov %vm11371_vm1 }
 0x2e6   :  { %3224 = vrot.lane.b32.xlu1 %v3151_v61, %s5030_s5  ;;  %v3162_v61 = vrot.slane %v8215_v59, 2  ;;  %v3163_v50 = vrot.slane %v11357_v53, 2  ;;  %v10413_v16 = vsub.f32 1.0, %v11370_v26  ;;  %vm11377_vm13 = vmmov %vm11374_vm0 }
 0x2e7   :  { %vm11379_vm6 = vmmov %vm11371_vm1 }
 0x2e8   :  { %v3166_v44 = vsel %vm11363_vm4, %v3163_v50, %v3165_v0  ;;  %v3164_v23 = vsel %vm11364_vm8, %v3162_v61, %v3163_v50  ;;  %v3907_v61 = vadd.f32 %v3906_v40, %v3905_v25  ;;  %v11373_v25 = vld [vmem:[#allocation66_spill] sm:$0xff]  ;;  %v3910_v6 = vsel %vm11374_vm0, %v10413_v16, 0.0  ;;  %vm11380_vm12 = vmmov %vm11371_vm1 }
 0x2e9   :  { %3226 = vrot.lane.b32.xlu0 %v3154_v34, %s5030_s5  ;;  %v3167_v34 = vrot.slane %v8227_v38, 2  ;;  %v10415_v40 = vsub.f32 1.0, %v11373_v25  ;;  %vm11381_vm9 = vmmov %vm11374_vm0 }
 0x2ea   :  { %3228 = vrot.lane.b32.xlu1 %v3156_v18, %s5030_s5  ;;  %v3170_v18 = vrot.slane %v11276_v8, 2  ;;  %v3173_v8 = vrot.slane %v8003_v36, 2  ;;  %vm11383_vm2 = vmmov %vm11371_vm1 }
 0x2eb   :  { %v3169_v50 = vsel %vm11368_vm11, %v3167_v34, %v3168_v57  ;;  %vm11384_vm4 = vmmov %vm11371_vm1 }
 0x2ec   :  { %v3171_v0 = vsel %vm11367_vm10, %v3168_v57, %v3170_v18  ;;  %v3909_v57 = vadd.f32 %v3908_v17, %v3907_v61  ;;  %v3912_v61 = vsel %vm11377_vm13, %v10415_v40, 0.0  ;;  %v11378_v17 = vld [vmem:[#allocation74_spill] sm:$0xff]  ;;  %vm11385_vm8 = vmmov %vm11374_vm0  ;;  %v3195_v40 = vrot.slane %v8559_v52, 2 }
 0x2ed   :  { %3230 = vrot.lane.b32.xlu0 %v3159_v4, %s5030_s5  ;;  %v3175_v4 = vrot.slane %v8243_v15, 2  ;;  %v3180_v15 = vrot.slane %v8451_v35, 2  ;;  %v3183_v35 = vrot.slane %v8487_v37, 2  ;;  %v10414_v16 = vsub.f32 1.0, %v11378_v17  ;;  %vm11387_vm3 = vmmov %vm11371_vm1 }
 0x2ee   :  { %3232 = vrot.lane.b32.xlu1 %v3161_v27, %s5030_s5  ;;  %v3172_v27 = vrot.slane %v8239_v39, 2  ;;  %vm11388_vm10 = vmmov %vm11371_vm1 }
 0x2ef   :  { %v3176_v18 = vsel %vm11371_vm1, %v3173_v8, %v3175_v4  ;;  %vm11391_vm11 = vmmov %vm11374_vm0 }
 0x2f0   :  { %v3174_v34 = vsel %vm11372_vm5, %v3172_v27, %v3173_v8  ;;  %v3911_v27 = vadd.f32 %v3910_v6, %v3909_v57  ;;  %v3914_v6 = vsel %vm11381_vm9, %v10414_v16, 0.0  ;;  %vm11392_vm15 = vmmov %vm11371_vm1  ;;  %vm10458_vm9 = vcmask 130048  }
 0x2f1   :  { %3234 = vrot.lane.b32.xlu0 %v3164_v23, %s5030_s5  ;;  %v3178_v23 = vrot.slane %v8247_v62, 2  ;;  %vm11394_vm5 = vmmov %vm11374_vm0  ;;  %v11403_v62 = vld [vmem:[#allocation113_spill] sm:$0xff] }
 0x2f2   :  { %3236 = vrot.lane.b32.xlu1 %v3166_v44, %s5030_s5  ;;  %v3177_v44 = vrot.slane %v8289_v33, 2  ;;  %v10437_v39 = vsub.f32 1.0, %v11403_v62  ;;  %vm11408_vm13 = vmmov %vm11374_vm0 }
 0x2f3   :  { %v3181_v4 = vsel %vm11375_vm14, %v3178_v23, %v3180_v15  ;;  %vm11401_vm14 = vmmov %vm11374_vm0 }
 0x2f4   :  { %v3179_v8 = vsel %vm11376_vm7, %v3177_v44, %v3178_v23  ;;  %v3913_v44 = vadd.f32 %v3912_v61, %v3911_v27  ;;  %v11382_v23 = vld [vmem:[#allocation81_spill] sm:$0xff]  ;;  %vm11404_vm7 = vmmov %vm11374_vm0 }
 0x2f5   :  { %3238 = vrot.lane.b32.xlu0 %v3169_v50, %s5030_s5  ;;  %v3182_v50 = vrot.slane %v8261_v21, 2  ;;  %v10417_v57 = vsub.f32 1.0, %v11382_v23  ;;  %v11400_v21 = vld [vmem:[#allocation114_spill] sm:$0xff] }
 0x2f6   :  { %3240 = vrot.lane.b32.xlu1 %v3171_v0, %s5030_s5  ;;  %v3185_v0 = vrot.slane %v11298_v9, 2  ;;  %v3187_v9 = vrot.slane %v8517_v28, 2  ;;  %v3915_v27 = vadd.f32 %v3914_v6, %v3913_v44  ;;  %v3200_v44 = vrot.slane %v8572_v30, 2  ;;  %v11395_v28 = vld [vmem:[#allocation105_spill] sm:$0xff] }
 0x2f7   :  { %v3184_v15 = vsel %vm11380_vm12, %v3182_v50, %v3183_v35  ;;  %v3916_v61 = vsel %vm11385_vm8, %v10417_v57, 0.0  ;;  %v10435_v37 = vsub.f32 1.0, %v11400_v21  ;;  %vm11413_vm12 = vmmov %vm11374_vm0 }
 0x2f8   :  { %v3917_v57 = vadd.f32 %v3916_v61, %v3915_v27  ;;  %v11393_v61 = vld [vmem:[#allocation93_spill] sm:$0xff] }
 0x2f9   :  { %3242 = vrot.lane.b32.xlu0 %v3174_v34, %s5030_s5  ;;  %v3186_v34 = vsel %vm11379_vm6, %v3183_v35, %v3185_v0  ;;  %v3193_v0 = vrot.slane %v8536_v1, 2  ;;  %v3197_v1 = vrot.slane %v8565_v46, 2  ;;  %v3198_v46 = vrot.slane %v8583_v42, 2  ;;  %vm11411_vm6 = vmmov %vm11374_vm0 }
 0x2fa   :  { %3244 = vrot.lane.b32.xlu1 %v3176_v18, %s5030_s5  ;;  %v3190_v18 = vrot.slane %v8521_v5, 2  ;;  %v8752_v5 = vpop.permute.xlu0 %3026 }
 0x2fb   :  { %v3196_v6 = vsel %vm11387_vm3, %v3193_v0, %v3195_v40  ;;  %v3201_v40 = vsel %vm11392_vm15, %v3198_v46, %v3200_v44  ;;  %v11396_v44 = vsub.f32 1.0, %v11395_v28  ;;  %v10440_v28 = vsub.f32 1.0, %v11407_v47 }
 0x2fc   :  { %v11414_v47 = vsub.f32 1.0, %v8369_v31 }
 0x2fd   :  { %3246 = vrot.lane.b32.xlu0 %v3179_v8, %s5030_s5  ;;  %v8750_v8 = vpop.permute.xlu1 %3028 }
 0x2fe   :  { %3248 = vrot.lane.b32.xlu1 %v3181_v4, %s5030_s5  ;;  %v3188_v4 = vrot.slane %v11303_v14, 2 }
 0x300   :  { %v3191_v50 = vsel %vm11383_vm2, %v3188_v4, %v3190_v18  ;;  %v3189_v35 = vsel %vm11384_vm4, %v3187_v9, %v3188_v4  ;;  %v8768_v9 = vpop.permute.xlu0 %3030  ;;  %vm3373_vm2 = vcmask 195584   ;;  %vm11425_vm4 = vcmask 64512  }
 0x301   :  { %3250 = vrot.lane.b32.xlu0 %v3184_v15, %s5030_s5  ;;  %v3192_v15 = vrot.slane %v8555_v41, 2  ;;  %v8766_v18 = vpop.permute.xlu1 %3032  ;;  %vm11426_vm8 = vmmov %vm11425_vm4 }
 0x302   :  { %3252 = vrot.lane.b32.xlu1 %v3186_v34, %s5030_s5  ;;  %v11386_v34 = vld [vmem:[#allocation89_spill] sm:$0xff]  ;;  %vm11429_vm3 = vmmov %vm11425_vm4 }
 0x303   :  { %v3194_v4 = vsel %vm11388_vm10, %v3192_v15, %v3193_v0  ;;  %v11390_v52 = vsub.f32 1.0, %v11386_v34  ;;  %v3199_v0 = vsel %vm11371_vm1, %v3197_v1, %v3198_v46  ;;  %v10427_v15 = vsub.f32 1.0, %v11393_v61  ;;  %v11397_v1 = vld [vmem:[#allocation109_spill] sm:$0xff]  ;;  %vm11430_vm10 = vmmov %vm11429_vm3 }
 0x304   :  { %v8782_v30 = vpop.permute.xlu0 %3034  ;;  %v10431_v46 = vsub.f32 1.0, %v11397_v1  ;;  %vm11434_vm15 = vmmov %vm11429_vm3 }
 0x305   :  { %3254 = vrot.lane.b32.xlu0 %v3189_v35, %s5030_s5  ;;  %v3918_v35 = vsel %vm11391_vm11, %v11390_v52, 0.0  ;;  %v8780_v41 = vpop.permute.xlu1 %3036  ;;  %vm11433_vm11 = vmmov %vm11429_vm3 }
 0x306   :  { %3256 = vrot.lane.b32.xlu1 %v3191_v50, %s5030_s5  ;;  %v11389_v50 = vld [vmem:[#allocation85_spill] sm:$0xff]  ;;  %v3919_v27 = vadd.f32 %v3918_v35, %v3917_v57  ;;  %v3922_v57 = vsel %vm11374_vm0, %v10427_v15, 0.0  ;;  %v11402_v15 = vsub.f32 1.0, %v8330_v24  ;;  %vm11437_vm1 = vmmov %vm11429_vm3 }
 0x307   :  { %v10422_v16 = vsub.f32 1.0, %v11389_v50  ;;  %vm11442_vm0 = vmmov %vm11437_vm1 }
 0x308   :  { %v8794_v52 = vpop.permute.xlu0 %3038 }
 0x309   :  { %3258 = vrot.lane.b32.xlu0 %v3194_v4, %s5030_s5  ;;  %v8792_v4 = vpop.permute.xlu1 %3040 }
 0x30a   :  { %3260 = vrot.lane.b32.xlu1 %v3196_v6, %s5030_s5  ;;  %v3920_v6 = vsel %vm11394_vm5, %v10422_v16, 0.0  ;;  %v11398_v16 = vld [vmem:[#allocation102_spill] sm:$0xff]  ;;  %vm11438_vm5 = vmmov %vm11437_vm1 }
 0x30b   :  { %v3921_v42 = vadd.f32 %v3920_v6, %v3919_v27  ;;  %v11399_v14 = vsub.f32 1.0, %v11398_v16  ;;  %v3924_v27 = vsel %vm11401_vm14, %v10431_v46, 0.0  ;;  %v11405_v46 = vld [vmem:[#allocation2_spill] sm:$0xff]  ;;  %v11410_v16 = vld [vmem:[#allocation115_spill] sm:$0xff]  ;;  %vm11444_vm14 = vmmov %vm11442_vm0 }
 0x30c   :  { %v11406_v38 = vsub.f32 1.0, %v11405_v46  ;;  %v10441_v59 = vsub.f32 1.0, %v11410_v16 }
 0x30d   :  { %3262 = vrot.lane.b32.xlu0 %v3199_v0, %s5030_s5  ;;  %v8802_v35 = vpop.permute.xlu1 %3044  ;;  %v3923_v0 = vadd.f32 %v3922_v57, %v3921_v42 }
 0x30e   :  { %3264 = vrot.lane.b32.xlu1 %v3201_v40, %s5030_s5  ;;  %v8804_v40 = vpop.permute.xlu0 %3042 }
 0x30f   :  { %v3925_v33 = vadd.f32 %v3924_v27, %v3923_v0 }
 0x311   :  { %v8812_v6 = vpop.permute.xlu1 %3048 }
 0x312   :  { %3945 = vperm.xlu1 %5020, %v11396_v44   ;;  %v8814_v44 = vpop.permute.xlu0 %3046 }
 0x315   :  { %v8822_v42 = vpop.permute.xlu1 %3052 }
 0x316   :  { %3950 = vperm.xlu1 %5020, %v11399_v14   ;;  %v3926_v14 = vsel %vm11404_vm7, %v10435_v37, 0.0  ;;  %v8824_v57 = vpop.permute.xlu0 %3050  ;;  %v11409_v37 = vsub.f32 1.0, %v8353_v2  ;;  %vm11448_vm7 = vmmov %vm11442_vm0 }
 0x317   :  { %v3927_v36 = vadd.f32 %v3926_v14, %v3925_v33 }
 0x319   :  { %v8832_v0 = vpop.permute.xlu1 %3056 }
 0x31a   :  { %3955 = vperm.xlu1 %5020, %v11402_v15   ;;  %v3928_v15 = vsel %vm11408_vm13, %v10437_v39, 0.0  ;;  %v8834_v27 = vpop.permute.xlu0 %3054  ;;  %v11412_v39 = vsub.f32 1.0, %v8362_v12  ;;  %vm11450_vm13 = vmmov %vm11442_vm0 }
 0x31b   :  { %v3929_v24 = vadd.f32 %v3928_v15, %v3927_v36  ;;  %v3932_v36 = vsel %vm11413_vm12, %v10441_v59, 0.0  ;;  %v11416_v59 = vsub.f32 1.0, %v11313_v11  ;;  %vm11456_vm12 = vmmov %vm11442_vm0 }
 0x31e   :  { %3960 = vperm.xlu1 %5020, %v11406_v38   ;;  %v3930_v38 = vsel %vm11411_vm6, %v10440_v28, 0.0  ;;  %vm11454_vm6 = vmmov %vm11442_vm0 }
 0x31f   :  { %v3931_v46 = vadd.f32 %v3930_v38, %v3929_v24  ;;  %v11415_v24 = vsub.f32 1.0, %v11301_v45 }
 0x320   :  { %v8844_v14 = vpop.permute.xlu0 %3058 }
 0x321   :  { %v3933_v2 = vadd.f32 %v3932_v36, %v3931_v46 }
 0x322   :  { %3965 = vperm.xlu1 %5020, %v11409_v37   ;;  %v8842_v33 = vpop.permute.xlu1 %3060 }
 0x326   :  { %3970 = vperm.xlu1 %5020, %v11412_v39   ;;  %v8851_v15 = vpop.permute.xlu1 %3064 }
 0x327   :  { %v8853_v37 = vpop.permute.xlu0 %3062 }
 0x32a   :  { %3975 = vperm.xlu1 %5020, %v11414_v47   ;;  %v11418_v47 = vsub.f32 1.0, %v11316_v54  ;;  %v11424_v54 = vsub.f32 1.0, %v11308_v13 }
 0x32b   :  { %v8859_v53 = vpop.permute.xlu0 %3066 }
 0x32c   :  { %v8857_v28 = vpop.permute.xlu1 %3068  ;;  %3934 = vadd.xlane.f32.xlu0 %v3933_v2 }
 0x32e   :  { %3980 = vperm.xlu1 %5020, %v11415_v24   ;;  %v11419_v24 = vsub.f32 1.0, %v11321_v60 }
 0x32f   :  { %v8865_v38 = vpop.permute.xlu0 %3070 }
 0x330   :  { %v8863_v39 = vpop.permute.xlu1 %3072 }
 0x332   :  { %3990 = vperm.xlu1 %5020, %v11416_v59   ;;  %v11420_v59 = vsub.f32 1.0, %v11325_v49 }
 0x333   :  { %v8871_v46 = vpop.permute.xlu0 %3074 }
 0x334   :  { %v8869_v12 = vpop.permute.xlu1 %3076  ;;  %11417 = vst [vmem:[#allocation10_spill] sm:$0xff] %v8871_v46 }
 0x336   :  { %3995 = vperm.xlu1 %5020, %v11418_v47   ;;  %v11423_v47 = vsub.f32 1.0, %v11328_v29 }
 0x337   :  { %v8877_v2 = vpop.permute.xlu0 %3078 }
 0x338   :  { %v8875_v36 = vpop.permute.xlu1 %3080 }
 0x33a   :  { %4000 = vperm.xlu1 %5020, %v11419_v24   ;;  %v3299_v24 = vsel %vm11425_vm4, %v7975_v19, %v8750_v8  ;;  %v3300_v19 = vsel %vm11430_vm10, %v8021_v58, %v8768_v9  ;;  %v3303_v58 = vsel %vm11433_vm11, %v8078_v51, %v8780_v41  ;;  %v3304_v51 = vsel %vm11438_vm5, %v8105_v7, %v8794_v52  ;;  %vm11460_vm4 = vmmov %vm11442_vm0 }
 0x33b   :  { %v8883_v45 = vpop.permute.xlu0 %3082  ;;  %vm11468_vm10 = vmmov %vm11442_vm0 }
 0x33c   :  { %v8881_v31 = vpop.permute.xlu1 %3084  ;;  %vm11478_vm5 = vmmov %vm11442_vm0 }
 0x33e   :  { %4005 = vperm.xlu1 %5020, %v11420_v59   ;;  %v3298_v59 = vsel %vm11426_vm8, %v7971_v48, %v8752_v5  ;;  %v3301_v48 = vsel %vm11429_vm3, %v8036_v63, %v8766_v18  ;;  %v3302_v63 = vsel %vm11434_vm15, %v8059_v43, %v8782_v30  ;;  %v3305_v43 = vsel %vm11437_vm1, %v8126_v10, %v8792_v4  ;;  %v11441_v10 = vld [vmem:[#allocation106_spill] sm:$0xff]  ;;  %v11443_v4 = vld [vmem:[#allocation65_spill] sm:$0xff]  ;;  %vm11462_vm8 = vmmov %vm11442_vm0 }
 0x33f   :  { %v8889_v46 = vpop.permute.xlu0 %3086  ;;  %v3307_v7 = vsel %vm11442_vm0, %v11441_v10, %v8802_v35  ;;  %v3306_v52 = vsel %vm11444_vm14, %v11443_v4, %v8804_v40  ;;  %v11447_v35 = vld [vmem:[#allocation135_spill] sm:$0xff]  ;;  %v11457_v10 = vsub.f32 1.0, %v11397_v1  ;;  %v11461_v4 = vld [vmem:[#allocation108_spill] sm:$0xff]  ;;  %vm11466_vm3 = vmmov %vm11442_vm0 }
 0x340   :  { %v8887_v11 = vpop.permute.xlu1 %3088  ;;  %11422 = vst [vmem:[#allocation32_spill] sm:$0xff] %v8889_v46  ;;  %v3309_v40 = vsel %vm11448_vm7, %v11447_v35, %v8812_v6  ;;  %v11453_v6 = vld [vmem:[#allocation111_spill] sm:$0xff]  ;;  %vm11476_vm1 = vmmov %vm11442_vm0 }
 0x341   :  { %11421 = vst [vmem:[#allocation28_spill] sm:$0xff] %v8887_v11  ;;  %v11467_v35 = vld [vmem:[#allocation103_spill] sm:$0xff]  ;;  %vm11482_vm7 = vmmov %vm11476_vm1 }
 0x342   :  { %4010 = vperm.xlu1 %5020, %v11423_v47   ;;  %3985 = vperm.xlu0 %5021, %v11424_v54   ;;  %v11427_v47 = vsub.f32 1.0, %v11343_v56  ;;  %v11428_v54 = vsub.f32 1.0, %v11336_v55 }
 0x343   :  { %v3203_v11 = vpop.permute.xlu0 %3202 }
 0x344   :  { %v3205_v49 = vpop.permute.xlu1 %3204  ;;  %v3331_v29 = vsel %vm10458_vm9, %v3298_v59, %v3203_v11 }
 0x345   :  { %v3332_v46 = vsel %vm10458_vm9, %v3299_v24, %v3205_v49  ;;  %4959 = vmatprep.mubr.msk.f32.mxu1 %vm3373_vm2, %v3331_v29  ;;  %v11431_v29 = vsub.f32 1.0, %v11355_v32 }
 0x346   :  { %4020 = vperm.xlu1 %5020, %v11427_v47   ;;  %4015 = vperm.xlu0 %5021, %v11428_v54   ;;  %v11435_v47 = vsub.f32 1.0, %v11366_v3  ;;  %v11436_v54 = vsub.f32 1.0, %v11362_v20 }
 0x347   :  { %4960 = vmatmul.mubr.msk.f32.vlgmr.msra.gmra.mxu1 %vm3373_vm2, %v3332_v46  ;;  %v3207_v11 = vpop.permute.xlu0 %3206  ;;  %v11432_v46 = vsub.f32 1.0, %v11349_v22 }
 0x348   :  { %v3209_v49 = vpop.permute.xlu1 %3208  ;;  %v3333_v5 = vsel %vm10458_vm9, %v3300_v19, %v3207_v11  ;;  %v11440_v11 = vsub.f32 1.0, %v11370_v26 }
 0x349   :  { %v3334_v8 = vsel %vm10458_vm9, %v3301_v48, %v3209_v49  ;;  %4962 = vmatprep.mubr.msk.f32.mxu1 %vm3373_vm2, %v3333_v5  ;;  %v11439_v49 = vsub.f32 1.0, %v11373_v25 }
 0x34a   :  { %4030 = vperm.xlu1 %5020, %v11431_v29   ;;  %4025 = vperm.xlu0 %5021, %v11432_v46  }
 0x34b   :  { %4963 = vmatmul.mubr.msk.f32.gmra.mxu1 %vm3373_vm2, %v3334_v8  ;;  %v3211_v9 = vpop.permute.xlu0 %3210 }
 0x34c   :  { %v3213_v18 = vpop.permute.xlu1 %3212  ;;  %v3335_v59 = vsel %vm10458_vm9, %v3302_v63, %v3211_v9  ;;  %v11446_v63 = vsub.f32 1.0, %v11378_v17 }
 0x34d   :  { %v3336_v24 = vsel %vm10458_vm9, %v3303_v58, %v3213_v18  ;;  %4965 = vmatprep.mubr.msk.f32.mxu1 %vm3373_vm2, %v3335_v59  ;;  %v11445_v58 = vsub.f32 1.0, %v11382_v23  ;;  %v11449_v18 = vld [vmem:[#allocation107_spill] sm:$0xff] }
 0x34e   :  { %4040 = vperm.xlu1 %5020, %v11435_v47   ;;  %4035 = vperm.xlu0 %5021, %v11436_v54   ;;  %v3308_v9 = vsel %vm11450_vm13, %v11449_v18, %v8814_v44  ;;  %v3311_v44 = vsel %vm11454_vm6, %v11453_v6, %v8822_v42  ;;  %v11459_v42 = vld [vmem:[#allocation91_spill] sm:$0xff]  ;;  %vm11484_vm13 = vmmov %vm11476_vm1 }
 0x34f   :  { %4966 = vmatmul.mubr.msk.f32.gmra.mxu1 %vm3373_vm2, %v3336_v24  ;;  %v3215_v30 = vpop.permute.xlu0 %3214 }
 0x350   :  { %v3217_v41 = vpop.permute.xlu1 %3216  ;;  %v3337_v19 = vsel %vm10458_vm9, %v3304_v51, %v3215_v30  ;;  %v11452_v51 = vsub.f32 1.0, %v11386_v34 }
 0x351   :  { %v3338_v48 = vsel %vm10458_vm9, %v3305_v43, %v3217_v41  ;;  %4968 = vmatprep.mubr.msk.f32.mxu1 %vm3373_vm2, %v3337_v19  ;;  %v11451_v43 = vsub.f32 1.0, %v11389_v50  ;;  %v11455_v41 = vld [vmem:[#allocation83_spill] sm:$0xff] }
 0x352   :  { %4050 = vperm.xlu1 %5020, %v11439_v49   ;;  %4045 = vperm.xlu0 %5021, %v11440_v11   ;;  %v3310_v30 = vsel %vm11456_vm12, %v11455_v41, %v8824_v57  ;;  %v3313_v57 = vsel %vm11460_vm4, %v11459_v42, %v8832_v0  ;;  %v11465_v0 = vld [vmem:[#allocation140_spill] sm:$0xff]  ;;  %vm11488_vm4 = vmmov %vm11476_vm1 }
 0x353   :  { %4969 = vmatmul.mubr.msk.f32.gmra.mxu1 %vm3373_vm2, %v3338_v48  ;;  %v3219_v5 = vpop.permute.xlu0 %3218 }
 0x354   :  { %v3221_v8 = vpop.permute.xlu1 %3220  ;;  %v3339_v46 = vsel %vm10458_vm9, %v3306_v52, %v3219_v5  ;;  %v3312_v52 = vsel %vm11462_vm8, %v11461_v4, %v8834_v27  ;;  %v3315_v27 = vsel %vm11466_vm3, %v11465_v0, %v8842_v33  ;;  %v11472_v33 = vld [vmem:[#allocation7_spill] sm:$0xff]  ;;  %vm11490_vm8 = vmmov %vm11476_vm1 }
 0x355   :  { %v3340_v29 = vsel %vm10458_vm9, %v3307_v7, %v3221_v8  ;;  %4971 = vmatprep.mubr.msk.f32.mxu1 %vm3373_vm2, %v3339_v46  ;;  %v11458_v7 = vsub.f32 1.0, %v11393_v61 }
 0x356   :  { %4060 = vperm.xlu1 %5020, %v11445_v58   ;;  %4055 = vperm.xlu0 %5021, %v11446_v63   ;;  %v11463_v58 = vsub.f32 1.0, %v11403_v62  ;;  %v11464_v63 = vsub.f32 1.0, %v11400_v21 }
 0x357   :  { %4972 = vmatmul.mubr.msk.f32.gmra.mxu1 %vm3373_vm2, %v3340_v29  ;;  %v3223_v59 = vpop.permute.xlu0 %3222 }
 0x358   :  { %v3225_v24 = vpop.permute.xlu1 %3224  ;;  %v3341_v54 = vsel %vm10458_vm9, %v3308_v9, %v3223_v59 }
 0x359   :  { %v3342_v47 = vsel %vm10458_vm9, %v3309_v40, %v3225_v24  ;;  %4974 = vmatprep.mubr.msk.f32.mxu1 %vm3373_vm2, %v3341_v54  ;;  %v3314_v40 = vsel %vm11468_vm10, %v11467_v35, %v8844_v14  ;;  %v11469_v24 = vld [vmem:[#allocation102_spill] sm:$0xff]  ;;  %v11470_v54 = vld [vmem:[#allocation105_spill] sm:$0xff]  ;;  %v11474_v14 = vmov 0  }
 0x35a   :  { %4070 = vperm.xlu1 %5020, %v11451_v43   ;;  %4065 = vperm.xlu0 %5021, %v11452_v51   ;;  %vm3808_vm11 = vcmp.gt.f32.partialorder %v11469_v24, 0.5  ;;  %vm3807_vm15 = vcmp.gt.f32.partialorder %v11470_v54, 0.5  ;;  %v11471_v43 = vsub.f32 1.0, %v11410_v16  ;;  %v11473_v51 = vsub.f32 1.0, %v11472_v33 }
 0x35b   :  { %4975 = vmatmul.mubr.msk.f32.gmra.mxu1 %vm3373_vm2, %v3342_v47  ;;  %v3227_v19 = vpop.permute.xlu0 %3226  ;;  %v4208_v6 = vsel %vm3808_vm11, 1, %v11474_v14  ;;  %vm11494_vm11 = vmmov %vm11476_vm1 }
 0x35c   :  { %v3229_v48 = vpop.permute.xlu1 %3228  ;;  %v3343_v11 = vsel %vm10458_vm9, %v3310_v30, %v3227_v19  ;;  %v11477_v30 = vld [vmem:[#allocation133_spill] sm:$0xff] }
 0x35d   :  { %v3344_v49 = vsel %vm10458_vm9, %v3311_v44, %v3229_v48  ;;  %4977 = vmatprep.mubr.msk.f32.mxu1 %vm3373_vm2, %v3343_v11  ;;  %v11475_v44 = vld [vmem:[#allocation138_spill] sm:$0xff]  ;;  %v3316_v48 = vsel %vm11478_vm5, %v11477_v30, %v8853_v37  ;;  %v4207_v11 = vsel %vm3807_vm15, 1, %v11474_v14  ;;  %v11481_v37 = vld [vmem:[#allocation100_spill] sm:$0xff]  ;;  %vm11497_vm15 = vmmov %vm11476_vm1  ;;  %vm3815_vm5 = vcmp.gt.f32.partialorder %v11308_v13, 0.5 }
 0x35e   :  { %4080 = vperm.xlu1 %5020, %v11457_v10   ;;  %4075 = vperm.xlu0 %5021, %v11458_v7   ;;  %v3317_v41 = vsel %vm11476_vm1, %v11475_v44, %v8851_v15  ;;  %v11479_v10 = vld [vmem:[#allocation2_spill] sm:$0xff]  ;;  %v3319_v4 = vsel %vm11482_vm7, %v11481_v37, %v8857_v28  ;;  %v4215_v13 = vsel %vm3815_vm5, 1, %v11474_v14  ;;  %vm3818_vm7 = vcmp.gt.f32.partialorder %v11321_v60, 0.5  ;;  %v11506_v60 = vld [vmem:[#allocation129_spill] sm:$0xff] }
 0x35f   :  { %4978 = vmatmul.mubr.msk.f32.gmra.mxu1 %vm3373_vm2, %v3344_v49  ;;  %v3231_v5 = vpop.permute.xlu0 %3230  ;;  %vm3810_vm0 = vcmp.gt.f32.partialorder %v11479_v10, 0.5  ;;  %v11495_v44 = vld [vmem:[#allocation10_spill] sm:$0xff]  ;;  %vm3823_vm5 = vcmp.gt.f32.partialorder %v11349_v22, 0.5 }
 0x360   :  { %v3233_v8 = vpop.permute.xlu1 %3232  ;;  %v3345_v46 = vsel %vm10458_vm9, %v3312_v52, %v3231_v5  ;;  %v4210_v15 = vsel %vm3810_vm0, 1, %v11474_v14  ;;  %v11483_v52 = vld [vmem:[#allocation78_spill] sm:$0xff]  ;;  %vm11500_vm0 = vmmov %vm11488_vm4 }
 0x361   :  { %v3346_v29 = vsel %vm10458_vm9, %v3313_v57, %v3233_v8  ;;  %4980 = vmatprep.mubr.msk.f32.mxu1 %vm3373_vm2, %v3345_v46  ;;  %v11480_v57 = vld [vmem:[#allocation99_spill] sm:$0xff]  ;;  %v3318_v8 = vsel %vm11484_vm13, %v11483_v52, %v8859_v53 }
 0x362   :  { %4090 = vperm.xlu1 %5020, %v11463_v58   ;;  %4085 = vperm.xlu0 %5021, %v11464_v63   ;;  %vm3809_vm14 = vcmp.gt.f32.partialorder %v11480_v57, 0.5  ;;  %v11485_v58 = vld [vmem:[#allocation104_spill] sm:$0xff]  ;;  %v11487_v53 = vld [vmem:[#allocation75_spill] sm:$0xff] }
 0x363   :  { %4981 = vmatmul.mubr.msk.f32.gmra.mxu1 %vm3373_vm2, %v3346_v29  ;;  %v3235_v9 = vpop.permute.xlu0 %3234  ;;  %v4209_v46 = vsel %vm3809_vm14, 1, %v11474_v14  ;;  %vm3812_vm6 = vcmp.gt.f32.partialorder %v11485_v58, 0.5  ;;  %v3321_v35 = vsel %vm11488_vm4, %v11487_v53, %v8863_v39  ;;  %vm11502_vm14 = vmmov %vm11500_vm0 }
 0x364   :  { %v3237_v18 = vpop.permute.xlu1 %3236  ;;  %v3347_v47 = vsel %vm10458_vm9, %v3314_v40, %v3235_v9  ;;  %v4212_v28 = vsel %vm3812_vm6, 1, %v11474_v14  ;;  %v11489_v40 = vld [vmem:[#allocation88_spill] sm:$0xff]  ;;  %vm11505_vm6 = vmmov %vm11500_vm0 }
 0x365   :  { %v3348_v59 = vsel %vm10458_vm9, %v3315_v27, %v3237_v18  ;;  %4983 = vmatprep.mubr.msk.f32.mxu1 %vm3373_vm2, %v3347_v47  ;;  %v11486_v27 = vld [vmem:[#allocation94_spill] sm:$0xff]  ;;  %v3320_v18 = vsel %vm11490_vm8, %v11489_v40, %v8865_v38  ;;  %v11491_v47 = vld [vmem:[#allocation13_spill] sm:$0xff]  ;;  %v11493_v38 = vld [vmem:[#allocation124_spill] sm:$0xff] }
 0x366   :  { %4100 = vperm.xlu1 %5020, %v11471_v43   ;;  %4095 = vperm.xlu0 %5021, %v11473_v51   ;;  %vm3811_vm12 = vcmp.gt.f32.partialorder %v11486_v27, 0.5  ;;  %vm3814_vm3 = vcmp.gt.f32.partialorder %v11491_v47, 0.5  ;;  %v11492_v51 = vld [vmem:[#allocation112_spill] sm:$0xff] }
 0x367   :  { %4984 = vmatmul.mubr.msk.f32.gmra.mxu1 %vm3373_vm2, %v3348_v59  ;;  %v3239_v49 = vpop.permute.xlu0 %3238  ;;  %v4211_v59 = vsel %vm3811_vm12, 1, %v11474_v14  ;;  %vm3813_vm10 = vcmp.gt.f32.partialorder %v11492_v51, 0.5  ;;  %v4214_v39 = vsel %vm3814_vm3, 1, %v11474_v14  ;;  %vm11507_vm12 = vmmov %vm11500_vm0  ;;  %v11509_v40 = vld [vmem:[#allocation36_spill] sm:$0xff] }
 0x368   :  { %v3241_v19 = vpop.permute.xlu1 %3240  ;;  %v3349_v42 = vsel %vm10458_vm9, %v3316_v48, %v3239_v49  ;;  %v4213_v49 = vsel %vm3813_vm10, 1, %v11474_v14  ;;  %v3326_v58 = vsel %vm11507_vm12, %v11506_v60, %v8883_v45  ;;  %vm3819_vm8 = vcmp.gt.f32.partialorder %v11509_v40, 0.5  ;;  %v11510_v45 = vld [vmem:[#allocation28_spill] sm:$0xff]  ;;  %vm11512_vm3 = vmmov %vm11500_vm0 }
 0x369   :  { %v3350_v7 = vsel %vm10458_vm9, %v3317_v41, %v3241_v19  ;;  %4986 = vmatprep.mubr.msk.f32.mxu1 %vm3373_vm2, %v3349_v42  ;;  %v11496_v41 = vld [vmem:[#allocation95_spill] sm:$0xff]  ;;  %v11499_v42 = vld [vmem:[#allocation82_spill] sm:$0xff]  ;;  %vm11515_vm10 = vmmov %vm11500_vm0  ;;  %v4219_v51 = vsel %vm3819_vm8, 1, %v11474_v14  ;;  %vm3832_vm12 = vcmp.gt.f32.partialorder %v11389_v50, 0.5  ;;  %vm3834_vm8 = vcmp.gt.f32.partialorder %v11397_v1, 0.5 }
 0x36a   :  { %4243 = vperm.xlu1 %5020, %v4208_v6   ;;  %4240 = vperm.xlu0 %5021, %v4207_v11   ;;  %v3323_v6 = vsel %vm11494_vm11, %v11493_v38, %v8869_v12  ;;  %v3322_v30 = vsel %vm11497_vm15, %v11496_v41, %v11495_v44  ;;  %v11498_v11 = vld [vmem:[#allocation16_spill] sm:$0xff]  ;;  %v3325_v57 = vsel %vm11500_vm0, %v11499_v42, %v8875_v36  ;;  %v4218_v36 = vsel %vm3818_vm7, 1, %v11474_v14 }
 0x36b   :  { %4987 = vmatmul.mubr.msk.f32.gmra.mxu1 %vm3373_vm2, %v3350_v7  ;;  %v3243_v29 = vpop.permute.xlu0 %3242  ;;  %vm3816_vm1 = vcmp.gt.f32.partialorder %v11498_v11, 0.5  ;;  %vm3822_vm11 = vcmp.gt.f32.partialorder %v11343_v56, 0.5  ;;  %vm3821_vm15 = vcmp.gt.f32.partialorder %v11336_v55, 0.5  ;;  %v4223_v55 = vsel %vm3823_vm5, 1, %v11474_v14 }
 0x36c   :  { %v3245_v5 = vpop.permute.xlu1 %3244  ;;  %v3351_v0 = vsel %vm10458_vm9, %v3318_v8, %v3243_v29  ;;  %v4216_v12 = vsel %vm3816_vm1, 1, %v11474_v14  ;;  %v11503_v29 = vld [vmem:[#allocation22_spill] sm:$0xff]  ;;  %v4221_v44 = vsel %vm3821_vm15, 1, %v11474_v14  ;;  %vm3824_vm1 = vcmp.gt.f32.partialorder %v11355_v32, 0.5 }
 0x36d   :  { %v3352_v63 = vsel %vm10458_vm9, %v3319_v4, %v3245_v5  ;;  %4989 = vmatprep.mubr.msk.f32.mxu1 %vm3373_vm2, %v3351_v0  ;;  %vm3817_vm13 = vcmp.gt.f32.partialorder %v11503_v29, 0.5  ;;  %v4224_v56 = vsel %vm3824_vm1, 1, %v11474_v14  ;;  %vm3826_vm0 = vcmp.gt.f32.partialorder %v11366_v3, 0.5 }
 0x36e   :  { %4249 = vperm.xlu1 %5020, %v4210_v15   ;;  %4246 = vperm.xlu0 %5021, %v4209_v46   ;;  %v11501_v15 = vld [vmem:[#allocation18_spill] sm:$0xff]  ;;  %v4217_v27 = vsel %vm3817_vm13, 1, %v11474_v14  ;;  %v4226_v41 = vsel %vm3826_vm0, 1, %v11474_v14  ;;  %vm3827_vm7 = vcmp.gt.f32.partialorder %v11370_v26, 0.5  ;;  %vm3830_vm13 = vcmp.gt.f32.partialorder %v11382_v23, 0.5 }
 0x36f   :  { %4990 = vmatmul.mubr.msk.f32.gmra.mxu1 %vm3373_vm2, %v3352_v63  ;;  %v3247_v24 = vpop.permute.xlu0 %3246  ;;  %v3324_v37 = vsel %vm11502_vm14, %v11501_v15, %v8877_v2  ;;  %v11504_v2 = vld [vmem:[#allocation23_spill] sm:$0xff]  ;;  %vm3825_vm14 = vcmp.gt.f32.partialorder %v11362_v20, 0.5  ;;  %v4227_v3 = vsel %vm3827_vm7, 1, %v11474_v14  ;;  %v4232_v23 = vsel %vm3832_vm12, 1, %v11474_v14 }
 0x370   :  { %v3249_v9 = vpop.permute.xlu1 %3248  ;;  %v3353_v43 = vsel %vm10458_vm9, %v3320_v18, %v3247_v24  ;;  %v3327_v46 = vsel %vm11505_vm6, %v11504_v2, %v8881_v31  ;;  %v11511_v18 = vld [vmem:[#allocation131_spill] sm:$0xff]  ;;  %v11513_v24 = vld [vmem:[#allocation32_spill] sm:$0xff]  ;;  %vm3829_vm6 = vcmp.gt.f32.partialorder %v11378_v17, 0.5  ;;  %v4234_v50 = vsel %vm3834_vm8, 1, %v11474_v14 }
 0x371   :  { %v3354_v54 = vsel %vm10458_vm9, %v3321_v35, %v3249_v9  ;;  %4992 = vmatprep.mubr.msk.f32.mxu1 %vm3373_vm2, %v3353_v43  ;;  %v3329_v9 = vsel %vm11512_vm3, %v11511_v18, %v11510_v45  ;;  %vm3833_vm3 = vcmp.gt.f32.partialorder %v11393_v61, 0.5  ;;  %vm3838_vm15 = vcmp.gt.f32.partialorder %v11410_v16, 0.5 }
 0x372   :  { %4255 = vperm.xlu1 %5020, %v4212_v28   ;;  %4252 = vperm.xlu0 %5021, %v4211_v59   ;;  %v11508_v28 = vld [vmem:[#allocation31_spill] sm:$0xff]  ;;  %v11514_v59 = vld [vmem:[#allocation14_spill] sm:$0xff]  ;;  %vm3837_vm1 = vcmp.gt.f32.partialorder %v11472_v33, 0.5 }
 0x373   :  { %4993 = vmatmul.mubr.msk.f32.gmra.mxu1 %vm3373_vm2, %v3354_v54  ;;  %v3251_v19 = vpop.permute.xlu0 %3250  ;;  %vm3820_vm4 = vcmp.gt.f32.partialorder %v11508_v28, 0.5  ;;  %v3328_v47 = vsel %vm11515_vm10, %v11514_v59, %v11513_v24  ;;  %vm3836_vm10 = vcmp.gt.f32.partialorder %v11403_v62, 0.5  ;;  %v4238_v62 = vsel %vm3838_vm15, 1, %v11474_v14 }
 0x374   :  { %v3253_v48 = vpop.permute.xlu1 %3252  ;;  %v3355_v7 = vsel %vm10458_vm9, %v3322_v30, %v3251_v19  ;;  %v4220_v31 = vsel %vm3820_vm4, 1, %v11474_v14  ;;  %v4225_v30 = vsel %vm3825_vm14, 1, %v11474_v14  ;;  %vm3831_vm4 = vcmp.gt.f32.partialorder %v11386_v34, 0.5 }
 0x375   :  { %v3356_v10 = vsel %vm10458_vm9, %v3323_v6, %v3253_v48  ;;  %4995 = vmatprep.mubr.msk.f32.mxu1 %vm3373_vm2, %v3355_v7  ;;  %v4222_v6 = vsel %vm3822_vm11, 1, %v11474_v14  ;;  %v4229_v48 = vsel %vm3829_vm6, 1, %v11474_v14  ;;  %v4231_v19 = vsel %vm3831_vm4, 1, %v11474_v14 }
 0x376   :  { %4261 = vperm.xlu1 %5020, %v4214_v39   ;;  %4258 = vperm.xlu0 %5021, %v4213_v49   ;;  %v4233_v49 = vsel %vm3833_vm3, 1, %v11474_v14  ;;  %vm3835_vm11 = vcmp.gt.f32.partialorder %v11400_v21, 0.5  ;;  %v4236_v1 = vsel %vm3836_vm10, 1, %v11474_v14 }
 0x377   :  { %4996 = vmatmul.mubr.msk.f32.gmra.mxu1 %vm3373_vm2, %v3356_v10  ;;  %v3255_v52 = vpop.permute.xlu0 %3254  ;;  %v4235_v11 = vsel %vm3835_vm11, 1, %v11474_v14  ;;  %v4237_v10 = vsel %vm3837_vm1, 1, %v11474_v14 }
 0x378   :  { %v3257_v4 = vpop.permute.xlu1 %3256  ;;  %v3357_v5 = vsel %vm10458_vm9, %v3324_v37, %v3255_v52 }
 0x379   :  { %v3358_v8 = vsel %vm10458_vm9, %v3325_v57, %v3257_v4  ;;  %4998 = vmatprep.mubr.msk.f32.mxu1 %vm3373_vm2, %v3357_v5 }
 0x37a   :  { %4267 = vperm.xlu1 %5020, %v4216_v12   ;;  %4264 = vperm.xlu0 %5021, %v4215_v13  }
 0x37b   :  { %4999 = vmatmul.mubr.msk.f32.gmra.mxu1 %vm3373_vm2, %v3358_v8  ;;  %v3259_v0 = vpop.permute.xlu0 %3258 }
 0x37c   :  { %v3261_v63 = vpop.permute.xlu1 %3260  ;;  %v3359_v35 = vsel %vm10458_vm9, %v3326_v58, %v3259_v0 }
 0x37d   :  { %v3360_v53 = vsel %vm10458_vm9, %v3327_v46, %v3261_v63  ;;  %5001 = vmatprep.mubr.msk.f32.mxu1 %vm3373_vm2, %v3359_v35 }
 0x37e   :  { %4273 = vperm.xlu1 %5020, %v4218_v36   ;;  %4270 = vperm.xlu0 %5021, %v4217_v27  }
 0x37f   :  { %5002 = vmatmul.mubr.msk.f32.gmra.mxu1 %vm3373_vm2, %v3360_v53  ;;  %v3263_v43 = vpop.permute.xlu0 %3262 }
 0x380   :  { %v3265_v54 = vpop.permute.xlu1 %3264  ;;  %v3361_v38 = vsel %vm10458_vm9, %v3328_v47, %v3263_v43 }
 0x381   :  { %v3362_v39 = vsel %vm10458_vm9, %v3329_v9, %v3265_v54  ;;  %5004 = vmatprep.mubr.msk.f32.mxu1 %vm3373_vm2, %v3361_v38  ;;  %v9226_v54 = vld [vmem:[%s10039_s6] ss:$0 sm:$0xff] }
 0x382   :  { %4279 = vperm.xlu1 %5020, %v4220_v31   ;;  %4276 = vperm.xlu0 %5021, %v4219_v51  }
 0x383   :  { %5005 = vmatmul.mubr.msk.f32.gmra.mxu1 %vm3373_vm2, %v3362_v39  ;;  %vm3828_vm2 = vcmp.gt.f32.partialorder %v11373_v25, 0.5  ;;  %v4230_v25 = vsel %vm3830_vm13, 1, %v11474_v14 }
 0x384   :  { %v4228_v22 = vsel %vm3828_vm2, 1, %v11474_v14 }
 0x386   :  { %4285 = vperm.xlu1 %5020, %v4222_v6   ;;  %4282 = vperm.xlu0 %5021, %v4221_v44  }
 0x38a   :  { %4291 = vperm.xlu1 %5020, %v4224_v56   ;;  %4288 = vperm.xlu0 %5021, %v4223_v55  }
 0x38d   :  { %v9132_v32 = vpop.permute.xlu1 %3945 }
 0x38e   :  { %4297 = vperm.xlu1 %5020, %v4226_v41   ;;  %4294 = vperm.xlu0 %5021, %v4225_v30  }
 0x391   :  { %v9138_v20 = vpop.permute.xlu1 %3950 }
 0x392   :  { %4303 = vperm.xlu1 %5020, %v4228_v22   ;;  %4300 = vperm.xlu0 %5021, %v4227_v3  }
 0x395   :  { %v9144_v26 = vpop.permute.xlu1 %3955 }
 0x396   :  { %4309 = vperm.xlu1 %5020, %v4230_v25   ;;  %4306 = vperm.xlu0 %5021, %v4229_v48  }
 0x399   :  { %v9150_v17 = vpop.permute.xlu1 %3960 }
 0x39a   :  { %4315 = vperm.xlu1 %5020, %v4232_v23   ;;  %4312 = vperm.xlu0 %5021, %v4231_v19  }
 0x39d   :  { %v9156_v34 = vpop.permute.xlu1 %3965 }
 0x39e   :  { %4321 = vperm.xlu1 %5020, %v4234_v50   ;;  %4318 = vperm.xlu0 %5021, %v4233_v49  }
 0x3a1   :  { %v9162_v61 = vpop.permute.xlu1 %3970 }
 0x3a2   :  { %4327 = vperm.xlu1 %5020, %v4236_v1   ;;  %4324 = vperm.xlu0 %5021, %v4235_v11  }
 0x3a5   :  { %v9167_v7 = vpop.permute.xlu1 %3975 }
 0x3a6   :  { %4333 = vperm.xlu1 %5020, %v4238_v62   ;;  %4330 = vperm.xlu0 %5021, %v4237_v10  }
 0x3a9   :  { %v9169_v21 = vpop.permute.xlu1 %3980 }
 0x3ad   :  { %v9171_v12 = vpop.permute.xlu1 %3990 }
 0x3b1   :  { %v9173_v42 = vpop.permute.xlu1 %3995 }
 0x3b5   :  { %v3935_v16 = vpop.xlane.xlu0 %3934  ;;  %v9175_v37 = vpop.permute.xlu1 %4000 }
 0x3b6   :  { %v3936_v57 = vrot.slane %v3935_v16, 4 }
 0x3b8   :  { %v3937_v15 = vadd.f32 %v3936_v57, %v3935_v16 }
 0x3b9   :  { %v9177_v14 = vpop.permute.xlu1 %4005 }
 0x3ba   :  { %v3938_v33 = vrot.slane %v3937_v15, 2 }
 0x3bc   :  { %v3939_v4 = vadd.f32 %v3938_v33, %v3937_v15 }
 0x3bd   :  { %v9179_v8 = vpop.permute.xlu1 %4010  ;;  %v9181_v5 = vpop.permute.xlu0 %3985 }
 0x3be   :  { %v3940_v52 = vrot.slane %v3939_v4, 1 }
 0x3c0   :  { %v3941_v13 = vadd.f32 %v3940_v52, %v3939_v4 }
 0x3c1   :  { %v9183_v29 = vpop.permute.xlu1 %4020  ;;  %v9185_v36 = vpop.permute.xlu0 %4015 }
 0x3c2   :  { %5013 = vpush %v3941_v13 }
 0x3c5   :  { %v9187_v2 = vpop.permute.xlu1 %4030  ;;  %v9189_v46 = vpop.permute.xlu0 %4025 }
 0x3c9   :  { %v9191_v60 = vpop.permute.xlu1 %4040  ;;  %v9193_v58 = vpop.permute.xlu0 %4035 }
 0x3cd   :  { %v9195_v63 = vpop.permute.xlu1 %4050  ;;  %v9197_v0 = vpop.permute.xlu0 %4045 }
 0x3d1   :  { %v9199_v27 = vpop.permute.xlu1 %4060  ;;  %v9201_v28 = vpop.permute.xlu0 %4055 }
 0x3d5   :  { %v9203_v53 = vpop.permute.xlu1 %4070  ;;  %v9205_v35 = vpop.permute.xlu0 %4065 }
 0x3d9   :  { %v9207_v40 = vpop.permute.xlu1 %4080  ;;  %v9209_v31 = vpop.permute.xlu0 %4075 }
 0x3dd   :  { %v9211_v45 = vpop.permute.xlu1 %4090  ;;  %v9213_v18 = vpop.permute.xlu0 %4085 }
 0x3e1   :  { %v9215_v9 = vpop.permute.xlu1 %4100  ;;  %v9217_v24 = vpop.permute.xlu0 %4095 }
 0x3e5   :  { %v9219_v59 = vpop.permute.xlu1 %4243  ;;  %v9221_v47 = vpop.permute.xlu0 %4240 }
 0x3e6   :  { %vm10460_vm5 = vcmp.eq.s32.totalorder %v9219_v59, 1  ;;  %vm10459_vm0 = vcmp.eq.s32.totalorder %v9221_v47, 1 }
 0x3e9   :  { %v9231_v38 = vpop.permute.xlu1 %4249  ;;  %v9236_v44 = vpop.permute.xlu0 %4246 }
 0x3ea   :  { %11516 = vst [vmem:[#allocation141_spill] sm:$0xff] %v9231_v38  ;;  %vm10462_vm14 = vcmp.eq.s32.totalorder %v9231_v38, 1  ;;  %vm10461_vm2 = vcmp.eq.s32.totalorder %v9236_v44, 1 }
 0x3ed   :  { %v9249_v23 = vpop.permute.xlu1 %4255  ;;  %v9259_v49 = vpop.permute.xlu0 %4252 }
 0x3ee   :  { %11517 = vst [vmem:[#allocation34_spill] sm:$0xff] %v9249_v23  ;;  %11518 = vst [vmem:[#allocation24_spill] sm:$0xff] %v9259_v49  ;;  %vm10464_vm7 = vcmp.eq.s32.totalorder %v9249_v23, 1  ;;  %vm10463_vm13 = vcmp.eq.s32.totalorder %v9259_v49, 1 }
 0x3f1   :  { %v9273_v13 = vpop.permute.xlu1 %4261 }
 0x3f2   :  { %11519 = vst [vmem:[#allocation12_spill] sm:$0xff] %v9273_v13 }
 0x3f3   :  { %s5014_s6 = spop %5013 }
 0x407   :  { %v4961_v43 = vpop.f32.mrf.mxu1 }
 0x408   :  { %v9229_v51 = vadd.f32 %v4961_v43, %v9226_v54 }
 0x409   :  { %v3536_v39 = vpop.f32.mrf.mxu1 }
 0x40a   :  { %v9234_v6 = vadd.f32 %v9226_v54, %v3536_v39  ;;  %v4104_v55 = vmul.f32 %v9138_v20, %v9229_v51 }
 0x40b   :  { %v4964_v56 = vpop.f32.mrf.mxu1 }
 0x40c   :  { %v4103_v41 = vmul.f32 %v9132_v32, %v9234_v6  ;;  %v9243_v30 = vadd.f32 %v4964_v56, %v9226_v54  ;;  %v4136_v19 = vsel %vm10458_vm9, %v4104_v55, 0.0  ;;  %v9279_v56 = vpop.permute.xlu0 %4258 }
 0x40d   :  { %v3546_v22 = vpop.f32.mrf.mxu1  ;;  %11520 = vst [vmem:[#allocation42_spill] sm:$0xff] %v9279_v56 }
 0x40e   :  { %v4135_v3 = vsel %vm10458_vm9, %v4103_v41, 0.0  ;;  %v9247_v25 = vadd.f32 %v9226_v54, %v3546_v22  ;;  %v4106_v20 = vmul.f32 %v9150_v17, %v9243_v30 }
 0x40f   :  { %v4967_v48 = vpop.f32.mrf.mxu1  ;;  %v4137_v1 = vadd.f32 %v4136_v19, %v4135_v3 }
 0x410   :  { %v4105_v32 = vmul.f32 %v9144_v26, %v9247_v25  ;;  %v9257_v50 = vadd.f32 %v4967_v48, %v9226_v54  ;;  %v4140_v15 = vsel %vm10458_vm9, %v4106_v20, 0.0 }
 0x411   :  { %v3556_v11 = vpop.f32.mrf.mxu1 }
 0x412   :  { %v4138_v62 = vsel %vm10458_vm9, %v4105_v32, 0.0  ;;  %v9263_v10 = vadd.f32 %v9226_v54, %v3556_v11  ;;  %v4108_v17 = vmul.f32 %v9162_v61, %v9257_v50 }
 0x413   :  { %v4139_v16 = vadd.f32 %v4138_v62, %v4137_v1  ;;  %v4970_v57 = vpop.f32.mrf.mxu1  ;;  %v9293_v62 = vpop.permute.xlu1 %4267 }
 0x414   :  { %v4107_v26 = vmul.f32 %v9156_v34, %v9263_v10  ;;  %v9271_v33 = vadd.f32 %v4970_v57, %v9226_v54  ;;  %v4144_v61 = vsel %vm10458_vm9, %v4108_v17, 0.0  ;;  %11521 = vst [vmem:[#allocation54_spill] sm:$0xff] %v9293_v62 }
 0x415   :  { %v4141_v4 = vadd.f32 %v4140_v15, %v4139_v16  ;;  %v3566_v52 = vpop.f32.mrf.mxu1  ;;  %v9303_v15 = vpop.permute.xlu0 %4264 }
 0x416   :  { %v4142_v43 = vsel %vm10458_vm9, %v4107_v26, 0.0  ;;  %v9277_v39 = vadd.f32 %v9226_v54, %v3566_v52  ;;  %v4110_v34 = vmul.f32 %v9169_v21, %v9271_v33  ;;  %11522 = vst [vmem:[#allocation79_spill] sm:$0xff] %v9303_v15 }
 0x417   :  { %v4143_v55 = vadd.f32 %v4142_v43, %v4141_v4  ;;  %v4973_v41 = vpop.f32.mrf.mxu1 }
 0x418   :  { %v4109_v22 = vmul.f32 %v9167_v7, %v9277_v39  ;;  %v9287_v3 = vadd.f32 %v4973_v41, %v9226_v54  ;;  %v4148_v16 = vsel %vm10458_vm9, %v4110_v34, 0.0 }
 0x419   :  { %v4145_v48 = vadd.f32 %v4144_v61, %v4143_v55  ;;  %v3576_v19 = vpop.f32.mrf.mxu1 }
 0x41a   :  { %v4146_v20 = vsel %vm10458_vm9, %v4109_v22, 0.0  ;;  %v9291_v32 = vadd.f32 %v9226_v54, %v3576_v19  ;;  %v4112_v21 = vmul.f32 %v9171_v12, %v9287_v3 }
 0x41b   :  { %v4147_v1 = vadd.f32 %v4146_v20, %v4145_v48  ;;  %v4976_v11 = vpop.f32.mrf.mxu1  ;;  %v9317_v48 = vpop.permute.xlu1 %4273 }
 0x41c   :  { %v4111_v7 = vmul.f32 %v9181_v5, %v9291_v32  ;;  %v9301_v57 = vadd.f32 %v4976_v11, %v9226_v54  ;;  %v4152_v41 = vsel %vm10458_vm9, %v4112_v21, 0.0  ;;  %11523 = vst [vmem:[#allocation20_spill] sm:$0xff] %v9317_v48 }
 0x41d   :  { %v4149_v17 = vadd.f32 %v4148_v16, %v4147_v1  ;;  %v3586_v26 = vpop.f32.mrf.mxu1  ;;  %v9323_v1 = vpop.permute.xlu0 %4270 }
 0x41e   :  { %v4150_v4 = vsel %vm10458_vm9, %v4111_v7, 0.0  ;;  %v9307_v52 = vadd.f32 %v9226_v54, %v3586_v26  ;;  %v4114_v12 = vmul.f32 %v9175_v37, %v9301_v57  ;;  %11524 = vst [vmem:[#allocation40_spill] sm:$0xff] %v9323_v1 }
 0x41f   :  { %v4151_v43 = vadd.f32 %v4150_v4, %v4149_v17  ;;  %v4979_v55 = vpop.f32.mrf.mxu1 }
 0x420   :  { %v4113_v5 = vmul.f32 %v9173_v42, %v9307_v52  ;;  %v9315_v61 = vadd.f32 %v4979_v55, %v9226_v54  ;;  %v4156_v37 = vsel %vm10458_vm9, %v4114_v12, 0.0 }
 0x421   :  { %v4153_v34 = vadd.f32 %v4152_v41, %v4151_v43  ;;  %v3596_v22 = vpop.f32.mrf.mxu1 }
 0x422   :  { %v4154_v19 = vsel %vm10458_vm9, %v4113_v5, 0.0  ;;  %v9321_v20 = vadd.f32 %v9226_v54, %v3596_v22  ;;  %v4116_v42 = vmul.f32 %v9179_v8, %v9315_v61  ;;  %v9337_v5 = vpop.permute.xlu1 %4279  ;;  %v9347_v22 = vpop.permute.xlu0 %4276 }
 0x423   :  { %v4155_v11 = vadd.f32 %v4154_v19, %v4153_v34  ;;  %v4982_v16 = vpop.f32.mrf.mxu1  ;;  %11525 = vst [vmem:[#allocation62_spill] sm:$0xff] %v9337_v5  ;;  %11527 = vst [vmem:[#allocation86_spill] sm:$0xff] %v9347_v22 }
 0x424   :  { %v4115_v21 = vmul.f32 %v9177_v14, %v9321_v20  ;;  %v9331_v7 = vadd.f32 %v4982_v16, %v9226_v54  ;;  %v4160_v12 = vsel %vm10458_vm9, %v4116_v42, 0.0 }
 0x425   :  { %v4157_v17 = vadd.f32 %v4156_v37, %v4155_v11  ;;  %v3606_v26 = vpop.f32.mrf.mxu1 }
 0x426   :  { %v4158_v4 = vsel %vm10458_vm9, %v4115_v21, 0.0  ;;  %v9335_v43 = vadd.f32 %v9226_v54, %v3606_v26  ;;  %v4118_v8 = vmul.f32 %v9183_v29, %v9331_v7 }
 0x427   :  { %v4159_v55 = vadd.f32 %v4158_v4, %v4157_v17  ;;  %v4985_v41 = vpop.f32.mrf.mxu1 }
 0x428   :  { %v4117_v14 = vmul.f32 %v9185_v36, %v9335_v43  ;;  %v9345_v34 = vadd.f32 %v4985_v41, %v9226_v54  ;;  %v4164_v17 = vsel %vm10458_vm9, %v4118_v8, 0.0  ;;  %v9361_v41 = vpop.permute.xlu1 %4285 }
 0x429   :  { %v4161_v19 = vadd.f32 %v4160_v12, %v4159_v55  ;;  %v3616_v11 = vpop.f32.mrf.mxu1  ;;  %11529 = vst [vmem:[#allocation137_spill] sm:$0xff] %v9361_v41 }
 0x42a   :  { %11526 = vst [vmem:[#allocation84_spill] sm:$0xff] %v9345_v34  ;;  %v4162_v16 = vsel %vm10458_vm9, %v4117_v14, 0.0  ;;  %v9351_v37 = vadd.f32 %v9226_v54, %v3616_v11  ;;  %v4120_v29 = vmul.f32 %v9187_v2, %v9345_v34 }
 0x42b   :  { %v4163_v21 = vadd.f32 %v4162_v16, %v4161_v19  ;;  %v4988_v42 = vpop.f32.mrf.mxu1  ;;  %v9367_v19 = vpop.permute.xlu0 %4282 }
 0x42c   :  { %v4119_v36 = vmul.f32 %v9189_v46, %v9351_v37  ;;  %v9359_v26 = vadd.f32 %v4988_v42, %v9226_v54  ;;  %11530 = vst [vmem:[#allocation96_spill] sm:$0xff] %v9367_v19  ;;  %v4168_v2 = vsel %vm10458_vm9, %v4120_v29, 0.0  ;;  %v9381_v34 = vpop.permute.xlu1 %4291 }
 0x42d   :  { %v4165_v4 = vadd.f32 %v4164_v17, %v4163_v21  ;;  %v3626_v55 = vpop.f32.mrf.mxu1  ;;  %11532 = vst [vmem:[#allocation21_spill] sm:$0xff] %v9381_v34 }
 0x42e   :  { %11528 = vst [vmem:[#allocation97_spill] sm:$0xff] %v9359_v26  ;;  %v4166_v12 = vsel %vm10458_vm9, %v4119_v36, 0.0  ;;  %v9365_v14 = vadd.f32 %v9226_v54, %v3626_v55  ;;  %v4122_v46 = vmul.f32 %v9191_v60, %v9359_v26 }
 0x42f   :  { %v4167_v8 = vadd.f32 %v4166_v12, %v4165_v4  ;;  %v4991_v11 = vpop.f32.mrf.mxu1 }
 0x430   :  { %v4121_v16 = vmul.f32 %v9193_v58, %v9365_v14  ;;  %v9375_v21 = vadd.f32 %v4991_v11, %v9226_v54  ;;  %v4172_v29 = vsel %vm10458_vm9, %v4122_v46, 0.0  ;;  %v9391_v11 = vpop.permute.xlu0 %4288 }
 0x431   :  { %v4169_v42 = vadd.f32 %v4168_v2, %v4167_v8  ;;  %v3636_v17 = vpop.f32.mrf.mxu1  ;;  %11534 = vst [vmem:[#allocation76_spill] sm:$0xff] %v9391_v11 }
 0x432   :  { %11531 = vst [vmem:[#allocation52_spill] sm:$0xff] %v9375_v21  ;;  %v4170_v36 = vsel %vm10458_vm9, %v4121_v16, 0.0  ;;  %v9379_v55 = vadd.f32 %v9226_v54, %v3636_v17  ;;  %v4124_v60 = vmul.f32 %v9195_v63, %v9375_v21  ;;  %v9405_v21 = vpop.permute.xlu1 %4297 }
 0x433   :  { %v4171_v4 = vadd.f32 %v4170_v36, %v4169_v42  ;;  %v4994_v12 = vpop.f32.mrf.mxu1  ;;  %11537 = vst [vmem:[#allocation139_spill] sm:$0xff] %v9405_v21 }
 0x434   :  { %v4123_v58 = vmul.f32 %v9197_v0, %v9379_v55  ;;  %v9389_v8 = vadd.f32 %v4994_v12, %v9226_v54  ;;  %v4176_v26 = vsel %vm10458_vm9, %v4124_v60, 0.0 }
 0x435   :  { %v4173_v2 = vadd.f32 %v4172_v29, %v4171_v4  ;;  %v3646_v16 = vpop.f32.mrf.mxu1 }
 0x436   :  { %11533 = vst [vmem:[#allocation110_spill] sm:$0xff] %v9389_v8  ;;  %v4174_v42 = vsel %vm10458_vm9, %v4123_v58, 0.0  ;;  %v9395_v17 = vadd.f32 %v9226_v54, %v3646_v16  ;;  %v4126_v63 = vmul.f32 %v9199_v27, %v9389_v8  ;;  %v9411_v16 = vpop.permute.xlu0 %4294 }
 0x437   :  { %v4175_v36 = vadd.f32 %v4174_v42, %v4173_v2  ;;  %v4997_v46 = vpop.f32.mrf.mxu1  ;;  %11538 = vst [vmem:[#allocation73_spill] sm:$0xff] %v9411_v16 }
 0x438   :  { %11535 = vst [vmem:[#allocation87_spill] sm:$0xff] %v9395_v17  ;;  %v4125_v0 = vmul.f32 %v9201_v28, %v9395_v17  ;;  %v9403_v12 = vadd.f32 %v4997_v46, %v9226_v54  ;;  %v4180_v27 = vsel %vm10458_vm9, %v4126_v63, 0.0  ;;  %v9425_v17 = vpop.permute.xlu1 %4303 }
 0x439   :  { %v4177_v4 = vadd.f32 %v4176_v26, %v4175_v36  ;;  %v3656_v29 = vpop.f32.mrf.mxu1  ;;  %11539 = vst [vmem:[#allocation33_spill] sm:$0xff] %v9425_v17 }
 0x43a   :  { %11536 = vst [vmem:[#allocation48_spill] sm:$0xff] %v9403_v12  ;;  %v4178_v58 = vsel %vm10458_vm9, %v4125_v0, 0.0  ;;  %v9409_v2 = vadd.f32 %v9226_v54, %v3656_v29  ;;  %v4128_v28 = vmul.f32 %v9203_v53, %v9403_v12 }
 0x43b   :  { %v4179_v60 = vadd.f32 %v4178_v58, %v4177_v4  ;;  %v5000_v42 = vpop.f32.mrf.mxu1 }
 0x43c   :  { %v4127_v26 = vmul.f32 %v9205_v35, %v9409_v2  ;;  %v9419_v36 = vadd.f32 %v5000_v42, %v9226_v54  ;;  %v4184_v63 = vsel %vm10458_vm9, %v4128_v28, 0.0  ;;  %v9435_v42 = vpop.permute.xlu0 %4300 }
 0x43d   :  { %v4181_v46 = vadd.f32 %v4180_v27, %v4179_v60  ;;  %v3666_v0 = vpop.f32.mrf.mxu1  ;;  %11541 = vst [vmem:[#allocation70_spill] sm:$0xff] %v9435_v42 }
 0x43e   :  { %v4182_v29 = vsel %vm10458_vm9, %v4127_v26, 0.0  ;;  %v9423_v8 = vadd.f32 %v9226_v54, %v3666_v0  ;;  %v4130_v53 = vmul.f32 %v9207_v40, %v9419_v36 }
 0x43f   :  { %v4183_v4 = vadd.f32 %v4182_v29, %v4181_v46  ;;  %v5003_v58 = vpop.f32.mrf.mxu1 }
 0x440   :  { %v4129_v35 = vmul.f32 %v9209_v31, %v9423_v8  ;;  %v9433_v60 = vadd.f32 %v5003_v58, %v9226_v54  ;;  %v4188_v12 = vsel %vm10458_vm9, %v4130_v53, 0.0 }
 0x441   :  { %v4185_v27 = vadd.f32 %v4184_v63, %v4183_v4  ;;  %v3676_v26 = vpop.f32.mrf.mxu1 }
 0x442   :  { %11540 = vst [vmem:[#allocation17_spill] sm:$0xff] %v9433_v60  ;;  %v4186_v46 = vsel %vm10458_vm9, %v4129_v35, 0.0  ;;  %v9439_v0 = vadd.f32 %v9226_v54, %v3676_v26  ;;  %v4132_v40 = vmul.f32 %v9211_v45, %v9433_v60 }
 0x443   :  { %v4187_v29 = vadd.f32 %v4186_v46, %v4185_v27  ;;  %v5006_v28 = vpop.f32.mrf.mxu1  ;;  %v9453_v27 = vpop.permute.xlu1 %4309 }
 0x444   :  { %11542 = vst [vmem:[#allocation29_spill] sm:$0xff] %v9439_v0  ;;  %v4131_v31 = vmul.f32 %v9213_v18, %v9439_v0  ;;  %v9447_v58 = vadd.f32 %v5006_v28, %v9226_v54  ;;  %11544 = vst [vmem:[#allocation5_spill] sm:$0xff] %v9453_v27  ;;  %v9455_v46 = vpop.permute.xlu0 %4306  ;;  %v4192_v45 = vsel %vm10458_vm9, %v4132_v40, 0.0  ;;  %vm10495_vm1 = vcmp.eq.s32.totalorder %v9453_v27, 1 }
 0x445   :  { %v4189_v4 = vadd.f32 %v4188_v12, %v4187_v29  ;;  %v3686_v63 = vpop.f32.mrf.mxu1  ;;  %11545 = vst [vmem:[#allocation57_spill] sm:$0xff] %v9455_v46 }
 0x446   :  { %11543 = vst [vmem:[#allocation46_spill] sm:$0xff] %v9447_v58  ;;  %v4190_v35 = vsel %vm10458_vm9, %v4131_v31, 0.0  ;;  %v9451_v26 = vadd.f32 %v9226_v54, %v3686_v63  ;;  %v4134_v18 = vmul.f32 %v9215_v9, %v9447_v58 }
 0x447   :  { %v4191_v53 = vadd.f32 %v4190_v35, %v4189_v4  ;;  %v9464_v63 = vpop.permute.xlu1 %4315  ;;  %v4204_v35 = vstv %s5014_s6 }
 0x448   :  { %v4133_v28 = vmul.f32 %v9217_v24, %v9451_v26  ;;  %v4196_v54 = vsel %vm10458_vm9, %v4134_v18, 0.0  ;;  %11546 = vst [vmem:[#allocation26_spill] sm:$0xff] %v9464_v63  ;;  %v9466_v60 = vpop.permute.xlu0 %4312  ;;  %5024 = vrcp.f32 %v4204_v35  ;;  %vm10493_vm6 = vcmp.eq.s32.totalorder %v9464_v63, 1 }
 0x449   :  { %v4193_v12 = vadd.f32 %v4192_v45, %v4191_v53  ;;  %11547 = vst [vmem:[#allocation37_spill] sm:$0xff] %v9466_v60  ;;  %vm10494_vm12 = vcmp.eq.s32.totalorder %v9466_v60, 1 }
 0x44a   :  { %v4194_v29 = vsel %vm10458_vm9, %v4133_v28, 0.0  ;;  %vm10496_vm9 = vcmp.eq.s32.totalorder %v9455_v46, 1 }
 0x44b   :  { %v4195_v31 = vadd.f32 %v4194_v29, %v4193_v12  ;;  %v9468_v9 = vpop.permute.xlu1 %4321  ;;  %v11576_v27 = vld [vmem:[#allocation29_spill] sm:$0xff] }
 0x44c   :  { %11548 = vst [vmem:[#allocation43_spill] sm:$0xff] %v9468_v9  ;;  %v9470_v58 = vpop.permute.xlu0 %4318  ;;  %vm10491_vm4 = vcmp.eq.s32.totalorder %v9468_v9, 1 }
 0x44d   :  { %v4197_v4 = vadd.f32 %v4196_v54, %v4195_v31  ;;  %11549 = vst [vmem:[#allocation60_spill] sm:$0xff] %v9470_v58  ;;  %vm10492_vm8 = vcmp.eq.s32.totalorder %v9470_v58, 1  ;;  %v11578_v63 = vld [vmem:[#allocation46_spill] sm:$0xff] }
 0x44f   :  { %v4198_v40 = vrot.slane %v4197_v4, 4  ;;  %v9472_v28 = vpop.permute.xlu1 %4327 }
 0x450   :  { %11550 = vst [vmem:[#allocation35_spill] sm:$0xff] %v9472_v28  ;;  %v9474_v12 = vpop.permute.xlu0 %4324  ;;  %vm10489_vm3 = vcmp.eq.s32.totalorder %v9472_v28, 1 }
 0x451   :  { %v4199_v0 = vadd.f32 %v4198_v40, %v4197_v4  ;;  %11551 = vst [vmem:[#allocation67_spill] sm:$0xff] %v9474_v12  ;;  %vm10490_vm10 = vcmp.eq.s32.totalorder %v9474_v12, 1 }
 0x453   :  { %v4200_v24 = vrot.slane %v4199_v0, 2  ;;  %v9496_v29 = vpop.permute.xlu1 %4333 }
 0x454   :  { %11552 = vst [vmem:[#allocation56_spill] sm:$0xff] %v9496_v29  ;;  %v9498_v31 = vpop.permute.xlu0 %4330  ;;  %vm10487_vm11 = vcmp.eq.s32.totalorder %v9496_v29, 1 }
 0x455   :  { %v4201_v53 = vadd.f32 %v4200_v24, %v4199_v0  ;;  %v5025_v0 = vpop.eup %5024  ;;  %11553 = vst [vmem:[#allocation39_spill] sm:$0xff] %v9498_v31  ;;  %vm10488_vm15 = vcmp.eq.s32.totalorder %v9498_v31, 1 }
 0x457   :  { %v4202_v45 = vrot.slane %v4201_v53, 1 }
 0x459   :  { %v4203_v18 = vadd.f32 %v4202_v45, %v4201_v53  ;;  %v11565_v45 = vld [vmem:[#allocation84_spill] sm:$0xff] }
 0x45b   :  { %v4206_v54 = vmul.f32 %v5025_v0, %v4203_v18  ;;  %v11568_v18 = vld [vmem:[#allocation97_spill] sm:$0xff]  ;;  %v11571_v0 = vld [vmem:[#allocation52_spill] sm:$0xff] }
 0x45d   :  { %v4367_v4 = vsel %vm10459_vm0, %v4206_v54, %v9234_v6  ;;  %v4368_v35 = vsel %vm10460_vm5, %v4206_v54, %v9229_v51  ;;  %v4369_v40 = vsel %vm10461_vm2, %v4206_v54, %v9247_v25  ;;  %v4370_v24 = vsel %vm10462_vm14, %v4206_v54, %v9243_v30 }
 0x45e   :  { %v4371_v53 = vsel %vm10463_vm13, %v4206_v54, %v9263_v10  ;;  %v4372_v6 = vsel %vm10464_vm7, %v4206_v54, %v9257_v50  ;;  %vm11554_vm0 = vcmp.eq.s32.totalorder %v9279_v56, 1  ;;  %vm11555_vm5 = vcmp.eq.s32.totalorder %v9273_v13, 1 }
 0x45f   :  { %v4373_v51 = vsel %vm11554_vm0, %v4206_v54, %v9277_v39  ;;  %v4374_v25 = vsel %vm11555_vm5, %v4206_v54, %v9271_v33  ;;  %vm11556_vm2 = vcmp.eq.s32.totalorder %v9303_v15, 1  ;;  %vm11557_vm14 = vcmp.eq.s32.totalorder %v9293_v62, 1 }
 0x460   :  { %v4375_v30 = vsel %vm11556_vm2, %v4206_v54, %v9291_v32  ;;  %v4376_v10 = vsel %vm11557_vm14, %v4206_v54, %v9287_v3  ;;  %vm11558_vm13 = vcmp.eq.s32.totalorder %v9323_v1, 1  ;;  %vm11559_vm7 = vcmp.eq.s32.totalorder %v9317_v48, 1 }
 0x461   :  { %v4377_v50 = vsel %vm11558_vm13, %v4206_v54, %v9307_v52  ;;  %v4378_v39 = vsel %vm11559_vm7, %v4206_v54, %v9301_v57  ;;  %vm11560_vm0 = vcmp.eq.s32.totalorder %v9347_v22, 1  ;;  %vm11561_vm5 = vcmp.eq.s32.totalorder %v9337_v5, 1 }
 0x462   :  { %v4379_v33 = vsel %vm11560_vm0, %v4206_v54, %v9321_v20  ;;  %v4380_v32 = vsel %vm11561_vm5, %v4206_v54, %v9315_v61  ;;  %vm11562_vm2 = vcmp.eq.s32.totalorder %v9367_v19, 1  ;;  %vm11563_vm14 = vcmp.eq.s32.totalorder %v9361_v41, 1 }
 0x463   :  { %v4381_v3 = vsel %vm11562_vm2, %v4206_v54, %v9335_v43  ;;  %v4382_v52 = vsel %vm11563_vm14, %v4206_v54, %v9331_v7  ;;  %vm11564_vm13 = vcmp.eq.s32.totalorder %v9391_v11, 1  ;;  %vm11566_vm7 = vcmp.eq.s32.totalorder %v9381_v34, 1  ;;  %v11573_v11 = vld [vmem:[#allocation87_spill] sm:$0xff]  ;;  %v11574_v34 = vld [vmem:[#allocation110_spill] sm:$0xff] }
 0x464   :  { %v4383_v57 = vsel %vm11564_vm13, %v4206_v54, %v9351_v37  ;;  %v4384_v20 = vsel %vm11566_vm7, %v4206_v54, %v11565_v45  ;;  %vm11567_vm0 = vcmp.eq.s32.totalorder %v9411_v16, 1  ;;  %vm11569_vm5 = vcmp.eq.s32.totalorder %v9405_v21, 1 }
 0x465   :  { %v4385_v61 = vsel %vm11567_vm0, %v4206_v54, %v9365_v14  ;;  %v4386_v43 = vsel %vm11569_vm5, %v4206_v54, %v11568_v18  ;;  %vm11570_vm2 = vcmp.eq.s32.totalorder %v9435_v42, 1  ;;  %vm11572_vm14 = vcmp.eq.s32.totalorder %v9425_v17, 1  ;;  %v4790_v18 = vld [vmem:[%s10040_s7] ss:$0 sm:$0xff]  ;;  %v11575_v42 = vld [vmem:[#allocation48_spill] sm:$0xff]  ;;  %v11577_v17 = vld [vmem:[#allocation17_spill] sm:$0xff] }
 0x466   :  { %v4387_v7 = vsel %vm11570_vm2, %v4206_v54, %v9379_v55  ;;  %v4388_v37 = vsel %vm11572_vm14, %v4206_v54, %v11571_v0  ;;  %v4389_v45 = vsel %vm10496_vm9, %v4206_v54, %v11573_v11  ;;  %v4390_v14 = vsel %vm10495_vm1, %v4206_v54, %v11574_v34 }
 0x467   :  { %v4391_v55 = vsel %vm10494_vm12, %v4206_v54, %v9409_v2  ;;  %v4392_v0 = vsel %vm10493_vm6, %v4206_v54, %v11575_v42  ;;  %v4393_v11 = vsel %vm10492_vm8, %v4206_v54, %v9423_v8  ;;  %v4394_v34 = vsel %vm10491_vm4, %v4206_v54, %v9419_v36 }
 0x468   :  { %v4395_v46 = vsel %vm10490_vm10, %v4206_v54, %v11576_v27  ;;  %v4396_v2 = vsel %vm10489_vm3, %v4206_v54, %v11577_v17  ;;  %v4397_v42 = vsel %vm10488_vm15, %v4206_v54, %v9451_v26  ;;  %v4398_v8 = vsel %vm10487_vm11, %v4206_v54, %v11578_v63 }
 0x469   :  { %v4406_v58 = vmul.f32 %v4790_v18, %v4367_v4  ;;  %v4407_v60 = vmul.f32 %v4790_v18, %v4368_v35  ;;  %v4408_v9 = vmul.f32 %v4790_v18, %v4369_v40  ;;  %v4409_v36 = vmul.f32 %v4790_v18, %v4370_v24  ;;  %v4791_v24 = vld [vmem:[%s10041_s8] ss:$0 sm:$0xff] }
 0x46a   :  { %v4410_v21 = vmul.f32 %v4790_v18, %v4371_v53  ;;  %v4411_v16 = vmul.f32 %v4790_v18, %v4372_v6  ;;  %v4412_v12 = vmul.f32 %v4790_v18, %v4373_v51  ;;  %v4413_v27 = vmul.f32 %v4790_v18, %v4374_v25 }
 0x46b   :  { %v4414_v41 = vmul.f32 %v4790_v18, %v4375_v30  ;;  %v4415_v19 = vmul.f32 %v4790_v18, %v4376_v10  ;;  %v4416_v28 = vmul.f32 %v4790_v18, %v4377_v50  ;;  %v4417_v17 = vmul.f32 %v4790_v18, %v4378_v39 }
 0x46c   :  { %v4418_v5 = vmul.f32 %v4790_v18, %v4379_v33  ;;  %v4419_v22 = vmul.f32 %v4790_v18, %v4380_v32  ;;  %v4420_v31 = vmul.f32 %v4790_v18, %v4381_v3  ;;  %v4421_v26 = vmul.f32 %v4790_v18, %v4382_v52 }
 0x46d   :  { %v4422_v48 = vmul.f32 %v4790_v18, %v4383_v57  ;;  %v4423_v1 = vmul.f32 %v4790_v18, %v4384_v20  ;;  %v4424_v29 = vmul.f32 %v4790_v18, %v4385_v61  ;;  %v4425_v63 = vmul.f32 %v4790_v18, %v4386_v43 }
 0x46e   :  { %v4426_v54 = vmul.f32 %v4790_v18, %v4387_v7  ;;  %v4427_v4 = vmul.f32 %v4790_v18, %v4388_v37  ;;  %v4428_v35 = vmul.f32 %v4790_v18, %v4389_v45  ;;  %v4429_v40 = vmul.f32 %v4790_v18, %v4390_v14 }
 0x46f   :  { %v4430_v53 = vmul.f32 %v4790_v18, %v4391_v55  ;;  %v4431_v6 = vmul.f32 %v4790_v18, %v4392_v0  ;;  %v4432_v51 = vmul.f32 %v4790_v18, %v4393_v11  ;;  %v4433_v25 = vmul.f32 %v4790_v18, %v4394_v34 }
 0x470   :  { %v4434_v30 = vmul.f32 %v4790_v18, %v4395_v46  ;;  %v4435_v10 = vmul.f32 %v4790_v18, %v4396_v2  ;;  %v4436_v50 = vmul.f32 %v4790_v18, %v4397_v42  ;;  %v4437_v39 = vmul.f32 %v4790_v18, %v4398_v8 }
 0x471   :  { %v9614_v33 = vadd.f32 %v4791_v24, %v4406_v58  ;;  %v9616_v32 = vadd.f32 %v4791_v24, %v4407_v60  ;;  %v9618_v3 = vadd.f32 %v4791_v24, %v4408_v9  ;;  %v9620_v52 = vadd.f32 %v4791_v24, %v4409_v36 }
 0x472   :  { %v9622_v57 = vadd.f32 %v4791_v24, %v4410_v21  ;;  %v9624_v20 = vadd.f32 %v4791_v24, %v4411_v16  ;;  %v9626_v61 = vadd.f32 %v4791_v24, %v4412_v12  ;;  %v9628_v43 = vadd.f32 %v4791_v24, %v4413_v27 }
 0x473   :  { %v9630_v46 = vadd.f32 %v4791_v24, %v4414_v41  ;;  %v9632_v7 = vadd.f32 %v4791_v24, %v4415_v19  ;;  %v9634_v58 = vadd.f32 %v4791_v24, %v4416_v28  ;;  %v9636_v60 = vadd.f32 %v4791_v24, %v4417_v17 }
 0x474   :  { %v9638_v9 = vadd.f32 %v4791_v24, %v4418_v5  ;;  %v9640_v37 = vadd.f32 %v4791_v24, %v4419_v22  ;;  %v9642_v21 = vadd.f32 %v4791_v24, %v4420_v31  ;;  %v9644_v16 = vadd.f32 %v4791_v24, %v4421_v26 }
 0x475   :  { %v9646_v12 = vadd.f32 %v4791_v24, %v4422_v48  ;;  %v9648_v45 = vadd.f32 %v4791_v24, %v4423_v1  ;;  %v9650_v41 = vadd.f32 %v4791_v24, %v4424_v29  ;;  %v9652_v19 = vadd.f32 %v4791_v24, %v4425_v63 }
 0x476   :  { %v9654_v28 = vadd.f32 %v4791_v24, %v4426_v54  ;;  %v9656_v14 = vadd.f32 %v4791_v24, %v4427_v4  ;;  %v9658_v5 = vadd.f32 %v4791_v24, %v4428_v35  ;;  %v9660_v22 = vadd.f32 %v4791_v24, %v4429_v40 }
 0x477   :  { %v9662_v31 = vadd.f32 %v4791_v24, %v4430_v53  ;;  %v9664_v18 = vadd.f32 %v4791_v24, %v4431_v6  ;;  %v9666_v48 = vadd.f32 %v4791_v24, %v4432_v51  ;;  %v9668_v1 = vadd.f32 %v4791_v24, %v4433_v25 }
 0x478   :  { %v9670_v29 = vadd.f32 %v4791_v24, %v4434_v30  ;;  %v9672_v55 = vadd.f32 %v4791_v24, %v4435_v10  ;;  %vm4477_vm13 = vcmp.ge.f32.partialorder %v9614_v33, 0.0  ;;  %vm4478_vm7 = vcmp.ge.f32.partialorder %v9616_v32, 0.0 }
 0x479   :  { %vm4479_vm0 = vcmp.ge.f32.partialorder %v9618_v3, 0.0  ;;  %vm4480_vm5 = vcmp.ge.f32.partialorder %v9620_v52, 0.0  ;;  %vm4481_vm2 = vcmp.ge.f32.partialorder %v9622_v57, 0.0  ;;  %vm4482_vm14 = vcmp.ge.f32.partialorder %v9624_v20, 0.0 }
 0x47a   :  { %vm4483_vm11 = vcmp.ge.f32.partialorder %v9626_v61, 0.0  ;;  %vm4484_vm15 = vcmp.ge.f32.partialorder %v9628_v43, 0.0  ;;  %vm4485_vm3 = vcmp.ge.f32.partialorder %v9630_v46, 0.0  ;;  %v9684_v0 = vadd.f32 %v4791_v24, %v4436_v50 }
 0x47b   :  { %v4509_v11 = vmul.f32 0.2, %v9614_v33  ;;  %v4510_v34 = vmul.f32 0.2, %v9616_v32  ;;  %v4511_v2 = vmul.f32 0.2, %v9618_v3  ;;  %v9693_v42 = vadd.f32 %v4791_v24, %v4437_v39 }
 0x47c   :  { %vm4492_vm9 = vcmp.ge.f32.partialorder %v9644_v16, 0.0  ;;  %vm4493_vm4 = vcmp.ge.f32.partialorder %v9646_v12, 0.0  ;;  %v4512_v8 = vmul.f32 0.2, %v9620_v52  ;;  %v4513_v36 = vmul.f32 0.2, %v9622_v57 }
 0x47d   :  { %v4514_v27 = vmul.f32 0.2, %v9624_v20  ;;  %vm4498_vm1 = vcmp.ge.f32.partialorder %v9656_v14, 0.0  ;;  %v4515_v17 = vmul.f32 0.2, %v9626_v61  ;;  %v9712_v54 = vsel %vm4477_vm13, %v9614_v33, %v4509_v11 }
 0x47e   :  { %v4516_v26 = vmul.f32 0.2, %v9628_v43  ;;  %v4517_v63 = vmul.f32 0.2, %v9630_v46  ;;  %vm4502_vm10 = vcmp.ge.f32.partialorder %v9664_v18, 0.0  ;;  %v4542_v24 = vsel %vm4478_vm7, %v9616_v32, %v4510_v34 }
 0x47f   :  { %v4518_v4 = vmul.f32 0.2, %v9632_v7  ;;  %v4519_v35 = vmul.f32 0.2, %v9634_v58  ;;  %v4520_v40 = vmul.f32 0.2, %v9636_v60  ;;  %v4543_v25 = vsel %vm4479_vm0, %v9618_v3, %v4511_v2 }
 0x480   :  { %vm4504_vm8 = vcmp.ge.f32.partialorder %v9668_v1, 0.0  ;;  %vm4505_vm12 = vcmp.ge.f32.partialorder %v9670_v29, 0.0  ;;  %vm4506_vm6 = vcmp.ge.f32.partialorder %v9672_v55, 0.0  ;;  %v4521_v53 = vmul.f32 0.2, %v9638_v9 }
 0x481   :  { %v4522_v6 = vmul.f32 0.2, %v9640_v37  ;;  %v4523_v51 = vmul.f32 0.2, %v9642_v21  ;;  %vm4507_vm7 = vcmp.ge.f32.partialorder %v9684_v0, 0.0  ;;  %vm4508_vm13 = vcmp.ge.f32.partialorder %v9693_v42, 0.0 }
 0x482   :  { %v4524_v30 = vmul.f32 0.2, %v9644_v16  ;;  %v4525_v10 = vmul.f32 0.2, %v9646_v12  ;;  %v4526_v50 = vmul.f32 0.2, %v9648_v45  ;;  %v4544_v39 = vsel %vm4480_vm5, %v9620_v52, %v4512_v8 }
 0x483   :  { %v4527_v33 = vmul.f32 0.2, %v9650_v41  ;;  %v4528_v32 = vmul.f32 0.2, %v9652_v19  ;;  %v4529_v3 = vmul.f32 0.2, %v9654_v28  ;;  %v4545_v11 = vsel %vm4481_vm2, %v9622_v57, %v4513_v36 }
 0x484   :  { %v4530_v34 = vmul.f32 0.2, %v9656_v14  ;;  %v4531_v2 = vmul.f32 0.2, %v9658_v5  ;;  %v4532_v62 = vmul.f32 0.2, %v9660_v22  ;;  %v4546_v52 = vsel %vm4482_vm14, %v9624_v20, %v4514_v27 }
 0x485   :  { %v4533_v8 = vmul.f32 0.2, %v9662_v31  ;;  %v4534_v15 = vmul.f32 0.2, %v9664_v18  ;;  %v4535_v13 = vmul.f32 0.2, %v9666_v48  ;;  %v4547_v57 = vsel %vm4483_vm11, %v9626_v61, %v4515_v17 }
 0x486   :  { %v4536_v36 = vmul.f32 0.2, %v9668_v1  ;;  %v4537_v56 = vmul.f32 0.2, %v9670_v29  ;;  %v4538_v23 = vmul.f32 0.2, %v9672_v55  ;;  %v4548_v20 = vsel %vm4484_vm15, %v9628_v43, %v4516_v26 }
 0x487   :  { %v4539_v27 = vmul.f32 0.2, %v9684_v0  ;;  %v4540_v49 = vmul.f32 0.2, %v9693_v42  ;;  %v4549_v38 = vsel %vm4485_vm3, %v9630_v46, %v4517_v63  ;;  %vm11579_vm11 = vcmp.ge.f32.partialorder %v9632_v7, 0.0 }
 0x488   :  { %v4550_v61 = vsel %vm11579_vm11, %v9632_v7, %v4518_v4  ;;  %vm11580_vm0 = vcmp.ge.f32.partialorder %v9634_v58, 0.0  ;;  %vm11581_vm5 = vcmp.ge.f32.partialorder %v9636_v60, 0.0  ;;  %vm11582_vm15 = vcmp.ge.f32.partialorder %v9638_v9, 0.0 }
 0x489   :  { %v4551_v17 = vsel %vm11580_vm0, %v9634_v58, %v4519_v35  ;;  %v4552_v43 = vsel %vm11581_vm5, %v9636_v60, %v4520_v40  ;;  %v4553_v26 = vsel %vm11582_vm15, %v9638_v9, %v4521_v53  ;;  %vm11583_vm2 = vcmp.ge.f32.partialorder %v9640_v37, 0.0  ;;  %v11618_v40 = vld [vmem:[#allocation20_spill] sm:$0xff]  ;;  %v11620_v53 = vld [vmem:[#allocation86_spill] sm:$0xff] }
 0x48a   :  { %v4554_v46 = vsel %vm11583_vm2, %v9640_v37, %v4522_v6  ;;  %vm11584_vm3 = vcmp.ge.f32.partialorder %v9642_v21, 0.0  ;;  %v4556_v58 = vsel %vm4492_vm9, %v9644_v16, %v4524_v30  ;;  %v4557_v60 = vsel %vm4493_vm4, %v9646_v12, %v4525_v10  ;;  %v11628_v30 = vld [vmem:[#allocation96_spill] sm:$0xff] }
 0x48b   :  { %v4555_v7 = vsel %vm11584_vm3, %v9642_v21, %v4523_v51  ;;  %vm11585_vm14 = vcmp.ge.f32.partialorder %v9648_v45, 0.0  ;;  %vm11586_vm11 = vcmp.ge.f32.partialorder %v9650_v41, 0.0  ;;  %vm11587_vm0 = vcmp.ge.f32.partialorder %v9652_v19, 0.0  ;;  %v11622_v51 = vld [vmem:[#allocation62_spill] sm:$0xff] }
 0x48c   :  { %v4558_v9 = vsel %vm11585_vm14, %v9648_v45, %v4526_v50  ;;  %v4559_v37 = vsel %vm11586_vm11, %v9650_v41, %v4527_v33  ;;  %v4560_v21 = vsel %vm11587_vm0, %v9652_v19, %v4528_v32  ;;  %vm11588_vm5 = vcmp.ge.f32.partialorder %v9654_v28, 0.0  ;;  %v11630_v50 = vld [vmem:[#allocation137_spill] sm:$0xff]  ;;  %v11632_v33 = vld [vmem:[#allocation76_spill] sm:$0xff] }
 0x48d   :  { %v4561_v16 = vsel %vm11588_vm5, %v9654_v28, %v4529_v3  ;;  %v4562_v12 = vsel %vm4498_vm1, %v9656_v14, %v4530_v34  ;;  %vm11589_vm9 = vcmp.ge.f32.partialorder %v9658_v5, 0.0  ;;  %vm11590_vm4 = vcmp.ge.f32.partialorder %v9660_v22, 0.0  ;;  %v11634_v3 = vld [vmem:[#allocation21_spill] sm:$0xff] }
 0x48e   :  { %v4563_v45 = vsel %vm11589_vm9, %v9658_v5, %v4531_v2  ;;  %v4564_v41 = vsel %vm11590_vm4, %v9660_v22, %v4532_v62  ;;  %vm11591_vm15 = vcmp.ge.f32.partialorder %v9662_v31, 0.0  ;;  %v4566_v28 = vsel %vm4502_vm10, %v9664_v18, %v4534_v15  ;;  %v11640_v34 = vld [vmem:[#allocation73_spill] sm:$0xff] }
 0x48f   :  { %v4565_v19 = vsel %vm11591_vm15, %v9662_v31, %v4533_v8  ;;  %vm11592_vm2 = vcmp.ge.f32.partialorder %v9666_v48, 0.0  ;;  %v4568_v5 = vsel %vm4504_vm8, %v9668_v1, %v4536_v36  ;;  %v4569_v62 = vsel %vm4505_vm12, %v9670_v29, %v4537_v56  ;;  %v11598_v1 = vld [vmem:[#allocation24_spill] sm:$0xff] }
 0x490   :  { %v4567_v14 = vsel %vm11592_vm2, %v9666_v48, %v4535_v13  ;;  %v4570_v22 = vsel %vm4506_vm6, %v9672_v55, %v4538_v23  ;;  %v4571_v15 = vsel %vm4507_vm7, %v9684_v0, %v4539_v27  ;;  %v4572_v13 = vsel %vm4508_vm13, %v9693_v42, %v4540_v49  ;;  %v11596_v48 = vld [vmem:[#allocation141_spill] sm:$0xff]  ;;  %v11600_v55 = vld [vmem:[#allocation34_spill] sm:$0xff]  ;;  %v11608_v42 = vld [vmem:[#allocation79_spill] sm:$0xff] }
 0x491   :  { %vm11593_vm10 = vcmp.eq.s32.totalorder %v9221_v47, 1  ;;  %vm11594_vm8 = vcmp.eq.s32.totalorder %v9219_v59, 1  ;;  %vm11595_vm12 = vcmp.eq.s32.totalorder %v9236_v44, 1  ;;  %vm11597_vm6 = vcmp.eq.s32.totalorder %v11596_v48, 1  ;;  %v11604_v59 = vld [vmem:[#allocation42_spill] sm:$0xff]  ;;  %v11606_v44 = vld [vmem:[#allocation12_spill] sm:$0xff] }
 0x492   :  { %v4573_v31 = vsel %vm11593_vm10, nan, %v9712_v54  ;;  %v4574_v18 = vsel %vm11594_vm8, nan, %v4542_v24  ;;  %v4575_v56 = vsel %vm11595_vm12, nan, %v4543_v25  ;;  %v4576_v23 = vsel %vm11597_vm6, nan, %v4544_v39  ;;  %v11610_v54 = vld [vmem:[#allocation54_spill] sm:$0xff] }
 0x493   :  { %vm11599_vm1 = vcmp.eq.s32.totalorder %v11598_v1, 1  ;;  %vm11601_vm7 = vcmp.eq.s32.totalorder %v11600_v55, 1  ;;  %vm11602_vm13 = vcmask 130048   ;;  %vm11605_vm14 = vcmp.eq.s32.totalorder %v11604_v59, 1 }
 0x494   :  { %v4577_v29 = vsel %vm11599_vm1, nan, %v4545_v11  ;;  %v4578_v0 = vsel %vm11601_vm7, nan, %v4546_v52  ;;  %4605 = vst.msk [vmem:[%s10042_s9] sm:$0xff] %vm11602_vm13, %v4573_v31  ;;  %vm11603_vm3 = vmmov %vm11602_vm13  ;;  %v4579_v47 = vsel %vm11605_vm14, nan, %v4547_v57  ;;  %vm11607_vm11 = vcmp.eq.s32.totalorder %v11606_v44, 1  ;;  %v11642_v52 = vld [vmem:[#allocation139_spill] sm:$0xff] }
 0x495   :  { %4606 = vst.msk [vmem:[%s10042_s9 + $0x8] sm:$0xff] %vm11603_vm3, %v4574_v18  ;;  %v4580_v49 = vsel %vm11607_vm11, nan, %v4548_v20  ;;  %vm11609_vm0 = vcmp.eq.s32.totalorder %v11608_v42, 1  ;;  %vm11611_vm5 = vcmp.eq.s32.totalorder %v11610_v54, 1  ;;  %vm11612_vm9 = vmmov %vm11603_vm3  ;;  %vm11619_vm8 = vcmp.eq.s32.totalorder %v11618_v40, 1  ;;  %v11644_v57 = vld [vmem:[#allocation70_spill] sm:$0xff] }
 0x496   :  { %v4581_v63 = vsel %vm11609_vm0, nan, %v4549_v38  ;;  %v4582_v4 = vsel %vm11611_vm5, nan, %v4550_v61  ;;  %4607 = vst.msk [vmem:[%s10042_s9 + $0x10] sm:$0xff] %vm11612_vm9, %v4575_v56  ;;  %vm11613_vm4 = vmmov %vm11603_vm3  ;;  %v11616_v38 = vld [vmem:[#allocation40_spill] sm:$0xff]  ;;  %v4584_v24 = vsel %vm11619_vm8, nan, %v4552_v43  ;;  %vm11621_vm12 = vcmp.eq.s32.totalorder %v11620_v53, 1 }
 0x497   :  { %4608 = vst.msk [vmem:[%s10042_s9 + $0x18] sm:$0xff] %vm11613_vm4, %v4576_v23  ;;  %vm11614_vm15 = vmmov %vm11603_vm3  ;;  %vm11617_vm10 = vcmp.eq.s32.totalorder %v11616_v38, 1  ;;  %v4585_v6 = vsel %vm11621_vm12, nan, %v4553_v26  ;;  %vm11623_vm6 = vcmp.eq.s32.totalorder %v11622_v51, 1  ;;  %vm11629_vm14 = vcmp.eq.s32.totalorder %v11628_v30, 1  ;;  %v11646_v20 = vld [vmem:[#allocation33_spill] sm:$0xff] }
 0x498   :  { %4609 = vst.msk [vmem:[%s10042_s9 + $0x20] sm:$0xff] %vm11614_vm15, %v4577_v29  ;;  %vm11615_vm2 = vmmov %vm11603_vm3  ;;  %v4583_v35 = vsel %vm11617_vm10, nan, %v4551_v17  ;;  %v4586_v25 = vsel %vm11623_vm6, nan, %v4554_v46  ;;  %v4587_v10 = vsel %vm11629_vm14, nan, %v4555_v7  ;;  %vm11631_vm11 = vcmp.eq.s32.totalorder %v11630_v50, 1  ;;  %v11651_v61 = vld [vmem:[#allocation57_spill] sm:$0xff] }
 0x499   :  { %4610 = vst.msk [vmem:[%s10042_s9 + $0x28] sm:$0xff] %vm11615_vm2, %v4578_v0  ;;  %vm11624_vm1 = vmmov %vm11615_vm2  ;;  %v4588_v39 = vsel %vm11631_vm11, nan, %v4556_v58  ;;  %vm11633_vm0 = vcmp.eq.s32.totalorder %v11632_v33, 1  ;;  %vm11635_vm5 = vcmp.eq.s32.totalorder %v11634_v3, 1  ;;  %vm11641_vm10 = vcmp.eq.s32.totalorder %v11640_v34, 1  ;;  %v11653_v43 = vld [vmem:[#allocation5_spill] sm:$0xff] }
 0x49a   :  { %4611 = vst.msk [vmem:[%s10042_s9 + $0x30] sm:$0xff] %vm11624_vm1, %v4579_v47  ;;  %vm11625_vm7 = vmmov %vm11624_vm1  ;;  %v4589_v32 = vsel %vm11633_vm0, nan, %v4557_v60  ;;  %v4590_v11 = vsel %vm11635_vm5, nan, %v4558_v9  ;;  %v4591_v2 = vsel %vm11641_vm10, nan, %v4559_v37  ;;  %vm11643_vm8 = vcmp.eq.s32.totalorder %v11642_v52, 1  ;;  %v11655_v46 = vld [vmem:[#allocation37_spill] sm:$0xff] }
 0x49b   :  { %4612 = vst.msk [vmem:[%s10042_s9 + $0x38] sm:$0xff] %vm11625_vm7, %v4580_v49  ;;  %vm11626_vm13 = vmmov %vm11624_vm1  ;;  %v4592_v8 = vsel %vm11643_vm8, nan, %v4560_v21  ;;  %vm11645_vm12 = vcmp.eq.s32.totalorder %v11644_v57, 1  ;;  %vm11647_vm6 = vcmp.eq.s32.totalorder %v11646_v20, 1  ;;  %vm11652_vm14 = vcmp.eq.s32.totalorder %v11651_v61, 1  ;;  %v11657_v58 = vld [vmem:[#allocation26_spill] sm:$0xff] }
 0x49c   :  { %4613 = vst.msk [vmem:[%s10042_s9 + $0x40] sm:$0xff] %vm11626_vm13, %v4581_v63  ;;  %vm11627_vm3 = vmmov %vm11624_vm1  ;;  %v4593_v36 = vsel %vm11645_vm12, nan, %v4561_v16  ;;  %v4594_v27 = vsel %vm11647_vm6, nan, %v4562_v12  ;;  %v4595_v17 = vsel %vm11652_vm14, nan, %v4563_v45  ;;  %vm11654_vm11 = vcmp.eq.s32.totalorder %v11653_v43, 1  ;;  %v11663_v9 = vld [vmem:[#allocation60_spill] sm:$0xff] }
 0x49d   :  { %4614 = vst.msk [vmem:[%s10042_s9 + $0x48] sm:$0xff] %vm11627_vm3, %v4582_v4  ;;  %vm11636_vm9 = vmmov %vm11624_vm1  ;;  %v4596_v26 = vsel %vm11654_vm11, nan, %v4564_v41  ;;  %vm11656_vm0 = vcmp.eq.s32.totalorder %v11655_v46, 1  ;;  %vm11658_vm5 = vcmp.eq.s32.totalorder %v11657_v58, 1  ;;  %vm11664_vm10 = vcmp.eq.s32.totalorder %v11663_v9, 1  ;;  %v11665_v21 = vld [vmem:[#allocation43_spill] sm:$0xff] }
 0x49e   :  { %4615 = vst.msk [vmem:[%s10042_s9 + $0x50] sm:$0xff] %vm11636_vm9, %v4583_v35  ;;  %vm11637_vm4 = vmmov %vm11624_vm1  ;;  %v4597_v7 = vsel %vm11656_vm0, nan, %v4565_v19  ;;  %v4598_v60 = vsel %vm11658_vm5, nan, %v4566_v28  ;;  %v4599_v37 = vsel %vm11664_vm10, nan, %v4567_v14  ;;  %vm11666_vm8 = vcmp.eq.s32.totalorder %v11665_v21, 1  ;;  %v11667_v12 = vld [vmem:[#allocation67_spill] sm:$0xff] }
 0x49f   :  { %4616 = vst.msk [vmem:[%s10042_s9 + $0x58] sm:$0xff] %vm11637_vm4, %v4584_v24  ;;  %vm11638_vm15 = vmmov %vm11624_vm1  ;;  %v4600_v16 = vsel %vm11666_vm8, nan, %v4568_v5  ;;  %vm11668_vm12 = vcmp.eq.s32.totalorder %v11667_v12, 1  ;;  %v11669_v41 = vld [vmem:[#allocation35_spill] sm:$0xff]  ;;  %v11676_v5 = vld [vmem:[#allocation56_spill] sm:$0xff] }
 0x4a0   :  { %4617 = vst.msk [vmem:[%s10042_s9 + $0x60] sm:$0xff] %vm11638_vm15, %v4585_v6  ;;  %vm11639_vm2 = vmmov %vm11624_vm1  ;;  %v4601_v45 = vsel %vm11668_vm12, nan, %v4569_v62  ;;  %vm11670_vm6 = vcmp.eq.s32.totalorder %v11669_v41, 1  ;;  %v11674_v28 = vld [vmem:[#allocation39_spill] sm:$0xff]  ;;  %vm11677_vm11 = vcmp.eq.s32.totalorder %v11676_v5, 1 }
 0x4a1   :  { %4618 = vst.msk [vmem:[%s10042_s9 + $0x68] sm:$0xff] %vm11639_vm2, %v4586_v25  ;;  %vm11648_vm7 = vmmov %vm11624_vm1  ;;  %v4602_v19 = vsel %vm11670_vm6, nan, %v4570_v22  ;;  %vm11675_vm14 = vcmp.eq.s32.totalorder %v11674_v28, 1  ;;  %v4604_v62 = vsel %vm11677_vm11, nan, %v4572_v13 }
 0x4a2   :  { %4619 = vst.msk [vmem:[%s10042_s9 + $0x70] sm:$0xff] %vm11624_vm1, %v4587_v10  ;;  %vm11649_vm13 = vmmov %vm11624_vm1  ;;  %v4603_v14 = vsel %vm11675_vm14, nan, %v4571_v15 }
 0x4a3   :  { %4620 = vst.msk [vmem:[%s10042_s9 + $0x78] sm:$0xff] %vm11648_vm7, %v4588_v39  ;;  %vm11650_vm3 = vmmov %vm11624_vm1 }
 0x4a4   :  { %4621 = vst.msk [vmem:[%s10042_s9 + $0x80] sm:$0xff] %vm11649_vm13, %v4589_v32  ;;  %vm11659_vm9 = vmmov %vm11624_vm1 }
 0x4a5   :  { %4622 = vst.msk [vmem:[%s10042_s9 + $0x88] sm:$0xff] %vm11650_vm3, %v4590_v11  ;;  %vm11660_vm4 = vmmov %vm11624_vm1 }
 0x4a6   :  { %4623 = vst.msk [vmem:[%s10042_s9 + $0x90] sm:$0xff] %vm11659_vm9, %v4591_v2  ;;  %vm11661_vm15 = vmmov %vm11624_vm1 }
 0x4a7   :  { %4624 = vst.msk [vmem:[%s10042_s9 + $0x98] sm:$0xff] %vm11660_vm4, %v4592_v8  ;;  %vm11662_vm2 = vmmov %vm11624_vm1 }
 0x4a8   :  { %4625 = vst.msk [vmem:[%s10042_s9 + $0xa0] sm:$0xff] %vm11661_vm15, %v4593_v36  ;;  %vm11671_vm7 = vmmov %vm11624_vm1 }
 0x4a9   :  { %4626 = vst.msk [vmem:[%s10042_s9 + $0xa8] sm:$0xff] %vm11662_vm2, %v4594_v27  ;;  %vm11672_vm13 = vmmov %vm11624_vm1 }
 0x4aa   :  { %4627 = vst.msk [vmem:[%s10042_s9 + $0xb0] sm:$0xff] %vm11624_vm1, %v4595_v17  ;;  %vm11673_vm3 = vmmov %vm11624_vm1 }
 0x4ab   :  { %4628 = vst.msk [vmem:[%s10042_s9 + $0xb8] sm:$0xff] %vm11671_vm7, %v4596_v26  ;;  %vm11678_vm0 = vmmov %vm11624_vm1 }
 0x4ac   :  { %4629 = vst.msk [vmem:[%s10042_s9 + $0xc0] sm:$0xff] %vm11672_vm13, %v4597_v7  ;;  %vm11679_vm5 = vmmov %vm11678_vm0 }
 0x4ad   :  { %4630 = vst.msk [vmem:[%s10042_s9 + $0xc8] sm:$0xff] %vm11673_vm3, %v4598_v60  ;;  %vm11680_vm9 = vmmov %vm11678_vm0 }
 0x4ae   :  { %4631 = vst.msk [vmem:[%s10042_s9 + $0xd0] sm:$0xff] %vm11678_vm0, %v4599_v37  ;;  %vm11681_vm4 = vmmov %vm11678_vm0 }
 0x4af   :  { %4632 = vst.msk [vmem:[%s10042_s9 + $0xd8] sm:$0xff] %vm11679_vm5, %v4600_v16  ;;  %vm11682_vm15 = vmmov %vm11678_vm0 }
 0x4b0   :  { %4633 = vst.msk [vmem:[%s10042_s9 + $0xe0] sm:$0xff] %vm11680_vm9, %v4601_v45  ;;  %vm11683_vm2 = vmmov %vm11678_vm0 }
 0x4b1   :  { %4634 = vst.msk [vmem:[%s10042_s9 + $0xe8] sm:$0xff] %vm11681_vm4, %v4602_v19 }
 0x4b2   :  { %4635 = vst.msk [vmem:[%s10042_s9 + $0xf0] sm:$0xff] %vm11682_vm15, %v4603_v14 }
 0x4b3   :  { %4636 = vst.msk [vmem:[%s10042_s9 + $0xf8] sm:$0xff] %vm11683_vm2, %v4604_v62 }

</bundles_post_ra>
